<compile_context>
chip_gen: v6e
topology: v6e:2x2x1
jax: 0.10.0
libtpu: 0.0.40
codegen_flags: <defaults>
</compile_context>

<pallas_src>
import functools

import numpy as np
import jax
import jax.numpy as jnp
from jax.experimental import pallas as pl
from jax.experimental.pallas import tpu as pltpu

_EPS = 1e-5
_PARALLEL = pltpu.CompilerParams(dimension_semantics=("parallel",))


# ----------------------------- Pallas kernels -----------------------------

def _conv_pool_stage_kernel(x_ref, w_ref, shift_ref, sel_ref, o_ref, *,
                            tap_offsets, mo):
    """Fused conv(+folded BN) + ReLU + maxpool for one batch element.

    x_ref:     (1, Din, Cin)   bf16  flattened, zero-padded input rows
    w_ref:     (T, Cin, Cout)  bf16  conv taps, BN scale folded in
    shift_ref: (1, Cout)       f32   folded conv-bias / BN shift
    sel_ref:   (P, Dout, Mo)   bf16  0/1 pool-window selection matrices
    o_ref:     (1, Dout, Cout) bf16  pooled output, already laid out as the
                                     next conv's zero-padded flattened input
    """
    cout = w_ref.shape[-1]
    # Implicit-GEMM conv: each tap is one contiguous row slice of the input.
    acc = jnp.zeros((mo, cout), jnp.float32)
    for t, off in enumerate(tap_offsets):
        a = x_ref[0, off:off + mo, :]
        acc = acc + jnp.dot(a, w_ref[t], preferred_element_type=jnp.float32)
    y = jnp.maximum(acc + shift_ref[...], 0.0).astype(jnp.bfloat16)
    # MaxPool: max over P = K*K selection matmuls (exact 0/1 row gathers).
    # Post-ReLU values are >= 0, so out-of-range window taps (all-zero rows)
    # contributing 0 is equivalent to -inf padding.
    p = jnp.dot(sel_ref[0], y, preferred_element_type=jnp.float32)
    for s in range(1, sel_ref.shape[0]):
        p = jnp.maximum(p, jnp.dot(sel_ref[s], y,
                                   preferred_element_type=jnp.float32))
    o_ref[0] = p.astype(o_ref.dtype)


def _tail_kernel(x_ref, w_ref, shift_ref, gapw_ref, fc1w_ref, fc1b_ref,
                 fc2w_ref, fc2b_ref, o_ref, *, tap_offsets, mo):
    """conv4(+BN) + ReLU + global-avg-pool + FC1 + ReLU + FC2 (one batch elem)."""
    cout = w_ref.shape[-1]
    acc = jnp.zeros((mo, cout), jnp.float32)
    for t, off in enumerate(tap_offsets):
        a = x_ref[0, off:off + mo, :]
        acc = acc + jnp.dot(a, w_ref[t], preferred_element_type=jnp.float32)
    y = jnp.maximum(acc + shift_ref[...], 0.0)               # (mo, 512) f32
    # Global average pool: gapw is 1/(Ho*Wo) at valid spatial rows, else 0.
    gap = jnp.sum(y * gapw_ref[...], axis=0, keepdims=True)  # (1, 512) f32
    # TODO(synk): Dropout(0.5) omitted — identity in eval/inference mode.
    h = jnp.dot(gap.astype(jnp.bfloat16), fc1w_ref[...],
                preferred_element_type=jnp.float32) + fc1b_ref[...]
    h = jnp.maximum(h, 0.0)
    logits = jnp.dot(h.astype(jnp.bfloat16), fc2w_ref[...],
                     preferred_element_type=jnp.float32) + fc2b_ref[...]
    o_ref[0] = logits


# ----------------------------- kernel wrappers -----------------------------

def _run_stage(x, w, shift, sel, tap_offsets, mo):
    n, din, cin = x.shape
    t, _, cout = w.shape
    p, dout, mo_sel = sel.shape
    assert mo_sel == mo
    kern = functools.partial(_conv_pool_stage_kernel,
                             tap_offsets=tuple(tap_offsets), mo=mo)
    return pl.pallas_call(
        kern,
        out_shape=jax.ShapeDtypeStruct((n, dout, cout), jnp.bfloat16),
        grid=(n,),
        in_specs=[
            pl.BlockSpec((1, din, cin), lambda i: (i, 0, 0)),
            pl.BlockSpec((t, cin, cout), lambda i: (0, 0, 0)),
            pl.BlockSpec((1, cout), lambda i: (0, 0)),
            pl.BlockSpec((p, dout, mo), lambda i: (0, 0, 0)),
        ],
        out_specs=pl.BlockSpec((1, dout, cout), lambda i: (i, 0, 0)),
        compiler_params=_PARALLEL,
    )(x, w, shift, sel)


def _run_tail(x, w4, shift4, gapw, fc1w, fc1b, fc2w, fc2b, tap_offsets, mo):
    n, din, cin = x.shape
    t, _, c4 = w4.shape
    nc = fc2b.shape[-1]
    kern = functools.partial(_tail_kernel, tap_offsets=tuple(tap_offsets), mo=mo)
    out = pl.pallas_call(
        kern,
        out_shape=jax.ShapeDtypeStruct((n, 1, nc), jnp.float32),
        grid=(n,),
        in_specs=[
            pl.BlockSpec((1, din, cin), lambda i: (i, 0, 0)),
            pl.BlockSpec((t, cin, c4), lambda i: (0, 0, 0)),
            pl.BlockSpec((1, c4), lambda i: (0, 0)),
            pl.BlockSpec(gapw.shape, lambda i: (0, 0)),
            pl.BlockSpec(fc1w.shape, lambda i: (0, 0)),
            pl.BlockSpec(fc1b.shape, lambda i: (0, 0)),
            pl.BlockSpec(fc2w.shape, lambda i: (0, 0)),
            pl.BlockSpec(fc2b.shape, lambda i: (0, 0)),
        ],
        out_specs=pl.BlockSpec((1, 1, nc), lambda i: (i, 0, 0)),
        compiler_params=_PARALLEL,
    )(x, w4, shift4, gapw, fc1w, fc1b, fc2w, fc2b)
    return out.reshape(n, nc)


# ----------------------------- parameter prep -----------------------------

def _bn_scale_shift(params, name):
    s = params[name + "_gamma"] / jnp.sqrt(params[name + "_var"] + _EPS)
    shift = (params[name + "_b"] - params[name + "_mean"]) * s + params[name + "_beta"]
    return s, shift.reshape(1, -1).astype(jnp.float32)


def _conv1_s2d_weight(w_oihw, scale):
    """7x7/stride-2 conv -> 4x4/stride-1 conv over a 2x2 space-to-depth input."""
    cout, cin, _, _ = w_oihw.shape                          # (64, 3, 7, 7)
    wp = jnp.pad(w_oihw, ((0, 0), (0, 0), (0, 1), (0, 1)))  # pad K 7->8
    # (o, c, qh, rh, qw, rw) -> (qh, qw, rh, rw, c, o)
    wr = wp.reshape(cout, cin, 4, 2, 4, 2).transpose(2, 4, 3, 5, 1, 0)
    wf = wr.reshape(16, 4 * cin, cout) * scale[None, None, :]
    return wf.astype(jnp.bfloat16)


def _conv3x3_weight(w_oihw, scale):
    cout, cin, _, _ = w_oihw.shape
    wf = jnp.transpose(w_oihw, (2, 3, 1, 0)).reshape(9, cin, cout)
    return (wf * scale[None, None, :]).astype(jnp.bfloat16)


def _pool_select_mats(ho, wo, wp_cur, pk, ps, ppad):
    """0/1 matrices: K*K maxpool taps + write pooled map directly into the next
    conv's zero-padded (pad=1, K=3) flattened layout (+2 tail zero rows)."""
    po = (ho + 2 * ppad - pk) // ps + 1
    pw = (wo + 2 * ppad - pk) // ps + 1
    wp_next = pw + 2
    dout = (po + 2) * wp_next + 2
    mo = ho * wp_cur
    sel = np.zeros((pk * pk, dout, mo), np.float32)
    for dh in range(pk):
        for dw in range(pk):
            for i in range(po):
                for j in range(pw):
                    ph = i * ps - ppad + dh
                    qw = j * ps - ppad + dw
                    if 0 <= ph < ho and 0 <= qw < wo:
                        sel[dh * pk + dw, (i + 1) * wp_next + (j + 1),
                            ph * wp_cur + qw] = 1.0
    return jnp.asarray(sel, dtype=jnp.bfloat16), po, pw


# ----------------------------- model -----------------------------

def init_params(key, num_classes, input_channels):
    conv_cfgs = [
        ("conv1", input_channels, 64, 7),
        ("conv2", 64, 128, 3),
        ("conv3", 128, 256, 3),
        ("conv4", 256, 512, 3),
    ]
    keys = jax.random.split(key, 32)
    p, ki = {}, 0
    for name, cin, cout, k in conv_cfgs:
        p[name + "_w"] = 0.05 * jax.random.normal(keys[ki], (cout, cin, k, k), jnp.float32); ki += 1
        p[name + "_b"] = 0.01 * jax.random.normal(keys[ki], (cout,), jnp.float32); ki += 1
        p[name + "_gamma"] = 1.0 + 0.1 * jax.random.normal(keys[ki], (cout,), jnp.float32); ki += 1
        p[name + "_beta"] = 0.1 * jax.random.normal(keys[ki], (cout,), jnp.float32); ki += 1
        p[name + "_mean"] = 0.1 * jax.random.normal(keys[ki], (cout,), jnp.float32); ki += 1
        p[name + "_var"] = 1.0 + 0.1 * jnp.abs(jax.random.normal(keys[ki], (cout,), jnp.float32)); ki += 1
    p["fc1_w"] = 0.05 * jax.random.normal(keys[ki], (256, 512), jnp.float32); ki += 1
    p["fc1_b"] = 0.01 * jax.random.normal(keys[ki], (256,), jnp.float32); ki += 1
    p["fc2_w"] = 0.05 * jax.random.normal(keys[ki], (num_classes, 256), jnp.float32); ki += 1
    p["fc2_b"] = 0.01 * jax.random.normal(keys[ki], (num_classes,), jnp.float32); ki += 1
    return p


def custom_cnn_forward(params, x_nchw):
    """Inference forward of CustomCNN (BN uses running stats, dropout = identity)."""
    n, c0, h, w = x_nchw.shape
    assert h % 2 == 0 and w % 2 == 0, "even input spatial size expected"

    # -------- input prep: NCHW->NHWC, pad 3, space-to-depth(2), flatten -------
    x = jnp.transpose(x_nchw, (0, 2, 3, 1)).astype(jnp.float32)
    xp = jnp.pad(x, ((0, 0), (3, 3), (3, 3), (0, 0)))
    hs, ws = (h + 6) // 2, (w + 6) // 2
    xs = xp.reshape(n, hs, 2, ws, 2, c0).transpose(0, 1, 3, 2, 4, 5)
    xs = xs.reshape(n, hs, ws, 4 * c0)
    x1 = xs.reshape(n, hs * ws, 4 * c0)
    x1 = jnp.pad(x1, ((0, 0), (0, 3), (0, 0))).astype(jnp.bfloat16)  # +KW-1 rows

    # -------- stage 1: conv1(7x7, s2) + BN + ReLU + maxpool(3, 2, pad 1) ------
    s1, sh1 = _bn_scale_shift(params, "conv1")
    w1 = _conv1_s2d_weight(params["conv1_w"], s1)
    ho1, wo1 = hs - 3, ws - 3
    sel1, cur_h, cur_w = _pool_select_mats(ho1, wo1, ws, 3, 2, 1)
    offs1 = tuple(qh * ws + qw for qh in range(4) for qw in range(4))
    y = _run_stage(x1, w1, sh1, sel1, offs1, ho1 * ws)

    # -------- stages 2 & 3: conv3x3(pad 1) + BN + ReLU + maxpool(2, 2) --------
    for name in ("conv2", "conv3"):
        s, sh = _bn_scale_shift(params, name)
        wk = _conv3x3_weight(params[name + "_w"], s)
        hp, wp = cur_h + 2, cur_w + 2          # zero-padded extent (pad=1)
        ho, wo = cur_h, cur_w                  # 3x3 / pad 1 / stride 1
        sel, cur_h, cur_w = _pool_select_mats(ho, wo, wp, 2, 2, 0)
        offs = tuple(kh * wp + kw for kh in range(3) for kw in range(3))
        y = _run_stage(y, wk, sh, sel, offs, ho * wp)

    # -------- stage 4: conv4 + BN + ReLU + GAP + FC1 + ReLU + FC2 -------------
    s4, sh4 = _bn_scale_shift(params, "conv4")
    w4 = _conv3x3_weight(params["conv4_w"], s4)
    hp4, wp4 = cur_h + 2, cur_w + 2
    ho4, wo4 = cur_h, cur_w
    offs4 = tuple(kh * wp4 + kw for kh in range(3) for kw in range(3))
    mo4 = ho4 * wp4
    gapw = np.zeros((mo4, 1), np.float32)
    for i in range(ho4):
        gapw[i * wp4:i * wp4 + wo4, 0] = 1.0 / float(ho4 * wo4)
    gapw = jnp.asarray(gapw)
    fc1w = params["fc1_w"].T.astype(jnp.bfloat16)
    fc1b = params["fc1_b"].reshape(1, -1).astype(jnp.float32)
    fc2w = params["fc2_w"].T.astype(jnp.bfloat16)
    fc2b = params["fc2_b"].reshape(1, -1).astype(jnp.float32)
    return _run_tail(y, w4, sh4, gapw, fc1w, fc1b, fc2w, fc2b, offs4, mo4)


# ----------------------------- f32 XLA reference (for the numeric check) ----

def reference_forward(params, x_nchw):
    x = x_nchw.astype(jnp.float32)

    def conv_bn_relu(x, name, stride, pad):
        y = jax.lax.conv_general_dilated(
            x, params[name + "_w"], (stride, stride),
            [(pad, pad), (pad, pad)],
            dimension_numbers=("NCHW", "OIHW", "NCHW"))
        y = y + params[name + "_b"][None, :, None, None]
        s = params[name + "_gamma"] / jnp.sqrt(params[name + "_var"] + _EPS)
        y = (y - params[name + "_mean"][None, :, None, None]) * s[None, :, None, None]
        y = y + params[name + "_beta"][None, :, None, None]
        return jnp.maximum(y, 0.0)

    def maxpool(x, k, s, p):
        return jax.lax.reduce_window(
            x, -jnp.inf, jax.lax.max, (1, 1, k, k), (1, 1, s, s),
            [(0, 0), (0, 0), (p, p), (p, p)])

    x = maxpool(conv_bn_relu(x, "conv1", 2, 3), 3, 2, 1)
    x = maxpool(conv_bn_relu(x, "conv2", 1, 1), 2, 2, 0)
    x = maxpool(conv_bn_relu(x, "conv3", 1, 1), 2, 2, 0)
    x = conv_bn_relu(x, "conv4", 1, 1)
    x = jnp.mean(x, axis=(2, 3))
    x = jnp.maximum(x @ params["fc1_w"].T + params["fc1_b"], 0.0)
    return x @ params["fc2_w"].T + params["fc2_b"]


if __name__ == "__main__":
    num_classes = 10
    input_channels = 3
    key = jax.random.PRNGKey(0)
    k_param, k_x = jax.random.split(key)

    params = init_params(k_param, num_classes, input_channels)
    x = jax.random.normal(k_x, (2, input_channels, 16, 16), jnp.float32)  # NCHW

    fwd = jax.jit(functools.partial(custom_cnn_forward, params))
    out = fwd(x)
    jax.block_until_ready(out)

    assert out.shape == (2, num_classes), out.shape
    assert bool(jnp.all(jnp.isfinite(out)))

    ref = jax.jit(functools.partial(reference_forward, params))(x)
    err = float(jnp.max(jnp.abs(out - ref)))
    scale = float(jnp.max(jnp.abs(ref))) + 1e-6
    # bf16 activations/weights vs f32 reference -> loose tolerance.
    assert err <= 0.05 * scale + 0.05, (err, scale)

    print("KERNEL_OK")
</pallas_src>

<mosaic_0001>
module attributes {stable_mosaic.version = 11 : i64} {
  func.func @_conv_pool_stage_kernel(%arg0: i32, %arg1: memref<1x124x12xbf16, #tpu.memory_space<vmem>>, %arg2: memref<16x12x64xbf16, #tpu.memory_space<vmem>>, %arg3: memref<1x64xf32, #tpu.memory_space<vmem>>, %arg4: memref<9x38x88xbf16, #tpu.memory_space<vmem>>, %arg5: memref<1x38x64xbf16, #tpu.memory_space<vmem>>) attributes {dimension_semantics = [#tpu.dimension_semantics<parallel>], iteration_bounds = array<i64: 2>, scalar_prefetch = 0 : i64, scratch_operands = 0 : i64, tpu.core_type = #tpu.core_type<tc>, window_params = [{transform_indices = @transform_0, window_bounds = array<i64: 1, 124, 12>}, {pipeline_mode = #tpu.pipeline_mode<synchronous>, transform_indices = @transform_1, window_bounds = array<i64: 16, 12, 64>}, {pipeline_mode = #tpu.pipeline_mode<synchronous>, transform_indices = @transform_2, window_bounds = array<i64: 1, 64>}, {pipeline_mode = #tpu.pipeline_mode<synchronous>, transform_indices = @transform_3, window_bounds = array<i64: 9, 38, 88>}, {transform_indices = @transform_4, window_bounds = array<i64: 1, 38, 64>}]} {
    %cst = arith.constant 0.000000e+00 : f32
    %0 = vector.broadcast %cst : f32 to vector<88x64xf32>
    %c0 = arith.constant 0 : index
    %c0_0 = arith.constant 0 : index
    %c0_1 = arith.constant 0 : index
    %1 = vector.load %arg1[%c0, %c0_0, %c0_1] : memref<1x124x12xbf16, #tpu.memory_space<vmem>>, vector<1x88x12xbf16>
    %2 = vector.shape_cast %1 : vector<1x88x12xbf16> to vector<88x12xbf16>
    %c0_2 = arith.constant 0 : index
    %c0_3 = arith.constant 0 : index
    %c0_4 = arith.constant 0 : index
    %3 = vector.load %arg2[%c0_2, %c0_3, %c0_4] : memref<16x12x64xbf16, #tpu.memory_space<vmem>>, vector<1x12x64xbf16>
    %4 = vector.shape_cast %3 : vector<1x12x64xbf16> to vector<12x64xbf16>
    %cst_5 = arith.constant dense<0.000000e+00> : vector<88x64xf32>
    %5 = tpu.matmul %2, %4, %cst_5 {dimension_numbers = #tpu.dot_dimension_numbers<[1], [0], [0], [1], [0, 0, 1, 1], [], []>} : vector<88x12xbf16>, vector<12x64xbf16>, vector<88x64xf32> -> vector<88x64xf32>
    %6 = arith.addf %0, %5 : vector<88x64xf32>
    %c0_6 = arith.constant 0 : index
    %c1 = arith.constant 1 : index
    %c0_7 = arith.constant 0 : index
    %7 = vector.load %arg1[%c0_6, %c1, %c0_7] : memref<1x124x12xbf16, #tpu.memory_space<vmem>>, vector<1x88x12xbf16>
    %8 = vector.shape_cast %7 : vector<1x88x12xbf16> to vector<88x12xbf16>
    %c1_8 = arith.constant 1 : index
    %c0_9 = arith.constant 0 : index
    %c0_10 = arith.constant 0 : index
    %9 = vector.load %arg2[%c1_8, %c0_9, %c0_10] : memref<16x12x64xbf16, #tpu.memory_space<vmem>>, vector<1x12x64xbf16>
    %10 = vector.shape_cast %9 : vector<1x12x64xbf16> to vector<12x64xbf16>
    %cst_11 = arith.constant dense<0.000000e+00> : vector<88x64xf32>
    %11 = tpu.matmul %8, %10, %cst_11 {dimension_numbers = #tpu.dot_dimension_numbers<[1], [0], [0], [1], [0, 0, 1, 1], [], []>} : vector<88x12xbf16>, vector<12x64xbf16>, vector<88x64xf32> -> vector<88x64xf32>
    %12 = arith.addf %6, %11 : vector<88x64xf32>
    %c0_12 = arith.constant 0 : index
    %c2 = arith.constant 2 : index
    %c0_13 = arith.constant 0 : index
    %13 = vector.load %arg1[%c0_12, %c2, %c0_13] : memref<1x124x12xbf16, #tpu.memory_space<vmem>>, vector<1x88x12xbf16>
    %14 = vector.shape_cast %13 : vector<1x88x12xbf16> to vector<88x12xbf16>
    %c2_14 = arith.constant 2 : index
    %c0_15 = arith.constant 0 : index
    %c0_16 = arith.constant 0 : index
    %15 = vector.load %arg2[%c2_14, %c0_15, %c0_16] : memref<16x12x64xbf16, #tpu.memory_space<vmem>>, vector<1x12x64xbf16>
    %16 = vector.shape_cast %15 : vector<1x12x64xbf16> to vector<12x64xbf16>
    %cst_17 = arith.constant dense<0.000000e+00> : vector<88x64xf32>
    %17 = tpu.matmul %14, %16, %cst_17 {dimension_numbers = #tpu.dot_dimension_numbers<[1], [0], [0], [1], [0, 0, 1, 1], [], []>} : vector<88x12xbf16>, vector<12x64xbf16>, vector<88x64xf32> -> vector<88x64xf32>
    %18 = arith.addf %12, %17 : vector<88x64xf32>
    %c0_18 = arith.constant 0 : index
    %c3 = arith.constant 3 : index
    %c0_19 = arith.constant 0 : index
    %19 = vector.load %arg1[%c0_18, %c3, %c0_19] : memref<1x124x12xbf16, #tpu.memory_space<vmem>>, vector<1x88x12xbf16>
    %20 = vector.shape_cast %19 : vector<1x88x12xbf16> to vector<88x12xbf16>
    %c3_20 = arith.constant 3 : index
    %c0_21 = arith.constant 0 : index
    %c0_22 = arith.constant 0 : index
    %21 = vector.load %arg2[%c3_20, %c0_21, %c0_22] : memref<16x12x64xbf16, #tpu.memory_space<vmem>>, vector<1x12x64xbf16>
    %22 = vector.shape_cast %21 : vector<1x12x64xbf16> to vector<12x64xbf16>
    %cst_23 = arith.constant dense<0.000000e+00> : vector<88x64xf32>
    %23 = tpu.matmul %20, %22, %cst_23 {dimension_numbers = #tpu.dot_dimension_numbers<[1], [0], [0], [1], [0, 0, 1, 1], [], []>} : vector<88x12xbf16>, vector<12x64xbf16>, vector<88x64xf32> -> vector<88x64xf32>
    %24 = arith.addf %18, %23 : vector<88x64xf32>
    %c0_24 = arith.constant 0 : index
    %c11 = arith.constant 11 : index
    %c0_25 = arith.constant 0 : index
    %25 = vector.load %arg1[%c0_24, %c11, %c0_25] : memref<1x124x12xbf16, #tpu.memory_space<vmem>>, vector<1x88x12xbf16>
    %26 = vector.shape_cast %25 : vector<1x88x12xbf16> to vector<88x12xbf16>
    %c4 = arith.constant 4 : index
    %c0_26 = arith.constant 0 : index
    %c0_27 = arith.constant 0 : index
    %27 = vector.load %arg2[%c4, %c0_26, %c0_27] : memref<16x12x64xbf16, #tpu.memory_space<vmem>>, vector<1x12x64xbf16>
    %28 = vector.shape_cast %27 : vector<1x12x64xbf16> to vector<12x64xbf16>
    %cst_28 = arith.constant dense<0.000000e+00> : vector<88x64xf32>
    %29 = tpu.matmul %26, %28, %cst_28 {dimension_numbers = #tpu.dot_dimension_numbers<[1], [0], [0], [1], [0, 0, 1, 1], [], []>} : vector<88x12xbf16>, vector<12x64xbf16>, vector<88x64xf32> -> vector<88x64xf32>
    %30 = arith.addf %24, %29 : vector<88x64xf32>
    %c0_29 = arith.constant 0 : index
    %c12 = arith.constant 12 : index
    %c0_30 = arith.constant 0 : index
    %31 = vector.load %arg1[%c0_29, %c12, %c0_30] : memref<1x124x12xbf16, #tpu.memory_space<vmem>>, vector<1x88x12xbf16>
    %32 = vector.shape_cast %31 : vector<1x88x12xbf16> to vector<88x12xbf16>
    %c5 = arith.constant 5 : index
    %c0_31 = arith.constant 0 : index
    %c0_32 = arith.constant 0 : index
    %33 = vector.load %arg2[%c5, %c0_31, %c0_32] : memref<16x12x64xbf16, #tpu.memory_space<vmem>>, vector<1x12x64xbf16>
    %34 = vector.shape_cast %33 : vector<1x12x64xbf16> to vector<12x64xbf16>
    %cst_33 = arith.constant dense<0.000000e+00> : vector<88x64xf32>
    %35 = tpu.matmul %32, %34, %cst_33 {dimension_numbers = #tpu.dot_dimension_numbers<[1], [0], [0], [1], [0, 0, 1, 1], [], []>} : vector<88x12xbf16>, vector<12x64xbf16>, vector<88x64xf32> -> vector<88x64xf32>
    %36 = arith.addf %30, %35 : vector<88x64xf32>
    %c0_34 = arith.constant 0 : index
    %c13 = arith.constant 13 : index
    %c0_35 = arith.constant 0 : index
    %37 = vector.load %arg1[%c0_34, %c13, %c0_35] : memref<1x124x12xbf16, #tpu.memory_space<vmem>>, vector<1x88x12xbf16>
    %38 = vector.shape_cast %37 : vector<1x88x12xbf16> to vector<88x12xbf16>
    %c6 = arith.constant 6 : index
    %c0_36 = arith.constant 0 : index
    %c0_37 = arith.constant 0 : index
    %39 = vector.load %arg2[%c6, %c0_36, %c0_37] : memref<16x12x64xbf16, #tpu.memory_space<vmem>>, vector<1x12x64xbf16>
    %40 = vector.shape_cast %39 : vector<1x12x64xbf16> to vector<12x64xbf16>
    %cst_38 = arith.constant dense<0.000000e+00> : vector<88x64xf32>
    %41 = tpu.matmul %38, %40, %cst_38 {dimension_numbers = #tpu.dot_dimension_numbers<[1], [0], [0], [1], [0, 0, 1, 1], [], []>} : vector<88x12xbf16>, vector<12x64xbf16>, vector<88x64xf32> -> vector<88x64xf32>
    %42 = arith.addf %36, %41 : vector<88x64xf32>
    %c0_39 = arith.constant 0 : index
    %c14 = arith.constant 14 : index
    %c0_40 = arith.constant 0 : index
    %43 = vector.load %arg1[%c0_39, %c14, %c0_40] : memref<1x124x12xbf16, #tpu.memory_space<vmem>>, vector<1x88x12xbf16>
    %44 = vector.shape_cast %43 : vector<1x88x12xbf16> to vector<88x12xbf16>
    %c7 = arith.constant 7 : index
    %c0_41 = arith.constant 0 : index
    %c0_42 = arith.constant 0 : index
    %45 = vector.load %arg2[%c7, %c0_41, %c0_42] : memref<16x12x64xbf16, #tpu.memory_space<vmem>>, vector<1x12x64xbf16>
    %46 = vector.shape_cast %45 : vector<1x12x64xbf16> to vector<12x64xbf16>
    %cst_43 = arith.constant dense<0.000000e+00> : vector<88x64xf32>
    %47 = tpu.matmul %44, %46, %cst_43 {dimension_numbers = #tpu.dot_dimension_numbers<[1], [0], [0], [1], [0, 0, 1, 1], [], []>} : vector<88x12xbf16>, vector<12x64xbf16>, vector<88x64xf32> -> vector<88x64xf32>
    %48 = arith.addf %42, %47 : vector<88x64xf32>
    %c0_44 = arith.constant 0 : index
    %c22 = arith.constant 22 : index
    %c0_45 = arith.constant 0 : index
    %49 = vector.load %arg1[%c0_44, %c22, %c0_45] : memref<1x124x12xbf16, #tpu.memory_space<vmem>>, vector<1x88x12xbf16>
    %50 = vector.shape_cast %49 : vector<1x88x12xbf16> to vector<88x12xbf16>
    %c8 = arith.constant 8 : index
    %c0_46 = arith.constant 0 : index
    %c0_47 = arith.constant 0 : index
    %51 = vector.load %arg2[%c8, %c0_46, %c0_47] : memref<16x12x64xbf16, #tpu.memory_space<vmem>>, vector<1x12x64xbf16>
    %52 = vector.shape_cast %51 : vector<1x12x64xbf16> to vector<12x64xbf16>
    %cst_48 = arith.constant dense<0.000000e+00> : vector<88x64xf32>
    %53 = tpu.matmul %50, %52, %cst_48 {dimension_numbers = #tpu.dot_dimension_numbers<[1], [0], [0], [1], [0, 0, 1, 1], [], []>} : vector<88x12xbf16>, vector<12x64xbf16>, vector<88x64xf32> -> vector<88x64xf32>
    %54 = arith.addf %48, %53 : vector<88x64xf32>
    %c0_49 = arith.constant 0 : index
    %c23 = arith.constant 23 : index
    %c0_50 = arith.constant 0 : index
    %55 = vector.load %arg1[%c0_49, %c23, %c0_50] : memref<1x124x12xbf16, #tpu.memory_space<vmem>>, vector<1x88x12xbf16>
    %56 = vector.shape_cast %55 : vector<1x88x12xbf16> to vector<88x12xbf16>
    %c9 = arith.constant 9 : index
    %c0_51 = arith.constant 0 : index
    %c0_52 = arith.constant 0 : index
    %57 = vector.load %arg2[%c9, %c0_51, %c0_52] : memref<16x12x64xbf16, #tpu.memory_space<vmem>>, vector<1x12x64xbf16>
    %58 = vector.shape_cast %57 : vector<1x12x64xbf16> to vector<12x64xbf16>
    %cst_53 = arith.constant dense<0.000000e+00> : vector<88x64xf32>
    %59 = tpu.matmul %56, %58, %cst_53 {dimension_numbers = #tpu.dot_dimension_numbers<[1], [0], [0], [1], [0, 0, 1, 1], [], []>} : vector<88x12xbf16>, vector<12x64xbf16>, vector<88x64xf32> -> vector<88x64xf32>
    %60 = arith.addf %54, %59 : vector<88x64xf32>
    %c0_54 = arith.constant 0 : index
    %c24 = arith.constant 24 : index
    %c0_55 = arith.constant 0 : index
    %61 = vector.load %arg1[%c0_54, %c24, %c0_55] : memref<1x124x12xbf16, #tpu.memory_space<vmem>>, vector<1x88x12xbf16>
    %62 = vector.shape_cast %61 : vector<1x88x12xbf16> to vector<88x12xbf16>
    %c10 = arith.constant 10 : index
    %c0_56 = arith.constant 0 : index
    %c0_57 = arith.constant 0 : index
    %63 = vector.load %arg2[%c10, %c0_56, %c0_57] : memref<16x12x64xbf16, #tpu.memory_space<vmem>>, vector<1x12x64xbf16>
    %64 = vector.shape_cast %63 : vector<1x12x64xbf16> to vector<12x64xbf16>
    %cst_58 = arith.constant dense<0.000000e+00> : vector<88x64xf32>
    %65 = tpu.matmul %62, %64, %cst_58 {dimension_numbers = #tpu.dot_dimension_numbers<[1], [0], [0], [1], [0, 0, 1, 1], [], []>} : vector<88x12xbf16>, vector<12x64xbf16>, vector<88x64xf32> -> vector<88x64xf32>
    %66 = arith.addf %60, %65 : vector<88x64xf32>
    %c0_59 = arith.constant 0 : index
    %c25 = arith.constant 25 : index
    %c0_60 = arith.constant 0 : index
    %67 = vector.load %arg1[%c0_59, %c25, %c0_60] : memref<1x124x12xbf16, #tpu.memory_space<vmem>>, vector<1x88x12xbf16>
    %68 = vector.shape_cast %67 : vector<1x88x12xbf16> to vector<88x12xbf16>
    %c11_61 = arith.constant 11 : index
    %c0_62 = arith.constant 0 : index
    %c0_63 = arith.constant 0 : index
    %69 = vector.load %arg2[%c11_61, %c0_62, %c0_63] : memref<16x12x64xbf16, #tpu.memory_space<vmem>>, vector<1x12x64xbf16>
    %70 = vector.shape_cast %69 : vector<1x12x64xbf16> to vector<12x64xbf16>
    %cst_64 = arith.constant dense<0.000000e+00> : vector<88x64xf32>
    %71 = tpu.matmul %68, %70, %cst_64 {dimension_numbers = #tpu.dot_dimension_numbers<[1], [0], [0], [1], [0, 0, 1, 1], [], []>} : vector<88x12xbf16>, vector<12x64xbf16>, vector<88x64xf32> -> vector<88x64xf32>
    %72 = arith.addf %66, %71 : vector<88x64xf32>
    %c0_65 = arith.constant 0 : index
    %c33 = arith.constant 33 : index
    %c0_66 = arith.constant 0 : index
    %73 = vector.load %arg1[%c0_65, %c33, %c0_66] : memref<1x124x12xbf16, #tpu.memory_space<vmem>>, vector<1x88x12xbf16>
    %74 = vector.shape_cast %73 : vector<1x88x12xbf16> to vector<88x12xbf16>
    %c12_67 = arith.constant 12 : index
    %c0_68 = arith.constant 0 : index
    %c0_69 = arith.constant 0 : index
    %75 = vector.load %arg2[%c12_67, %c0_68, %c0_69] : memref<16x12x64xbf16, #tpu.memory_space<vmem>>, vector<1x12x64xbf16>
    %76 = vector.shape_cast %75 : vector<1x12x64xbf16> to vector<12x64xbf16>
    %cst_70 = arith.constant dense<0.000000e+00> : vector<88x64xf32>
    %77 = tpu.matmul %74, %76, %cst_70 {dimension_numbers = #tpu.dot_dimension_numbers<[1], [0], [0], [1], [0, 0, 1, 1], [], []>} : vector<88x12xbf16>, vector<12x64xbf16>, vector<88x64xf32> -> vector<88x64xf32>
    %78 = arith.addf %72, %77 : vector<88x64xf32>
    %c0_71 = arith.constant 0 : index
    %c34 = arith.constant 34 : index
    %c0_72 = arith.constant 0 : index
    %79 = vector.load %arg1[%c0_71, %c34, %c0_72] : memref<1x124x12xbf16, #tpu.memory_space<vmem>>, vector<1x88x12xbf16>
    %80 = vector.shape_cast %79 : vector<1x88x12xbf16> to vector<88x12xbf16>
    %c13_73 = arith.constant 13 : index
    %c0_74 = arith.constant 0 : index
    %c0_75 = arith.constant 0 : index
    %81 = vector.load %arg2[%c13_73, %c0_74, %c0_75] : memref<16x12x64xbf16, #tpu.memory_space<vmem>>, vector<1x12x64xbf16>
    %82 = vector.shape_cast %81 : vector<1x12x64xbf16> to vector<12x64xbf16>
    %cst_76 = arith.constant dense<0.000000e+00> : vector<88x64xf32>
    %83 = tpu.matmul %80, %82, %cst_76 {dimension_numbers = #tpu.dot_dimension_numbers<[1], [0], [0], [1], [0, 0, 1, 1], [], []>} : vector<88x12xbf16>, vector<12x64xbf16>, vector<88x64xf32> -> vector<88x64xf32>
    %84 = arith.addf %78, %83 : vector<88x64xf32>
    %c0_77 = arith.constant 0 : index
    %c35 = arith.constant 35 : index
    %c0_78 = arith.constant 0 : index
    %85 = vector.load %arg1[%c0_77, %c35, %c0_78] : memref<1x124x12xbf16, #tpu.memory_space<vmem>>, vector<1x88x12xbf16>
    %86 = vector.shape_cast %85 : vector<1x88x12xbf16> to vector<88x12xbf16>
    %c14_79 = arith.constant 14 : index
    %c0_80 = arith.constant 0 : index
    %c0_81 = arith.constant 0 : index
    %87 = vector.load %arg2[%c14_79, %c0_80, %c0_81] : memref<16x12x64xbf16, #tpu.memory_space<vmem>>, vector<1x12x64xbf16>
    %88 = vector.shape_cast %87 : vector<1x12x64xbf16> to vector<12x64xbf16>
    %cst_82 = arith.constant dense<0.000000e+00> : vector<88x64xf32>
    %89 = tpu.matmul %86, %88, %cst_82 {dimension_numbers = #tpu.dot_dimension_numbers<[1], [0], [0], [1], [0, 0, 1, 1], [], []>} : vector<88x12xbf16>, vector<12x64xbf16>, vector<88x64xf32> -> vector<88x64xf32>
    %90 = arith.addf %84, %89 : vector<88x64xf32>
    %c0_83 = arith.constant 0 : index
    %c36 = arith.constant 36 : index
    %c0_84 = arith.constant 0 : index
    %91 = vector.load %arg1[%c0_83, %c36, %c0_84] : memref<1x124x12xbf16, #tpu.memory_space<vmem>>, vector<1x88x12xbf16>
    %92 = vector.shape_cast %91 : vector<1x88x12xbf16> to vector<88x12xbf16>
    %c15 = arith.constant 15 : index
    %c0_85 = arith.constant 0 : index
    %c0_86 = arith.constant 0 : index
    %93 = vector.load %arg2[%c15, %c0_85, %c0_86] : memref<16x12x64xbf16, #tpu.memory_space<vmem>>, vector<1x12x64xbf16>
    %94 = vector.shape_cast %93 : vector<1x12x64xbf16> to vector<12x64xbf16>
    %cst_87 = arith.constant dense<0.000000e+00> : vector<88x64xf32>
    %95 = tpu.matmul %92, %94, %cst_87 {dimension_numbers = #tpu.dot_dimension_numbers<[1], [0], [0], [1], [0, 0, 1, 1], [], []>} : vector<88x12xbf16>, vector<12x64xbf16>, vector<88x64xf32> -> vector<88x64xf32>
    %96 = arith.addf %90, %95 : vector<88x64xf32>
    %c0_88 = arith.constant 0 : index
    %c0_89 = arith.constant 0 : index
    %97 = vector.load %arg3[%c0_88, %c0_89] : memref<1x64xf32, #tpu.memory_space<vmem>>, vector<1x64xf32>
    %98 = vector.broadcast %97 : vector<1x64xf32> to vector<88x64xf32>
    %99 = arith.addf %96, %98 : vector<88x64xf32>
    %cst_90 = arith.constant 0.000000e+00 : f32
    %100 = vector.broadcast %cst_90 : f32 to vector<88x64xf32>
    %101 = arith.maximumf %99, %100 : vector<88x64xf32>
    %102 = arith.truncf %101 : vector<88x64xf32> to vector<88x64xbf16>
    %c0_91 = arith.constant 0 : index
    %c0_92 = arith.constant 0 : index
    %c0_93 = arith.constant 0 : index
    %103 = vector.load %arg4[%c0_91, %c0_92, %c0_93] : memref<9x38x88xbf16, #tpu.memory_space<vmem>>, vector<1x38x88xbf16>
    %104 = vector.shape_cast %103 : vector<1x38x88xbf16> to vector<38x88xbf16>
    %cst_94 = arith.constant dense<0.000000e+00> : vector<38x64xf32>
    %105 = tpu.matmul %104, %102, %cst_94 {dimension_numbers = #tpu.dot_dimension_numbers<[1], [0], [0], [1], [0, 0, 1, 1], [], []>} : vector<38x88xbf16>, vector<88x64xbf16>, vector<38x64xf32> -> vector<38x64xf32>
    %c1_95 = arith.constant 1 : index
    %c0_96 = arith.constant 0 : index
    %c0_97 = arith.constant 0 : index
    %106 = vector.load %arg4[%c1_95, %c0_96, %c0_97] : memref<9x38x88xbf16, #tpu.memory_space<vmem>>, vector<1x38x88xbf16>
    %107 = vector.shape_cast %106 : vector<1x38x88xbf16> to vector<38x88xbf16>
    %cst_98 = arith.constant dense<0.000000e+00> : vector<38x64xf32>
    %108 = tpu.matmul %107, %102, %cst_98 {dimension_numbers = #tpu.dot_dimension_numbers<[1], [0], [0], [1], [0, 0, 1, 1], [], []>} : vector<38x88xbf16>, vector<88x64xbf16>, vector<38x64xf32> -> vector<38x64xf32>
    %109 = arith.maximumf %105, %108 : vector<38x64xf32>
    %c2_99 = arith.constant 2 : index
    %c0_100 = arith.constant 0 : index
    %c0_101 = arith.constant 0 : index
    %110 = vector.load %arg4[%c2_99, %c0_100, %c0_101] : memref<9x38x88xbf16, #tpu.memory_space<vmem>>, vector<1x38x88xbf16>
    %111 = vector.shape_cast %110 : vector<1x38x88xbf16> to vector<38x88xbf16>
    %cst_102 = arith.constant dense<0.000000e+00> : vector<38x64xf32>
    %112 = tpu.matmul %111, %102, %cst_102 {dimension_numbers = #tpu.dot_dimension_numbers<[1], [0], [0], [1], [0, 0, 1, 1], [], []>} : vector<38x88xbf16>, vector<88x64xbf16>, vector<38x64xf32> -> vector<38x64xf32>
    %113 = arith.maximumf %109, %112 : vector<38x64xf32>
    %c3_103 = arith.constant 3 : index
    %c0_104 = arith.constant 0 : index
    %c0_105 = arith.constant 0 : index
    %114 = vector.load %arg4[%c3_103, %c0_104, %c0_105] : memref<9x38x88xbf16, #tpu.memory_space<vmem>>, vector<1x38x88xbf16>
    %115 = vector.shape_cast %114 : vector<1x38x88xbf16> to vector<38x88xbf16>
    %cst_106 = arith.constant dense<0.000000e+00> : vector<38x64xf32>
    %116 = tpu.matmul %115, %102, %cst_106 {dimension_numbers = #tpu.dot_dimension_numbers<[1], [0], [0], [1], [0, 0, 1, 1], [], []>} : vector<38x88xbf16>, vector<88x64xbf16>, vector<38x64xf32> -> vector<38x64xf32>
    %117 = arith.maximumf %113, %116 : vector<38x64xf32>
    %c4_107 = arith.constant 4 : index
    %c0_108 = arith.constant 0 : index
    %c0_109 = arith.constant 0 : index
    %118 = vector.load %arg4[%c4_107, %c0_108, %c0_109] : memref<9x38x88xbf16, #tpu.memory_space<vmem>>, vector<1x38x88xbf16>
    %119 = vector.shape_cast %118 : vector<1x38x88xbf16> to vector<38x88xbf16>
    %cst_110 = arith.constant dense<0.000000e+00> : vector<38x64xf32>
    %120 = tpu.matmul %119, %102, %cst_110 {dimension_numbers = #tpu.dot_dimension_numbers<[1], [0], [0], [1], [0, 0, 1, 1], [], []>} : vector<38x88xbf16>, vector<88x64xbf16>, vector<38x64xf32> -> vector<38x64xf32>
    %121 = arith.maximumf %117, %120 : vector<38x64xf32>
    %c5_111 = arith.constant 5 : index
    %c0_112 = arith.constant 0 : index
    %c0_113 = arith.constant 0 : index
    %122 = vector.load %arg4[%c5_111, %c0_112, %c0_113] : memref<9x38x88xbf16, #tpu.memory_space<vmem>>, vector<1x38x88xbf16>
    %123 = vector.shape_cast %122 : vector<1x38x88xbf16> to vector<38x88xbf16>
    %cst_114 = arith.constant dense<0.000000e+00> : vector<38x64xf32>
    %124 = tpu.matmul %123, %102, %cst_114 {dimension_numbers = #tpu.dot_dimension_numbers<[1], [0], [0], [1], [0, 0, 1, 1], [], []>} : vector<38x88xbf16>, vector<88x64xbf16>, vector<38x64xf32> -> vector<38x64xf32>
    %125 = arith.maximumf %121, %124 : vector<38x64xf32>
    %c6_115 = arith.constant 6 : index
    %c0_116 = arith.constant 0 : index
    %c0_117 = arith.constant 0 : index
    %126 = vector.load %arg4[%c6_115, %c0_116, %c0_117] : memref<9x38x88xbf16, #tpu.memory_space<vmem>>, vector<1x38x88xbf16>
    %127 = vector.shape_cast %126 : vector<1x38x88xbf16> to vector<38x88xbf16>
    %cst_118 = arith.constant dense<0.000000e+00> : vector<38x64xf32>
    %128 = tpu.matmul %127, %102, %cst_118 {dimension_numbers = #tpu.dot_dimension_numbers<[1], [0], [0], [1], [0, 0, 1, 1], [], []>} : vector<38x88xbf16>, vector<88x64xbf16>, vector<38x64xf32> -> vector<38x64xf32>
    %129 = arith.maximumf %125, %128 : vector<38x64xf32>
    %c7_119 = arith.constant 7 : index
    %c0_120 = arith.constant 0 : index
    %c0_121 = arith.constant 0 : index
    %130 = vector.load %arg4[%c7_119, %c0_120, %c0_121] : memref<9x38x88xbf16, #tpu.memory_space<vmem>>, vector<1x38x88xbf16>
    %131 = vector.shape_cast %130 : vector<1x38x88xbf16> to vector<38x88xbf16>
    %cst_122 = arith.constant dense<0.000000e+00> : vector<38x64xf32>
    %132 = tpu.matmul %131, %102, %cst_122 {dimension_numbers = #tpu.dot_dimension_numbers<[1], [0], [0], [1], [0, 0, 1, 1], [], []>} : vector<38x88xbf16>, vector<88x64xbf16>, vector<38x64xf32> -> vector<38x64xf32>
    %133 = arith.maximumf %129, %132 : vector<38x64xf32>
    %c8_123 = arith.constant 8 : index
    %c0_124 = arith.constant 0 : index
    %c0_125 = arith.constant 0 : index
    %134 = vector.load %arg4[%c8_123, %c0_124, %c0_125] : memref<9x38x88xbf16, #tpu.memory_space<vmem>>, vector<1x38x88xbf16>
    %135 = vector.shape_cast %134 : vector<1x38x88xbf16> to vector<38x88xbf16>
    %cst_126 = arith.constant dense<0.000000e+00> : vector<38x64xf32>
    %136 = tpu.matmul %135, %102, %cst_126 {dimension_numbers = #tpu.dot_dimension_numbers<[1], [0], [0], [1], [0, 0, 1, 1], [], []>} : vector<38x88xbf16>, vector<88x64xbf16>, vector<38x64xf32> -> vector<38x64xf32>
    %137 = arith.maximumf %133, %136 : vector<38x64xf32>
    %138 = arith.truncf %137 : vector<38x64xf32> to vector<38x64xbf16>
    %c0_127 = arith.constant 0 : index
    %c0_128 = arith.constant 0 : index
    %c0_129 = arith.constant 0 : index
    %139 = vector.load %arg5[%c0_127, %c0_128, %c0_129] : memref<1x38x64xbf16, #tpu.memory_space<vmem>>, vector<1x38x64xbf16>
    %140 = vector.shape_cast %139 : vector<1x38x64xbf16> to vector<38x64xbf16>
    %141 = vector.shape_cast %138 : vector<38x64xbf16> to vector<1x38x64xbf16>
    tpu.vector_store %arg5[%c0_127, %c0_128, %c0_129], %141 {strides = array<i32>} : memref<1x38x64xbf16, #tpu.memory_space<vmem>>, vector<1x38x64xbf16>,
    return
  }
  func.func @transform_0(%arg0: i32) -> (i32, i32, i32) {
    %c0_i32 = arith.constant 0 : i32
    %c0_i32_0 = arith.constant 0 : i32
    %c0_i32_1 = arith.constant 0 : i32
    return %arg0, %c0_i32, %c0_i32_0 : i32, i32, i32
  }
  func.func @transform_1(%arg0: i32) -> (i32, i32, i32) {
    %c0_i32 = arith.constant 0 : i32
    %c0_i32_0 = arith.constant 0 : i32
    %c0_i32_1 = arith.constant 0 : i32
    %c0_i32_2 = arith.constant 0 : i32
    return %c0_i32, %c0_i32_0, %c0_i32_1 : i32, i32, i32
  }
  func.func @transform_2(%arg0: i32) -> (i32, i32) {
    %c0_i32 = arith.constant 0 : i32
    %c0_i32_0 = arith.constant 0 : i32
    %c0_i32_1 = arith.constant 0 : i32
    return %c0_i32, %c0_i32_0 : i32, i32
  }
  func.func @transform_3(%arg0: i32) -> (i32, i32, i32) {
    %c0_i32 = arith.constant 0 : i32
    %c0_i32_0 = arith.constant 0 : i32
    %c0_i32_1 = arith.constant 0 : i32
    %c0_i32_2 = arith.constant 0 : i32
    return %c0_i32, %c0_i32_0, %c0_i32_1 : i32, i32, i32
  }
  func.func @transform_4(%arg0: i32) -> (i32, i32, i32) {
    %c0_i32 = arith.constant 0 : i32
    %c0_i32_0 = arith.constant 0 : i32
    %c0_i32_1 = arith.constant 0 : i32
    return %arg0, %c0_i32, %c0_i32_0 : i32, i32, i32
  }
}

module attributes {stable_mosaic.version = 11 : i64} {
  func.func @_conv_pool_stage_kernel(%arg0: i32, %arg1: memref<1x18x128xbf16, #tpu.memory_space<vmem>>, %arg2: memref<9x128x256xbf16, #tpu.memory_space<vmem>>, %arg3: memref<1x256xf32, #tpu.memory_space<vmem>>, %arg4: memref<4x11x8xbf16, #tpu.memory_space<vmem>>, %arg5: memref<1x11x256xbf16, #tpu.memory_space<vmem>>) attributes {dimension_semantics = [#tpu.dimension_semantics<parallel>], iteration_bounds = array<i64: 2>, scalar_prefetch = 0 : i64, scratch_operands = 0 : i64, tpu.core_type = #tpu.core_type<tc>, window_params = [{transform_indices = @transform_0, window_bounds = array<i64: 1, 18, 128>}, {pipeline_mode = #tpu.pipeline_mode<synchronous>, transform_indices = @transform_1, window_bounds = array<i64: 9, 128, 256>}, {pipeline_mode = #tpu.pipeline_mode<synchronous>, transform_indices = @transform_2, window_bounds = array<i64: 1, 256>}, {pipeline_mode = #tpu.pipeline_mode<synchronous>, transform_indices = @transform_3, window_bounds = array<i64: 4, 11, 8>}, {transform_indices = @transform_4, window_bounds = array<i64: 1, 11, 256>}]} {
    %cst = arith.constant 0.000000e+00 : f32
    %0 = vector.broadcast %cst : f32 to vector<8x256xf32>
    %c0 = arith.constant 0 : index
    %c0_0 = arith.constant 0 : index
    %c0_1 = arith.constant 0 : index
    %1 = vector.load %arg1[%c0, %c0_0, %c0_1] : memref<1x18x128xbf16, #tpu.memory_space<vmem>>, vector<1x8x128xbf16>
    %2 = vector.shape_cast %1 : vector<1x8x128xbf16> to vector<8x128xbf16>
    %c0_2 = arith.constant 0 : index
    %c0_3 = arith.constant 0 : index
    %c0_4 = arith.constant 0 : index
    %3 = vector.load %arg2[%c0_2, %c0_3, %c0_4] : memref<9x128x256xbf16, #tpu.memory_space<vmem>>, vector<1x128x256xbf16>
    %4 = vector.shape_cast %3 : vector<1x128x256xbf16> to vector<128x256xbf16>
    %cst_5 = arith.constant dense<0.000000e+00> : vector<8x256xf32>
    %5 = tpu.matmul %2, %4, %cst_5 {dimension_numbers = #tpu.dot_dimension_numbers<[1], [0], [0], [1], [0, 0, 1, 1], [], []>} : vector<8x128xbf16>, vector<128x256xbf16>, vector<8x256xf32> -> vector<8x256xf32>
    %6 = arith.addf %0, %5 : vector<8x256xf32>
    %c0_6 = arith.constant 0 : index
    %c1 = arith.constant 1 : index
    %c0_7 = arith.constant 0 : index
    %7 = vector.load %arg1[%c0_6, %c1, %c0_7] : memref<1x18x128xbf16, #tpu.memory_space<vmem>>, vector<1x8x128xbf16>
    %8 = vector.shape_cast %7 : vector<1x8x128xbf16> to vector<8x128xbf16>
    %c1_8 = arith.constant 1 : index
    %c0_9 = arith.constant 0 : index
    %c0_10 = arith.constant 0 : index
    %9 = vector.load %arg2[%c1_8, %c0_9, %c0_10] : memref<9x128x256xbf16, #tpu.memory_space<vmem>>, vector<1x128x256xbf16>
    %10 = vector.shape_cast %9 : vector<1x128x256xbf16> to vector<128x256xbf16>
    %cst_11 = arith.constant dense<0.000000e+00> : vector<8x256xf32>
    %11 = tpu.matmul %8, %10, %cst_11 {dimension_numbers = #tpu.dot_dimension_numbers<[1], [0], [0], [1], [0, 0, 1, 1], [], []>} : vector<8x128xbf16>, vector<128x256xbf16>, vector<8x256xf32> -> vector<8x256xf32>
    %12 = arith.addf %6, %11 : vector<8x256xf32>
    %c0_12 = arith.constant 0 : index
    %c2 = arith.constant 2 : index
    %c0_13 = arith.constant 0 : index
    %13 = vector.load %arg1[%c0_12, %c2, %c0_13] : memref<1x18x128xbf16, #tpu.memory_space<vmem>>, vector<1x8x128xbf16>
    %14 = vector.shape_cast %13 : vector<1x8x128xbf16> to vector<8x128xbf16>
    %c2_14 = arith.constant 2 : index
    %c0_15 = arith.constant 0 : index
    %c0_16 = arith.constant 0 : index
    %15 = vector.load %arg2[%c2_14, %c0_15, %c0_16] : memref<9x128x256xbf16, #tpu.memory_space<vmem>>, vector<1x128x256xbf16>
    %16 = vector.shape_cast %15 : vector<1x128x256xbf16> to vector<128x256xbf16>
    %cst_17 = arith.constant dense<0.000000e+00> : vector<8x256xf32>
    %17 = tpu.matmul %14, %16, %cst_17 {dimension_numbers = #tpu.dot_dimension_numbers<[1], [0], [0], [1], [0, 0, 1, 1], [], []>} : vector<8x128xbf16>, vector<128x256xbf16>, vector<8x256xf32> -> vector<8x256xf32>
    %18 = arith.addf %12, %17 : vector<8x256xf32>
    %c0_18 = arith.constant 0 : index
    %c4 = arith.constant 4 : index
    %c0_19 = arith.constant 0 : index
    %19 = vector.load %arg1[%c0_18, %c4, %c0_19] : memref<1x18x128xbf16, #tpu.memory_space<vmem>>, vector<1x8x128xbf16>
    %20 = vector.shape_cast %19 : vector<1x8x128xbf16> to vector<8x128xbf16>
    %c3 = arith.constant 3 : index
    %c0_20 = arith.constant 0 : index
    %c0_21 = arith.constant 0 : index
    %21 = vector.load %arg2[%c3, %c0_20, %c0_21] : memref<9x128x256xbf16, #tpu.memory_space<vmem>>, vector<1x128x256xbf16>
    %22 = vector.shape_cast %21 : vector<1x128x256xbf16> to vector<128x256xbf16>
    %cst_22 = arith.constant dense<0.000000e+00> : vector<8x256xf32>
    %23 = tpu.matmul %20, %22, %cst_22 {dimension_numbers = #tpu.dot_dimension_numbers<[1], [0], [0], [1], [0, 0, 1, 1], [], []>} : vector<8x128xbf16>, vector<128x256xbf16>, vector<8x256xf32> -> vector<8x256xf32>
    %24 = arith.addf %18, %23 : vector<8x256xf32>
    %c0_23 = arith.constant 0 : index
    %c5 = arith.constant 5 : index
    %c0_24 = arith.constant 0 : index
    %25 = vector.load %arg1[%c0_23, %c5, %c0_24] : memref<1x18x128xbf16, #tpu.memory_space<vmem>>, vector<1x8x128xbf16>
    %26 = vector.shape_cast %25 : vector<1x8x128xbf16> to vector<8x128xbf16>
    %c4_25 = arith.constant 4 : index
    %c0_26 = arith.constant 0 : index
    %c0_27 = arith.constant 0 : index
    %27 = vector.load %arg2[%c4_25, %c0_26, %c0_27] : memref<9x128x256xbf16, #tpu.memory_space<vmem>>, vector<1x128x256xbf16>
    %28 = vector.shape_cast %27 : vector<1x128x256xbf16> to vector<128x256xbf16>
    %cst_28 = arith.constant dense<0.000000e+00> : vector<8x256xf32>
    %29 = tpu.matmul %26, %28, %cst_28 {dimension_numbers = #tpu.dot_dimension_numbers<[1], [0], [0], [1], [0, 0, 1, 1], [], []>} : vector<8x128xbf16>, vector<128x256xbf16>, vector<8x256xf32> -> vector<8x256xf32>
    %30 = arith.addf %24, %29 : vector<8x256xf32>
    %c0_29 = arith.constant 0 : index
    %c6 = arith.constant 6 : index
    %c0_30 = arith.constant 0 : index
    %31 = vector.load %arg1[%c0_29, %c6, %c0_30] : memref<1x18x128xbf16, #tpu.memory_space<vmem>>, vector<1x8x128xbf16>
    %32 = vector.shape_cast %31 : vector<1x8x128xbf16> to vector<8x128xbf16>
    %c5_31 = arith.constant 5 : index
    %c0_32 = arith.constant 0 : index
    %c0_33 = arith.constant 0 : index
    %33 = vector.load %arg2[%c5_31, %c0_32, %c0_33] : memref<9x128x256xbf16, #tpu.memory_space<vmem>>, vector<1x128x256xbf16>
    %34 = vector.shape_cast %33 : vector<1x128x256xbf16> to vector<128x256xbf16>
    %cst_34 = arith.constant dense<0.000000e+00> : vector<8x256xf32>
    %35 = tpu.matmul %32, %34, %cst_34 {dimension_numbers = #tpu.dot_dimension_numbers<[1], [0], [0], [1], [0, 0, 1, 1], [], []>} : vector<8x128xbf16>, vector<128x256xbf16>, vector<8x256xf32> -> vector<8x256xf32>
    %36 = arith.addf %30, %35 : vector<8x256xf32>
    %c0_35 = arith.constant 0 : index
    %c8 = arith.constant 8 : index
    %c0_36 = arith.constant 0 : index
    %37 = vector.load %arg1[%c0_35, %c8, %c0_36] : memref<1x18x128xbf16, #tpu.memory_space<vmem>>, vector<1x8x128xbf16>
    %38 = vector.shape_cast %37 : vector<1x8x128xbf16> to vector<8x128xbf16>
    %c6_37 = arith.constant 6 : index
    %c0_38 = arith.constant 0 : index
    %c0_39 = arith.constant 0 : index
    %39 = vector.load %arg2[%c6_37, %c0_38, %c0_39] : memref<9x128x256xbf16, #tpu.memory_space<vmem>>, vector<1x128x256xbf16>
    %40 = vector.shape_cast %39 : vector<1x128x256xbf16> to vector<128x256xbf16>
    %cst_40 = arith.constant dense<0.000000e+00> : vector<8x256xf32>
    %41 = tpu.matmul %38, %40, %cst_40 {dimension_numbers = #tpu.dot_dimension_numbers<[1], [0], [0], [1], [0, 0, 1, 1], [], []>} : vector<8x128xbf16>, vector<128x256xbf16>, vector<8x256xf32> -> vector<8x256xf32>
    %42 = arith.addf %36, %41 : vector<8x256xf32>
    %c0_41 = arith.constant 0 : index
    %c9 = arith.constant 9 : index
    %c0_42 = arith.constant 0 : index
    %43 = vector.load %arg1[%c0_41, %c9, %c0_42] : memref<1x18x128xbf16, #tpu.memory_space<vmem>>, vector<1x8x128xbf16>
    %44 = vector.shape_cast %43 : vector<1x8x128xbf16> to vector<8x128xbf16>
    %c7 = arith.constant 7 : index
    %c0_43 = arith.constant 0 : index
    %c0_44 = arith.constant 0 : index
    %45 = vector.load %arg2[%c7, %c0_43, %c0_44] : memref<9x128x256xbf16, #tpu.memory_space<vmem>>, vector<1x128x256xbf16>
    %46 = vector.shape_cast %45 : vector<1x128x256xbf16> to vector<128x256xbf16>
    %cst_45 = arith.constant dense<0.000000e+00> : vector<8x256xf32>
    %47 = tpu.matmul %44, %46, %cst_45 {dimension_numbers = #tpu.dot_dimension_numbers<[1], [0], [0], [1], [0, 0, 1, 1], [], []>} : vector<8x128xbf16>, vector<128x256xbf16>, vector<8x256xf32> -> vector<8x256xf32>
    %48 = arith.addf %42, %47 : vector<8x256xf32>
    %c0_46 = arith.constant 0 : index
    %c10 = arith.constant 10 : index
    %c0_47 = arith.constant 0 : index
    %49 = vector.load %arg1[%c0_46, %c10, %c0_47] : memref<1x18x128xbf16, #tpu.memory_space<vmem>>, vector<1x8x128xbf16>
    %50 = vector.shape_cast %49 : vector<1x8x128xbf16> to vector<8x128xbf16>
    %c8_48 = arith.constant 8 : index
    %c0_49 = arith.constant 0 : index
    %c0_50 = arith.constant 0 : index
    %51 = vector.load %arg2[%c8_48, %c0_49, %c0_50] : memref<9x128x256xbf16, #tpu.memory_space<vmem>>, vector<1x128x256xbf16>
    %52 = vector.shape_cast %51 : vector<1x128x256xbf16> to vector<128x256xbf16>
    %cst_51 = arith.constant dense<0.000000e+00> : vector<8x256xf32>
    %53 = tpu.matmul %50, %52, %cst_51 {dimension_numbers = #tpu.dot_dimension_numbers<[1], [0], [0], [1], [0, 0, 1, 1], [], []>} : vector<8x128xbf16>, vector<128x256xbf16>, vector<8x256xf32> -> vector<8x256xf32>
    %54 = arith.addf %48, %53 : vector<8x256xf32>
    %c0_52 = arith.constant 0 : index
    %c0_53 = arith.constant 0 : index
    %55 = vector.load %arg3[%c0_52, %c0_53] : memref<1x256xf32, #tpu.memory_space<vmem>>, vector<1x256xf32>
    %56 = vector.broadcast %55 : vector<1x256xf32> to vector<8x256xf32>
    %57 = arith.addf %54, %56 : vector<8x256xf32>
    %cst_54 = arith.constant 0.000000e+00 : f32
    %58 = vector.broadcast %cst_54 : f32 to vector<8x256xf32>
    %59 = arith.maximumf %57, %58 : vector<8x256xf32>
    %60 = arith.truncf %59 : vector<8x256xf32> to vector<8x256xbf16>
    %c0_55 = arith.constant 0 : index
    %c0_56 = arith.constant 0 : index
    %c0_57 = arith.constant 0 : index
    %61 = vector.load %arg4[%c0_55, %c0_56, %c0_57] : memref<4x11x8xbf16, #tpu.memory_space<vmem>>, vector<1x11x8xbf16>
    %62 = vector.shape_cast %61 : vector<1x11x8xbf16> to vector<11x8xbf16>
    %cst_58 = arith.constant dense<0.000000e+00> : vector<11x256xf32>
    %63 = tpu.matmul %62, %60, %cst_58 {dimension_numbers = #tpu.dot_dimension_numbers<[1], [0], [0], [1], [0, 0, 1, 1], [], []>} : vector<11x8xbf16>, vector<8x256xbf16>, vector<11x256xf32> -> vector<11x256xf32>
    %c1_59 = arith.constant 1 : index
    %c0_60 = arith.constant 0 : index
    %c0_61 = arith.constant 0 : index
    %64 = vector.load %arg4[%c1_59, %c0_60, %c0_61] : memref<4x11x8xbf16, #tpu.memory_space<vmem>>, vector<1x11x8xbf16>
    %65 = vector.shape_cast %64 : vector<1x11x8xbf16> to vector<11x8xbf16>
    %cst_62 = arith.constant dense<0.000000e+00> : vector<11x256xf32>
    %66 = tpu.matmul %65, %60, %cst_62 {dimension_numbers = #tpu.dot_dimension_numbers<[1], [0], [0], [1], [0, 0, 1, 1], [], []>} : vector<11x8xbf16>, vector<8x256xbf16>, vector<11x256xf32> -> vector<11x256xf32>
    %67 = arith.maximumf %63, %66 : vector<11x256xf32>
    %c2_63 = arith.constant 2 : index
    %c0_64 = arith.constant 0 : index
    %c0_65 = arith.constant 0 : index
    %68 = vector.load %arg4[%c2_63, %c0_64, %c0_65] : memref<4x11x8xbf16, #tpu.memory_space<vmem>>, vector<1x11x8xbf16>
    %69 = vector.shape_cast %68 : vector<1x11x8xbf16> to vector<11x8xbf16>
    %cst_66 = arith.constant dense<0.000000e+00> : vector<11x256xf32>
    %70 = tpu.matmul %69, %60, %cst_66 {dimension_numbers = #tpu.dot_dimension_numbers<[1], [0], [0], [1], [0, 0, 1, 1], [], []>} : vector<11x8xbf16>, vector<8x256xbf16>, vector<11x256xf32> -> vector<11x256xf32>
    %71 = arith.maximumf %67, %70 : vector<11x256xf32>
    %c3_67 = arith.constant 3 : index
    %c0_68 = arith.constant 0 : index
    %c0_69 = arith.constant 0 : index
    %72 = vector.load %arg4[%c3_67, %c0_68, %c0_69] : memref<4x11x8xbf16, #tpu.memory_space<vmem>>, vector<1x11x8xbf16>
    %73 = vector.shape_cast %72 : vector<1x11x8xbf16> to vector<11x8xbf16>
    %cst_70 = arith.constant dense<0.000000e+00> : vector<11x256xf32>
    %74 = tpu.matmul %73, %60, %cst_70 {dimension_numbers = #tpu.dot_dimension_numbers<[1], [0], [0], [1], [0, 0, 1, 1], [], []>} : vector<11x8xbf16>, vector<8x256xbf16>, vector<11x256xf32> -> vector<11x256xf32>
    %75 = arith.maximumf %71, %74 : vector<11x256xf32>
    %76 = arith.truncf %75 : vector<11x256xf32> to vector<11x256xbf16>
    %c0_71 = arith.constant 0 : index
    %c0_72 = arith.constant 0 : index
    %c0_73 = arith.constant 0 : index
    %77 = vector.load %arg5[%c0_71, %c0_72, %c0_73] : memref<1x11x256xbf16, #tpu.memory_space<vmem>>, vector<1x11x256xbf16>
    %78 = vector.shape_cast %77 : vector<1x11x256xbf16> to vector<11x256xbf16>
    %79 = vector.shape_cast %76 : vector<11x256xbf16> to vector<1x11x256xbf16>
    tpu.vector_store %arg5[%c0_71, %c0_72, %c0_73], %79 {strides = array<i32>} : memref<1x11x256xbf16, #tpu.memory_space<vmem>>, vector<1x11x256xbf16>,
    return
  }
  func.func @transform_0(%arg0: i32) -> (i32, i32, i32) {
    %c0_i32 = arith.constant 0 : i32
    %c0_i32_0 = arith.constant 0 : i32
    %c0_i32_1 = arith.constant 0 : i32
    return %arg0, %c0_i32, %c0_i32_0 : i32, i32, i32
  }
  func.func @transform_1(%arg0: i32) -> (i32, i32, i32) {
    %c0_i32 = arith.constant 0 : i32
    %c0_i32_0 = arith.constant 0 : i32
    %c0_i32_1 = arith.constant 0 : i32
    %c0_i32_2 = arith.constant 0 : i32
    return %c0_i32, %c0_i32_0, %c0_i32_1 : i32, i32, i32
  }
  func.func @transform_2(%arg0: i32) -> (i32, i32) {
    %c0_i32 = arith.constant 0 : i32
    %c0_i32_0 = arith.constant 0 : i32
    %c0_i32_1 = arith.constant 0 : i32
    return %c0_i32, %c0_i32_0 : i32, i32
  }
  func.func @transform_3(%arg0: i32) -> (i32, i32, i32) {
    %c0_i32 = arith.constant 0 : i32
    %c0_i32_0 = arith.constant 0 : i32
    %c0_i32_1 = arith.constant 0 : i32
    %c0_i32_2 = arith.constant 0 : i32
    return %c0_i32, %c0_i32_0, %c0_i32_1 : i32, i32, i32
  }
  func.func @transform_4(%arg0: i32) -> (i32, i32, i32) {
    %c0_i32 = arith.constant 0 : i32
    %c0_i32_0 = arith.constant 0 : i32
    %c0_i32_1 = arith.constant 0 : i32
    return %arg0, %c0_i32, %c0_i32_0 : i32, i32, i32
  }
}

module attributes {stable_mosaic.version = 11 : i64} {
  func.func @_conv_pool_stage_kernel(%arg0: i32, %arg1: memref<1x38x64xbf16, #tpu.memory_space<vmem>>, %arg2: memref<9x64x128xbf16, #tpu.memory_space<vmem>>, %arg3: memref<1x128xf32, #tpu.memory_space<vmem>>, %arg4: memref<4x18x24xbf16, #tpu.memory_space<vmem>>, %arg5: memref<1x18x128xbf16, #tpu.memory_space<vmem>>) attributes {dimension_semantics = [#tpu.dimension_semantics<parallel>], iteration_bounds = array<i64: 2>, scalar_prefetch = 0 : i64, scratch_operands = 0 : i64, tpu.core_type = #tpu.core_type<tc>, window_params = [{transform_indices = @transform_0, window_bounds = array<i64: 1, 38, 64>}, {pipeline_mode = #tpu.pipeline_mode<synchronous>, transform_indices = @transform_1, window_bounds = array<i64: 9, 64, 128>}, {pipeline_mode = #tpu.pipeline_mode<synchronous>, transform_indices = @transform_2, window_bounds = array<i64: 1, 128>}, {pipeline_mode = #tpu.pipeline_mode<synchronous>, transform_indices = @transform_3, window_bounds = array<i64: 4, 18, 24>}, {transform_indices = @transform_4, window_bounds = array<i64: 1, 18, 128>}]} {
    %cst = arith.constant 0.000000e+00 : f32
    %0 = vector.broadcast %cst : f32 to vector<24x128xf32>
    %c0 = arith.constant 0 : index
    %c0_0 = arith.constant 0 : index
    %c0_1 = arith.constant 0 : index
    %1 = vector.load %arg1[%c0, %c0_0, %c0_1] : memref<1x38x64xbf16, #tpu.memory_space<vmem>>, vector<1x24x64xbf16>
    %2 = vector.shape_cast %1 : vector<1x24x64xbf16> to vector<24x64xbf16>
    %c0_2 = arith.constant 0 : index
    %c0_3 = arith.constant 0 : index
    %c0_4 = arith.constant 0 : index
    %3 = vector.load %arg2[%c0_2, %c0_3, %c0_4] : memref<9x64x128xbf16, #tpu.memory_space<vmem>>, vector<1x64x128xbf16>
    %4 = vector.shape_cast %3 : vector<1x64x128xbf16> to vector<64x128xbf16>
    %cst_5 = arith.constant dense<0.000000e+00> : vector<24x128xf32>
    %5 = tpu.matmul %2, %4, %cst_5 {dimension_numbers = #tpu.dot_dimension_numbers<[1], [0], [0], [1], [0, 0, 1, 1], [], []>} : vector<24x64xbf16>, vector<64x128xbf16>, vector<24x128xf32> -> vector<24x128xf32>
    %6 = arith.addf %0, %5 : vector<24x128xf32>
    %c0_6 = arith.constant 0 : index
    %c1 = arith.constant 1 : index
    %c0_7 = arith.constant 0 : index
    %7 = vector.load %arg1[%c0_6, %c1, %c0_7] : memref<1x38x64xbf16, #tpu.memory_space<vmem>>, vector<1x24x64xbf16>
    %8 = vector.shape_cast %7 : vector<1x24x64xbf16> to vector<24x64xbf16>
    %c1_8 = arith.constant 1 : index
    %c0_9 = arith.constant 0 : index
    %c0_10 = arith.constant 0 : index
    %9 = vector.load %arg2[%c1_8, %c0_9, %c0_10] : memref<9x64x128xbf16, #tpu.memory_space<vmem>>, vector<1x64x128xbf16>
    %10 = vector.shape_cast %9 : vector<1x64x128xbf16> to vector<64x128xbf16>
    %cst_11 = arith.constant dense<0.000000e+00> : vector<24x128xf32>
    %11 = tpu.matmul %8, %10, %cst_11 {dimension_numbers = #tpu.dot_dimension_numbers<[1], [0], [0], [1], [0, 0, 1, 1], [], []>} : vector<24x64xbf16>, vector<64x128xbf16>, vector<24x128xf32> -> vector<24x128xf32>
    %12 = arith.addf %6, %11 : vector<24x128xf32>
    %c0_12 = arith.constant 0 : index
    %c2 = arith.constant 2 : index
    %c0_13 = arith.constant 0 : index
    %13 = vector.load %arg1[%c0_12, %c2, %c0_13] : memref<1x38x64xbf16, #tpu.memory_space<vmem>>, vector<1x24x64xbf16>
    %14 = vector.shape_cast %13 : vector<1x24x64xbf16> to vector<24x64xbf16>
    %c2_14 = arith.constant 2 : index
    %c0_15 = arith.constant 0 : index
    %c0_16 = arith.constant 0 : index
    %15 = vector.load %arg2[%c2_14, %c0_15, %c0_16] : memref<9x64x128xbf16, #tpu.memory_space<vmem>>, vector<1x64x128xbf16>
    %16 = vector.shape_cast %15 : vector<1x64x128xbf16> to vector<64x128xbf16>
    %cst_17 = arith.constant dense<0.000000e+00> : vector<24x128xf32>
    %17 = tpu.matmul %14, %16, %cst_17 {dimension_numbers = #tpu.dot_dimension_numbers<[1], [0], [0], [1], [0, 0, 1, 1], [], []>} : vector<24x64xbf16>, vector<64x128xbf16>, vector<24x128xf32> -> vector<24x128xf32>
    %18 = arith.addf %12, %17 : vector<24x128xf32>
    %c0_18 = arith.constant 0 : index
    %c6 = arith.constant 6 : index
    %c0_19 = arith.constant 0 : index
    %19 = vector.load %arg1[%c0_18, %c6, %c0_19] : memref<1x38x64xbf16, #tpu.memory_space<vmem>>, vector<1x24x64xbf16>
    %20 = vector.shape_cast %19 : vector<1x24x64xbf16> to vector<24x64xbf16>
    %c3 = arith.constant 3 : index
    %c0_20 = arith.constant 0 : index
    %c0_21 = arith.constant 0 : index
    %21 = vector.load %arg2[%c3, %c0_20, %c0_21] : memref<9x64x128xbf16, #tpu.memory_space<vmem>>, vector<1x64x128xbf16>
    %22 = vector.shape_cast %21 : vector<1x64x128xbf16> to vector<64x128xbf16>
    %cst_22 = arith.constant dense<0.000000e+00> : vector<24x128xf32>
    %23 = tpu.matmul %20, %22, %cst_22 {dimension_numbers = #tpu.dot_dimension_numbers<[1], [0], [0], [1], [0, 0, 1, 1], [], []>} : vector<24x64xbf16>, vector<64x128xbf16>, vector<24x128xf32> -> vector<24x128xf32>
    %24 = arith.addf %18, %23 : vector<24x128xf32>
    %c0_23 = arith.constant 0 : index
    %c7 = arith.constant 7 : index
    %c0_24 = arith.constant 0 : index
    %25 = vector.load %arg1[%c0_23, %c7, %c0_24] : memref<1x38x64xbf16, #tpu.memory_space<vmem>>, vector<1x24x64xbf16>
    %26 = vector.shape_cast %25 : vector<1x24x64xbf16> to vector<24x64xbf16>
    %c4 = arith.constant 4 : index
    %c0_25 = arith.constant 0 : index
    %c0_26 = arith.constant 0 : index
    %27 = vector.load %arg2[%c4, %c0_25, %c0_26] : memref<9x64x128xbf16, #tpu.memory_space<vmem>>, vector<1x64x128xbf16>
    %28 = vector.shape_cast %27 : vector<1x64x128xbf16> to vector<64x128xbf16>
    %cst_27 = arith.constant dense<0.000000e+00> : vector<24x128xf32>
    %29 = tpu.matmul %26, %28, %cst_27 {dimension_numbers = #tpu.dot_dimension_numbers<[1], [0], [0], [1], [0, 0, 1, 1], [], []>} : vector<24x64xbf16>, vector<64x128xbf16>, vector<24x128xf32> -> vector<24x128xf32>
    %30 = arith.addf %24, %29 : vector<24x128xf32>
    %c0_28 = arith.constant 0 : index
    %c8 = arith.constant 8 : index
    %c0_29 = arith.constant 0 : index
    %31 = vector.load %arg1[%c0_28, %c8, %c0_29] : memref<1x38x64xbf16, #tpu.memory_space<vmem>>, vector<1x24x64xbf16>
    %32 = vector.shape_cast %31 : vector<1x24x64xbf16> to vector<24x64xbf16>
    %c5 = arith.constant 5 : index
    %c0_30 = arith.constant 0 : index
    %c0_31 = arith.constant 0 : index
    %33 = vector.load %arg2[%c5, %c0_30, %c0_31] : memref<9x64x128xbf16, #tpu.memory_space<vmem>>, vector<1x64x128xbf16>
    %34 = vector.shape_cast %33 : vector<1x64x128xbf16> to vector<64x128xbf16>
    %cst_32 = arith.constant dense<0.000000e+00> : vector<24x128xf32>
    %35 = tpu.matmul %32, %34, %cst_32 {dimension_numbers = #tpu.dot_dimension_numbers<[1], [0], [0], [1], [0, 0, 1, 1], [], []>} : vector<24x64xbf16>, vector<64x128xbf16>, vector<24x128xf32> -> vector<24x128xf32>
    %36 = arith.addf %30, %35 : vector<24x128xf32>
    %c0_33 = arith.constant 0 : index
    %c12 = arith.constant 12 : index
    %c0_34 = arith.constant 0 : index
    %37 = vector.load %arg1[%c0_33, %c12, %c0_34] : memref<1x38x64xbf16, #tpu.memory_space<vmem>>, vector<1x24x64xbf16>
    %38 = vector.shape_cast %37 : vector<1x24x64xbf16> to vector<24x64xbf16>
    %c6_35 = arith.constant 6 : index
    %c0_36 = arith.constant 0 : index
    %c0_37 = arith.constant 0 : index
    %39 = vector.load %arg2[%c6_35, %c0_36, %c0_37] : memref<9x64x128xbf16, #tpu.memory_space<vmem>>, vector<1x64x128xbf16>
    %40 = vector.shape_cast %39 : vector<1x64x128xbf16> to vector<64x128xbf16>
    %cst_38 = arith.constant dense<0.000000e+00> : vector<24x128xf32>
    %41 = tpu.matmul %38, %40, %cst_38 {dimension_numbers = #tpu.dot_dimension_numbers<[1], [0], [0], [1], [0, 0, 1, 1], [], []>} : vector<24x64xbf16>, vector<64x128xbf16>, vector<24x128xf32> -> vector<24x128xf32>
    %42 = arith.addf %36, %41 : vector<24x128xf32>
    %c0_39 = arith.constant 0 : index
    %c13 = arith.constant 13 : index
    %c0_40 = arith.constant 0 : index
    %43 = vector.load %arg1[%c0_39, %c13, %c0_40] : memref<1x38x64xbf16, #tpu.memory_space<vmem>>, vector<1x24x64xbf16>
    %44 = vector.shape_cast %43 : vector<1x24x64xbf16> to vector<24x64xbf16>
    %c7_41 = arith.constant 7 : index
    %c0_42 = arith.constant 0 : index
    %c0_43 = arith.constant 0 : index
    %45 = vector.load %arg2[%c7_41, %c0_42, %c0_43] : memref<9x64x128xbf16, #tpu.memory_space<vmem>>, vector<1x64x128xbf16>
    %46 = vector.shape_cast %45 : vector<1x64x128xbf16> to vector<64x128xbf16>
    %cst_44 = arith.constant dense<0.000000e+00> : vector<24x128xf32>
    %47 = tpu.matmul %44, %46, %cst_44 {dimension_numbers = #tpu.dot_dimension_numbers<[1], [0], [0], [1], [0, 0, 1, 1], [], []>} : vector<24x64xbf16>, vector<64x128xbf16>, vector<24x128xf32> -> vector<24x128xf32>
    %48 = arith.addf %42, %47 : vector<24x128xf32>
    %c0_45 = arith.constant 0 : index
    %c14 = arith.constant 14 : index
    %c0_46 = arith.constant 0 : index
    %49 = vector.load %arg1[%c0_45, %c14, %c0_46] : memref<1x38x64xbf16, #tpu.memory_space<vmem>>, vector<1x24x64xbf16>
    %50 = vector.shape_cast %49 : vector<1x24x64xbf16> to vector<24x64xbf16>
    %c8_47 = arith.constant 8 : index
    %c0_48 = arith.constant 0 : index
    %c0_49 = arith.constant 0 : index
    %51 = vector.load %arg2[%c8_47, %c0_48, %c0_49] : memref<9x64x128xbf16, #tpu.memory_space<vmem>>, vector<1x64x128xbf16>
    %52 = vector.shape_cast %51 : vector<1x64x128xbf16> to vector<64x128xbf16>
    %cst_50 = arith.constant dense<0.000000e+00> : vector<24x128xf32>
    %53 = tpu.matmul %50, %52, %cst_50 {dimension_numbers = #tpu.dot_dimension_numbers<[1], [0], [0], [1], [0, 0, 1, 1], [], []>} : vector<24x64xbf16>, vector<64x128xbf16>, vector<24x128xf32> -> vector<24x128xf32>
    %54 = arith.addf %48, %53 : vector<24x128xf32>
    %c0_51 = arith.constant 0 : index
    %c0_52 = arith.constant 0 : index
    %55 = vector.load %arg3[%c0_51, %c0_52] : memref<1x128xf32, #tpu.memory_space<vmem>>, vector<1x128xf32>
    %56 = vector.broadcast %55 : vector<1x128xf32> to vector<24x128xf32>
    %57 = arith.addf %54, %56 : vector<24x128xf32>
    %cst_53 = arith.constant 0.000000e+00 : f32
    %58 = vector.broadcast %cst_53 : f32 to vector<24x128xf32>
    %59 = arith.maximumf %57, %58 : vector<24x128xf32>
    %60 = arith.truncf %59 : vector<24x128xf32> to vector<24x128xbf16>
    %c0_54 = arith.constant 0 : index
    %c0_55 = arith.constant 0 : index
    %c0_56 = arith.constant 0 : index
    %61 = vector.load %arg4[%c0_54, %c0_55, %c0_56] : memref<4x18x24xbf16, #tpu.memory_space<vmem>>, vector<1x18x24xbf16>
    %62 = vector.shape_cast %61 : vector<1x18x24xbf16> to vector<18x24xbf16>
    %cst_57 = arith.constant dense<0.000000e+00> : vector<18x128xf32>
    %63 = tpu.matmul %62, %60, %cst_57 {dimension_numbers = #tpu.dot_dimension_numbers<[1], [0], [0], [1], [0, 0, 1, 1], [], []>} : vector<18x24xbf16>, vector<24x128xbf16>, vector<18x128xf32> -> vector<18x128xf32>
    %c1_58 = arith.constant 1 : index
    %c0_59 = arith.constant 0 : index
    %c0_60 = arith.constant 0 : index
    %64 = vector.load %arg4[%c1_58, %c0_59, %c0_60] : memref<4x18x24xbf16, #tpu.memory_space<vmem>>, vector<1x18x24xbf16>
    %65 = vector.shape_cast %64 : vector<1x18x24xbf16> to vector<18x24xbf16>
    %cst_61 = arith.constant dense<0.000000e+00> : vector<18x128xf32>
    %66 = tpu.matmul %65, %60, %cst_61 {dimension_numbers = #tpu.dot_dimension_numbers<[1], [0], [0], [1], [0, 0, 1, 1], [], []>} : vector<18x24xbf16>, vector<24x128xbf16>, vector<18x128xf32> -> vector<18x128xf32>
    %67 = arith.maximumf %63, %66 : vector<18x128xf32>
    %c2_62 = arith.constant 2 : index
    %c0_63 = arith.constant 0 : index
    %c0_64 = arith.constant 0 : index
    %68 = vector.load %arg4[%c2_62, %c0_63, %c0_64] : memref<4x18x24xbf16, #tpu.memory_space<vmem>>, vector<1x18x24xbf16>
    %69 = vector.shape_cast %68 : vector<1x18x24xbf16> to vector<18x24xbf16>
    %cst_65 = arith.constant dense<0.000000e+00> : vector<18x128xf32>
    %70 = tpu.matmul %69, %60, %cst_65 {dimension_numbers = #tpu.dot_dimension_numbers<[1], [0], [0], [1], [0, 0, 1, 1], [], []>} : vector<18x24xbf16>, vector<24x128xbf16>, vector<18x128xf32> -> vector<18x128xf32>
    %71 = arith.maximumf %67, %70 : vector<18x128xf32>
    %c3_66 = arith.constant 3 : index
    %c0_67 = arith.constant 0 : index
    %c0_68 = arith.constant 0 : index
    %72 = vector.load %arg4[%c3_66, %c0_67, %c0_68] : memref<4x18x24xbf16, #tpu.memory_space<vmem>>, vector<1x18x24xbf16>
    %73 = vector.shape_cast %72 : vector<1x18x24xbf16> to vector<18x24xbf16>
    %cst_69 = arith.constant dense<0.000000e+00> : vector<18x128xf32>
    %74 = tpu.matmul %73, %60, %cst_69 {dimension_numbers = #tpu.dot_dimension_numbers<[1], [0], [0], [1], [0, 0, 1, 1], [], []>} : vector<18x24xbf16>, vector<24x128xbf16>, vector<18x128xf32> -> vector<18x128xf32>
    %75 = arith.maximumf %71, %74 : vector<18x128xf32>
    %76 = arith.truncf %75 : vector<18x128xf32> to vector<18x128xbf16>
    %c0_70 = arith.constant 0 : index
    %c0_71 = arith.constant 0 : index
    %c0_72 = arith.constant 0 : index
    %77 = vector.load %arg5[%c0_70, %c0_71, %c0_72] : memref<1x18x128xbf16, #tpu.memory_space<vmem>>, vector<1x18x128xbf16>
    %78 = vector.shape_cast %77 : vector<1x18x128xbf16> to vector<18x128xbf16>
    %79 = vector.shape_cast %76 : vector<18x128xbf16> to vector<1x18x128xbf16>
    tpu.vector_store %arg5[%c0_70, %c0_71, %c0_72], %79 {strides = array<i32>} : memref<1x18x128xbf16, #tpu.memory_space<vmem>>, vector<1x18x128xbf16>,
    return
  }
  func.func @transform_0(%arg0: i32) -> (i32, i32, i32) {
    %c0_i32 = arith.constant 0 : i32
    %c0_i32_0 = arith.constant 0 : i32
    %c0_i32_1 = arith.constant 0 : i32
    return %arg0, %c0_i32, %c0_i32_0 : i32, i32, i32
  }
  func.func @transform_1(%arg0: i32) -> (i32, i32, i32) {
    %c0_i32 = arith.constant 0 : i32
    %c0_i32_0 = arith.constant 0 : i32
    %c0_i32_1 = arith.constant 0 : i32
    %c0_i32_2 = arith.constant 0 : i32
    return %c0_i32, %c0_i32_0, %c0_i32_1 : i32, i32, i32
  }
  func.func @transform_2(%arg0: i32) -> (i32, i32) {
    %c0_i32 = arith.constant 0 : i32
    %c0_i32_0 = arith.constant 0 : i32
    %c0_i32_1 = arith.constant 0 : i32
    return %c0_i32, %c0_i32_0 : i32, i32
  }
  func.func @transform_3(%arg0: i32) -> (i32, i32, i32) {
    %c0_i32 = arith.constant 0 : i32
    %c0_i32_0 = arith.constant 0 : i32
    %c0_i32_1 = arith.constant 0 : i32
    %c0_i32_2 = arith.constant 0 : i32
    return %c0_i32, %c0_i32_0, %c0_i32_1 : i32, i32, i32
  }
  func.func @transform_4(%arg0: i32) -> (i32, i32, i32) {
    %c0_i32 = arith.constant 0 : i32
    %c0_i32_0 = arith.constant 0 : i32
    %c0_i32_1 = arith.constant 0 : i32
    return %arg0, %c0_i32, %c0_i32_0 : i32, i32, i32
  }
}

module attributes {stable_mosaic.version = 11 : i64} {
  func.func @_tail_kernel(%arg0: i32, %arg1: memref<1x11x256xbf16, #tpu.memory_space<vmem>>, %arg2: memref<9x256x512xbf16, #tpu.memory_space<vmem>>, %arg3: memref<1x512xf32, #tpu.memory_space<vmem>>, %arg4: memref<3x1xf32, #tpu.memory_space<vmem>>, %arg5: memref<512x256xbf16, #tpu.memory_space<vmem>>, %arg6: memref<1x256xf32, #tpu.memory_space<vmem>>, %arg7: memref<256x10xbf16, #tpu.memory_space<vmem>>, %arg8: memref<1x10xf32, #tpu.memory_space<vmem>>, %arg9: memref<1x1x10xf32, #tpu.memory_space<vmem>>) attributes {dimension_semantics = [#tpu.dimension_semantics<parallel>], iteration_bounds = array<i64: 2>, scalar_prefetch = 0 : i64, scratch_operands = 0 : i64, tpu.core_type = #tpu.core_type<tc>, window_params = [{transform_indices = @transform_0, window_bounds = array<i64: 1, 11, 256>}, {pipeline_mode = #tpu.pipeline_mode<synchronous>, transform_indices = @transform_1, window_bounds = array<i64: 9, 256, 512>}, {pipeline_mode = #tpu.pipeline_mode<synchronous>, transform_indices = @transform_2, window_bounds = array<i64: 1, 512>}, {pipeline_mode = #tpu.pipeline_mode<synchronous>, transform_indices = @transform_3, window_bounds = array<i64: 3, 1>}, {pipeline_mode = #tpu.pipeline_mode<synchronous>, transform_indices = @transform_4, window_bounds = array<i64: 512, 256>}, {pipeline_mode = #tpu.pipeline_mode<synchronous>, transform_indices = @transform_5, window_bounds = array<i64: 1, 256>}, {pipeline_mode = #tpu.pipeline_mode<synchronous>, transform_indices = @transform_6, window_bounds = array<i64: 256, 10>}, {pipeline_mode = #tpu.pipeline_mode<synchronous>, transform_indices = @transform_7, window_bounds = array<i64: 1, 10>}, {transform_indices = @transform_8, window_bounds = array<i64: 1, 1, 10>}]} {
    %cst = arith.constant 0.000000e+00 : f32
    %0 = vector.broadcast %cst : f32 to vector<3x512xf32>
    %c0 = arith.constant 0 : index
    %c0_0 = arith.constant 0 : index
    %c0_1 = arith.constant 0 : index
    %1 = vector.load %arg1[%c0, %c0_0, %c0_1] : memref<1x11x256xbf16, #tpu.memory_space<vmem>>, vector<1x3x256xbf16>
    %2 = vector.shape_cast %1 : vector<1x3x256xbf16> to vector<3x256xbf16>
    %c0_2 = arith.constant 0 : index
    %c0_3 = arith.constant 0 : index
    %c0_4 = arith.constant 0 : index
    %3 = vector.load %arg2[%c0_2, %c0_3, %c0_4] : memref<9x256x512xbf16, #tpu.memory_space<vmem>>, vector<1x256x512xbf16>
    %4 = vector.shape_cast %3 : vector<1x256x512xbf16> to vector<256x512xbf16>
    %cst_5 = arith.constant dense<0.000000e+00> : vector<3x512xf32>
    %5 = tpu.matmul %2, %4, %cst_5 {dimension_numbers = #tpu.dot_dimension_numbers<[1], [0], [0], [1], [0, 0, 1, 1], [], []>} : vector<3x256xbf16>, vector<256x512xbf16>, vector<3x512xf32> -> vector<3x512xf32>
    %6 = arith.addf %0, %5 : vector<3x512xf32>
    %c0_6 = arith.constant 0 : index
    %c1 = arith.constant 1 : index
    %c0_7 = arith.constant 0 : index
    %7 = vector.load %arg1[%c0_6, %c1, %c0_7] : memref<1x11x256xbf16, #tpu.memory_space<vmem>>, vector<1x3x256xbf16>
    %8 = vector.shape_cast %7 : vector<1x3x256xbf16> to vector<3x256xbf16>
    %c1_8 = arith.constant 1 : index
    %c0_9 = arith.constant 0 : index
    %c0_10 = arith.constant 0 : index
    %9 = vector.load %arg2[%c1_8, %c0_9, %c0_10] : memref<9x256x512xbf16, #tpu.memory_space<vmem>>, vector<1x256x512xbf16>
    %10 = vector.shape_cast %9 : vector<1x256x512xbf16> to vector<256x512xbf16>
    %cst_11 = arith.constant dense<0.000000e+00> : vector<3x512xf32>
    %11 = tpu.matmul %8, %10, %cst_11 {dimension_numbers = #tpu.dot_dimension_numbers<[1], [0], [0], [1], [0, 0, 1, 1], [], []>} : vector<3x256xbf16>, vector<256x512xbf16>, vector<3x512xf32> -> vector<3x512xf32>
    %12 = arith.addf %6, %11 : vector<3x512xf32>
    %c0_12 = arith.constant 0 : index
    %c2 = arith.constant 2 : index
    %c0_13 = arith.constant 0 : index
    %13 = vector.load %arg1[%c0_12, %c2, %c0_13] : memref<1x11x256xbf16, #tpu.memory_space<vmem>>, vector<1x3x256xbf16>
    %14 = vector.shape_cast %13 : vector<1x3x256xbf16> to vector<3x256xbf16>
    %c2_14 = arith.constant 2 : index
    %c0_15 = arith.constant 0 : index
    %c0_16 = arith.constant 0 : index
    %15 = vector.load %arg2[%c2_14, %c0_15, %c0_16] : memref<9x256x512xbf16, #tpu.memory_space<vmem>>, vector<1x256x512xbf16>
    %16 = vector.shape_cast %15 : vector<1x256x512xbf16> to vector<256x512xbf16>
    %cst_17 = arith.constant dense<0.000000e+00> : vector<3x512xf32>
    %17 = tpu.matmul %14, %16, %cst_17 {dimension_numbers = #tpu.dot_dimension_numbers<[1], [0], [0], [1], [0, 0, 1, 1], [], []>} : vector<3x256xbf16>, vector<256x512xbf16>, vector<3x512xf32> -> vector<3x512xf32>
    %18 = arith.addf %12, %17 : vector<3x512xf32>
    %c0_18 = arith.constant 0 : index
    %c3 = arith.constant 3 : index
    %c0_19 = arith.constant 0 : index
    %19 = vector.load %arg1[%c0_18, %c3, %c0_19] : memref<1x11x256xbf16, #tpu.memory_space<vmem>>, vector<1x3x256xbf16>
    %20 = vector.shape_cast %19 : vector<1x3x256xbf16> to vector<3x256xbf16>
    %c3_20 = arith.constant 3 : index
    %c0_21 = arith.constant 0 : index
    %c0_22 = arith.constant 0 : index
    %21 = vector.load %arg2[%c3_20, %c0_21, %c0_22] : memref<9x256x512xbf16, #tpu.memory_space<vmem>>, vector<1x256x512xbf16>
    %22 = vector.shape_cast %21 : vector<1x256x512xbf16> to vector<256x512xbf16>
    %cst_23 = arith.constant dense<0.000000e+00> : vector<3x512xf32>
    %23 = tpu.matmul %20, %22, %cst_23 {dimension_numbers = #tpu.dot_dimension_numbers<[1], [0], [0], [1], [0, 0, 1, 1], [], []>} : vector<3x256xbf16>, vector<256x512xbf16>, vector<3x512xf32> -> vector<3x512xf32>
    %24 = arith.addf %18, %23 : vector<3x512xf32>
    %c0_24 = arith.constant 0 : index
    %c4 = arith.constant 4 : index
    %c0_25 = arith.constant 0 : index
    %25 = vector.load %arg1[%c0_24, %c4, %c0_25] : memref<1x11x256xbf16, #tpu.memory_space<vmem>>, vector<1x3x256xbf16>
    %26 = vector.shape_cast %25 : vector<1x3x256xbf16> to vector<3x256xbf16>
    %c4_26 = arith.constant 4 : index
    %c0_27 = arith.constant 0 : index
    %c0_28 = arith.constant 0 : index
    %27 = vector.load %arg2[%c4_26, %c0_27, %c0_28] : memref<9x256x512xbf16, #tpu.memory_space<vmem>>, vector<1x256x512xbf16>
    %28 = vector.shape_cast %27 : vector<1x256x512xbf16> to vector<256x512xbf16>
    %cst_29 = arith.constant dense<0.000000e+00> : vector<3x512xf32>
    %29 = tpu.matmul %26, %28, %cst_29 {dimension_numbers = #tpu.dot_dimension_numbers<[1], [0], [0], [1], [0, 0, 1, 1], [], []>} : vector<3x256xbf16>, vector<256x512xbf16>, vector<3x512xf32> -> vector<3x512xf32>
    %30 = arith.addf %24, %29 : vector<3x512xf32>
    %c0_30 = arith.constant 0 : index
    %c5 = arith.constant 5 : index
    %c0_31 = arith.constant 0 : index
    %31 = vector.load %arg1[%c0_30, %c5, %c0_31] : memref<1x11x256xbf16, #tpu.memory_space<vmem>>, vector<1x3x256xbf16>
    %32 = vector.shape_cast %31 : vector<1x3x256xbf16> to vector<3x256xbf16>
    %c5_32 = arith.constant 5 : index
    %c0_33 = arith.constant 0 : index
    %c0_34 = arith.constant 0 : index
    %33 = vector.load %arg2[%c5_32, %c0_33, %c0_34] : memref<9x256x512xbf16, #tpu.memory_space<vmem>>, vector<1x256x512xbf16>
    %34 = vector.shape_cast %33 : vector<1x256x512xbf16> to vector<256x512xbf16>
    %cst_35 = arith.constant dense<0.000000e+00> : vector<3x512xf32>
    %35 = tpu.matmul %32, %34, %cst_35 {dimension_numbers = #tpu.dot_dimension_numbers<[1], [0], [0], [1], [0, 0, 1, 1], [], []>} : vector<3x256xbf16>, vector<256x512xbf16>, vector<3x512xf32> -> vector<3x512xf32>
    %36 = arith.addf %30, %35 : vector<3x512xf32>
    %c0_36 = arith.constant 0 : index
    %c6 = arith.constant 6 : index
    %c0_37 = arith.constant 0 : index
    %37 = vector.load %arg1[%c0_36, %c6, %c0_37] : memref<1x11x256xbf16, #tpu.memory_space<vmem>>, vector<1x3x256xbf16>
    %38 = vector.shape_cast %37 : vector<1x3x256xbf16> to vector<3x256xbf16>
    %c6_38 = arith.constant 6 : index
    %c0_39 = arith.constant 0 : index
    %c0_40 = arith.constant 0 : index
    %39 = vector.load %arg2[%c6_38, %c0_39, %c0_40] : memref<9x256x512xbf16, #tpu.memory_space<vmem>>, vector<1x256x512xbf16>
    %40 = vector.shape_cast %39 : vector<1x256x512xbf16> to vector<256x512xbf16>
    %cst_41 = arith.constant dense<0.000000e+00> : vector<3x512xf32>
    %41 = tpu.matmul %38, %40, %cst_41 {dimension_numbers = #tpu.dot_dimension_numbers<[1], [0], [0], [1], [0, 0, 1, 1], [], []>} : vector<3x256xbf16>, vector<256x512xbf16>, vector<3x512xf32> -> vector<3x512xf32>
    %42 = arith.addf %36, %41 : vector<3x512xf32>
    %c0_42 = arith.constant 0 : index
    %c7 = arith.constant 7 : index
    %c0_43 = arith.constant 0 : index
    %43 = vector.load %arg1[%c0_42, %c7, %c0_43] : memref<1x11x256xbf16, #tpu.memory_space<vmem>>, vector<1x3x256xbf16>
    %44 = vector.shape_cast %43 : vector<1x3x256xbf16> to vector<3x256xbf16>
    %c7_44 = arith.constant 7 : index
    %c0_45 = arith.constant 0 : index
    %c0_46 = arith.constant 0 : index
    %45 = vector.load %arg2[%c7_44, %c0_45, %c0_46] : memref<9x256x512xbf16, #tpu.memory_space<vmem>>, vector<1x256x512xbf16>
    %46 = vector.shape_cast %45 : vector<1x256x512xbf16> to vector<256x512xbf16>
    %cst_47 = arith.constant dense<0.000000e+00> : vector<3x512xf32>
    %47 = tpu.matmul %44, %46, %cst_47 {dimension_numbers = #tpu.dot_dimension_numbers<[1], [0], [0], [1], [0, 0, 1, 1], [], []>} : vector<3x256xbf16>, vector<256x512xbf16>, vector<3x512xf32> -> vector<3x512xf32>
    %48 = arith.addf %42, %47 : vector<3x512xf32>
    %c0_48 = arith.constant 0 : index
    %c8 = arith.constant 8 : index
    %c0_49 = arith.constant 0 : index
    %49 = vector.load %arg1[%c0_48, %c8, %c0_49] : memref<1x11x256xbf16, #tpu.memory_space<vmem>>, vector<1x3x256xbf16>
    %50 = vector.shape_cast %49 : vector<1x3x256xbf16> to vector<3x256xbf16>
    %c8_50 = arith.constant 8 : index
    %c0_51 = arith.constant 0 : index
    %c0_52 = arith.constant 0 : index
    %51 = vector.load %arg2[%c8_50, %c0_51, %c0_52] : memref<9x256x512xbf16, #tpu.memory_space<vmem>>, vector<1x256x512xbf16>
    %52 = vector.shape_cast %51 : vector<1x256x512xbf16> to vector<256x512xbf16>
    %cst_53 = arith.constant dense<0.000000e+00> : vector<3x512xf32>
    %53 = tpu.matmul %50, %52, %cst_53 {dimension_numbers = #tpu.dot_dimension_numbers<[1], [0], [0], [1], [0, 0, 1, 1], [], []>} : vector<3x256xbf16>, vector<256x512xbf16>, vector<3x512xf32> -> vector<3x512xf32>
    %54 = arith.addf %48, %53 : vector<3x512xf32>
    %c0_54 = arith.constant 0 : index
    %c0_55 = arith.constant 0 : index
    %55 = vector.load %arg3[%c0_54, %c0_55] : memref<1x512xf32, #tpu.memory_space<vmem>>, vector<1x512xf32>
    %56 = vector.broadcast %55 : vector<1x512xf32> to vector<3x512xf32>
    %57 = arith.addf %54, %56 : vector<3x512xf32>
    %cst_56 = arith.constant 0.000000e+00 : f32
    %58 = vector.broadcast %cst_56 : f32 to vector<3x512xf32>
    %59 = arith.maximumf %57, %58 : vector<3x512xf32>
    %c0_57 = arith.constant 0 : index
    %c0_58 = arith.constant 0 : index
    %60 = vector.load %arg4[%c0_57, %c0_58] : memref<3x1xf32, #tpu.memory_space<vmem>>, vector<3x1xf32>
    %61 = vector.broadcast %60 : vector<3x1xf32> to vector<3x512xf32>
    %62 = arith.mulf %59, %61 : vector<3x512xf32>
    %cst_59 = arith.constant dense<0.000000e+00> : vector<512xf32>
    %63 = vector.multi_reduction <add>, %62, %cst_59 [0] : vector<3x512xf32> to vector<512xf32>
    %64 = vector.shape_cast %63 : vector<512xf32> to vector<1x512xf32>
    %65 = arith.truncf %64 : vector<1x512xf32> to vector<1x512xbf16>
    %c0_60 = arith.constant 0 : index
    %c0_61 = arith.constant 0 : index
    %66 = vector.load %arg5[%c0_60, %c0_61] : memref<512x256xbf16, #tpu.memory_space<vmem>>, vector<512x256xbf16>
    %cst_62 = arith.constant dense<0.000000e+00> : vector<1x256xf32>
    %67 = tpu.matmul %65, %66, %cst_62 {dimension_numbers = #tpu.dot_dimension_numbers<[1], [0], [0], [1], [0, 0, 1, 1], [], []>} : vector<1x512xbf16>, vector<512x256xbf16>, vector<1x256xf32> -> vector<1x256xf32>
    %c0_63 = arith.constant 0 : index
    %c0_64 = arith.constant 0 : index
    %68 = vector.load %arg6[%c0_63, %c0_64] : memref<1x256xf32, #tpu.memory_space<vmem>>, vector<1x256xf32>
    %69 = arith.addf %67, %68 : vector<1x256xf32>
    %cst_65 = arith.constant 0.000000e+00 : f32
    %70 = vector.broadcast %cst_65 : f32 to vector<1x256xf32>
    %71 = arith.maximumf %69, %70 : vector<1x256xf32>
    %72 = arith.truncf %71 : vector<1x256xf32> to vector<1x256xbf16>
    %c0_66 = arith.constant 0 : index
    %c0_67 = arith.constant 0 : index
    %73 = vector.load %arg7[%c0_66, %c0_67] : memref<256x10xbf16, #tpu.memory_space<vmem>>, vector<256x10xbf16>
    %cst_68 = arith.constant dense<0.000000e+00> : vector<1x10xf32>
    %74 = tpu.matmul %72, %73, %cst_68 {dimension_numbers = #tpu.dot_dimension_numbers<[1], [0], [0], [1], [0, 0, 1, 1], [], []>} : vector<1x256xbf16>, vector<256x10xbf16>, vector<1x10xf32> -> vector<1x10xf32>
    %c0_69 = arith.constant 0 : index
    %c0_70 = arith.constant 0 : index
    %75 = vector.load %arg8[%c0_69, %c0_70] : memref<1x10xf32, #tpu.memory_space<vmem>>, vector<1x10xf32>
    %76 = arith.addf %74, %75 : vector<1x10xf32>
    %c0_71 = arith.constant 0 : index
    %c0_72 = arith.constant 0 : index
    %c0_73 = arith.constant 0 : index
    %77 = vector.load %arg9[%c0_71, %c0_72, %c0_73] : memref<1x1x10xf32, #tpu.memory_space<vmem>>, vector<1x1x10xf32>
    %78 = vector.shape_cast %77 : vector<1x1x10xf32> to vector<1x10xf32>
    %79 = vector.shape_cast %76 : vector<1x10xf32> to vector<1x1x10xf32>
    tpu.vector_store %arg9[%c0_71, %c0_72, %c0_73], %79 {strides = array<i32>} : memref<1x1x10xf32, #tpu.memory_space<vmem>>, vector<1x1x10xf32>,
    return
  }
  func.func @transform_0(%arg0: i32) -> (i32, i32, i32) {
    %c0_i32 = arith.constant 0 : i32
    %c0_i32_0 = arith.constant 0 : i32
    %c0_i32_1 = arith.constant 0 : i32
    return %arg0, %c0_i32, %c0_i32_0 : i32, i32, i32
  }
  func.func @transform_1(%arg0: i32) -> (i32, i32, i32) {
    %c0_i32 = arith.constant 0 : i32
    %c0_i32_0 = arith.constant 0 : i32
    %c0_i32_1 = arith.constant 0 : i32
    %c0_i32_2 = arith.constant 0 : i32
    return %c0_i32, %c0_i32_0, %c0_i32_1 : i32, i32, i32
  }
  func.func @transform_2(%arg0: i32) -> (i32, i32) {
    %c0_i32 = arith.constant 0 : i32
    %c0_i32_0 = arith.constant 0 : i32
    %c0_i32_1 = arith.constant 0 : i32
    return %c0_i32, %c0_i32_0 : i32, i32
  }
  func.func @transform_3(%arg0: i32) -> (i32, i32) {
    %c0_i32 = arith.constant 0 : i32
    %c0_i32_0 = arith.constant 0 : i32
    %c0_i32_1 = arith.constant 0 : i32
    return %c0_i32, %c0_i32_0 : i32, i32
  }
  func.func @transform_4(%arg0: i32) -> (i32, i32) {
    %c0_i32 = arith.constant 0 : i32
    %c0_i32_0 = arith.constant 0 : i32
    %c0_i32_1 = arith.constant 0 : i32
    return %c0_i32, %c0_i32_0 : i32, i32
  }
  func.func @transform_5(%arg0: i32) -> (i32, i32) {
    %c0_i32 = arith.constant 0 : i32
    %c0_i32_0 = arith.constant 0 : i32
    %c0_i32_1 = arith.constant 0 : i32
    return %c0_i32, %c0_i32_0 : i32, i32
  }
  func.func @transform_6(%arg0: i32) -> (i32, i32) {
    %c0_i32 = arith.constant 0 : i32
    %c0_i32_0 = arith.constant 0 : i32
    %c0_i32_1 = arith.constant 0 : i32
    return %c0_i32, %c0_i32_0 : i32, i32
  }
  func.func @transform_7(%arg0: i32) -> (i32, i32) {
    %c0_i32 = arith.constant 0 : i32
    %c0_i32_0 = arith.constant 0 : i32
    %c0_i32_1 = arith.constant 0 : i32
    return %c0_i32, %c0_i32_0 : i32, i32
  }
  func.func @transform_8(%arg0: i32) -> (i32, i32, i32) {
    %c0_i32 = arith.constant 0 : i32
    %c0_i32_0 = arith.constant 0 : i32
    %c0_i32_1 = arith.constant 0 : i32
    return %arg0, %c0_i32, %c0_i32_0 : i32, i32, i32
  }
}

</mosaic_0001>

<bundles_post_ra>
// kernel: custom_cnn_forward.6
= control target key start
LH: loop header
LB: loop body
LE: loop exit
PB: predicated region body
PF: predicated region fallthrough
CT: control target
= control target key end

     0   :  { %9 = vsyncpa [#allocation3], 0  ;;  %s2643_s0 = inlined_call_operand.vmem [shape: bf16[2,18,128], index: 0, kind: input, shape index: {}]   ;;  %s2644_s1 = inlined_call_operand.hbm [shape: bf16[9,128,256], index: 1, kind: input, shape index: {}]   ;;  %s2645_s2 = inlined_call_operand.hbm [shape: f32[1,256], index: 2, kind: input, shape index: {}]   ;;  %s2646_s3 = inlined_call_operand.hbm [shape: bf16[4,11,8], index: 3, kind: input, shape index: {}]   ;;  %s2647_s4 = inlined_call_operand.vmem [shape: bf16[2,11,256], index: 4, kind: output, shape index: {}]  }
   0x1   :  { %10 = vsyncpa [#allocation5], 0  ;;  %s2512_s15 = smov 0  }
   0x2 LB: > { %s2479_s16 = smov [#allocation4]   ;;  %s2518_s18 = sadd.s32 4294967295, %s2477_s15   ;;  %s2477_s15 = sphi %s2512_s15, %s16_s15  }
   0x3   : > { %s162_s17 = sshll.u32 %s2479_s16, 4  ;;  %p1931_p0 = scmp.ge.s32.totalorder %s2477_s15, 1  ;;  %s163_s17 = int_to_ptr.vmem [resolvable:$true] %s162_s17 }
   0x4   : > { %p136_p1 = scmp.lt.s32.totalorder %s2477_s15, 3  ;;  %p2136_p2 = scmp.eq.s32.totalorder %s2518_s18, 0 }
   0x5   : > { %s2480_s20 = smov [#allocation2]   ;;  %s2481_s23 = smov [#allocation6]  }
   0x6   : > { %p2523_p3 = pnand %p1931_p0, %p136_p1  ;;  %s148_s21 = sshll.u32 %s2480_s20, 4  ;;  %s2529_s21 = int_to_ptr.vmem [resolvable:$true] %s148_s21 }
   0x7   : > { %s172_s24 = sshll.u32 %s2481_s23, 4  ;;  %s2396_s25 = scalar_lea.vmem %s163_s17, 32  ;;  %s2537_s24 = int_to_ptr.vmem [resolvable:$true] %s172_s24 }
   0x8   : > { %p2126_p4 = pneg %p2523_p3  ;;  %p2397_p7 = scmp.ne.s32.totalorder %s163_s17, %s2396_s25 }
   0x9   : > { %p2404_p10 = scmp.lt.s32.totalorder %s163_s17, %s163_s17  ;;  %p2405_p11 = scmp.lt.s32.totalorder %s2396_s25, %s2396_s25 }
   0xa   : > { %p2533_p5 = pnand %p2136_p2, %p2126_p4 }
   0xb   : > { %p2406_p12 = por %p2405_p11, %p2404_p10 }
   0xc   : > { %p2387_p6 = pneg %p2533_p5 }
   0xe   : > { %p2399_p8 = pnand %p2397_p7, %p2387_p6 }
  0x10   : > { %p2400_p9 = pneg %p2399_p8 }
  0x12   : > { %p2407_p13 = pnand %p2406_p12, %p2400_p9 }
  0x14   : > { %2410 = shalt.err (!%p2407_p13)
}
  0x15   : > { %2132 = dma.hbm_to_vmem [thread:$0]  (!%p2533_p5), %s2645_s2, 32, %s163_s17, [#allocation5]  }
  0x16   : > { %s2422_s28 = scalar_lea.vmem %s2529_s21, 18432  ;;  %p2430_p7 = scmp.lt.s32.totalorder %s2529_s21, %s2529_s21 }
  0x17   : > { %p2423_p0 = scmp.ne.s32.totalorder %s2529_s21, %s2422_s28  ;;  %p2431_p8 = scmp.lt.s32.totalorder %s2422_s28, %s2422_s28 }
  0x19   : > { %p2425_p1 = pnand %p2423_p0, %p2387_p6  ;;  %p2432_p9 = por %p2431_p8, %p2430_p7 }
  0x1b   : > { %p2426_p4 = pneg %p2425_p1 }
  0x1d   : > { %p2433_p10 = pnand %p2432_p9, %p2426_p4 }
  0x1f   : > { %2436 = shalt.err (!%p2433_p10)
}
  0x20   : > { %s2482_s29 = smov 128   ;;  %s2483_s30 = smov 8  }
  0x21   : > { %2129 = dma.hbm_to_vmem [thread:$0]  (!%p2533_p5), %s2644_s1, 18432, %s2529_s21, [#allocation3], %s2482_s29, %s2482_s29, %s2483_s30  }
  0x22   : > { %s2448_s7 = scalar_lea.vmem %s2537_s24, 512  ;;  %p2456_p0 = scmp.lt.s32.totalorder %s2537_s24, %s2537_s24 }
  0x23   : > { %p2449_p11 = scmp.ne.s32.totalorder %s2537_s24, %s2448_s7  ;;  %p2457_p1 = scmp.lt.s32.totalorder %s2448_s7, %s2448_s7 }
  0x25   : > { %p2451_p12 = pnand %p2449_p11, %p2387_p6  ;;  %p2458_p4 = por %p2457_p1, %p2456_p0 }
  0x27   : > { %p2452_p13 = pneg %p2451_p12 }
  0x29   : > { %p2459_p7 = pnand %p2458_p4, %p2452_p13 }
  0x2b   : > { %2462 = shalt.err (!%p2459_p7)
}
  0x2c   : > { %s2484_s8 = smov 64   ;;  %s2485_s9 = smov 4  }
  0x2d   : > { %2135 = dma.hbm_to_vmem [thread:$0]  (!%p2533_p5), %s2646_s3, 512, %s2537_s24, [#allocation5], %s2484_s8, %s2484_s8, %s2485_s9  }
  0x2e   : > { %196 = sbr.rel (%p2523_p3) target bundleno = 652 (0x28c), region = 36 }
  0x33   : > { %2468 = dma.done.wait (%p2136_p2), [#allocation3], 18432  }
  0x34   : > { %2470 = vsyncadd (%p2136_p2), [#allocation3], 4294948864 }
  0x35   : > { %2472 = dma.done.wait (%p2136_p2), [#allocation5], 544  }
  0x36   : > { %2474 = vsyncadd (%p2136_p2), [#allocation5], 4294966752  ;;  %v2486_v0 = vmov 0   ;;  %v2158_v1 = vld [vmem:[#allocation2 + $0xf4] ss:$8 sps:$4 sm:$0xff]   ;;  %p230_p2 = scmp.lt.s32.totalorder %s2518_s18, 1 }
  0x37   : > { %401 = vmatprep.mubr.bf16.mxu0 %v2486_v0  ;;  %522 = vmatprep.mubr.bf16.mxu1 %v2486_v0  ;;  %v2160_v2 = vld [vmem:[#allocation2 + $0x74] ss:$8 sps:$4 sm:$0xff]   ;;  %v2162_v3 = vld [vmem:[#allocation2 + $0xf0] ss:$8 sps:$4 sm:$0xff]   ;;  %v2164_v5 = vld [vmem:[#allocation2 + $0xe4] ss:$8 sps:$4 sm:$0xff]  }
  0x38   : > { %369 = vmatprep.subr.bf16.mxu0 %v2158_v1  ;;  %v2163_v4 = vld [vmem:[#allocation2 + $0x70] ss:$8 sps:$4 sm:$0xff]   ;;  %490 = vmatprep.subr.bf16.mxu1 %v2160_v2  ;;  %v2166_v6 = vld [vmem:[#allocation2 + $0x64] ss:$8 sps:$4 sm:$0xff]   ;;  %v2168_v7 = vld [vmem:[#allocation2 + $0xe0] ss:$8 sps:$4 sm:$0xff]  }
  0x39   : > { %370 = vmatpush1.bf16.msra.mxu0 %v2162_v3  ;;  %491 = vmatpush1.bf16.msra.mxu1 %v2163_v4  ;;  %v2169_v8 = vld [vmem:[#allocation2 + $0x60] ss:$8 sps:$4 sm:$0xff]   ;;  %v2170_v9 = vld [vmem:[#allocation2 + $0xd4] ss:$8 sps:$4 sm:$0xff]   ;;  %v2174_v11 = vld [vmem:[#allocation2 + $0xd0] ss:$8 sps:$4 sm:$0xff]  }
  0x3a   : > { %371 = vmatprep.subr.bf16.mxu0 %v2164_v5  ;;  %492 = vmatprep.subr.bf16.mxu1 %v2166_v6  ;;  %v2172_v10 = vld [vmem:[#allocation2 + $0x54] ss:$8 sps:$4 sm:$0xff]   ;;  %v2175_v12 = vld [vmem:[#allocation2 + $0x50] ss:$8 sps:$4 sm:$0xff]   ;;  %v2176_v13 = vld [vmem:[#allocation2 + $0xc4] ss:$8 sps:$4 sm:$0xff]  }
  0x3b   : > { %v2178_v14 = vld [vmem:[#allocation2 + $0x44] ss:$8 sps:$4 sm:$0xff]   ;;  %s2651_s18 = smov (!%p230_p2, %s2518_s18), 1  ;;  %v2180_v15 = vld [vmem:[#allocation2 + $0xc0] ss:$8 sps:$4 sm:$0xff]   ;;  %vm1596_vm0 = vcmask 1043456  }
  0x3c   : > { %v2181_v16 = vld [vmem:[#allocation2 + $0x40] ss:$8 sps:$4 sm:$0xff]   ;;  %v2182_v17 = vld [vmem:[#allocation2 + $0xb4] ss:$8 sps:$4 sm:$0xff]   ;;  %s2113_s12 = smul.u32 12, %s2651_s18  ;;  %vm1592_vm1 = vcmask 64512  }
  0x3d   : > { %372 = vmatpush1.bf16.msra.mxu0 %v2168_v7  ;;  %493 = vmatpush1.bf16.msra.mxu1 %v2169_v8  ;;  %v2184_v18 = vld [vmem:[#allocation2 + $0x34] ss:$8 sps:$4 sm:$0xff]   ;;  %v2186_v19 = vld [vmem:[#allocation2 + $0xb0] ss:$8 sps:$4 sm:$0xff]   ;;  %v2188_v21 = vld [vmem:[#allocation2 + $0xa4] ss:$8 sps:$4 sm:$0xff]  }
  0x3e   : > { %373 = vmatprep.subr.bf16.mxu0 %v2170_v9  ;;  %494 = vmatprep.subr.bf16.mxu1 %v2172_v10  ;;  %v2187_v20 = vld [vmem:[#allocation2 + $0x30] ss:$8 sps:$4 sm:$0xff]   ;;  %v2190_v22 = vld [vmem:[#allocation2 + $0x24] ss:$8 sps:$4 sm:$0xff]   ;;  %s2595_s16 = scalar_lea.vmem %s2643_s0, %s2113_s12  ;;  %v2192_v23 = vld [vmem:[#allocation2 + $0xa0] ss:$8 sps:$4 sm:$0xff]  }
  0x3f   : > { %v2193_v24 = vld [vmem:[#allocation2 + $0x20] ss:$8 sps:$4 sm:$0xff]   ;;  %v2194_v25 = vld [vmem:[#allocation2 + $0x94] ss:$8 sps:$4 sm:$0xff]   ;;  %v2599_v28 = vld [vmem:[%s2595_s16 + $0x4] sm:$0x1] }
  0x40   : > { %v2196_v26 = vld [vmem:[#allocation2 + $0x14] ss:$8 sps:$4 sm:$0xff]   ;;  %v241_v27 = vld [vmem:[%s2595_s16] sm:$0xf]  ;;  %v2198_v30 = vld [vmem:[#allocation2 + $0x90] ss:$8 sps:$4 sm:$0xff]  }
  0x41   : > { %374 = vmatpush1.bf16.msra.mxu0 %v2174_v11  ;;  %495 = vmatpush1.bf16.msra.mxu1 %v2175_v12  ;;  %v1943_v29 = vcombine.low %v241_v27, %v2599_v28  ;;  %v2199_v31 = vld [vmem:[#allocation2 + $0x10] ss:$8 sps:$4 sm:$0xff]   ;;  %v2200_v32 = vld [vmem:[#allocation2 + $0x84] ss:$8 sps:$4 sm:$0xff]   ;;  %v2204_v35 = vld [vmem:[#allocation2 + $0x80] ss:$8 sps:$4 sm:$0xff]  }
  0x42   : > { %375 = vmatprep.subr.bf16.mxu0 %v2176_v13  ;;  %496 = vmatprep.subr.bf16.mxu1 %v2178_v14  ;;  %v2202_v34 = vld [vmem:[#allocation2 + $0x4] ss:$8 sps:$4 sm:$0xff]   ;;  %v2205_v38 = vld [vmem:[#allocation2] ss:$8 sps:$4 sm:$0xff]   ;;  %v2209_v39 = vld [vmem:[#allocation2 + $0x174] ss:$8 sps:$4 sm:$0xff]  }
  0x43   : > { %v284_v33 = vshll.u32 %v1943_v29, 16  ;;  %v282_v36 = vshrl.u32 %v1943_v29, 16  ;;  %v2212_v40 = vld [vmem:[#allocation2 + $0x1f4] ss:$8 sps:$4 sm:$0xff]   ;;  %v2207_v42 = vld [vmem:[#allocation2 + $0x170] ss:$8 sps:$4 sm:$0xff]  }
  0x44   : > { %v2210_v43 = vld [vmem:[#allocation2 + $0x1f0] ss:$8 sps:$4 sm:$0xff]   ;;  %v2215_v44 = vld [vmem:[#allocation2 + $0x164] ss:$8 sps:$4 sm:$0xff]   ;;  %v2213_v46 = vld [vmem:[#allocation2 + $0x160] ss:$8 sps:$4 sm:$0xff]  }
  0x45   : > { %376 = vmatpush1.bf16.msra.mxu0 %v2180_v15  ;;  %497 = vmatpush1.bf16.msra.mxu1 %v2181_v16  ;;  %v286_v37 = vrot.slane %v284_v33, 1  ;;  %v2218_v45 = vld [vmem:[#allocation2 + $0x1e4] ss:$8 sps:$4 sm:$0xff]   ;;  %v2216_v47 = vld [vmem:[#allocation2 + $0x1e0] ss:$8 sps:$4 sm:$0xff]   ;;  %s2110_s17 = sshll.u32 %s2651_s18, 4 }
  0x46   : > { %377 = vmatprep.subr.bf16.mxu0 %v2182_v17  ;;  %498 = vmatprep.subr.bf16.mxu1 %v2184_v18  ;;  %v2221_v48 = vld [vmem:[#allocation2 + $0x154] ss:$8 sps:$4 sm:$0xff]   ;;  %v2219_v50 = vld [vmem:[#allocation2 + $0x150] ss:$8 sps:$4 sm:$0xff]   ;;  %v2227_v52 = vld [vmem:[#allocation2 + $0x144] ss:$8 sps:$4 sm:$0xff]   ;;  %s239_s21 = scalar_lea.vmem %s2647_s4, %s2110_s17 }
  0x47   : > { %v287_v41 = vor.u32 %v286_v37, %v282_v36  ;;  %v2224_v49 = vld [vmem:[#allocation2 + $0x1d4] ss:$8 sps:$4 sm:$0xff]   ;;  %v2222_v51 = vld [vmem:[#allocation2 + $0x1d0] ss:$8 sps:$4 sm:$0xff]   ;;  %v2230_v53 = vld [vmem:[#allocation2 + $0x1c4] ss:$8 sps:$4 sm:$0xff]  }
  0x48   : > { %v2225_v54 = vld [vmem:[#allocation2 + $0x140] ss:$8 sps:$4 sm:$0xff]   ;;  %v2233_v56 = vld [vmem:[#allocation2 + $0x134] ss:$8 sps:$4 sm:$0xff]   ;;  %v2231_v58 = vld [vmem:[#allocation2 + $0x130] ss:$8 sps:$4 sm:$0xff]  }
  0x49   : > { %378 = vmatpush1.bf16.msra.mxu0 %v2186_v19  ;;  %499 = vmatpush1.bf16.msra.mxu1 %v2187_v20  ;;  %v2228_v55 = vld [vmem:[#allocation2 + $0x1c0] ss:$8 sps:$4 sm:$0xff]   ;;  %v2236_v57 = vld [vmem:[#allocation2 + $0x1b4] ss:$8 sps:$4 sm:$0xff]   ;;  %v2234_v59 = vld [vmem:[#allocation2 + $0x1b0] ss:$8 sps:$4 sm:$0xff]  }
  0x4a   : > { %379 = vmatprep.subr.bf16.mxu0 %v2188_v21  ;;  %500 = vmatprep.subr.bf16.mxu1 %v2190_v22  ;;  %v2239_v60 = vld [vmem:[#allocation2 + $0x124] ss:$8 sps:$4 sm:$0xff]   ;;  %v2237_v62 = vld [vmem:[#allocation2 + $0x120] ss:$8 sps:$4 sm:$0xff]   ;;  %v2245_v1 = vld [vmem:[#allocation2 + $0x114] ss:$8 sps:$4 sm:$0xff]  }
  0x4b   : > { %v2242_v61 = vld [vmem:[#allocation2 + $0x1a4] ss:$8 sps:$4 sm:$0xff]   ;;  %v2240_v63 = vld [vmem:[#allocation2 + $0x1a0] ss:$8 sps:$4 sm:$0xff]   ;;  %v2248_v2 = vld [vmem:[#allocation2 + $0x194] ss:$8 sps:$4 sm:$0xff]  }
  0x4c   : > { %v2243_v3 = vld [vmem:[#allocation2 + $0x110] ss:$8 sps:$4 sm:$0xff]   ;;  %v2251_v5 = vld [vmem:[#allocation2 + $0x104] ss:$8 sps:$4 sm:$0xff]   ;;  %v531_v6 = vld [vmem:[%s2595_s16] sm:$0xe] }
  0x4d   : > { %380 = vmatpush1.bf16.msra.mxu0 %v2192_v23  ;;  %501 = vmatpush1.bf16.msra.mxu1 %v2193_v24  ;;  %v2246_v4 = vld [vmem:[#allocation2 + $0x190] ss:$8 sps:$4 sm:$0xff]   ;;  %v677_v7 = vld [vmem:[%s2595_s16] sm:$0xc]  ;;  %v678_v8 = vld [vmem:[%s2595_s16 + $0x4] sm:$0x3]  ;;  %v1976_v11 = vcombine.low %v531_v6, %v2599_v28 }
  0x4e   : > { %381 = vmatprep.subr.bf16.mxu0 %v2194_v25  ;;  %502 = vmatprep.subr.bf16.mxu1 %v2196_v26  ;;  %v2254_v9 = vld [vmem:[#allocation2 + $0x184] ss:$8 sps:$4 sm:$0xff]   ;;  %v2249_v10 = vld [vmem:[#allocation2 + $0x100] ss:$8 sps:$4 sm:$0xff]   ;;  %v1993_v12 = vcombine.low %v677_v7, %v678_v8  ;;  %v2258_v14 = vld [vmem:[#allocation2 + $0x274] ss:$8 sps:$4 sm:$0xff]  }
  0x4f   : > { %v2252_v13 = vld [vmem:[#allocation2 + $0x180] ss:$8 sps:$4 sm:$0xff]   ;;  %v2263_v15 = vld [vmem:[#allocation2 + $0x2f4] ss:$8 sps:$4 sm:$0xff]   ;;  %v552_v16 = vrot.slane %v1976_v11, 1  ;;  %vm1833_vm2 = vcmask 1041408  }
  0x50   : > { %v2256_v17 = vld [vmem:[#allocation2 + $0x270] ss:$8 sps:$4 sm:$0xff]   ;;  %v701_v18 = vrot.slane %v1993_v12, 2  ;;  %v2266_v20 = vld [vmem:[#allocation2 + $0x264] ss:$8 sps:$4 sm:$0xff]   ;;  %vm1836_vm4 = vcmask 1045508  }
  0x51   : > { %382 = vmatpush1.bf16.msra.mxu0 %v2198_v30  ;;  %503 = vmatpush1.bf16.msra.mxu1 %v2199_v31  ;;  %v2261_v19 = vld [vmem:[#allocation2 + $0x2f0] ss:$8 sps:$4 sm:$0xff]   ;;  %v2269_v21 = vld [vmem:[#allocation2 + $0x2e4] ss:$8 sps:$4 sm:$0xff]   ;;  %v2264_v22 = vld [vmem:[#allocation2 + $0x260] ss:$8 sps:$4 sm:$0xff]  }
  0x52   : > { %383 = vmatprep.subr.bf16.mxu0 %v2200_v32  ;;  %504 = vmatprep.subr.bf16.mxu1 %v2202_v34  ;;  %v2267_v23 = vld [vmem:[#allocation2 + $0x2e0] ss:$8 sps:$4 sm:$0xff]   ;;  %v2272_v24 = vld [vmem:[#allocation2 + $0x254] ss:$8 sps:$4 sm:$0xff]   ;;  %v2270_v26 = vld [vmem:[#allocation2 + $0x250] ss:$8 sps:$4 sm:$0xff]  }
  0x53   : > { %v2275_v25 = vld [vmem:[#allocation2 + $0x2d4] ss:$8 sps:$4 sm:$0xff]   ;;  %v2278_v28 = vld [vmem:[#allocation2 + $0x244] ss:$8 sps:$4 sm:$0xff]   ;;  %v2276_v30 = vld [vmem:[#allocation2 + $0x240] ss:$8 sps:$4 sm:$0xff]  }
  0x54   : > { %v2281_v29 = vld [vmem:[#allocation2 + $0x2c4] ss:$8 sps:$4 sm:$0xff]   ;;  %v2279_v31 = vld [vmem:[#allocation2 + $0x2c0] ss:$8 sps:$4 sm:$0xff]   ;;  %v2284_v32 = vld [vmem:[#allocation2 + $0x234] ss:$8 sps:$4 sm:$0xff]  }
  0x55   : > { %384 = vmatpush1.bf16.msra.mxu0 %v2204_v35  ;;  %505 = vmatpush1.bf16.msra.mxu1 %v2205_v38  ;;  %v2287_v33 = vld [vmem:[#allocation2 + $0x2b4] ss:$8 sps:$4 sm:$0xff]   ;;  %v826_v34 = vld [vmem:[%s2595_s16 + $0x4] sm:$0x7]  ;;  %v2282_v35 = vld [vmem:[#allocation2 + $0x230] ss:$8 sps:$4 sm:$0xff]  }
  0x56   : > { %634 = vmatprep.subr.bf16.mxu0 %v2209_v39  ;;  %783 = vmatprep.subr.bf16.mxu1 %v2212_v40  ;;  %v2285_v36 = vld [vmem:[#allocation2 + $0x2b0] ss:$8 sps:$4 sm:$0xff]   ;;  %v2290_v37 = vld [vmem:[#allocation2 + $0x224] ss:$8 sps:$4 sm:$0xff]   ;;  %v2010_v39 = vcombine.low %v677_v7, %v826_v34  ;;  %v2288_v40 = vld [vmem:[#allocation2 + $0x220] ss:$8 sps:$4 sm:$0xff]  }
  0x57   : > { %v2293_v38 = vld [vmem:[#allocation2 + $0x2a4] ss:$8 sps:$4 sm:$0xff]   ;;  %v2322_v6 = vld [vmem:[#allocation2 + $0x3d0] ss:$8 sps:$4 sm:$0xff]   ;;  %v2333_v11 = vld [vmem:[#allocation2 + $0x334] ss:$8 sps:$4 sm:$0xff]  }
  0x58   : > { %402 = vmatmul.mubr.bf16.vlgmr.msra.gmra.mxu0 %v287_v41  ;;  %523 = vmatmul.mubr.bf16.vlgmr.msra.gmra.mxu1 %v241_v27  ;;  %v2273_v27 = vld [vmem:[#allocation2 + $0x2d0] ss:$8 sps:$4 sm:$0xff]   ;;  %v2291_v41 = vld [vmem:[#allocation2 + $0x2a0] ss:$8 sps:$4 sm:$0xff]   ;;  %v2327_v7 = vld [vmem:[#allocation2 + $0x344] ss:$8 sps:$4 sm:$0xff]  }
  0x59   : > { %635 = vmatpush1.bf16.msra.mxu0 %v2207_v42  ;;  %784 = vmatpush1.bf16.msra.mxu1 %v2210_v43  ;;  %v2296_v42 = vld [vmem:[#allocation2 + $0x214] ss:$8 sps:$4 sm:$0xff]   ;;  %v2330_v8 = vld [vmem:[#allocation2 + $0x3c4] ss:$8 sps:$4 sm:$0xff]   ;;  %vm1834_vm3 = vsmask.f32 1280 }
  0x5a   : > { %636 = vmatprep.subr.bf16.mxu0 %v2215_v44  ;;  %785 = vmatprep.subr.bf16.mxu1 %v2218_v45  ;;  %v2299_v43 = vld [vmem:[#allocation2 + $0x294] ss:$8 sps:$4 sm:$0xff]   ;;  %v848_v44 = vshrl.u32 %v2010_v39, 16  ;;  %v2294_v45 = vld [vmem:[#allocation2 + $0x210] ss:$8 sps:$4 sm:$0xff]   ;;  %vm1835_vm6 = vmand %vm1833_vm2, %vm1834_vm3 }
  0x5b   : > { %666 = vmatprep.mubr.bf16.mxu0 %v2486_v0  ;;  %815 = vmatprep.mubr.bf16.mxu1 %v2486_v0  ;;  %v2336_v12 = vld [vmem:[#allocation2 + $0x3b4] ss:$8 sps:$4 sm:$0xff]   ;;  %vm1837_vm5 = vsmask.f32 5376 }
  0x5c   : > { %vm1838_vm7 = vmand %vm1836_vm4, %vm1837_vm5 }
  0x5d   : > { %637 = vmatpush1.bf16.msra.mxu0 %v2213_v46  ;;  %786 = vmatpush1.bf16.msra.mxu1 %v2216_v47  ;;  %v2297_v46 = vld [vmem:[#allocation2 + $0x290] ss:$8 sps:$4 sm:$0xff]   ;;  %v851_v47 = vshll.u32 %v2010_v39, 16  ;;  %v2364_v39 = vld [vmem:[#allocation2 + $0x454] ss:$8 sps:$4 sm:$0xff]   ;;  %vm1839_vm8 = vmor %vm1838_vm7, %vm1835_vm6 }
  0x5e   : > { %638 = vmatprep.subr.bf16.mxu0 %v2221_v48  ;;  %787 = vmatprep.subr.bf16.mxu1 %v2224_v49  ;;  %v979_v48 = vld [vmem:[%s2595_s16] sm:$0x8]  ;;  %v2302_v49 = vld [vmem:[#allocation2 + $0x204] ss:$8 sps:$4 sm:$0xff]  }
  0x61   : > { %639 = vmatpush1.bf16.msra.mxu0 %v2219_v50  ;;  %788 = vmatpush1.bf16.msra.mxu1 %v2222_v51  ;;  %v2305_v50 = vld [vmem:[#allocation2 + $0x284] ss:$8 sps:$4 sm:$0xff]   ;;  %v2300_v51 = vld [vmem:[#allocation2 + $0x200] ss:$8 sps:$4 sm:$0xff]  }
  0x62   : > { %640 = vmatprep.subr.bf16.mxu0 %v2227_v52  ;;  %789 = vmatprep.subr.bf16.mxu1 %v2230_v53  ;;  %v850_v52 = vrot.slane %v848_v44, 2  ;;  %v853_v53 = vrot.slane %v851_v47, 3  ;;  %v2368_v44 = vld [vmem:[#allocation2 + $0x430] ss:$8 sps:$4 sm:$0xff]   ;;  %v2376_v47 = vld [vmem:[#allocation2 + $0x414] ss:$8 sps:$4 sm:$0xff]  }
  0x65   : > { %641 = vmatpush1.bf16.msra.mxu0 %v2225_v54  ;;  %790 = vmatpush1.bf16.msra.mxu1 %v2228_v55  ;;  %v2027_v54 = vcombine.low %v979_v48, %v826_v34  ;;  %v2303_v55 = vld [vmem:[#allocation2 + $0x280] ss:$8 sps:$4 sm:$0xff]   ;;  %v2374_v48 = vld [vmem:[#allocation2 + $0x410] ss:$8 sps:$4 sm:$0xff]  }
  0x66   : > { %642 = vmatprep.subr.bf16.mxu0 %v2233_v56  ;;  %791 = vmatprep.subr.bf16.mxu1 %v2236_v57  ;;  %v2308_v56 = vld [vmem:[#allocation2 + $0x374] ss:$8 sps:$4 sm:$0xff]  }
  0x67   : > { %v2312_v57 = vld [vmem:[#allocation2 + $0x3f4] ss:$8 sps:$4 sm:$0xff]  }
  0x69   : > { %643 = vmatpush1.bf16.msra.mxu0 %v2231_v58  ;;  %792 = vmatpush1.bf16.msra.mxu1 %v2234_v59  ;;  %v854_v58 = vor.u32 %v853_v53, %v850_v52  ;;  %v2306_v59 = vld [vmem:[#allocation2 + $0x370] ss:$8 sps:$4 sm:$0xff]   ;;  %v2377_v52 = vld [vmem:[#allocation2 + $0x400] ss:$8 sps:$4 sm:$0xff]  }
  0x6a   : > { %644 = vmatprep.subr.bf16.mxu0 %v2239_v60  ;;  %793 = vmatprep.subr.bf16.mxu1 %v2242_v61  ;;  %v1000_v60 = vrot.slane %v2027_v54, 3  ;;  %v2310_v61 = vld [vmem:[#allocation2 + $0x3f0] ss:$8 sps:$4 sm:$0xff]  }
  0x6d   : > { %645 = vmatpush1.bf16.msra.mxu0 %v2237_v62  ;;  %794 = vmatpush1.bf16.msra.mxu1 %v2240_v63  ;;  %v2315_v62 = vld [vmem:[#allocation2 + $0x364] ss:$8 sps:$4 sm:$0xff]  }
  0x6e   : > { %646 = vmatprep.subr.bf16.mxu0 %v2245_v1  ;;  %795 = vmatprep.subr.bf16.mxu1 %v2248_v2  ;;  %v2318_v63 = vld [vmem:[#allocation2 + $0x3e4] ss:$8 sps:$4 sm:$0xff]   ;;  %v2313_v1 = vld [vmem:[#allocation2 + $0x360] ss:$8 sps:$4 sm:$0xff]  }
  0x6f   : > { %v2316_v2 = vld [vmem:[#allocation2 + $0x3e0] ss:$8 sps:$4 sm:$0xff]  }
  0x71   : > { %647 = vmatpush1.bf16.msra.mxu0 %v2243_v3  ;;  %796 = vmatpush1.bf16.msra.mxu1 %v2246_v4  ;;  %v2321_v3 = vld [vmem:[#allocation2 + $0x354] ss:$8 sps:$4 sm:$0xff]  }
  0x72   : > { %648 = vmatprep.subr.bf16.mxu0 %v2251_v5  ;;  %797 = vmatprep.subr.bf16.mxu1 %v2254_v9  ;;  %v2324_v4 = vld [vmem:[#allocation2 + $0x3d4] ss:$8 sps:$4 sm:$0xff]   ;;  %v2319_v5 = vld [vmem:[#allocation2 + $0x350] ss:$8 sps:$4 sm:$0xff]   ;;  %v2325_v9 = vld [vmem:[#allocation2 + $0x340] ss:$8 sps:$4 sm:$0xff]  }
  0x75   : > { %649 = vmatpush1.bf16.msra.mxu0 %v2249_v10  ;;  %798 = vmatpush1.bf16.msra.mxu1 %v2252_v13  ;;  %v2328_v10 = vld [vmem:[#allocation2 + $0x3c0] ss:$8 sps:$4 sm:$0xff]   ;;  %v2331_v13 = vld [vmem:[#allocation2 + $0x330] ss:$8 sps:$4 sm:$0xff]  }
  0x76   : > { %936 = vmatprep.subr.bf16.mxu0 %v2258_v14  ;;  %1082 = vmatprep.subr.bf16.mxu1 %v2263_v15  ;;  %v2334_v14 = vld [vmem:[#allocation2 + $0x3b0] ss:$8 sps:$4 sm:$0xff]   ;;  %v1266_v15 = vld [vmem:[%s2595_s16 + $0x4] sm:$0xf] }
  0x78   : > { %667 = vmatmul.mubr.bf16.vlgmr.msra.gmra.mxu0 %v552_v16  ;;  %816 = vmatmul.mubr.bf16.vlgmr.msra.gmra.mxu1 %v701_v18  ;;  %v2616_v16 = vld [vmem:[%s2595_s16 + $0x8] sm:$0x1]  ;;  %v2342_v18 = vld [vmem:[#allocation2 + $0x3a4] ss:$8 sps:$4 sm:$0xff]  }
  0x79   : > { %937 = vmatpush1.bf16.msra.mxu0 %v2256_v17  ;;  %1083 = vmatpush1.bf16.msra.mxu1 %v2261_v19  ;;  %v2339_v17 = vld [vmem:[#allocation2 + $0x324] ss:$8 sps:$4 sm:$0xff]   ;;  %v2060_v19 = vcombine.low %v1266_v15, %v2616_v16 }
  0x7a   : > { %938 = vmatprep.subr.bf16.mxu0 %v2266_v20  ;;  %1084 = vmatprep.subr.bf16.mxu1 %v2269_v21  ;;  %v2337_v20 = vld [vmem:[#allocation2 + $0x320] ss:$8 sps:$4 sm:$0xff]  }
  0x7b   : > { %968 = vmatprep.mubr.bf16.mxu0 %v2486_v0  ;;  %1114 = vmatprep.mubr.bf16.mxu1 %v2486_v0  ;;  %v2340_v21 = vld [vmem:[#allocation2 + $0x3a0] ss:$8 sps:$4 sm:$0xff]  }
  0x7d   : > { %939 = vmatpush1.bf16.msra.mxu0 %v2264_v22  ;;  %1085 = vmatpush1.bf16.msra.mxu1 %v2267_v23  ;;  %v2345_v22 = vld [vmem:[#allocation2 + $0x314] ss:$8 sps:$4 sm:$0xff]  }
  0x7e   : > { %940 = vmatprep.subr.bf16.mxu0 %v2272_v24  ;;  %1086 = vmatprep.subr.bf16.mxu1 %v2275_v25  ;;  %v2348_v23 = vld [vmem:[#allocation2 + $0x394] ss:$8 sps:$4 sm:$0xff]   ;;  %v1293_v24 = vshll.u32 %v2060_v19, 16  ;;  %v2343_v25 = vld [vmem:[#allocation2 + $0x310] ss:$8 sps:$4 sm:$0xff]  }
  0x81   : > { %941 = vmatpush1.bf16.msra.mxu0 %v2270_v26  ;;  %1087 = vmatpush1.bf16.msra.mxu1 %v2273_v27  ;;  %v2346_v26 = vld [vmem:[#allocation2 + $0x390] ss:$8 sps:$4 sm:$0xff]   ;;  %v2351_v27 = vld [vmem:[#allocation2 + $0x304] ss:$8 sps:$4 sm:$0xff]  }
  0x82   : > { %942 = vmatprep.subr.bf16.mxu0 %v2278_v28  ;;  %1088 = vmatprep.subr.bf16.mxu1 %v2281_v29  ;;  %v2354_v28 = vld [vmem:[#allocation2 + $0x384] ss:$8 sps:$4 sm:$0xff]   ;;  %v1291_v29 = vshrl.u32 %v2060_v19, 16 }
  0x85   : > { %943 = vmatpush1.bf16.msra.mxu0 %v2276_v30  ;;  %1089 = vmatpush1.bf16.msra.mxu1 %v2279_v31  ;;  %v1295_v30 = vrot.slane %v1293_v24, 1  ;;  %v2349_v31 = vld [vmem:[#allocation2 + $0x300] ss:$8 sps:$4 sm:$0xff]  }
  0x86   : > { %944 = vmatprep.subr.bf16.mxu0 %v2284_v32  ;;  %1090 = vmatprep.subr.bf16.mxu1 %v2287_v33  ;;  %v2352_v32 = vld [vmem:[#allocation2 + $0x380] ss:$8 sps:$4 sm:$0xff]   ;;  %v2357_v33 = vld [vmem:[#allocation2 + $0x474] ss:$8 sps:$4 sm:$0xff]  }
  0x87   : > { %v1296_v34 = vor.u32 %v1295_v30, %v1291_v29  ;;  %v1569_v29 = vlaneseq }
  0x89   : > { %945 = vmatpush1.bf16.msra.mxu0 %v2282_v35  ;;  %1091 = vmatpush1.bf16.msra.mxu1 %v2285_v36  ;;  %v1125_v35 = vld [vmem:[%s2595_s16 + $0x4] sm:$0xf]  ;;  %v2355_v36 = vld [vmem:[#allocation2 + $0x470] ss:$8 sps:$4 sm:$0xff]  }
  0x8a   : > { %946 = vmatprep.subr.bf16.mxu0 %v2290_v37  ;;  %1092 = vmatprep.subr.bf16.mxu1 %v2293_v38  ;;  %v2361_v37 = vld [vmem:[#allocation2 + $0x464] ss:$8 sps:$4 sm:$0xff]   ;;  %v2359_v38 = vld [vmem:[#allocation2 + $0x460] ss:$8 sps:$4 sm:$0xff]  }
  0x8d   : > { %947 = vmatpush1.bf16.msra.mxu0 %v2288_v40  ;;  %1093 = vmatpush1.bf16.msra.mxu1 %v2291_v41  ;;  %v2362_v40 = vld [vmem:[#allocation2 + $0x450] ss:$8 sps:$4 sm:$0xff]   ;;  %v2367_v41 = vld [vmem:[#allocation2 + $0x444] ss:$8 sps:$4 sm:$0xff]  }
  0x8e   : > { %948 = vmatprep.subr.bf16.mxu0 %v2296_v42  ;;  %1094 = vmatprep.subr.bf16.mxu1 %v2299_v43  ;;  %v2365_v42 = vld [vmem:[#allocation2 + $0x440] ss:$8 sps:$4 sm:$0xff]   ;;  %v2370_v43 = vld [vmem:[#allocation2 + $0x434] ss:$8 sps:$4 sm:$0xff]  }
  0x91   : > { %949 = vmatpush1.bf16.msra.mxu0 %v2294_v45  ;;  %1095 = vmatpush1.bf16.msra.mxu1 %v2297_v46  ;;  %v2373_v45 = vld [vmem:[#allocation2 + $0x424] ss:$8 sps:$4 sm:$0xff]   ;;  %v2371_v46 = vld [vmem:[#allocation2 + $0x420] ss:$8 sps:$4 sm:$0xff]  }
  0x92   : > { %950 = vmatprep.subr.bf16.mxu0 %v2302_v49  ;;  %1096 = vmatprep.subr.bf16.mxu1 %v2305_v50  ;;  %v1421_v49 = vld [vmem:[%s2595_s16 + $0x4] sm:$0xe] }
  0x93   : > { %v2379_v50 = vld [vmem:[#allocation2 + $0x404] ss:$8 sps:$4 sm:$0xff]  }
  0x95   : > { %951 = vmatpush1.bf16.msra.mxu0 %v2300_v51  ;;  %1097 = vmatpush1.bf16.msra.mxu1 %v2303_v55  ;;  %v2077_v51 = vcombine.low %v1421_v49, %v2616_v16 }
  0x96   : > { %1223 = vmatprep.subr.bf16.mxu0 %v2308_v56  ;;  %1378 = vmatprep.subr.bf16.mxu1 %v2312_v57 }
  0x97   : > { %v1442_v53 = vrot.slane %v2077_v51, 1 }
  0x98   : > { %969 = vmatmul.mubr.bf16.vlgmr.msra.gmra.mxu0 %v854_v58  ;;  %1115 = vmatmul.mubr.bf16.vlgmr.msra.gmra.mxu1 %v1000_v60 }
  0x99   : > { %1224 = vmatpush1.bf16.msra.mxu0 %v2306_v59  ;;  %1379 = vmatpush1.bf16.msra.mxu1 %v2310_v61 }
  0x9a   : > { %1225 = vmatprep.subr.bf16.mxu0 %v2315_v62  ;;  %1380 = vmatprep.subr.bf16.mxu1 %v2318_v63 }
  0x9b   : > { %1255 = vmatprep.mubr.bf16.mxu0 %v2486_v0  ;;  %1410 = vmatprep.mubr.bf16.mxu1 %v2486_v0 }
  0x9d   : > { %1226 = vmatpush1.bf16.msra.mxu0 %v2313_v1  ;;  %1381 = vmatpush1.bf16.msra.mxu1 %v2316_v2 }
  0x9e   : > { %1227 = vmatprep.subr.bf16.mxu0 %v2321_v3  ;;  %1382 = vmatprep.subr.bf16.mxu1 %v2324_v4 }
  0xa1   : > { %1228 = vmatpush1.bf16.msra.mxu0 %v2319_v5  ;;  %1383 = vmatpush1.bf16.msra.mxu1 %v2322_v6 }
  0xa2   : > { %1229 = vmatprep.subr.bf16.mxu0 %v2327_v7  ;;  %1384 = vmatprep.subr.bf16.mxu1 %v2330_v8 }
  0xa5   : > { %1230 = vmatpush1.bf16.msra.mxu0 %v2325_v9  ;;  %1385 = vmatpush1.bf16.msra.mxu1 %v2328_v10 }
  0xa6   : > { %1231 = vmatprep.subr.bf16.mxu0 %v2333_v11  ;;  %1386 = vmatprep.subr.bf16.mxu1 %v2336_v12 }
  0xa9   : > { %1232 = vmatpush1.bf16.msra.mxu0 %v2331_v13  ;;  %1387 = vmatpush1.bf16.msra.mxu1 %v2334_v14 }
  0xaa   : > { %1233 = vmatprep.subr.bf16.mxu0 %v2339_v17  ;;  %1388 = vmatprep.subr.bf16.mxu1 %v2342_v18 }
  0xad   : > { %1234 = vmatpush1.bf16.msra.mxu0 %v2337_v20  ;;  %1389 = vmatpush1.bf16.msra.mxu1 %v2340_v21 }
  0xae   : > { %1235 = vmatprep.subr.bf16.mxu0 %v2345_v22  ;;  %1390 = vmatprep.subr.bf16.mxu1 %v2348_v23 }
  0xb1   : > { %1236 = vmatpush1.bf16.msra.mxu0 %v2343_v25  ;;  %1391 = vmatpush1.bf16.msra.mxu1 %v2346_v26 }
  0xb2   : > { %1237 = vmatprep.subr.bf16.mxu0 %v2351_v27  ;;  %1392 = vmatprep.subr.bf16.mxu1 %v2354_v28 }
  0xb5   : > { %1238 = vmatpush1.bf16.msra.mxu0 %v2349_v31  ;;  %1393 = vmatpush1.bf16.msra.mxu1 %v2352_v32  ;;  %v1570_v32 = vshrl.u32 %v1569_v29, 7 }
  0xb6   : > { %1524 = vmatprep.subr.bf16.mxu0 %v2357_v33 }
  0xb8   : > { %1256 = vmatmul.mubr.bf16.vlgmr.msra.gmra.mxu0 %v1125_v35  ;;  %1411 = vmatmul.mubr.bf16.vlgmr.msra.gmra.mxu1 %v1296_v34 }
  0xb9   : > { %1525 = vmatpush1.bf16.msra.mxu0 %v2355_v36  ;;  %1556 = vmatprep.mubr.bf16.mxu0 %v2486_v0  ;;  %v1571_v36 = vsub.s32 0, %v1570_v32 }
  0xba   : > { %1526 = vmatprep.subr.bf16.mxu0 %v2361_v37  ;;  %1635 = vmatprep.mubr.bf16.mxu1 %v2486_v0  ;;  %v1567_v37 = vld [vmem:[#allocation4] sm:$0x3] }
  0xbd   : > { %1527 = vmatpush1.bf16.msra.mxu0 %v2359_v38 }
  0xbe   : > { %1528 = vmatprep.subr.bf16.mxu0 %v2364_v39  ;;  %v1575_v39 = vsub.s32 1, %v1570_v32 }
  0xc1   : > { %1529 = vmatpush1.bf16.msra.mxu0 %v2362_v40 }
  0xc2   : > { %1530 = vmatprep.subr.bf16.mxu0 %v2367_v41  ;;  %v1572_v41 = vrot.slane %v1567_v37, %v1571_v36 }
  0xc5   : > { %1531 = vmatpush1.bf16.msra.mxu0 %v2365_v42 }
  0xc6   : > { %1532 = vmatprep.subr.bf16.mxu0 %v2370_v43 }
  0xc9   : > { %1533 = vmatpush1.bf16.msra.mxu0 %v2368_v44 }
  0xca   : > { %1534 = vmatprep.subr.bf16.mxu0 %v2373_v45  ;;  %v1576_v45 = vrot.slane %v1567_v37, %v1575_v39 }
  0xcd   : > { %1535 = vmatpush1.bf16.msra.mxu0 %v2371_v46 }
  0xce   : > { %1536 = vmatprep.subr.bf16.mxu0 %v2376_v47 }
  0xd1   : > { %1537 = vmatpush1.bf16.msra.mxu0 %v2374_v48 }
  0xd2   : > { %1538 = vmatprep.subr.bf16.mxu0 %v2379_v50 }
  0xd5   : > { %1539 = vmatpush1.bf16.msra.mxu0 %v2377_v52 }
  0xd8   : > { %1557 = vmatmul.mubr.bf16.vlgmr.msra.gmra.mxu0 %v1442_v53 }
 0x118   : > { %v403_v54 = vpop.f32.mrf.mxu0  ;;  %v524_v55 = vpop.f32.mrf.mxu1 }
 0x119   : > { %v525_v56 = vadd.f32 %v524_v55, %v403_v54 }
 0x11a   : > { %v405_v57 = vpop.f32.mrf.mxu0  ;;  %v526_v58 = vpop.f32.mrf.mxu1 }
 0x11b   : > { %v527_v59 = vadd.f32 %v526_v58, %v405_v57  ;;  %v2381_v57 = vld [vmem:[#allocation6] sm:$0x3f]   ;;  %v2382_v58 = vld [vmem:[#allocation6 + $0x8] sm:$0x3f]  }
 0x11c   : > { %v407_v60 = vpop.f32.mrf.mxu0  ;;  %v528_v61 = vpop.f32.mrf.mxu1 }
 0x11d   : > { %v2384_v60 = vld [vmem:[#allocation6 + $0x18] sm:$0x3f]  }
 0x11e   : > { %v408_v62 = vpop.f32.mrf.mxu0  ;;  %v529_v63 = vpop.f32.mrf.mxu1 }
 0x138   : > { %v668_v1 = vpop.f32.mrf.mxu0  ;;  %v817_v2 = vpop.f32.mrf.mxu1 }
 0x139   : > { %v675_v3 = vadd.f32 %v668_v1, %v525_v56 }
 0x13a   : > { %v670_v4 = vpop.f32.mrf.mxu0  ;;  %v819_v5 = vpop.f32.mrf.mxu1 }
 0x13b   : > { %v676_v6 = vadd.f32 %v670_v4, %v527_v59  ;;  %v824_v7 = vadd.f32 %v817_v2, %v675_v3  ;;  %v2383_v59 = vld [vmem:[#allocation6 + $0x10] sm:$0x3f]  }
 0x13c   : > { %v672_v8 = vpop.f32.mrf.mxu0  ;;  %v821_v9 = vpop.f32.mrf.mxu1 }
 0x13d   : > { %v825_v10 = vadd.f32 %v819_v5, %v676_v6 }
 0x13e   : > { %v673_v11 = vpop.f32.mrf.mxu0  ;;  %v822_v12 = vpop.f32.mrf.mxu1 }
 0x158   : > { %v970_v13 = vpop.f32.mrf.mxu0  ;;  %v1116_v14 = vpop.f32.mrf.mxu1 }
 0x159   : > { %v977_v30 = vadd.f32 %v970_v13, %v824_v7 }
 0x15a   : > { %v972_v15 = vpop.f32.mrf.mxu0  ;;  %v1118_v16 = vpop.f32.mrf.mxu1 }
 0x15b   : > { %v978_v31 = vadd.f32 %v972_v15, %v825_v10  ;;  %v1123_v33 = vadd.f32 %v1116_v14, %v977_v30 }
 0x15c   : > { %v974_v17 = vpop.f32.mrf.mxu0  ;;  %v1120_v18 = vpop.f32.mrf.mxu1 }
 0x15d   : > { %v1124_v34 = vadd.f32 %v1118_v16, %v978_v31 }
 0x15e   : > { %v975_v19 = vpop.f32.mrf.mxu0  ;;  %v1121_v20 = vpop.f32.mrf.mxu1 }
 0x178   : > { %v1257_v21 = vpop.f32.mrf.mxu0  ;;  %v1412_v22 = vpop.f32.mrf.mxu1 }
 0x179   : > { %v1264_v35 = vadd.f32 %v1257_v21, %v1123_v33 }
 0x17a   : > { %v1259_v23 = vpop.f32.mrf.mxu0  ;;  %v1414_v24 = vpop.f32.mrf.mxu1 }
 0x17b   : > { %v1265_v38 = vadd.f32 %v1259_v23, %v1124_v34  ;;  %v1419_v40 = vadd.f32 %v1412_v22, %v1264_v35 }
 0x17c   : > { %v1261_v25 = vpop.f32.mrf.mxu0  ;;  %v1416_v26 = vpop.f32.mrf.mxu1 }
 0x17d   : > { %v1420_v43 = vadd.f32 %v1414_v24, %v1265_v38  ;;  %v1840_v26 = vld [vmem:[%s239_s21 + $0x8] sm:$0x33] }
 0x17e   : > { %v1262_v27 = vpop.f32.mrf.mxu0  ;;  %v1417_v28 = vpop.f32.mrf.mxu1 }
 0x198   : > { %v1558_v42 = vpop.f32.mrf.mxu0 }
 0x199   : > { %v1565_v44 = vadd.f32 %v1558_v42, %v1419_v40 }
 0x19a   : > { %v1560_v46 = vpop.f32.mrf.mxu0 }
 0x19b   : > { %v1579_v47 = vadd.f32 %v1572_v41, %v1565_v44  ;;  %v1566_v48 = vadd.f32 %v1560_v46, %v1420_v43 }
 0x19c   : > { %v1562_v49 = vpop.f32.mrf.mxu0 }
 0x19d   : > { %v1581_v50 = vmax.f32 %v1579_v47, 0.0  ;;  %v1580_v51 = vadd.f32 %v1576_v45, %v1566_v48 }
 0x19e   : > { %v1563_v52 = vpop.f32.mrf.mxu0 }
 0x19f   : > { %v1583_v53 = vpack.c.bf16 %v1581_v50, %v1581_v50  ;;  %v1582_v54 = vmax.f32 %v1580_v51, 0.0 }
 0x1a1   : > { %v1584_v55 = vpack.c.bf16 %v1582_v54, %v1582_v54  ;;  %v1598_v56 = vsel %vm1596_vm0, %v1583_v53, 0 }
 0x1a3   : > { %2095 = vmatprep.subr.msk.bf16.mxu1 %vm1596_vm0, %v1584_v55 }
 0x1a4   : > { %1618 = vmatpush1.bf16.msra.mxu1 %v1598_v56 }
 0x1a5   : > { %2098 = vmatprep.subr.msk.bf16.mxu1 %vm1596_vm0, %v1584_v55 }
 0x1a7   : > { %2096 = vmatmul.mubr.msk.bf16.vlgmr.msra.gmra.mxu1 %vm1592_vm1, %v2381_v57 }
 0x1a8   : > { %1672 = vmatpush1.bf16.msra.mxu1 %v1598_v56  ;;  %1689 = vmatprep.mubr.bf16.mxu1 %v2486_v0 }
 0x1a9   : > { %2101 = vmatprep.subr.msk.bf16.mxu1 %vm1596_vm0, %v1584_v55 }
 0x1af   : > { %2099 = vmatmul.mubr.msk.bf16.vlgmr.msra.gmra.mxu1 %vm1592_vm1, %v2382_v58 }
 0x1b0   : > { %1730 = vmatpush1.bf16.msra.mxu1 %v1598_v56  ;;  %1747 = vmatprep.mubr.bf16.mxu1 %v2486_v0 }
 0x1b1   : > { %2104 = vmatprep.subr.msk.bf16.mxu1 %vm1596_vm0, %v1584_v55 }
 0x1b7   : > { %2102 = vmatmul.mubr.msk.bf16.vlgmr.msra.gmra.mxu1 %vm1592_vm1, %v2383_v59 }
 0x1b8   : > { %1788 = vmatpush1.bf16.msra.mxu1 %v1598_v56  ;;  %1805 = vmatprep.mubr.bf16.mxu1 %v2486_v0 }
 0x1bf   : > { %2105 = vmatmul.mubr.msk.bf16.vlgmr.msra.gmra.mxu1 %vm1592_vm1, %v2384_v60 }
 0x267   : > { %v1637_v61 = vpop.f32.mrf.mxu1 }
 0x269   : > { %v1639_v62 = vpop.f32.mrf.mxu1 }
 0x26b   : > { %v1641_v63 = vpop.f32.mrf.mxu1 }
 0x26d   : > { %v1643_v1 = vpop.f32.mrf.mxu1 }
 0x26f   : > { %v1691_v2 = vpop.f32.mrf.mxu1 }
 0x270   : > { %v1700_v10 = vmax.f32 %v1637_v61, %v1691_v2 }
 0x271   : > { %v1693_v3 = vpop.f32.mrf.mxu1 }
 0x272   : > { %v1701_v11 = vmax.f32 %v1639_v62, %v1693_v3 }
 0x273   : > { %v1695_v4 = vpop.f32.mrf.mxu1 }
 0x274   : > { %v1702_v15 = vmax.f32 %v1641_v63, %v1695_v4 }
 0x275   : > { %v1697_v5 = vpop.f32.mrf.mxu1 }
 0x276   : > { %v1703_v16 = vmax.f32 %v1643_v1, %v1697_v5 }
 0x277   : > { %v1749_v6 = vpop.f32.mrf.mxu1 }
 0x278   : > { %v1758_v0 = vmax.f32 %v1700_v10, %v1749_v6 }
 0x279   : > { %v1751_v7 = vpop.f32.mrf.mxu1 }
 0x27a   : > { %v1759_v13 = vmax.f32 %v1701_v11, %v1751_v7 }
 0x27b   : > { %v1753_v8 = vpop.f32.mrf.mxu1 }
 0x27c   : > { %v1760_v20 = vmax.f32 %v1702_v15, %v1753_v8 }
 0x27d   : > { %v1755_v9 = vpop.f32.mrf.mxu1 }
 0x27e   : > { %v1761_v21 = vmax.f32 %v1703_v16, %v1755_v9 }
 0x27f   : > { %v1807_v12 = vpop.f32.mrf.mxu1 }
 0x280   : > { %v1816_v17 = vmax.f32 %v1758_v0, %v1807_v12 }
 0x281   : > { %v1809_v14 = vpop.f32.mrf.mxu1 }
 0x282   : > { %v1817_v18 = vmax.f32 %v1759_v13, %v1809_v14 }
 0x283   : > { %v1811_v19 = vpop.f32.mrf.mxu1 }
 0x284   : > { %v2111_v22 = vpack.c.bf16 %v1817_v18, %v1816_v17  ;;  %v1818_v24 = vmax.f32 %v1760_v20, %v1811_v19 }
 0x285   : > { %v1813_v23 = vpop.f32.mrf.mxu1 }
 0x286   : > { %1832 = vst [vmem:[%s239_s21] sm:$0xff] %v2111_v22  ;;  %v1819_v25 = vmax.f32 %v1761_v21, %v1813_v23 }
 0x288   : > { %v2112_v27 = vpack.c.bf16 %v1819_v25, %v1818_v24 }
 0x28a   : > { %v1841_v28 = vsel %vm1839_vm8, %v2112_v27, %v1840_v26 }
 0x28b   : > { %1842 = vst [vmem:[%s239_s21 + $0x8] sm:$0x33] %v1841_v28 }
 0x28c PF: > { %s16_s15 = sadd.s32 1, %s2477_s15  }
 0x28d   : > { %p13_p3 = scmp.ge.s32.totalorder %s16_s15, 4  }
 0x28f   :  { %15 = sbr.rel (!%p13_p3) target bundleno = 2 (0x2), region = 90 }
 0x294   :  { %1864 = vsyncpa [#allocation3], 1 }
 0x295   :  { %1866 = vsyncpa [#allocation3 + $0x1], 1 }
 0x296   :  { %1867 = vsyncpa [#allocation5], 1 }

// kernel: custom_cnn_forward.5
= control target key start
LH: loop header
LB: loop body
LE: loop exit
PB: predicated region body
PF: predicated region fallthrough
CT: control target
= control target key end

     0   :  { %9 = vsyncpa [#allocation3], 0  ;;  %s2273_s0 = inlined_call_operand.vmem [shape: bf16[2,38,64], index: 0, kind: input, shape index: {}]   ;;  %s2274_s1 = inlined_call_operand.hbm [shape: bf16[9,64,128], index: 1, kind: input, shape index: {}]   ;;  %s2275_s2 = inlined_call_operand.hbm [shape: f32[1,128], index: 2, kind: input, shape index: {}]   ;;  %s2276_s3 = inlined_call_operand.hbm [shape: bf16[4,18,24], index: 3, kind: input, shape index: {}]   ;;  %s2277_s4 = inlined_call_operand.vmem [shape: bf16[2,18,128], index: 4, kind: output, shape index: {}]  }
   0x1   :  { %10 = vsyncpa [#allocation5], 0  ;;  %s2108_s15 = smov 0  }
   0x2 LB: > { %s2078_s16 = smov [#allocation4]   ;;  %s2114_s18 = sadd.s32 4294967295, %s2076_s15   ;;  %s2076_s15 = sphi %s2108_s15, %s16_s15  }
   0x3   : > { %s162_s17 = sshll.u32 %s2078_s16, 4  ;;  %p1562_p0 = scmp.ge.s32.totalorder %s2076_s15, 1  ;;  %s163_s17 = int_to_ptr.vmem [resolvable:$true] %s162_s17 }
   0x4   : > { %p136_p1 = scmp.lt.s32.totalorder %s2076_s15, 3  ;;  %p2278_p2 = scmp.eq.s32.totalorder %s2114_s18, 0 }
   0x5   : > { %s2079_s20 = smov [#allocation2]   ;;  %s2080_s23 = smov [#allocation6]  }
   0x6   : > { %p2119_p3 = pnand %p1562_p0, %p136_p1  ;;  %s148_s21 = sshll.u32 %s2079_s20, 4  ;;  %s149_s21 = int_to_ptr.vmem [resolvable:$true] %s148_s21 }
   0x7   : > { %s172_s24 = sshll.u32 %s2080_s23, 4  ;;  %s1995_s25 = scalar_lea.vmem %s163_s17, 16  ;;  %s2131_s24 = int_to_ptr.vmem [resolvable:$true] %s172_s24 }
   0x8   : > { %s2280_s19 = scalar_select %p2119_p3, 1, 0 }
   0x9   : > { %p1898_p4 = pneg %p2119_p3  ;;  %p1996_p7 = scmp.ne.s32.totalorder %s163_s17, %s1995_s25 }
   0xa   : > { %s2002_s26 = scalar_lea.vmem %s163_s17, 32  ;;  %p2003_p10 = scmp.lt.s32.totalorder %s163_s17, %s163_s17 }
   0xb   : > { %p2127_p5 = pnand %p2278_p2, %p1898_p4  ;;  %p2004_p11 = scmp.lt.s32.totalorder %s2002_s26, %s1995_s25 }
   0xd   : > { %p1986_p6 = pneg %p2127_p5  ;;  %p2005_p12 = por %p2004_p11, %p2003_p10 }
   0xf   : > { %p1998_p8 = pnand %p1996_p7, %p1986_p6 }
  0x11   : > { %p1999_p9 = pneg %p1998_p8 }
  0x13   : > { %p2006_p13 = pnand %p2005_p12, %p1999_p9 }
  0x15   : > { %2009 = shalt.err (!%p2006_p13)
}
  0x16   : > { %1904 = dma.hbm_to_vmem [thread:$0]  (!%p2127_p5), %s2275_s2, 16, %s163_s17, [#allocation5]  }
  0x17   : > { %s2021_s29 = scalar_lea.vmem %s149_s21, 4608  ;;  %p2029_p7 = scmp.lt.s32.totalorder %s149_s21, %s149_s21 }
  0x18   : > { %p2022_p0 = scmp.ne.s32.totalorder %s149_s21, %s2021_s29  ;;  %p2030_p8 = scmp.lt.s32.totalorder %s2021_s29, %s2021_s29 }
  0x1a   : > { %p2024_p1 = pnand %p2022_p0, %p1986_p6  ;;  %p2031_p2 = por %p2030_p8, %p2029_p7 }
  0x1c   : > { %p2025_p4 = pneg %p2024_p1 }
  0x1e   : > { %p2032_p3 = pnand %p2031_p2, %p2025_p4 }
  0x20   : > { %2035 = shalt.err (!%p2032_p3)
}
  0x21   : > { %s2081_s30 = smov 64   ;;  %s2082_s5 = smov 4  }
  0x22   : > { %1901 = dma.hbm_to_vmem [thread:$0]  (!%p2127_p5), %s2274_s1, 4608, %s149_s21, [#allocation3], %s2081_s30, %s2081_s30, %s2082_s5  }
  0x23   : > { %s2047_s8 = scalar_lea.vmem %s2131_s24, 768  ;;  %p2055_p2 = scmp.lt.s32.totalorder %s2131_s24, %s2131_s24 }
  0x24   : > { %p2048_p9 = scmp.ne.s32.totalorder %s2131_s24, %s2047_s8  ;;  %p2056_p3 = scmp.lt.s32.totalorder %s2047_s8, %s2047_s8 }
  0x26   : > { %p2050_p10 = pnand %p2048_p9, %p1986_p6  ;;  %p2057_p12 = por %p2056_p3, %p2055_p2 }
  0x28   : > { %p2051_p11 = pneg %p2050_p10 }
  0x2a   : > { %p2058_p13 = pnand %p2057_p12, %p2051_p11 }
  0x2c   : > { %2061 = shalt.err (!%p2058_p13)
}
  0x2d   : > { %1907 = dma.hbm_to_vmem [thread:$0]  (!%p2127_p5), %s2276_s3, 768, %s2131_s24, [#allocation5], %s2081_s30, %s2081_s30, %s2082_s5  }
  0x2e   : > { %p2282_p0 = scmp.ne.s32.totalorder %s2280_s19, 0 }
  0x2f   : > { %p2283_p1 = scmp.eq.s32.totalorder (!%p2282_p0), %s2114_s18, 0 }
  0x30   : > { %196 = sbr.rel (%p2282_p0) target bundleno = 569 (0x239), region = 36 }
  0x35   : > { %2067 = dma.done.wait (%p2283_p1), [#allocation3], 4608   ;;  %p2284_p6 = pmov %p2283_p1 }
  0x36   : > { %p2285_p4 = pmov %p2283_p1 }
  0x37   : > { %2069 = vsyncadd (%p2284_p6), [#allocation3], 4294962688 }
  0x38   : > { %2071 = dma.done.wait (%p2285_p4), [#allocation5], 784   ;;  %p2286_p7 = pmov %p2283_p1 }
  0x39   : > { %p230_p8 = scmp.lt.s32.totalorder %s2114_s18, 1  ;;  %v1927_v0 = vld [vmem:[#allocation2 + $0x38] sm:$0xff]   ;;  %v1929_v2 = vld [vmem:[#allocation2 + $0x30] sm:$0xff]   ;;  %v1931_v4 = vld [vmem:[#allocation2 + $0x28] sm:$0xff]   ;;  %vm312_vm0 = vcmask 523264   ;;  %vm458_vm2 = vcmask 1046528  }
  0x3a   : > { %2073 = vsyncadd (%p2286_p7), [#allocation5], 4294966512  ;;  %v1928_v1 = vld [vmem:[#allocation2 + $0x18] sm:$0xff]   ;;  %1740 = vmatprep.subr.bf16.mxu0 %v1927_v0  ;;  %v1930_v3 = vld [vmem:[#allocation2 + $0x10] sm:$0xff]   ;;  %vm272_vm1 = vsmask.f32 7424 }
  0x3b   : > { %s2288_s18 = smov (!%p230_p8, %s2114_s18), 1  ;;  %1752 = vmatprep.subr.bf16.mxu1 %v1928_v1  ;;  %1741 = vmatpush3.bf16.msra.mxu0 %v1927_v0  ;;  %v1932_v5 = vld [vmem:[#allocation2 + $0x8] sm:$0xff]   ;;  %v1933_v6 = vld [vmem:[#allocation2 + $0x20] sm:$0xff]   ;;  %v1938_v16 = vld [vmem:[#allocation2 + $0x58] sm:$0xff]   ;;  %vm560_vm3 = vcmask 1044480   ;;  %vm872_vm5 = vcmask 1045504  }
  0x3c   : > { %s1884_s11 = smul.u32 20, %s2288_s18  ;;  %1753 = vmatpush3.bf16.msra.mxu1 %v1928_v1  ;;  %1742 = vmatprep.subr.bf16.mxu0 %v1929_v2  ;;  %v1934_v7 = vld [vmem:[#allocation2] sm:$0xff]   ;;  %v1939_v20 = vld [vmem:[#allocation2 + $0x78] sm:$0xff]   ;;  %v1940_v25 = vld [vmem:[#allocation2 + $0x50] sm:$0xff]   ;;  %vm658_vm4 = vsmask.f32 4352 }
  0x3d   : > { %1754 = vmatprep.subr.bf16.mxu1 %v1930_v3  ;;  %v1941_v27 = vld [vmem:[#allocation2 + $0x70] sm:$0xff]   ;;  %v1942_v33 = vld [vmem:[#allocation2 + $0x48] sm:$0xff]   ;;  %v1944_v41 = vld [vmem:[#allocation2 + $0x40] sm:$0xff]   ;;  %vm970_vm6 = vsmask.f32 5376  ;;  %vm1192_vm7 = vcmask 195584  }
  0x3e   : > { %s2182_s14 = scalar_lea.vmem %s2273_s0, %s1884_s11  ;;  %v1943_v37 = vld [vmem:[#allocation2 + $0x68] sm:$0xff]   ;;  %v1945_v44 = vld [vmem:[#allocation2 + $0x60] sm:$0xff]   ;;  %v1947_v47 = vld [vmem:[#allocation2 + $0x98] sm:$0xff]   ;;  %vm1199_vm8 = vcmask 1043456   ;;  %s1885_s16 = smul.u32 12, %s2288_s18 }
  0x3f   : > { %1743 = vmatpush3.bf16.msra.mxu0 %v1929_v2  ;;  %v241_v8 = vld [vmem:[%s2182_s14] sm:$0xf]  ;;  %v2186_v9 = vld [vmem:[%s2182_s14 + $0x4] sm:$0xf]  ;;  %v2189_v10 = vld [vmem:[%s2182_s14 + $0x8] sm:$0xf] }
  0x40   : > { %1755 = vmatpush3.bf16.msra.mxu1 %v1930_v3  ;;  %1744 = vmatprep.subr.bf16.mxu0 %v1931_v4  ;;  %v252_v11 = vld [vmem:[%s2182_s14 + $0xc] sm:$0x1]  ;;  %v1573_v12 = vcombine.low %v241_v8, %v2186_v9  ;;  %v1581_v23 = vcombine.low %v2189_v10, %v2189_v10  ;;  %v445_v28 = vld [vmem:[%s2182_s14] sm:$0xe]  ;;  %v1950_v51 = vld [vmem:[#allocation2 + $0xb8] sm:$0xff]   ;;  %v1610_v60 = vcombine.low %v2186_v9, %v2189_v10  ;;  %s239_s20 = scalar_lea.vmem %s2277_s4, %s1885_s16 }
  0x41   : > { %1756 = vmatprep.subr.bf16.mxu1 %v1932_v5  ;;  %v2194_v13 = vcombine.low %v2189_v10, %v252_v11  ;;  %v1588_v29 = vcombine.low %v445_v28, %v2186_v9  ;;  %v543_v31 = vld [vmem:[%s2182_s14] sm:$0x8]  ;;  %v544_v32 = vld [vmem:[%s2182_s14 + $0xc] sm:$0x7]  ;;  %v1951_v54 = vld [vmem:[#allocation2 + $0x90] sm:$0xff]  }
  0x42   : > { %v274_v14 = vshrl.u32 %v1573_v12, 16  ;;  %v276_v15 = vshll.u32 %v1573_v12, 16  ;;  %1760 = vmatprep.mubr.msk.bf16.mxu1 %vm312_vm0, %v1573_v12  ;;  %v1595_v35 = vcombine.low %v543_v31, %v2186_v9  ;;  %v1596_v36 = vcombine.low %v2189_v10, %v544_v32  ;;  %v2217_v46 = vld [vmem:[%s2182_s14 + $0xc] sm:$0xf]  ;;  %v1952_v58 = vld [vmem:[#allocation2 + $0xb0] sm:$0xff]   ;;  %v1955_v8 = vld [vmem:[#allocation2 + $0x80] sm:$0xff]  }
  0x43   : > { %1745 = vmatpush3.bf16.msra.mxu0 %v1931_v4  ;;  %v281_v17 = vshll.u32 %v2194_v13, 16  ;;  %v285_v18 = vshrl.u32 %v2194_v13, 16  ;;  %v460_v30 = vrot.slane %v2194_v13, 1  ;;  %v459_v34 = vrot.slane %v1588_v29, 1  ;;  %v849_v62 = vld [vmem:[%s2182_s14 + $0x4] sm:$0xc] }
  0x44   : > { %1757 = vmatpush3.bf16.msra.mxu1 %v1932_v5  ;;  %1746 = vmatprep.subr.bf16.mxu0 %v1933_v6  ;;  %v278_v19 = vrot.slane %v276_v15, 1  ;;  %v561_v39 = vrot.slane %v1595_v35, 3  ;;  %v562_v40 = vrot.slane %v1596_v36, 3  ;;  %v660_v43 = vshrl.u32 %v1595_v35, 16  ;;  %v2227_v63 = vld [vmem:[%s2182_s14 + $0x8] sm:$0xf] }
  0x45   : > { %1758 = vmatprep.subr.bf16.mxu1 %v1934_v7  ;;  %v283_v21 = vrot.slane %v281_v17, 1  ;;  %v461_v38 = vsel %vm458_vm2, %v459_v34, %v460_v30  ;;  %v663_v45 = vshll.u32 %v1595_v35, 16  ;;  %v1603_v48 = vcombine.low %v2189_v10, %v2217_v46  ;;  %v1953_v0 = vld [vmem:[#allocation2 + $0x88] sm:$0xff]   ;;  %v957_v3 = vld [vmem:[%s2182_s14 + $0x10] sm:$0x7]  ;;  %v1956_v12 = vld [vmem:[#allocation2 + $0xa0] sm:$0xff]  }
  0x46   : > { %v279_v22 = vor.u32 %v278_v19, %v274_v14  ;;  %v563_v42 = vsel %vm560_vm3, %v561_v39, %v562_v40  ;;  %v662_v49 = vrot.slane %v660_v43, 3  ;;  %v851_v1 = vld [vmem:[%s2182_s14 + $0xc] sm:$0xf]  ;;  %v1618_v2 = vcombine.low %v849_v62, %v2227_v63  ;;  %v852_v11 = vld [vmem:[%s2182_s14 + $0x10] sm:$0x3]  ;;  %v1958_v17 = vld [vmem:[#allocation2 + $0xd8] sm:$0xff]  }
  0x47   : > { %1747 = vmatpush3.bf16.msra.mxu0 %v1933_v6  ;;  %v287_v24 = vor.u32 %v285_v18, %v283_v21  ;;  %v665_v50 = vrot.slane %v663_v45, 4  ;;  %v668_v52 = vshrl.u32 %v1603_v48, 16  ;;  %v671_v53 = vshll.u32 %v1603_v48, 16  ;;  %v1954_v4 = vld [vmem:[#allocation2 + $0xa8] sm:$0xff]   ;;  %v1961_v19 = vld [vmem:[#allocation2 + $0xf8] sm:$0xff]   ;;  %v1966_v32 = vld [vmem:[#allocation2 + $0xc0] sm:$0xff]  }
  0x48   : > { %1759 = vmatpush3.bf16.msra.mxu1 %v1934_v7  ;;  %1764 = vmatprep.subr.bf16.mxu0 %v1938_v16  ;;  %v284_v26 = vsel %vm272_vm1, %v279_v22, %v283_v21  ;;  %v2232_v5 = vcombine.low %v851_v1, %v957_v3  ;;  %v972_v6 = vshrl.u32 %v1618_v2, 16  ;;  %v975_v7 = vshll.u32 %v1618_v2, 16  ;;  %v1964_v29 = vld [vmem:[#allocation2 + $0xc8] sm:$0xff]   ;;  %v1069_v31 = vld [vmem:[%s2182_s14 + $0x4] sm:$0x8]  ;;  %v1971_v35 = vld [vmem:[#allocation2 + $0x118] sm:$0xff]  }
  0x49   : > { %1776 = vmatprep.subr.bf16.mxu1 %v1939_v20  ;;  %1748 = vmatprep.mubr.msk.bf16.mxu0 %vm312_vm0, %v284_v26  ;;  %v666_v55 = vor.u32 %v665_v50, %v662_v49  ;;  %v670_v56 = vrot.slane %v668_v52, 3  ;;  %v673_v57 = vrot.slane %v671_v53, 4  ;;  %v1619_v18 = vcombine.low %v851_v1, %v852_v11  ;;  %v1963_v26 = vld [vmem:[#allocation2 + $0xf0] sm:$0xff]   ;;  %v1980_v43 = vld [vmem:[#allocation6 + $0x18] sm:$0xff]  }
  0x4a   : > { %1749 = vmatmul.mubr.msk.bf16.vlgmr.msra.gmra.mxu0 %vm312_vm0, %v287_v24  ;;  %v980_v9 = vshrl.u32 %v2232_v5, 16  ;;  %v983_v10 = vshll.u32 %v2232_v5, 16  ;;  %v974_v13 = vrot.slane %v972_v6, 2  ;;  %v977_v14 = vrot.slane %v975_v7, 3 }
  0x4b   : > { %1761 = vmatmul.mubr.msk.bf16.vlgmr.msra.gmra.mxu1 %vm312_vm0, %v1581_v23  ;;  %1765 = vmatpush3.bf16.msra.mxu0 %v1938_v16  ;;  %v674_v59 = vor.u32 %v673_v57, %v670_v56  ;;  %v873_v21 = vrot.slane %v1618_v2, 2  ;;  %v874_v22 = vrot.slane %v1619_v18, 2  ;;  %v1633_v34 = vcombine.low %v1069_v31, %v2227_v63 }
  0x4c   : > { %1777 = vmatpush3.bf16.msra.mxu1 %v1939_v20  ;;  %1766 = vmatprep.subr.bf16.mxu0 %v1940_v25  ;;  %v982_v15 = vrot.slane %v980_v9, 2  ;;  %v985_v16 = vrot.slane %v983_v10, 3  ;;  %v1611_v20 = vcombine.low %v2217_v46, %v2217_v46  ;;  %v978_v23 = vor.u32 %v977_v14, %v974_v13 }
  0x4d   : > { %1778 = vmatprep.subr.bf16.mxu1 %v1941_v27  ;;  %1772 = vmatprep.mubr.msk.bf16.mxu0 %vm312_vm0, %v461_v38  ;;  %v675_v61 = vsel %vm658_vm4, %v666_v55, %v674_v59  ;;  %v1082_v36 = vrot.slane %v1633_v34, 3  ;;  %v1972_v38 = vld [vmem:[#allocation2 + $0x110] sm:$0xff]  }
  0x4e   : > { %1784 = vmatprep.mubr.msk.bf16.mxu1 %vm312_vm0, %v563_v42  ;;  %v986_v24 = vor.u32 %v985_v16, %v982_v15  ;;  %v1976_v42 = vld [vmem:[#allocation6] sm:$0xff]  }
  0x4f   : > { %1767 = vmatpush3.bf16.msra.mxu0 %v1940_v25  ;;  %v1962_v25 = vld [vmem:[#allocation2 + $0xd0] sm:$0xff]  }
  0x50   : > { %1779 = vmatpush3.bf16.msra.mxu1 %v1941_v27  ;;  %1768 = vmatprep.subr.bf16.mxu0 %v1942_v33  ;;  %v875_v27 = vsel %vm872_vm5, %v873_v21, %v874_v22  ;;  %v987_v28 = vsel %vm970_vm6, %v978_v23, %v986_v24 }
  0x51   : > { %1780 = vmatprep.subr.bf16.mxu1 %v1943_v37 }
  0x53   : > { %1769 = vmatpush3.bf16.msra.mxu0 %v1942_v33  ;;  %v1967_v33 = vld [vmem:[#allocation2 + $0xe0] sm:$0xff]  }
  0x54   : > { %1781 = vmatpush3.bf16.msra.mxu1 %v1943_v37  ;;  %1770 = vmatprep.subr.bf16.mxu0 %v1944_v41  ;;  %v1083_v37 = vrot.slane %v2232_v5, 3 }
  0x55   : > { %1782 = vmatprep.subr.bf16.mxu1 %v1945_v44 }
  0x56   : > { %v1084_v39 = vsel %vm560_vm3, %v1082_v36, %v1083_v37 }
  0x57   : > { %1771 = vmatpush3.bf16.msra.mxu0 %v1944_v41  ;;  %v1974_v41 = vld [vmem:[#allocation2 + $0x100] sm:$0xff]  }
  0x58   : > { %1783 = vmatpush3.bf16.msra.mxu1 %v1945_v44  ;;  %1788 = vmatprep.subr.bf16.mxu0 %v1947_v47 }
  0x59   : > { %1800 = vmatprep.subr.bf16.mxu1 %v1950_v51 }
  0x5a   : > { %1773 = vmatmul.mubr.msk.bf16.vlgmr.msra.gmra.mxu0 %vm312_vm0, %v460_v30  ;;  %v1965_v30 = vld [vmem:[#allocation2 + $0xe8] sm:$0xff]  }
  0x5b   : > { %1785 = vmatmul.mubr.msk.bf16.vlgmr.msra.gmra.mxu1 %vm312_vm0, %v562_v40  ;;  %1789 = vmatpush3.bf16.msra.mxu0 %v1947_v47  ;;  %v1973_v40 = vld [vmem:[#allocation2 + $0x108] sm:$0xff]  }
  0x5c   : > { %1801 = vmatpush3.bf16.msra.mxu1 %v1950_v51  ;;  %1790 = vmatprep.subr.bf16.mxu0 %v1951_v54 }
  0x5d   : > { %1802 = vmatprep.subr.bf16.mxu1 %v1952_v58  ;;  %1796 = vmatprep.mubr.msk.bf16.mxu0 %vm312_vm0, %v675_v61 }
  0x5e   : > { %1808 = vmatprep.mubr.msk.bf16.mxu1 %vm312_vm0, %v1610_v60 }
  0x5f   : > { %1791 = vmatpush3.bf16.msra.mxu0 %v1951_v54 }
  0x60   : > { %1803 = vmatpush3.bf16.msra.mxu1 %v1952_v58  ;;  %1792 = vmatprep.subr.bf16.mxu0 %v1953_v0 }
  0x61   : > { %1804 = vmatprep.subr.bf16.mxu1 %v1954_v4 }
  0x63   : > { %1793 = vmatpush3.bf16.msra.mxu0 %v1953_v0 }
  0x64   : > { %1805 = vmatpush3.bf16.msra.mxu1 %v1954_v4  ;;  %1794 = vmatprep.subr.bf16.mxu0 %v1955_v8 }
  0x65   : > { %1806 = vmatprep.subr.bf16.mxu1 %v1956_v12 }
  0x67   : > { %1795 = vmatpush3.bf16.msra.mxu0 %v1955_v8 }
  0x68   : > { %1807 = vmatpush3.bf16.msra.mxu1 %v1956_v12  ;;  %1812 = vmatprep.subr.bf16.mxu0 %v1958_v17 }
  0x69   : > { %1824 = vmatprep.subr.bf16.mxu1 %v1961_v19 }
  0x6a   : > { %1797 = vmatmul.mubr.msk.bf16.vlgmr.msra.gmra.mxu0 %vm312_vm0, %v674_v59 }
  0x6b   : > { %1809 = vmatmul.mubr.msk.bf16.vlgmr.msra.gmra.mxu1 %vm312_vm0, %v1611_v20  ;;  %1813 = vmatpush3.bf16.msra.mxu0 %v1958_v17 }
  0x6c   : > { %1825 = vmatpush3.bf16.msra.mxu1 %v1961_v19  ;;  %1814 = vmatprep.subr.bf16.mxu0 %v1962_v25 }
  0x6d   : > { %1826 = vmatprep.subr.bf16.mxu1 %v1963_v26  ;;  %1820 = vmatprep.mubr.msk.bf16.mxu0 %vm312_vm0, %v875_v27 }
  0x6e   : > { %1832 = vmatprep.mubr.msk.bf16.mxu1 %vm312_vm0, %v987_v28 }
  0x6f   : > { %1815 = vmatpush3.bf16.msra.mxu0 %v1962_v25 }
  0x70   : > { %1827 = vmatpush3.bf16.msra.mxu1 %v1963_v26  ;;  %1816 = vmatprep.subr.bf16.mxu0 %v1964_v29 }
  0x71   : > { %1828 = vmatprep.subr.bf16.mxu1 %v1965_v30 }
  0x73   : > { %1817 = vmatpush3.bf16.msra.mxu0 %v1964_v29 }
  0x74   : > { %1829 = vmatpush3.bf16.msra.mxu1 %v1965_v30  ;;  %1818 = vmatprep.subr.bf16.mxu0 %v1966_v32  ;;  %v1640_v30 = vld [vmem:[#allocation4] ss:$0 sm:$0xff] }
  0x75   : > { %1830 = vmatprep.subr.bf16.mxu1 %v1967_v33 }
  0x77   : > { %1819 = vmatpush3.bf16.msra.mxu0 %v1966_v32 }
  0x78   : > { %1831 = vmatpush3.bf16.msra.mxu1 %v1967_v33  ;;  %1836 = vmatprep.subr.bf16.mxu0 %v1971_v35 }
  0x7a   : > { %1821 = vmatmul.mubr.msk.bf16.vlgmr.msra.gmra.mxu0 %vm312_vm0, %v874_v22 }
  0x7b   : > { %1833 = vmatmul.mubr.msk.bf16.vlgmr.msra.gmra.mxu1 %vm312_vm0, %v986_v24  ;;  %1837 = vmatpush3.bf16.msra.mxu0 %v1971_v35 }
  0x7c   : > { %1844 = vmatprep.mubr.msk.bf16.mxu0 %vm312_vm0, %v1084_v39  ;;  %1838 = vmatprep.subr.bf16.mxu0 %v1972_v38 }
  0x7d   : > { %1852 = vmatprep.mubr.msk.bf16.mxu1 %vm1192_vm7, %v1976_v42 }
  0x7f   : > { %1839 = vmatpush3.bf16.msra.mxu0 %v1972_v38 }
  0x80   : > { %1840 = vmatprep.subr.bf16.mxu0 %v1973_v40 }
  0x83   : > { %1841 = vmatpush3.bf16.msra.mxu0 %v1973_v40 }
  0x84   : > { %1842 = vmatprep.subr.bf16.mxu0 %v1974_v41 }
  0x87   : > { %1843 = vmatpush3.bf16.msra.mxu0 %v1974_v41 }
  0x8a   : > { %1845 = vmatmul.mubr.msk.bf16.vlgmr.msra.gmra.mxu0 %vm312_vm0, %v1083_v37 }
  0x8b   : > { %1868 = vmatprep.mubr.msk.bf16.mxu0 %vm1192_vm7, %v1980_v43 }
 0x10a   : > { %v1750_v44 = vpop.f32.mrf.mxu0 }
 0x10b   : > { %v1762_v45 = vpop.f32.mrf.mxu1 }
 0x10c   : > { %v353_v46 = vpop.f32.mrf.mxu0  ;;  %v440_v2 = vadd.f32 %v1762_v45, %v1750_v44 }
 0x10d   : > { %v431_v47 = vpop.f32.mrf.mxu1 }
 0x10e   : > { %v1751_v48 = vpop.f32.mrf.mxu0  ;;  %v432_v5 = vadd.f32 %v431_v47, %v353_v46 }
 0x10f   : > { %v1763_v49 = vpop.f32.mrf.mxu1 }
 0x110   : > { %v356_v50 = vpop.f32.mrf.mxu0 }
 0x111   : > { %v434_v51 = vpop.f32.mrf.mxu1 }
 0x112   : > { %v435_v12 = vadd.f32 %v434_v51, %v356_v50  ;;  %v1977_v50 = vld [vmem:[#allocation6 + $0x8] ss:$0 sps:$4 sm:$0x11]   ;;  %v1981_v51 = vld [vmem:[#allocation6 + $0x20] ss:$0 sps:$4 sm:$0x11]  }
 0x11a   : > { %v1774_v52 = vpop.f32.mrf.mxu0 }
 0x11b   : > { %v1786_v53 = vpop.f32.mrf.mxu1  ;;  %v542_v6 = vadd.f32 %v1774_v52, %v440_v2  ;;  %v1978_v52 = vld [vmem:[#allocation6 + $0xc] sm:$0xff]  }
 0x11c   : > { %v526_v54 = vpop.f32.mrf.mxu0 }
 0x11d   : > { %v628_v55 = vpop.f32.mrf.mxu1  ;;  %v540_v9 = vadd.f32 %v526_v54, %v432_v5  ;;  %v644_v13 = vadd.f32 %v1786_v53, %v542_v6  ;;  %v1979_v53 = vld [vmem:[#allocation6 + $0x14] ss:$0 sps:$4 sm:$0x11]   ;;  %v1982_v54 = vld [vmem:[#allocation6 + $0x24] sm:$0xff]  }
 0x11e   : > { %v1775_v56 = vpop.f32.mrf.mxu0 }
 0x11f   : > { %v1787_v57 = vpop.f32.mrf.mxu1  ;;  %v642_v16 = vadd.f32 %v628_v55, %v540_v9  ;;  %v1983_v55 = vld [vmem:[#allocation6 + $0x2c] ss:$0 sps:$4 sm:$0x11]  }
 0x120   : > { %v529_v58 = vpop.f32.mrf.mxu0 }
 0x121   : > { %v631_v59 = vpop.f32.mrf.mxu1  ;;  %v541_v17 = vadd.f32 %v529_v58, %v435_v12 }
 0x123   : > { %v643_v20 = vadd.f32 %v631_v59, %v541_v17 }
 0x12a   : > { %v1798_v60 = vpop.f32.mrf.mxu0 }
 0x12b   : > { %v1810_v61 = vpop.f32.mrf.mxu1  ;;  %v756_v18 = vadd.f32 %v1798_v60, %v644_v13 }
 0x12c   : > { %v740_v62 = vpop.f32.mrf.mxu0 }
 0x12d   : > { %v832_v63 = vpop.f32.mrf.mxu1  ;;  %v754_v19 = vadd.f32 %v740_v62, %v642_v16  ;;  %v848_v21 = vadd.f32 %v1810_v61, %v756_v18 }
 0x12e   : > { %v1799_v0 = vpop.f32.mrf.mxu0 }
 0x12f   : > { %v1811_v1 = vpop.f32.mrf.mxu1  ;;  %v846_v22 = vadd.f32 %v832_v63, %v754_v19 }
 0x130   : > { %v743_v3 = vpop.f32.mrf.mxu0 }
 0x131   : > { %v835_v4 = vpop.f32.mrf.mxu1  ;;  %v755_v23 = vadd.f32 %v743_v3, %v643_v20 }
 0x133   : > { %v847_v27 = vadd.f32 %v835_v4, %v755_v23 }
 0x13a   : > { %v1822_v7 = vpop.f32.mrf.mxu0 }
 0x13b   : > { %v1834_v8 = vpop.f32.mrf.mxu1  ;;  %v956_v24 = vadd.f32 %v1822_v7, %v848_v21 }
 0x13c   : > { %v940_v10 = vpop.f32.mrf.mxu0 }
 0x13d   : > { %v1052_v11 = vpop.f32.mrf.mxu1  ;;  %v954_v25 = vadd.f32 %v940_v10, %v846_v22  ;;  %v1068_v28 = vadd.f32 %v1834_v8, %v956_v24 }
 0x13e   : > { %v1823_v14 = vpop.f32.mrf.mxu0 }
 0x13f   : > { %v1835_v15 = vpop.f32.mrf.mxu1  ;;  %v1066_v31 = vadd.f32 %v1052_v11, %v954_v25 }
 0x140   : > { %v943_v26 = vpop.f32.mrf.mxu0 }
 0x141   : > { %v955_v32 = vadd.f32 %v943_v26, %v847_v27  ;;  %v1055_v34 = vpop.f32.mrf.mxu1 }
 0x143   : > { %v1067_v39 = vadd.f32 %v1055_v34, %v955_v32 }
 0x14a   : > { %v1846_v29 = vpop.f32.mrf.mxu0 }
 0x14b   : > { %v1165_v33 = vadd.f32 %v1846_v29, %v1068_v28 }
 0x14c   : > { %v1149_v35 = vpop.f32.mrf.mxu0 }
 0x14d   : > { %v1175_v36 = vadd.f32 %v1640_v30, %v1165_v33  ;;  %v1163_v37 = vadd.f32 %v1149_v35, %v1066_v31 }
 0x14e   : > { %v1847_v38 = vpop.f32.mrf.mxu0 }
 0x14f   : > { %v1178_v40 = vmax.f32 %v1175_v36, 0.0  ;;  %v1173_v43 = vadd.f32 %v1640_v30, %v1163_v37 }
 0x150   : > { %v1152_v41 = vpop.f32.mrf.mxu0 }
 0x151   : > { %v1180_v42 = vpack.c.bf16 %v1178_v40, %v1178_v40  ;;  %v1164_v44 = vadd.f32 %v1152_v41, %v1067_v39  ;;  %v1176_v47 = vmax.f32 %v1173_v43, 0.0 }
 0x153   : > { %v1174_v45 = vadd.f32 %v1640_v30, %v1164_v44  ;;  %1880 = vmatprep.subr.msk.bf16.mxu1 %vm1199_vm8, %v1180_v42  ;;  %1882 = vmatprep.subr.msk.bf16.mxu0 %vm1199_vm8, %v1180_v42  ;;  %v1201_v46 = vsel %vm1199_vm8, %v1180_v42, 0 }
 0x154   : > { %1849 = vmatpush3.bf16.msra.mxu1 %v1201_v46  ;;  %1865 = vmatpush3.bf16.msra.mxu0 %v1201_v46 }
 0x155   : > { %v1177_v48 = vmax.f32 %v1174_v45, 0.0 }
 0x157   : > { %v1179_v49 = vpack.c.bf16 %v1177_v48, %v1176_v47 }
 0x159   : > { %1850 = vmatprep.subr.bf16.mxu1 %v1179_v49  ;;  %1866 = vmatprep.subr.bf16.mxu0 %v1179_v49 }
 0x15a   : > { %1851 = vmatpush3.bf16.msra.mxu1 %v1179_v49  ;;  %1867 = vmatpush3.bf16.msra.mxu0 %v1179_v49 }
 0x15b   : > { %1881 = vmatprep.subr.msk.bf16.mxu1 %vm1199_vm8, %v1180_v42 }
 0x15d   : > { %1853 = vmatmul.mubr.msk.bf16.vlgmr.msra.gmra.mxu1 %vm1192_vm7, %v1977_v50  ;;  %1869 = vmatmul.mubr.msk.bf16.vlgmr.msra.gmra.mxu0 %vm1192_vm7, %v1981_v51 }
 0x15e   : > { %1857 = vmatpush3.bf16.msra.mxu1 %v1201_v46  ;;  %1860 = vmatprep.mubr.msk.bf16.mxu1 %vm1192_vm7, %v1978_v52 }
 0x15f   : > { %1858 = vmatprep.subr.bf16.mxu1 %v1179_v49 }
 0x162   : > { %1859 = vmatpush3.bf16.msra.mxu1 %v1179_v49 }
 0x163   : > { %1883 = vmatprep.subr.msk.bf16.mxu1 %vm1199_vm8, %v1180_v42 }
 0x165   : > { %1861 = vmatmul.mubr.msk.bf16.vlgmr.msra.gmra.mxu1 %vm1192_vm7, %v1979_v53 }
 0x166   : > { %1873 = vmatpush3.bf16.msra.mxu1 %v1201_v46  ;;  %1876 = vmatprep.mubr.msk.bf16.mxu1 %vm1192_vm7, %v1982_v54 }
 0x167   : > { %1874 = vmatprep.subr.bf16.mxu1 %v1179_v49 }
 0x16a   : > { %1875 = vmatpush3.bf16.msra.mxu1 %v1179_v49 }
 0x16d   : > { %1877 = vmatmul.mubr.msk.bf16.vlgmr.msra.gmra.mxu1 %vm1192_vm7, %v1983_v55 }
 0x21d   : > { %v1854_v56 = vpop.f32.mrf.mxu1  ;;  %v1870_v57 = vpop.f32.mrf.mxu0 }
 0x21f   : > { %v1237_v58 = vpop.f32.mrf.mxu1  ;;  %v1372_v59 = vpop.f32.mrf.mxu0 }
 0x221   : > { %v1855_v60 = vpop.f32.mrf.mxu1  ;;  %v1871_v61 = vpop.f32.mrf.mxu0 }
 0x223   : > { %v1240_v62 = vpop.f32.mrf.mxu1  ;;  %v1375_v11 = vpop.f32.mrf.mxu0 }
 0x225   : > { %v1862_v63 = vpop.f32.mrf.mxu1 }
 0x226   : > { %v1319_v1 = vmax.f32 %v1854_v56, %v1862_v63 }
 0x227   : > { %v1303_v0 = vpop.f32.mrf.mxu1 }
 0x228   : > { %v1388_v4 = vmax.f32 %v1319_v1, %v1870_v57  ;;  %v1317_v6 = vmax.f32 %v1237_v58, %v1303_v0 }
 0x229   : > { %v1863_v2 = vpop.f32.mrf.mxu1 }
 0x22a   : > { %v1386_v13 = vmax.f32 %v1317_v6, %v1372_v59 }
 0x22b   : > { %v1306_v3 = vpop.f32.mrf.mxu1 }
 0x22c   : > { %v1318_v7 = vmax.f32 %v1240_v62, %v1306_v3 }
 0x22d   : > { %v1878_v5 = vpop.f32.mrf.mxu1 }
 0x22e   : > { %v1457_v8 = vmax.f32 %v1388_v4, %v1878_v5  ;;  %v1387_v14 = vmax.f32 %v1318_v7, %v1375_v11 }
 0x22f   : > { %v1441_v9 = vpop.f32.mrf.mxu1 }
 0x230   : > { %v1664_v10 = vpack.c.bf16 %v1457_v8, %v1457_v8  ;;  %v1455_v16 = vmax.f32 %v1386_v13, %v1441_v9 }
 0x231   : > { %v1879_v12 = vpop.f32.mrf.mxu1 }
 0x232   : > { %1473 = vst [vmem:[%s239_s20 + $0x8] sm:$0x1] %v1664_v10 }
 0x233   : > { %v1444_v15 = vpop.f32.mrf.mxu1 }
 0x234   : > { %v1456_v17 = vmax.f32 %v1387_v14, %v1444_v15 }
 0x236   : > { %v1668_v18 = vpack.c.bf16 %v1456_v17, %v1455_v16 }
 0x238   : > { %1669 = vst [vmem:[%s239_s20] sm:$0xff] %v1668_v18  }
 0x239 PF: > { %s16_s15 = sadd.s32 1, %s2076_s15  }
 0x23a   : > { %p13_p5 = scmp.ge.s32.totalorder %s16_s15, 4  }
 0x23c   :  { %15 = sbr.rel (!%p13_p5) target bundleno = 2 (0x2), region = 90 }
 0x241   :  { %1495 = vsyncpa [#allocation3], 1 }
 0x242   :  { %1497 = vsyncpa [#allocation3 + $0x1], 1 }
 0x243   :  { %1498 = vsyncpa [#allocation5], 1 }

// kernel: custom_cnn_forward.4
= control target key start
LH: loop header
LB: loop body
LE: loop exit
PB: predicated region body
PF: predicated region fallthrough
CT: control target
= control target key end

     0   :  { %9 = vsyncpa [#allocation3], 0  ;;  %s5947_s0 = inlined_call_operand.vmem [shape: bf16[2,124,12], index: 0, kind: input, shape index: {}]   ;;  %s5948_s1 = inlined_call_operand.hbm [shape: bf16[16,12,64], index: 1, kind: input, shape index: {}]   ;;  %s5949_s2 = inlined_call_operand.hbm [shape: f32[1,64], index: 2, kind: input, shape index: {}]   ;;  %s5950_s3 = inlined_call_operand.hbm [shape: bf16[9,38,88], index: 3, kind: input, shape index: {}]   ;;  %s5951_s4 = inlined_call_operand.vmem [shape: bf16[2,38,64], index: 4, kind: output, shape index: {}]  }
   0x1   :  { %10 = vsyncpa [#allocation5], 0  ;;  %s4907_s15 = smov 0  }
   0x2 LB: > { %s4875_s16 = smov [#allocation4]   ;;  %s4913_s18 = sadd.s32 4294967295, %s4873_s15   ;;  %s4873_s15 = sphi %s4907_s15, %s16_s15  }
   0x3   : > { %s162_s17 = sshll.u32 %s4875_s16, 4  ;;  %p3758_p0 = scmp.ge.s32.totalorder %s4873_s15, 1  ;;  %s163_s17 = int_to_ptr.vmem [resolvable:$true] %s162_s17 }
   0x4   : > { %p136_p1 = scmp.lt.s32.totalorder %s4873_s15, 3  ;;  %p5952_p2 = scmp.eq.s32.totalorder %s4913_s18, 0 }
   0x5   : > { %s4876_s20 = smov [#allocation2]   ;;  %s4877_s23 = smov [#allocation6]  }
   0x6   : > { %p4918_p3 = pnand %p3758_p0, %p136_p1  ;;  %s148_s21 = sshll.u32 %s4876_s20, 4  ;;  %s149_s21 = int_to_ptr.vmem [resolvable:$true] %s148_s21 }
   0x7   : > { %s172_s24 = sshll.u32 %s4877_s23, 4  ;;  %s4792_s25 = scalar_lea.vmem %s163_s17, 16  ;;  %s4930_s24 = int_to_ptr.vmem [resolvable:$true] %s172_s24 }
   0x8   : > { %s5954_s19 = scalar_select %p4918_p3, 1, 0 }
   0x9   : > { %p4661_p4 = pneg %p4918_p3  ;;  %p4793_p7 = scmp.ne.s32.totalorder %s163_s17, %s4792_s25 }
   0xa   : > { %s4799_s26 = scalar_lea.vmem %s163_s17, 32  ;;  %p4800_p10 = scmp.lt.s32.totalorder %s163_s17, %s163_s17 }
   0xb   : > { %p4926_p5 = pnand %p5952_p2, %p4661_p4  ;;  %p4801_p11 = scmp.lt.s32.totalorder %s4799_s26, %s4792_s25 }
   0xd   : > { %p4783_p6 = pneg %p4926_p5  ;;  %p4802_p12 = por %p4801_p11, %p4800_p10 }
   0xf   : > { %p4795_p8 = pnand %p4793_p7, %p4783_p6 }
  0x11   : > { %p4796_p9 = pneg %p4795_p8 }
  0x13   : > { %p4803_p13 = pnand %p4802_p12, %p4796_p9 }
  0x15   : > { %4806 = shalt.err (!%p4803_p13)
}
  0x16   : > { %4667 = dma.hbm_to_vmem [thread:$0]  (!%p4926_p5), %s5949_s2, 16, %s163_s17, [#allocation5]  }
  0x17   : > { %s4818_s29 = scalar_lea.vmem %s149_s21, 2048  ;;  %p4826_p7 = scmp.lt.s32.totalorder %s149_s21, %s149_s21 }
  0x18   : > { %p4819_p0 = scmp.ne.s32.totalorder %s149_s21, %s4818_s29  ;;  %p4827_p8 = scmp.lt.s32.totalorder %s4818_s29, %s4818_s29 }
  0x1a   : > { %p4821_p1 = pnand %p4819_p0, %p4783_p6  ;;  %p4828_p2 = por %p4827_p8, %p4826_p7 }
  0x1c   : > { %p4822_p4 = pneg %p4821_p1 }
  0x1e   : > { %p4829_p3 = pnand %p4828_p2, %p4822_p4 }
  0x20   : > { %4832 = shalt.err (!%p4829_p3)
}
  0x21   : > { %s4878_s30 = smov 64   ;;  %s4879_s5 = smov 4  }
  0x22   : > { %4664 = dma.hbm_to_vmem [thread:$0]  (!%p4926_p5), %s5948_s1, 2048, %s149_s21, [#allocation3], %s4878_s30, %s4878_s30, %s4879_s5  }
  0x23   : > { %s4844_s8 = scalar_lea.vmem %s4930_s24, 2880  ;;  %p4852_p2 = scmp.lt.s32.totalorder %s4930_s24, %s4930_s24 }
  0x24   : > { %p4845_p9 = scmp.ne.s32.totalorder %s4930_s24, %s4844_s8  ;;  %p4853_p3 = scmp.lt.s32.totalorder %s4844_s8, %s4844_s8 }
  0x26   : > { %p4847_p10 = pnand %p4845_p9, %p4783_p6  ;;  %p4854_p12 = por %p4853_p3, %p4852_p2 }
  0x28   : > { %p4848_p11 = pneg %p4847_p10 }
  0x2a   : > { %p4855_p13 = pnand %p4854_p12, %p4848_p11 }
  0x2c   : > { %4858 = shalt.err (!%p4855_p13)
}
  0x2d   : > { %4670 = dma.hbm_to_vmem [thread:$0]  (!%p4926_p5), %s5950_s3, 2880, %s4930_s24, [#allocation5], %s4878_s30, %s4878_s30, %s4879_s5  }
  0x2e   : > { %p5956_p0 = scmp.ne.s32.totalorder %s5954_s19, 0 }
  0x2f   : > { %p5957_p1 = scmp.eq.s32.totalorder (!%p5956_p0), %s4913_s18, 0 }
  0x30   : > { %196 = sbr.rel (%p5956_p0) target bundleno = 808 (0x328), region = 36 }
  0x35   : > { %4864 = dma.done.wait (%p5957_p1), [#allocation3], 2048   ;;  %p5958_p6 = pmov %p5957_p1 }
  0x36   : > { %p5959_p4 = pmov %p5957_p1 }
  0x37   : > { %4866 = vsyncadd (%p5958_p6), [#allocation3], 4294965248 }
  0x38   : > { %4868 = dma.done.wait (%p5959_p4), [#allocation5], 2896   ;;  %p5960_p7 = pmov %p5957_p1 }
  0x39   : > { %p230_p8 = scmp.lt.s32.totalorder %s4913_s18, 1  ;;  %vm360_vm0 = vcmask 1045504   ;;  %vm288_vm1 = vsmask.f32 7424  ;;  %v4692_v0 = vld [vmem:[#allocation2 + $0x8] sm:$0x3f]  }
  0x3a   : > { %4870 = vsyncadd (%p5960_p7), [#allocation5], 4294964400  ;;  %4632 = vmatprep.subr.msk.bf16.mxu1 %vm360_vm0, %v4692_v0  ;;  %v362_v1 = vsel %vm360_vm0, %v4692_v0, 0  ;;  %4631 = vmatprep.subr.msk.bf16.mxu0 %vm360_vm0, %v4692_v0  ;;  %v4696_v10 = vld [vmem:[#allocation2] sm:$0x3f]   ;;  %vm341_vm2 = vcmask 97280  }
  0x3b   : > { %s5962_s18 = smov (!%p230_p8, %s4913_s18), 1  ;;  %4630 = vmatpush3.bf16.msra.mxu1 %v362_v1  ;;  %4190 = vmatpush3.bf16.msra.mxu0 %v362_v1  ;;  %v464_v16 = vsel %vm360_vm0, %v4696_v10, 0  ;;  %v4700_v31 = vld [vmem:[#allocation2 + $0x10] sm:$0x3f]   ;;  %v4701_v37 = vld [vmem:[#allocation2 + $0x18] sm:$0x3f]  }
  0x3c   : > { %s3990_s11 = sshll.u32 %s5962_s18, 6  ;;  %4633 = vmatprep.subr.msk.bf16.mxu1 %vm360_vm0, %v4696_v10  ;;  %4634 = vmatprep.subr.msk.bf16.mxu0 %vm360_vm0, %v4700_v31  ;;  %vm553_vm3 = vcmask 1046528   ;;  %v589_v49 = vsel %vm360_vm0, %v4700_v31, 0  ;;  %v4704_v51 = vld [vmem:[#allocation2 + $0x20] sm:$0x3f]   ;;  %v747_v57 = vsel %vm360_vm0, %v4701_v37, 0 }
  0x3d   : > { %s4981_s14 = scalar_lea.vmem %s5947_s0, %s3990_s11  ;;  %v5068_v61 = vld [vmem:[#allocation2 + $0x28] sm:$0x3f]   ;;  %v962_v62 = vsel %vm360_vm0, %v4704_v51, 0  ;;  %v5072_v63 = vld [vmem:[#allocation2 + $0x30] sm:$0x3f]   ;;  %vm1356_vm6 = vcmask 1044480  }
  0x3e   : > { %v4986_v2 = vld [vmem:[%s4981_s14 + $0x10] sm:$0xff]   ;;  %v4989_v3 = vld [vmem:[%s4981_s14 + $0x18] sm:$0xff]   ;;  %v4993_v4 = vld [vmem:[%s4981_s14 + $0x20] sm:$0xff]   ;;  %vm689_vm4 = vsmask.f32 6400  ;;  %vm4881_vm8 = vmmov 0  }
  0x3f   : > { %v305_v5 = vshll.u32 %v4986_v2, 16  ;;  %v309_v6 = vshrl.u32 %v4986_v2, 16  ;;  %v313_v7 = vshll.u32 %v4989_v3, 16  ;;  %v317_v8 = vshrl.u32 %v4989_v3, 16  ;;  %v5005_v13 = vld [vmem:[%s4981_s14 + $0x28] sm:$0xf] }
  0x40   : > { %v321_v9 = vshll.u32 %v4993_v4, 16  ;;  %v325_v14 = vshrl.u32 %v4993_v4, 16  ;;  %v254_v17 = vld [vmem:[%s4981_s14 + $0x2c] sm:$0x1]  ;;  %v241_v22 = vld [vmem:[%s4981_s14] sm:$0xf] }
  0x41   : > { %v307_v11 = vrot.slane %v305_v5, 1  ;;  %v315_v12 = vrot.slane %v313_v7, 1  ;;  %v5014_v18 = vld [vmem:[%s4981_s14 + $0x8] sm:$0xff]   ;;  %v5021_v21 = vcombine.low %v5005_v13, %v254_v17  ;;  %v242_v23 = vld [vmem:[%s4981_s14 + $0x4] sm:$0xf]  ;;  %v557_v52 = vrot.slane %v4986_v2, 1 }
  0x42   : > { %v323_v15 = vrot.slane %v321_v9, 1  ;;  %v3770_v24 = vcombine.low %v241_v22, %v242_v23  ;;  %v297_v25 = vshll.u32 %v5014_v18, 16  ;;  %v301_v26 = vshrl.u32 %v5014_v18, 16  ;;  %v546_v40 = vld [vmem:[%s4981_s14] sm:$0xe]  ;;  %v5066_v60 = vld [vmem:[%s4981_s14 + $0xc] sm:$0xff]  }
  0x43   : > { %v311_v19 = vor.u32 %v309_v6, %v307_v11  ;;  %v319_v20 = vor.u32 %v317_v8, %v315_v12  ;;  %v329_v30 = vshll.u32 %v5021_v21, 16  ;;  %v333_v36 = vshrl.u32 %v5021_v21, 16  ;;  %v840_v54 = vld [vmem:[%s4981_s14 + $0x4] sm:$0xe]  ;;  %v5059_v55 = vld [vmem:[%s4981_s14 + $0x8] sm:$0xf] }
  0x44   : > { %v327_v29 = vor.u32 %v325_v14, %v323_v15  ;;  %v290_v32 = vshrl.u32 %v3770_v24, 16  ;;  %v292_v33 = vshll.u32 %v3770_v24, 16  ;;  %v299_v34 = vrot.slane %v297_v25, 1  ;;  %v5093_v22 = vld [vmem:[%s4981_s14 + $0x1c] sm:$0xff]   ;;  %s4648_s16 = smul.u32 20, %s5962_s18 }
  0x45   : > { %v316_v27 = vsel %vm288_vm1, %v311_v19, %v315_v12  ;;  %v324_v28 = vsel %vm288_vm1, %v319_v20, %v323_v15  ;;  %v331_v35 = vrot.slane %v329_v30, 1  ;;  %v3791_v42 = vcombine.low %v546_v40, %v242_v23 }
  0x46   : > { %4195 = vmatprep.mubr.msk.bf16.mxu1 %vm341_vm2, %v316_v27  ;;  %v294_v38 = vrot.slane %v292_v33, 1  ;;  %v303_v39 = vor.u32 %v301_v26, %v299_v34  ;;  %v555_v43 = vrot.slane %v5014_v18, 1  ;;  %v559_v53 = vrot.slane %v4989_v3, 1  ;;  %s5929_s20 = scalar_lea.vmem %s5951_s4, %s4648_s16 }
  0x47   : > { %4196 = vmatmul.mubr.msk.bf16.vlgmr.msra.gmra.mxu1 %vm341_vm2, %v324_v28  ;;  %v332_v41 = vsel %vm288_vm1, %v327_v29, %v331_v35  ;;  %v335_v45 = vor.u32 %v333_v36, %v331_v35  ;;  %v554_v47 = vrot.slane %v3791_v42, 1  ;;  %v3807_v59 = vcombine.low %v840_v54, %v5059_v55 }
  0x48   : > { %4204 = vmatpush3.bf16.msra.mxu1 %v464_v16  ;;  %4199 = vmatprep.mubr.msk.bf16.mxu1 %vm341_vm2, %v332_v41  ;;  %v295_v44 = vor.u32 %v294_v38, %v290_v32  ;;  %v308_v46 = vsel %vm288_vm1, %v303_v39, %v307_v11  ;;  %v558_v56 = vsel %vm553_vm3, %v555_v43, %v557_v52  ;;  %v561_v0 = vrot.slane %v4993_v4, 1  ;;  %v5114_v38 = vld [vmem:[%s4981_s14 + $0x2c] sm:$0xf]  ;;  %v851_v39 = vld [vmem:[%s4981_s14 + $0x30] sm:$0x3]  ;;  %v5120_v41 = vld [vmem:[%s4981_s14 + $0x24] sm:$0xff]  }
  0x49   : > { %4635 = vmatprep.subr.msk.bf16.mxu1 %vm360_vm0, %v4701_v37  ;;  %v556_v50 = vsel %vm553_vm3, %v554_v47, %v555_v43  ;;  %v560_v58 = vsel %vm553_vm3, %v557_v52, %v559_v53  ;;  %v563_v1 = vrot.slane %v5021_v21, 1  ;;  %v886_v10 = vshrl.u32 %v3807_v59, 16  ;;  %v5090_v21 = vld [vmem:[%s4981_s14 + $0x14] sm:$0xff]  }
  0x4a   : > { %v300_v48 = vsel %vm288_vm1, %v295_v44, %v299_v34  ;;  %v889_v11 = vshll.u32 %v3807_v59, 16  ;;  %v894_v12 = vshrl.u32 %v5066_v60, 16  ;;  %v897_v15 = vshll.u32 %v5066_v60, 16 }
  0x4b   : > { %4191 = vmatprep.mubr.msk.bf16.mxu0 %vm341_vm2, %v300_v48  ;;  %v691_v16 = vshrl.u32 %v3791_v42, 16  ;;  %v694_v17 = vshll.u32 %v3791_v42, 16  ;;  %v562_v19 = vsel %vm553_vm3, %v559_v53, %v561_v0  ;;  %v564_v20 = vsel %vm553_vm3, %v561_v0, %v563_v1  ;;  %v682_v42 = vld [vmem:[%s4981_s14 + $0x2c] sm:$0x3] }
  0x4c   : > { %4192 = vmatmul.mubr.msk.bf16.vlgmr.msra.gmra.mxu0 %vm341_vm2, %v308_v46  ;;  %v888_v23 = vrot.slane %v886_v10, 1  ;;  %v896_v27 = vrot.slane %v894_v12, 1  ;;  %v899_v28 = vrot.slane %v897_v15, 2  ;;  %v699_v29 = vrot.slane %v297_v25, 2 }
  0x4d   : > { %4218 = vmatpush3.bf16.msra.mxu0 %v589_v49  ;;  %4219 = vmatprep.mubr.msk.bf16.mxu0 %vm341_vm2, %v556_v50  ;;  %v693_v30 = vrot.slane %v691_v16, 1  ;;  %v696_v31 = vrot.slane %v694_v17, 2  ;;  %v698_v32 = vrot.slane %v301_v26, 1  ;;  %v903_v33 = vshrl.u32 %v5090_v21, 16  ;;  %v5166_v17 = vld [vmem:[#allocation2 + $0x38] sm:$0x3f]  }
  0x4e   : > { %4636 = vmatprep.subr.msk.bf16.mxu0 %vm360_vm0, %v4704_v51  ;;  %v906_v25 = vshll.u32 %v5090_v21, 16  ;;  %v900_v35 = vor.u32 %v899_v28, %v896_v27  ;;  %v915_v26 = vshll.u32 %v5093_v22, 16  ;;  %v702_v40 = vrot.slane %v309_v6, 1  ;;  %v4717_v28 = vld [vmem:[#allocation2 + $0x40] sm:$0x3f]  }
  0x4f   : > { %4200 = vmatmul.mubr.msk.bf16.gmra.mxu1 %vm341_vm2, %v335_v45  ;;  %v697_v36 = vor.u32 %v696_v31, %v693_v30  ;;  %v700_v37 = vor.u32 %v699_v29, %v698_v32  ;;  %v703_v43 = vrot.slane %v305_v5, 2  ;;  %v3783_v44 = vcombine.low %v5005_v13, %v5005_v13 }
  0x50   : > { %4205 = vmatprep.mubr.msk.bf16.mxu1 %vm341_vm2, %v3770_v24  ;;  %v891_v24 = vrot.slane %v889_v11, 2  ;;  %v905_v45 = vrot.slane %v903_v33, 1  ;;  %v908_v46 = vrot.slane %v906_v25, 2  ;;  %v917_v48 = vrot.slane %v915_v26, 2 }
  0x51   : > { %v707_v5 = vrot.slane %v313_v7, 2  ;;  %v701_v49 = vsel %vm689_vm4, %v697_v36, %v700_v37  ;;  %v706_v50 = vrot.slane %v317_v8, 1  ;;  %v3799_v51 = vcombine.low %v5005_v13, %v682_v42 }
  0x52   : > { %v892_v34 = vor.u32 %v891_v24, %v888_v23  ;;  %v921_v52 = vshrl.u32 %v5120_v41, 16  ;;  %v924_v53 = vshll.u32 %v5120_v41, 16  ;;  %v704_v54 = vor.u32 %v703_v43, %v702_v40 }
  0x53   : > { %v909_v7 = vor.u32 %v908_v46, %v905_v45  ;;  %v715_v59 = vshrl.u32 %v3799_v51, 16  ;;  %v710_v0 = vrot.slane %v325_v14, 1  ;;  %v1256_v27 = vsel %vm360_vm0, %v5072_v63, 0 }
  0x54   : > { %4220 = vmatmul.mubr.msk.bf16.vlgmr.msra.gmra.mxu0 %vm341_vm2, %v558_v56  ;;  %v901_v47 = vsel %vm689_vm4, %v892_v34, %v900_v35  ;;  %v923_v10 = vrot.slane %v921_v52, 1  ;;  %v1208_v43 = vrot.slane %v897_v15, 3  ;;  %vm1198_vm5 = vsmask.f32 5376 }
  0x55   : > { %4223 = vmatprep.mubr.msk.bf16.mxu0 %vm341_vm2, %v560_v58  ;;  %4246 = vmatpush3.bf16.msra.mxu0 %v962_v62  ;;  %v708_v58 = vor.u32 %v707_v5, %v706_v50  ;;  %v718_v62 = vshll.u32 %v3799_v51, 16  ;;  %v910_v11 = vsel %vm689_vm4, %v900_v35, %v909_v7  ;;  %v1211_v15 = vrot.slane %v903_v33, 2 }
  0x56   : > { %4638 = vmatprep.subr.msk.bf16.mxu0 %vm360_vm0, %v5072_v63  ;;  %v1216_v50 = vrot.slane %v915_v26, 3  ;;  %v1066_v33 = vrot.slane %v5090_v21, 2  ;;  %vm1665_vm7 = vsmask.f32 4352  ;;  %vm2870_vm9 = vcmask 1043456  }
  0x57   : > { %4206 = vmatmul.mubr.msk.bf16.vlgmr.msra.gmra.mxu1 %vm341_vm2, %v5014_v18  ;;  %v912_v18 = vshrl.u32 %v5093_v22, 16  ;;  %v720_v24 = vrot.slane %v718_v62, 2  ;;  %v5222_v62 = vld [vmem:[#allocation2 + $0x48] sm:$0x3f]   ;;  %vm2860_vm10 = vcmask 719872   ;;  %vm3663_vm11 = vcmask 519168  }
  0x58   : > { %4232 = vmatpush3.bf16.msra.mxu1 %v747_v57  ;;  %4209 = vmatprep.mubr.msk.bf16.mxu1 %vm341_vm2, %v4986_v2  ;;  %v5137_v2 = vcombine.low %v5114_v38, %v851_v39  ;;  %v1055_v57 = vld [vmem:[%s4981_s14 + $0x4] sm:$0xc]  ;;  %vm3668_vm12 = vcmask 518144  }
  0x59   : > { %4637 = vmatprep.subr.msk.bf16.mxu1 %vm360_vm0, %v5068_v61  ;;  %v914_v6 = vrot.slane %v912_v18, 1  ;;  %v3820_v16 = vcombine.low %v1055_v57, %v5059_v55 }
  0x5a   : > { %v930_v13 = vshrl.u32 %v5137_v2, 16  ;;  %v933_v56 = vshll.u32 %v5137_v2, 16 }
  0x5b   : > { %v918_v8 = vor.u32 %v917_v48, %v914_v6  ;;  %v1200_v30 = vshrl.u32 %v3820_v16, 16  ;;  %v1203_v34 = vshll.u32 %v3820_v16, 16  ;;  %v1063_v46 = vrot.slane %v3820_v16, 2  ;;  %v1191_v6 = vld [vmem:[%s4981_s14 + $0x30] sm:$0x7] }
  0x5c   : > { %4224 = vmatmul.mubr.msk.bf16.gmra.mxu0 %vm341_vm2, %v562_v19  ;;  %v705_v19 = vsel %vm689_vm4, %v700_v37, %v704_v54  ;;  %v932_v14 = vrot.slane %v930_v13, 1  ;;  %v935_v23 = vrot.slane %v933_v56, 2  ;;  %v1207_v37 = vrot.slane %v894_v12, 2  ;;  %v5234_v16 = vld [vmem:[%s4981_s14 + $0xc] sm:$0xf] }
  0x5d   : > { %4227 = vmatprep.mubr.msk.bf16.mxu0 %vm341_vm2, %v564_v20  ;;  %v919_v20 = vsel %vm689_vm4, %v909_v7, %v918_v8  ;;  %v1202_v36 = vrot.slane %v1200_v30, 2  ;;  %v1205_v42 = vrot.slane %v1203_v34, 3  ;;  %v1212_v48 = vrot.slane %v906_v25, 3  ;;  %v5268_v34 = vld [vmem:[%s4981_s14 + $0x24] sm:$0xf] }
  0x5e   : > { %v936_v32 = vor.u32 %v935_v23, %v932_v14  ;;  %v1209_v45 = vor.u32 %v1208_v43, %v1207_v37  ;;  %v5204_v51 = vcombine.low %v5114_v38, %v1191_v6  ;;  %v1068_v38 = vrot.slane %v5093_v22, 2  ;;  %v1349_v23 = vld [vmem:[%s4981_s14 + $0x4] sm:$0x8] }
  0x5f   : > { %4210 = vmatmul.mubr.msk.bf16.gmra.mxu1 %vm341_vm2, %v4989_v3  ;;  %v1098_v3 = vsel %vm360_vm0, %v5068_v61, 0  ;;  %v926_v61 = vrot.slane %v924_v53, 2  ;;  %v1206_v12 = vor.u32 %v1205_v42, %v1202_v36  ;;  %v1213_v25 = vor.u32 %v1212_v48, %v1211_v15 }
  0x60   : > { %4213 = vmatprep.mubr.msk.bf16.mxu1 %vm341_vm2, %v4993_v4  ;;  %v709_v4 = vsel %vm689_vm4, %v704_v54, %v708_v58  ;;  %v1224_v7 = vshrl.u32 %v5204_v51, 16  ;;  %v1227_v26 = vshll.u32 %v5204_v51, 16  ;;  %v1220_v13 = vrot.slane %v924_v53, 3  ;;  %v4727_v53 = vld [vmem:[#allocation2 + $0x50] sm:$0x3f]  }
  0x61   : > { %v927_v29 = vor.u32 %v926_v61, %v923_v10  ;;  %v1210_v5 = vsel %vm1198_vm5, %v1206_v12, %v1209_v45  ;;  %v1070_v10 = vrot.slane %v5120_v41, 2  ;;  %v1072_v14 = vrot.slane %v5137_v2, 2 }
  0x63   : > { %v928_v63 = vsel %vm689_vm4, %v918_v8, %v927_v29  ;;  %v937_v40 = vsel %vm689_vm4, %v927_v29, %v936_v32  ;;  %v1219_v8 = vrot.slane %v921_v52, 2  ;;  %v1069_v52 = vsel %vm360_vm0, %v1066_v33, %v1068_v38 }
  0x64   : > { %4228 = vmatmul.mubr.msk.bf16.gmra.mxu0 %vm341_vm2, %v563_v1  ;;  %v711_v1 = vrot.slane %v321_v9, 2  ;;  %v717_v9 = vrot.slane %v715_v59, 1  ;;  %v1229_v59 = vrot.slane %v1227_v26, 3  ;;  %v1073_v30 = vsel %vm360_vm0, %v1070_v10, %v1072_v14 }
  0x65   : > { %4247 = vmatprep.mubr.msk.bf16.mxu0 %vm341_vm2, %v901_v47  ;;  %v1064_v47 = vrot.slane %v5066_v60, 2  ;;  %v1221_v61 = vor.u32 %v1220_v13, %v1219_v8  ;;  %v1366_v26 = vrot.slane %v5204_v51, 3 }
  0x66   : > { %v712_v31 = vor.u32 %v711_v1, %v710_v0  ;;  %v721_v35 = vor.u32 %v720_v24, %v717_v9  ;;  %v1392_v0 = vsel %vm360_vm0, %v5166_v17, 0  ;;  %v1565_v1 = vsel %vm360_vm0, %v4717_v28, 0 }
  0x67   : > { %4214 = vmatmul.mubr.msk.bf16.gmra.mxu1 %vm341_vm2, %v3783_v44  ;;  %v1065_v54 = vsel %vm360_vm0, %v1063_v46, %v1064_v47  ;;  %v1067_v56 = vsel %vm360_vm0, %v1064_v47, %v1066_v33  ;;  %v1071_v9 = vsel %vm360_vm0, %v1068_v38, %v1070_v10  ;;  %v5292_v46 = vld [vmem:[%s4981_s14 + $0x28] sm:$0xf]  ;;  %v5295_v47 = vld [vmem:[%s4981_s14 + $0x2c] sm:$0xf]  ;;  %v1869_v33 = vsel %vm360_vm0, %v4727_v53, 0 }
  0x68   : > { %4233 = vmatprep.mubr.msk.bf16.mxu1 %vm341_vm2, %v701_v49  ;;  %v713_v39 = vsel %vm689_vm4, %v708_v58, %v712_v31  ;;  %v722_v44 = vsel %vm689_vm4, %v712_v31, %v721_v35  ;;  %v1215_v49 = vrot.slane %v912_v18, 2  ;;  %v1226_v58 = vrot.slane %v1224_v7, 2 }
  0x69   : > { %v3836_v31 = vcombine.low %v1349_v23, %v5059_v55  ;;  %v5307_v6 = vcombine.low %v5292_v46, %v5295_v47  ;;  %v1364_v7 = vrot.slane %v5120_v41, 3 }
  0x6a   : > { %v1217_v18 = vor.u32 %v1216_v50, %v1215_v49  ;;  %v1743_v49 = vsel %vm360_vm0, %v5222_v62, 0 }
  0x6b   : > { %v1357_v37 = vrot.slane %v3836_v31, 3  ;;  %v1367_v51 = vsel %vm1356_vm6, %v1364_v7, %v1366_v26  ;;  %v1705_v31 = vshll.u32 %v5307_v6, 16 }
  0x6c   : > { %4248 = vmatmul.mubr.msk.bf16.vlgmr.msra.gmra.mxu0 %vm341_vm2, %v910_v11  ;;  %v1218_v57 = vsel %vm1198_vm5, %v1213_v25, %v1217_v18  ;;  %v1485_v11 = vld [vmem:[%s4981_s14 + $0x8] sm:$0x8] }
  0x6d   : > { %4251 = vmatprep.mubr.msk.bf16.mxu0 %vm341_vm2, %v919_v20  ;;  %4274 = vmatpush3.bf16.msra.mxu0 %v1256_v27  ;;  %v5241_v20 = vld [vmem:[%s4981_s14 + $0x14] sm:$0xf]  ;;  %v5252_v27 = vld [vmem:[%s4981_s14 + $0x18] sm:$0xf]  ;;  %v3844_v29 = vcombine.low %v1485_v11, %v5234_v16 }
  0x6e   : > { %4640 = vmatprep.subr.msk.bf16.mxu0 %vm360_vm0, %v4717_v28  ;;  %v5255_v28 = vld [vmem:[%s4981_s14 + $0x1c] sm:$0xf] }
  0x6f   : > { %4234 = vmatmul.mubr.msk.bf16.vlgmr.msra.gmra.mxu1 %vm341_vm2, %v705_v19  ;;  %v1230_v19 = vor.u32 %v1229_v59, %v1226_v58  ;;  %v1670_v8 = vshll.u32 %v3844_v29, 16 }
  0x70   : > { %4260 = vmatpush3.bf16.msra.mxu1 %v1098_v3  ;;  %4237 = vmatprep.mubr.msk.bf16.mxu1 %vm341_vm2, %v709_v4  ;;  %v1214_v3 = vsel %vm1198_vm5, %v1209_v45, %v1213_v25  ;;  %v1222_v4 = vsel %vm1198_vm5, %v1217_v18, %v1221_v61  ;;  %v5319_v25 = vld [vmem:[#allocation2 + $0x60] sm:$0x3f]   ;;  %v1537_v18 = vrot.slane %v5307_v6, 3 }
  0x71   : > { %4639 = vmatprep.subr.msk.bf16.mxu1 %vm360_vm0, %v5166_v17  ;;  %v5237_v17 = vld [vmem:[%s4981_s14 + $0x10] sm:$0xf]  ;;  %v1231_v24 = vsel %vm1198_vm5, %v1221_v61, %v1230_v19 }
  0x72   : > { %v5260_v2 = vcombine.low %v5237_v17, %v5241_v20  ;;  %v3865_v23 = vcombine.low %v5234_v16, %v5237_v17  ;;  %v1702_v17 = vshrl.u32 %v5307_v6, 16 }
  0x74   : > { %4252 = vmatmul.mubr.msk.bf16.gmra.mxu0 %vm341_vm2, %v928_v63  ;;  %v1530_v63 = vrot.slane %v3844_v29, 3  ;;  %v1531_v55 = vrot.slane %v5260_v2, 3  ;;  %v1675_v13 = vshrl.u32 %v5260_v2, 16 }
  0x75   : > { %4255 = vmatprep.mubr.msk.bf16.mxu0 %vm341_vm2, %v937_v40  ;;  %v1360_v40 = vrot.slane %v5090_v21, 3  ;;  %v1496_v21 = vld [vmem:[%s4981_s14 + $0x34] sm:$0x7] }
  0x76   : > { %v1532_v42 = vsel %vm1356_vm6, %v1530_v63, %v1531_v55 }
  0x77   : > { %4238 = vmatmul.mubr.msk.bf16.gmra.mxu1 %vm341_vm2, %v713_v39  ;;  %v1358_v39 = vrot.slane %v5066_v60, 3  ;;  %v5300_v60 = vld [vmem:[%s4981_s14 + $0x30] sm:$0xf] }
  0x78   : > { %4241 = vmatprep.mubr.msk.bf16.mxu1 %vm341_vm2, %v722_v44  ;;  %v1362_v44 = vrot.slane %v5093_v22, 3 }
  0x79   : > { %v1359_v45 = vsel %vm1356_vm6, %v1357_v37, %v1358_v39  ;;  %v1361_v15 = vsel %vm1356_vm6, %v1358_v39, %v1360_v40  ;;  %v5361_v37 = vld [vmem:[%s4981_s14 + $0x14] sm:$0xf]  ;;  %v3866_v39 = vcombine.low %v5241_v20, %v5252_v27  ;;  %v5373_v20 = vld [vmem:[#allocation2 + $0x68] sm:$0x3f]  }
  0x7a   : > { %v1363_v50 = vsel %vm1356_vm6, %v1360_v40, %v1362_v44  ;;  %v1365_v41 = vsel %vm1356_vm6, %v1362_v44, %v1364_v7  ;;  %v1707_v44 = vrot.slane %v1705_v31, 4 }
  0x7c   : > { %4256 = vmatmul.mubr.msk.bf16.gmra.mxu0 %vm341_vm2, %v936_v32  ;;  %v5265_v32 = vld [vmem:[%s4981_s14 + $0x20] sm:$0xf] }
  0x7d   : > { %4275 = vmatprep.mubr.msk.bf16.mxu0 %vm341_vm2, %v1210_v5  ;;  %v5281_v36 = vcombine.low %v5265_v32, %v5268_v34  ;;  %v3849_v5 = vcombine.low %v5300_v60, %v1496_v21  ;;  %v3867_v40 = vcombine.low %v5255_v28, %v5265_v32 }
  0x7f   : > { %4242 = vmatmul.mubr.msk.bf16.gmra.mxu1 %vm341_vm2, %v721_v35  ;;  %v5276_v35 = vcombine.low %v5252_v27, %v5255_v28  ;;  %v1535_v12 = vrot.slane %v5281_v36, 3  ;;  %v1539_v38 = vrot.slane %v3849_v5, 3  ;;  %v1693_v11 = vshrl.u32 %v5281_v36, 16  ;;  %v5378_v28 = vld [vmem:[#allocation2 + $0x70] sm:$0x3f]  }
  0x80   : > { %4261 = vmatprep.mubr.msk.bf16.mxu1 %vm341_vm2, %v1065_v54  ;;  %v5315_v54 = vld [vmem:[#allocation2 + $0x58] sm:$0x3f]   ;;  %v2287_v27 = vsel %vm360_vm0, %v5319_v25, 0 }
  0x81   : > { %v1533_v43 = vrot.slane %v5276_v35, 3  ;;  %v1540_v58 = vsel %vm1356_vm6, %v1537_v18, %v1539_v38 }
  0x83   : > { %v1534_v22 = vsel %vm1356_vm6, %v1531_v55, %v1533_v43  ;;  %v1536_v48 = vsel %vm1356_vm6, %v1533_v43, %v1535_v12  ;;  %v1704_v43 = vrot.slane %v1702_v17, 3 }
  0x84   : > { %4276 = vmatmul.mubr.msk.bf16.vlgmr.msra.gmra.mxu0 %vm341_vm2, %v1214_v3  ;;  %v1667_v3 = vshrl.u32 %v3844_v29, 16  ;;  %v1695_v29 = vrot.slane %v1693_v11, 3 }
  0x85   : > { %4279 = vmatprep.mubr.msk.bf16.mxu0 %vm341_vm2, %v1218_v57  ;;  %4302 = vmatpush3.bf16.msra.mxu0 %v1565_v1  ;;  %v1538_v57 = vsel %vm1356_vm6, %v1535_v12, %v1537_v18  ;;  %v1684_v1 = vshrl.u32 %v5276_v35, 16  ;;  %v1708_v32 = vor.u32 %v1707_v44, %v1704_v43 }
  0x86   : > { %4642 = vmatprep.subr.msk.bf16.mxu0 %vm360_vm0, %v4727_v53  ;;  %v1669_v59 = vrot.slane %v1667_v3, 3  ;;  %v1687_v53 = vshll.u32 %v5276_v35, 16 }
  0x87   : > { %4262 = vmatmul.mubr.msk.bf16.vlgmr.msra.gmra.mxu1 %vm341_vm2, %v1067_v56  ;;  %v1678_v56 = vshll.u32 %v5260_v2, 16 }
  0x88   : > { %4288 = vmatpush3.bf16.msra.mxu1 %v1392_v0  ;;  %4265 = vmatprep.mubr.msk.bf16.mxu1 %vm341_vm2, %v1069_v52  ;;  %v1677_v0 = vrot.slane %v1675_v13, 3 }
  0x89   : > { %4641 = vmatprep.subr.msk.bf16.mxu1 %vm360_vm0, %v5222_v62  ;;  %v1672_v62 = vrot.slane %v1670_v8, 4  ;;  %v1680_v52 = vrot.slane %v1678_v56, 4 }
  0x8b   : > { %v1673_v10 = vor.u32 %v1672_v62, %v1669_v59  ;;  %v1681_v61 = vor.u32 %v1680_v52, %v1677_v0 }
  0x8c   : > { %4280 = vmatmul.mubr.msk.bf16.gmra.mxu0 %vm341_vm2, %v1222_v4  ;;  %v1686_v4 = vrot.slane %v1684_v1, 3 }
  0x8d   : > { %4283 = vmatprep.mubr.msk.bf16.mxu0 %vm341_vm2, %v1231_v24  ;;  %v1682_v24 = vsel %vm1665_vm7, %v1673_v10, %v1681_v61 }
  0x8f   : > { %4266 = vmatmul.mubr.msk.bf16.gmra.mxu1 %vm341_vm2, %v1071_v9  ;;  %v1689_v9 = vrot.slane %v1687_v53, 4 }
  0x90   : > { %4269 = vmatprep.mubr.msk.bf16.mxu1 %vm341_vm2, %v1073_v30 }
  0x91   : > { %v1690_v16 = vor.u32 %v1689_v9, %v1686_v4  ;;  %v5421_v4 = vld [vmem:[%s4981_s14 + $0x38] sm:$0xf] }
  0x94   : > { %4284 = vmatmul.mubr.msk.bf16.gmra.mxu0 %vm341_vm2, %v1230_v19  ;;  %v1696_v19 = vshll.u32 %v5281_v36, 16  ;;  %v2171_v36 = vld [vmem:[%s4981_s14 + $0x10] sm:$0xf] }
  0x95   : > { %4303 = vmatprep.mubr.msk.bf16.mxu0 %vm341_vm2, %v1532_v42  ;;  %v1691_v42 = vsel %vm1665_vm7, %v1681_v61, %v1690_v16  ;;  %v3891_v12 = vcombine.low %v2171_v36, %v5361_v37  ;;  %v4747_v36 = vld [vmem:[%s4981_s14 + $0x34] sm:$0x1f]  }
  0x96   : > { %v1698_v2 = vrot.slane %v1696_v19, 4 }
  0x97   : > { %4270 = vmatmul.mubr.msk.bf16.gmra.mxu1 %vm341_vm2, %v1072_v14  ;;  %v5346_v14 = vld [vmem:[%s4981_s14 + $0x34] sm:$0xf]  ;;  %v2219_v5 = vshll.u32 %v3891_v12, 16  ;;  %v2217_v7 = vshrl.u32 %v3891_v12, 16 }
  0x98   : > { %4289 = vmatprep.mubr.msk.bf16.mxu1 %vm341_vm2, %v1359_v45  ;;  %v3857_v30 = vcombine.low %v5300_v60, %v5346_v14  ;;  %v1699_v35 = vor.u32 %v1698_v2, %v1695_v29  ;;  %v2078_v45 = vsel %vm360_vm0, %v5315_v54, 0  ;;  %v3870_v59 = vcombine.low %v5346_v14, %v5346_v14  ;;  %v2182_v14 = vld [vmem:[%s4981_s14 + $0x3c] sm:$0x1]  ;;  %v5428_v2 = vld [vmem:[%s4981_s14 + $0x30] sm:$0xff]  }
  0x9a   : > { %v1711_v63 = vshrl.u32 %v3857_v30, 16  ;;  %v1714_v55 = vshll.u32 %v3857_v30, 16  ;;  %v1700_v21 = vsel %vm1665_vm7, %v1690_v16, %v1699_v35  ;;  %v1709_v18 = vsel %vm1665_vm7, %v1699_v35, %v1708_v32  ;;  %v4744_v16 = vld [vmem:[%s4981_s14 + $0x2c] sm:$0xff]  }
  0x9b   : > { %v5439_v35 = vcombine.low %v5421_v4, %v2182_v14  ;;  %v2039_v12 = vshll.u32 %v4744_v16, 16 }
  0x9c   : > { %4304 = vmatmul.mubr.msk.bf16.vlgmr.msra.gmra.mxu0 %vm341_vm2, %v1534_v22  ;;  %v1713_v22 = vrot.slane %v1711_v63, 3  ;;  %v1716_v6 = vrot.slane %v1714_v55, 4 }
  0x9d   : > { %4307 = vmatprep.mubr.msk.bf16.mxu0 %vm341_vm2, %v1536_v48  ;;  %4330 = vmatpush3.bf16.msra.mxu0 %v1869_v33  ;;  %v5384_v48 = vld [vmem:[%s4981_s14 + $0x18] sm:$0xff]   ;;  %v3868_v33 = vcombine.low %v5268_v34, %v5292_v46  ;;  %v5401_v46 = vld [vmem:[%s4981_s14 + $0x20] sm:$0xff]  }
  0x9e   : > { %4644 = vmatprep.subr.msk.bf16.mxu0 %vm360_vm0, %v5319_v25  ;;  %v3869_v25 = vcombine.low %v5295_v47, %v5300_v60  ;;  %v4738_v34 = vld [vmem:[%s4981_s14 + $0x1c] sm:$0xff]   ;;  %v2232_v52 = vshll.u32 %v5401_v46, 16  ;;  %v2228_v1 = vshrl.u32 %v5384_v48, 16  ;;  %v2236_v10 = vshrl.u32 %v5401_v46, 16 }
  0x9f   : > { %4290 = vmatmul.mubr.msk.bf16.vlgmr.msra.gmra.mxu1 %vm341_vm2, %v1361_v15  ;;  %v4736_v15 = vld [vmem:[%s4981_s14 + $0xc] sm:$0xff]   ;;  %v2023_v0 = vshll.u32 %v4738_v34, 16  ;;  %v2027_v19 = vshrl.u32 %v4738_v34, 16 }
  0xa0   : > { %4316 = vmatpush3.bf16.msra.mxu1 %v1743_v49  ;;  %4293 = vmatprep.mubr.msk.bf16.mxu1 %vm341_vm2, %v1363_v50  ;;  %v1717_v49 = vor.u32 %v1716_v6, %v1713_v22  ;;  %v4737_v50 = vld [vmem:[%s4981_s14 + $0x14] sm:$0xff]   ;;  %v2008_v8 = vshrl.u32 %v4736_v15, 16  ;;  %v2234_v29 = vrot.slane %v2232_v52, 1  ;;  %v2252_v22 = vshrl.u32 %v5428_v2, 16 }
  0xa1   : > { %4643 = vmatprep.subr.msk.bf16.mxu1 %vm360_vm0, %v5315_v54  ;;  %v2010_v54 = vshll.u32 %v4736_v15, 16  ;;  %v2015_v56 = vshll.u32 %v4737_v50, 16  ;;  %v2019_v62 = vshrl.u32 %v4737_v50, 16  ;;  %v2256_v6 = vshll.u32 %v5439_v35, 16  ;;  %v5454_v50 = vld [vmem:[#allocation2 + $0x78] sm:$0x3f]  }
  0xa2   : > { %v1718_v3 = vsel %vm1665_vm7, %v1708_v32, %v1717_v49  ;;  %v2238_v17 = vor.u32 %v2236_v10, %v2234_v29  ;;  %v2534_v14 = vrot.slane %v2236_v10, 1 }
  0xa3   : > { %v2012_v13 = vrot.slane %v2010_v54, 1 }
  0xa4   : > { %4308 = vmatmul.mubr.msk.bf16.gmra.mxu0 %vm341_vm2, %v1538_v57  ;;  %v5409_v57 = vld [vmem:[%s4981_s14 + $0x28] sm:$0xff]  }
  0xa5   : > { %4311 = vmatprep.mubr.msk.bf16.mxu0 %vm341_vm2, %v1540_v58  ;;  %v4743_v58 = vld [vmem:[%s4981_s14 + $0x24] sm:$0xff]   ;;  %v2240_v61 = vshll.u32 %v5409_v57, 16 }
  0xa6   : > { %v2035_v44 = vshrl.u32 %v4743_v58, 16 }
  0xa7   : > { %4294 = vmatmul.mubr.msk.bf16.gmra.mxu1 %vm341_vm2, %v1365_v41  ;;  %v2013_v41 = vor.u32 %v2012_v13, %v2008_v8  ;;  %v2242_v31 = vrot.slane %v2240_v61, 1 }
  0xa8   : > { %4297 = vmatprep.mubr.msk.bf16.mxu1 %vm341_vm2, %v1367_v51  ;;  %v2017_v51 = vrot.slane %v2015_v56, 1 }
  0xaa   : > { %v2018_v11 = vsel %vm288_vm1, %v2013_v41, %v2017_v51  ;;  %v2021_v9 = vor.u32 %v2019_v62, %v2017_v51  ;;  %v2260_v62 = vshrl.u32 %v5439_v35, 16 }
  0xac   : > { %4312 = vmatmul.mubr.msk.bf16.gmra.mxu0 %vm341_vm2, %v1539_v38  ;;  %v2224_v38 = vshll.u32 %v5384_v48, 16 }
  0xad   : > { %4331 = vmatprep.mubr.msk.bf16.mxu0 %vm341_vm2, %v3865_v23  ;;  %v2031_v23 = vshll.u32 %v4743_v58, 16 }
  0xae   : > { %v2226_v60 = vrot.slane %v2224_v38, 1  ;;  %v2531_v58 = vrot.slane %v2224_v38, 2 }
  0xaf   : > { %4298 = vmatmul.mubr.msk.bf16.gmra.mxu1 %vm341_vm2, %v1366_v26  ;;  %v2221_v26 = vrot.slane %v2219_v5, 1  ;;  %v2033_v55 = vrot.slane %v2031_v23, 1  ;;  %v2043_v5 = vshrl.u32 %v4744_v16, 16  ;;  %v2515_v23 = vld [vmem:[%s4981_s14 + $0x3c] sm:$0x3]  ;;  %v2539_v16 = vrot.slane %v2240_v61, 2 }
  0xb0   : > { %4317 = vmatprep.mubr.msk.bf16.mxu1 %vm341_vm2, %v1682_v24  ;;  %v2025_v24 = vrot.slane %v2023_v0, 1  ;;  %v2230_v30 = vor.u32 %v2228_v1, %v2226_v60  ;;  %v2051_v0 = vshrl.u32 %v4747_v36, 16 }
  0xb1   : > { %v2222_v47 = vor.u32 %v2221_v26, %v2217_v7  ;;  %v2258_v26 = vrot.slane %v2256_v6, 1 }
  0xb2   : > { %v2029_v63 = vor.u32 %v2027_v19, %v2025_v24  ;;  %v2235_v43 = vsel %vm288_vm1, %v2230_v30, %v2234_v29  ;;  %v2388_v19 = vrot.slane %v5384_v48, 1 }
  0xb3   : > { %v2227_v53 = vsel %vm288_vm1, %v2222_v47, %v2226_v60  ;;  %v2530_v47 = vrot.slane %v2228_v1, 1  ;;  %v2262_v38 = vor.u32 %v2260_v62, %v2258_v26 }
  0xb4   : > { %4332 = vmatmul.mubr.msk.bf16.vlgmr.msra.gmra.mxu0 %vm341_vm2, %v3866_v39  ;;  %v2380_v39 = vld [vmem:[%s4981_s14 + $0x10] sm:$0xe]  ;;  %v2034_v32 = vsel %vm288_vm1, %v2029_v63, %v2033_v55 }
  0xb5   : > { %4335 = vmatprep.mubr.msk.bf16.mxu0 %vm341_vm2, %v3867_v40  ;;  %4358 = vmatpush3.bf16.msra.mxu0 %v2287_v27  ;;  %v2026_v40 = vsel %vm288_vm1, %v2021_v9, %v2025_v24  ;;  %v3904_v15 = vcombine.low %v2380_v39, %v5361_v37  ;;  %v2422_v27 = vsel %vm360_vm0, %v5373_v20, 0  ;;  %v2535_v24 = vrot.slane %v2232_v52, 2 }
  0xb6   : > { %4646 = vmatprep.subr.msk.bf16.mxu0 %vm360_vm0, %v5378_v28  ;;  %v2390_v52 = vrot.slane %v5401_v46, 1  ;;  %v2542_v39 = vrot.slane %v2252_v22, 1 }
  0xb7   : > { %4318 = vmatmul.mubr.msk.bf16.vlgmr.msra.gmra.mxu1 %vm341_vm2, %v1691_v42  ;;  %v2248_v42 = vshll.u32 %v5428_v2, 16  ;;  %v2526_v8 = vshll.u32 %v3904_v15, 16  ;;  %v2536_v10 = vor.u32 %v2535_v24, %v2534_v14 }
  0xb8   : > { %4344 = vmatpush3.bf16.msra.mxu1 %v2078_v45  ;;  %4321 = vmatprep.mubr.msk.bf16.mxu1 %vm341_vm2, %v1700_v21  ;;  %v2244_v45 = vshrl.u32 %v5409_v57, 16  ;;  %v2243_v21 = vsel %vm288_vm1, %v2238_v17, %v2242_v31  ;;  %v5489_v17 = vcombine.low %v5421_v4, %v2515_v23  ;;  %v2392_v4 = vrot.slane %v5409_v57, 1 }
  0xb9   : > { %4645 = vmatprep.subr.msk.bf16.mxu1 %vm360_vm0, %v5373_v20  ;;  %v2250_v54 = vrot.slane %v2248_v42, 1  ;;  %v2528_v51 = vrot.slane %v2526_v8, 2 }
  0xba   : > { %v2246_v20 = vor.u32 %v2244_v45, %v2242_v31  ;;  %v2538_v30 = vrot.slane %v2244_v45, 1  ;;  %v2550_v61 = vshll.u32 %v5489_v17, 16  ;;  %v2393_v6 = vsel %vm553_vm3, %v2390_v52, %v2392_v4 }
  0xbb   : > { %v2254_v7 = vor.u32 %v2252_v22, %v2250_v54 }
  0xbc   : > { %4336 = vmatmul.mubr.msk.bf16.gmra.mxu0 %vm341_vm2, %v3868_v33  ;;  %v2579_v33 = vsel %vm360_vm0, %v5378_v28, 0  ;;  %v2251_v34 = vsel %vm288_vm1, %v2246_v20, %v2250_v54  ;;  %v2540_v63 = vor.u32 %v2539_v16, %v2538_v30  ;;  %v2552_v45 = vrot.slane %v2550_v61, 2 }
  0xbd   : > { %4339 = vmatprep.mubr.msk.bf16.mxu0 %vm341_vm2, %v3869_v25  ;;  %v2037_v25 = vor.u32 %v2035_v44, %v2033_v55  ;;  %v2259_v60 = vsel %vm288_vm1, %v2254_v7, %v2258_v26  ;;  %v2547_v55 = vshrl.u32 %v5489_v17, 16  ;;  %v2684_v20 = vrot.slane %v5409_v57, 2 }
  0xbe   : > { %v2541_v44 = vsel %vm689_vm4, %v2536_v10, %v2540_v63 }
  0xbf   : > { %4322 = vmatmul.mubr.msk.bf16.gmra.mxu1 %vm341_vm2, %v1709_v18  ;;  %v2041_v18 = vrot.slane %v2039_v12, 1  ;;  %v2549_v12 = vrot.slane %v2547_v55, 1 }
  0xc0   : > { %4325 = vmatprep.mubr.msk.bf16.mxu1 %vm341_vm2, %v1718_v3  ;;  %v2523_v3 = vshrl.u32 %v3904_v15, 16 }
  0xc1   : > { %v2045_v13 = vor.u32 %v2043_v5, %v2041_v18  ;;  %v2042_v28 = vsel %vm288_vm1, %v2037_v25, %v2041_v18  ;;  %v2680_v25 = vrot.slane %v5384_v48, 2  ;;  %v2686_v48 = vrot.slane %v5428_v2, 2 }
  0xc2   : > { %v2525_v41 = vrot.slane %v2523_v3, 1  ;;  %v2688_v3 = vrot.slane %v5489_v17, 2 }
  0xc3   : > { %v2687_v8 = vsel %vm360_vm0, %v2684_v20, %v2686_v48 }
  0xc4   : > { %4340 = vmatmul.mubr.msk.bf16.gmra.mxu0 %vm341_vm2, %v3870_v59  ;;  %v2529_v1 = vor.u32 %v2528_v51, %v2525_v41 }
  0xc5   : > { %4359 = vmatprep.mubr.msk.bf16.mxu0 %vm341_vm2, %v2227_v53  ;;  %v2532_v53 = vor.u32 %v2531_v58, %v2530_v47 }
  0xc7   : > { %4326 = vmatmul.mubr.msk.bf16.gmra.mxu1 %vm341_vm2, %v1717_v49  ;;  %v2047_v49 = vshll.u32 %v4747_v36, 16  ;;  %v2533_v29 = vsel %vm689_vm4, %v2529_v1, %v2532_v53  ;;  %v2537_v36 = vsel %vm689_vm4, %v2532_v53, %v2536_v10 }
  0xc8   : > { %4345 = vmatprep.mubr.msk.bf16.mxu1 %vm341_vm2, %v2018_v11  ;;  %v2387_v11 = vrot.slane %v3904_v15, 1  ;;  %v2553_v15 = vor.u32 %v2552_v45, %v2549_v12 }
  0xc9   : > { %v2049_v56 = vrot.slane %v2047_v49, 1 }
  0xca   : > { %v2389_v31 = vsel %vm553_vm3, %v2387_v11, %v2388_v19 }
  0xcb   : > { %v2050_v59 = vsel %vm288_vm1, %v2045_v13, %v2049_v56  ;;  %v2053_v9 = vor.u32 %v2051_v0, %v2049_v56  ;;  %v2689_v13 = vsel %vm360_vm0, %v2686_v48, %v2688_v3 }
  0xcc   : > { %4360 = vmatmul.mubr.msk.bf16.vlgmr.msra.gmra.mxu0 %vm341_vm2, %v2235_v43  ;;  %v2391_v43 = vsel %vm553_vm3, %v2388_v19, %v2390_v52 }
  0xcd   : > { %4363 = vmatprep.mubr.msk.bf16.mxu0 %vm341_vm2, %v2243_v21  ;;  %4386 = vmatpush3.bf16.msra.mxu0 %v2579_v33  ;;  %v2714_v21 = vsel %vm360_vm0, %v5454_v50, 0 }
  0xcf   : > { %4346 = vmatmul.mubr.msk.bf16.vlgmr.msra.gmra.mxu1 %vm341_vm2, %v2026_v40  ;;  %v2543_v40 = vrot.slane %v2248_v42, 2  ;;  %v2394_v42 = vrot.slane %v5428_v2, 1 }
  0xd0   : > { %4372 = vmatpush3.bf16.msra.mxu1 %v2422_v27  ;;  %4349 = vmatprep.mubr.msk.bf16.mxu1 %vm341_vm2, %v2034_v32  ;;  %v2396_v27 = vrot.slane %v5439_v35, 1  ;;  %v2672_v32 = vld [vmem:[%s4981_s14 + $0x10] sm:$0xc] }
  0xd1   : > { %4647 = vmatprep.subr.msk.bf16.mxu1 %vm360_vm0, %v5454_v50  ;;  %v2544_v22 = vor.u32 %v2543_v40, %v2542_v39  ;;  %v2395_v49 = vsel %vm553_vm3, %v2392_v4, %v2394_v42  ;;  %v3920_v33 = vcombine.low %v2672_v32, %v5361_v37  ;;  %v2682_v37 = vrot.slane %v5401_v46, 2 }
  0xd2   : > { %v2397_v54 = vsel %vm553_vm3, %v2394_v42, %v2396_v27 }
  0xd3   : > { %v2545_v5 = vsel %vm689_vm4, %v2540_v63, %v2544_v22  ;;  %v2554_v50 = vsel %vm689_vm4, %v2544_v22, %v2553_v15  ;;  %v2679_v35 = vrot.slane %v3920_v33, 2  ;;  %v2683_v7 = vsel %vm360_vm0, %v2680_v25, %v2682_v37 }
  0xd4   : > { %4364 = vmatmul.mubr.msk.bf16.gmra.mxu0 %vm341_vm2, %v2251_v34  ;;  %v2685_v26 = vsel %vm360_vm0, %v2682_v37, %v2684_v20 }
  0xd5   : > { %4367 = vmatprep.mubr.msk.bf16.mxu0 %vm341_vm2, %v2259_v60  ;;  %v2681_v18 = vsel %vm360_vm0, %v2679_v35, %v2680_v25 }
  0xd7   : > { %4350 = vmatmul.mubr.msk.bf16.gmra.mxu1 %vm341_vm2, %v2042_v28 }
  0xd8   : > { %4353 = vmatprep.mubr.msk.bf16.mxu1 %vm341_vm2, %v2050_v59 }
  0xdc   : > { %4368 = vmatmul.mubr.msk.bf16.gmra.mxu0 %vm341_vm2, %v2262_v38 }
  0xdd   : > { %4387 = vmatprep.mubr.msk.bf16.mxu0 %vm341_vm2, %v2533_v29 }
  0xdf   : > { %4354 = vmatmul.mubr.msk.bf16.gmra.mxu1 %vm341_vm2, %v2053_v9 }
  0xe0   : > { %4373 = vmatprep.mubr.msk.bf16.mxu1 %vm341_vm2, %v2389_v31 }
  0xe4   : > { %4388 = vmatmul.mubr.msk.bf16.vlgmr.msra.gmra.mxu0 %vm341_vm2, %v2537_v36 }
  0xe5   : > { %4391 = vmatprep.mubr.msk.bf16.mxu0 %vm341_vm2, %v2541_v44 }
  0xe7   : > { %4374 = vmatmul.mubr.msk.bf16.vlgmr.msra.gmra.mxu1 %vm341_vm2, %v2391_v43 }
  0xe8   : > { %4400 = vmatpush3.bf16.msra.mxu1 %v2714_v21  ;;  %4377 = vmatprep.mubr.msk.bf16.mxu1 %vm341_vm2, %v2393_v6 }
  0xec   : > { %4392 = vmatmul.mubr.msk.bf16.gmra.mxu0 %vm341_vm2, %v2545_v5 }
  0xed   : > { %4395 = vmatprep.mubr.msk.bf16.mxu0 %vm341_vm2, %v2554_v50 }
  0xef   : > { %4378 = vmatmul.mubr.msk.bf16.gmra.mxu1 %vm341_vm2, %v2395_v49 }
  0xf0   : > { %4381 = vmatprep.mubr.msk.bf16.mxu1 %vm341_vm2, %v2397_v54 }
  0xf4   : > { %4396 = vmatmul.mubr.msk.bf16.gmra.mxu0 %vm341_vm2, %v2553_v15 }
  0xf7   : > { %4382 = vmatmul.mubr.msk.bf16.gmra.mxu1 %vm341_vm2, %v2396_v27 }
  0xf8   : > { %4401 = vmatprep.mubr.msk.bf16.mxu1 %vm341_vm2, %v2681_v18 }
  0xff   : > { %4402 = vmatmul.mubr.msk.bf16.vlgmr.msra.gmra.mxu1 %vm341_vm2, %v2683_v7 }
 0x100   : > { %4405 = vmatprep.mubr.msk.bf16.mxu1 %vm341_vm2, %v2685_v26 }
 0x107   : > { %v4197_v56 = vpop.f32.mrf.mxu1  ;;  %4406 = vmatmul.mubr.msk.bf16.gmra.mxu1 %vm341_vm2, %v2687_v8 }
 0x108   : > { %4409 = vmatprep.mubr.msk.bf16.mxu1 %vm341_vm2, %v2689_v13 }
 0x109   : > { %v414_v46 = vpop.f32.mrf.mxu1 }
 0x10b   : > { %v4198_v57 = vpop.f32.mrf.mxu1 }
 0x10c   : > { %v4193_v34 = vpop.f32.mrf.mxu0 }
 0x10d   : > { %v5543_v28 = vpop.f32.mrf.mxu1 }
 0x10e   : > { %v398_v2 = vpop.f32.mrf.mxu0 }
 0x10f   : > { %v4201_v47 = vpop.f32.mrf.mxu1  ;;  %4410 = vmatmul.mubr.msk.bf16.gmra.mxu1 %vm341_vm2, %v2688_v3 }
 0x110   : > { %v4194_v41 = vpop.f32.mrf.mxu0 }
 0x111   : > { %v430_v60 = vpop.f32.mrf.mxu1 }
 0x112   : > { %v5546_v58 = vpop.f32.mrf.mxu0 }
 0x113   : > { %v4202_v51 = vpop.f32.mrf.mxu1 }
 0x114   : > { %v4221_v62 = vpop.f32.mrf.mxu0 }
 0x115   : > { %v5548_v59 = vpop.f32.mrf.mxu1 }
 0x116   : > { %v625_v53 = vpop.f32.mrf.mxu0 }
 0x117   : > { %v4207_v0 = vpop.f32.mrf.mxu1 }
 0x118   : > { %v509_v1 = vadd.f32 %v4207_v0, %v4193_v34  ;;  %v4222_v38 = vpop.f32.mrf.mxu0 }
 0x119   : > { %v500_v11 = vpop.f32.mrf.mxu1 }
 0x11a   : > { %v501_v19 = vadd.f32 %v500_v11, %v398_v2  ;;  %v673_v23 = vadd.f32 %v4221_v62, %v509_v1  ;;  %v5550_v29 = vpop.f32.mrf.mxu0 }
 0x11b   : > { %v4208_v14 = vpop.f32.mrf.mxu1 }
 0x11c   : > { %v512_v9 = vadd.f32 %v4208_v14, %v4194_v41  ;;  %v671_v24 = vadd.f32 %v625_v53, %v501_v19  ;;  %v4225_v17 = vpop.f32.mrf.mxu0 }
 0x11d   : > { %v5552_v30 = vpop.f32.mrf.mxu1 }
 0x11e   : > { %v674_v16 = vadd.f32 %v4222_v38, %v512_v9  ;;  %v641_v52 = vpop.f32.mrf.mxu0 }
 0x11f   : > { %v4211_v31 = vpop.f32.mrf.mxu1 }
 0x120   : > { %v525_v10 = vadd.f32 %v4211_v31, %v4197_v56  ;;  %v4226_v4 = vpop.f32.mrf.mxu0 }
 0x121   : > { %v516_v63 = vpop.f32.mrf.mxu1 }
 0x122   : > { %v517_v55 = vadd.f32 %v516_v63, %v414_v46  ;;  %v677_v61 = vadd.f32 %v4225_v17, %v525_v10  ;;  %v5554_v43 = vpop.f32.mrf.mxu0 }
 0x123   : > { %v4212_v36 = vpop.f32.mrf.mxu1 }
 0x124   : > { %v528_v39 = vadd.f32 %v4212_v36, %v4198_v57  ;;  %v675_v40 = vadd.f32 %v641_v52, %v517_v55  ;;  %v4229_v45 = vpop.f32.mrf.mxu0 }
 0x125   : > { %v5556_v44 = vpop.f32.mrf.mxu1 }
 0x126   : > { %v678_v12 = vadd.f32 %v4226_v4, %v528_v39  ;;  %v657_v22 = vpop.f32.mrf.mxu0 }
 0x127   : > { %v4215_v21 = vpop.f32.mrf.mxu1 }
 0x128   : > { %v541_v6 = vadd.f32 %v4215_v21, %v4201_v47  ;;  %v4230_v32 = vpop.f32.mrf.mxu0 }
 0x129   : > { %v532_v42 = vpop.f32.mrf.mxu1 }
 0x12a   : > { %v533_v15 = vadd.f32 %v532_v42, %v430_v60  ;;  %v681_v27 = vadd.f32 %v4229_v45, %v541_v6  ;;  %v5558_v50 = vpop.f32.mrf.mxu0 }
 0x12b   : > { %v4216_v5 = vpop.f32.mrf.mxu1 }
 0x12c   : > { %v679_v49 = vadd.f32 %v657_v22, %v533_v15  ;;  %v4249_v33 = vpop.f32.mrf.mxu0 }
 0x12d   : > { %v535_v54 = vpop.f32.mrf.mxu1 }
 0x12e   : > { %v998_v18 = vpop.f32.mrf.mxu0 }
 0x12f   : > { %v4235_v35 = vpop.f32.mrf.mxu1 }
 0x130   : > { %v831_v25 = vadd.f32 %v4235_v35, %v673_v23  ;;  %v4250_v26 = vpop.f32.mrf.mxu0 }
 0x131   : > { %v783_v37 = vpop.f32.mrf.mxu1 }
 0x132   : > { %v829_v20 = vadd.f32 %v783_v37, %v671_v24  ;;  %v1046_v7 = vadd.f32 %v4249_v33, %v831_v25  ;;  %v5560_v13 = vpop.f32.mrf.mxu0  ;;  %v536_v37 = vadd.f32 %v535_v54, %v5548_v59 }
 0x133   : > { %v4236_v48 = vpop.f32.mrf.mxu1 }
 0x134   : > { %v832_v3 = vadd.f32 %v4236_v48, %v674_v16  ;;  %v1044_v8 = vadd.f32 %v998_v18, %v829_v20  ;;  %v4253_v57 = vpop.f32.mrf.mxu0 }
 0x135   : > { %v5562_v56 = vpop.f32.mrf.mxu1 }
 0x136   : > { %v1047_v46 = vadd.f32 %v4250_v26, %v832_v3  ;;  %v1014_v2 = vpop.f32.mrf.mxu0  ;;  %v504_v3 = vadd.f32 %v5552_v30, %v5546_v58 }
 0x137   : > { %v4239_v34 = vpop.f32.mrf.mxu1 }
 0x138   : > { %v835_v47 = vadd.f32 %v4239_v34, %v677_v61  ;;  %v4254_v62 = vpop.f32.mrf.mxu0 }
 0x139   : > { %v799_v60 = vpop.f32.mrf.mxu1 }
 0x13a   : > { %v833_v41 = vadd.f32 %v799_v60, %v675_v40  ;;  %v1050_v51 = vadd.f32 %v4253_v57, %v835_v47  ;;  %v5564_v11 = vpop.f32.mrf.mxu0  ;;  %v680_v47 = vadd.f32 %v5558_v50, %v536_v37 }
 0x13b   : > { %v4240_v0 = vpop.f32.mrf.mxu1 }
 0x13c   : > { %v836_v1 = vadd.f32 %v4240_v0, %v678_v12  ;;  %v1048_v53 = vadd.f32 %v1014_v2, %v833_v41  ;;  %v4257_v38 = vpop.f32.mrf.mxu0  ;;  %v4880_v0 = vmov 0.0  }
 0x13d   : > { %v5566_v19 = vpop.f32.mrf.mxu1  ;;  %4413 = vmatprep.subr.bf16.mxu0 %v4880_v0  ;;  %4437 = vmatprep.subr.bf16.mxu1 %v4880_v0 }
 0x13e   : > { %v1051_v23 = vadd.f32 %v4254_v62, %v836_v1  ;;  %v1030_v24 = vpop.f32.mrf.mxu0  ;;  %4425 = vmatprep.mubr.msk.bf16.mxu0 %vm4881_vm8, %v4880_v0  ;;  %4449 = vmatprep.mubr.msk.bf16.mxu1 %vm4881_vm8, %v4880_v0 }
 0x13f   : > { %v4243_v14 = vpop.f32.mrf.mxu1 }
 0x140   : > { %v839_v9 = vadd.f32 %v4243_v14, %v681_v27  ;;  %v4258_v10 = vpop.f32.mrf.mxu0 }
 0x141   : > { %v815_v16 = vpop.f32.mrf.mxu1 }
 0x142   : > { %v837_v17 = vadd.f32 %v815_v16, %v679_v49  ;;  %v1054_v31 = vadd.f32 %v4257_v38, %v839_v9  ;;  %v1033_v55 = vpop.f32.mrf.mxu0  ;;  %v520_v38 = vadd.f32 %v5556_v44, %v5543_v28 }
 0x143   : > { %v4244_v52 = vpop.f32.mrf.mxu1 }
 0x144   : > { %v1052_v63 = vadd.f32 %v1030_v24, %v837_v17  ;;  %v4277_v4 = vpop.f32.mrf.mxu0  ;;  %v676_v52 = vadd.f32 %v5554_v43, %v520_v38 }
 0x145   : > { %v818_v61 = vpop.f32.mrf.mxu1 }
 0x146   : > { %v1292_v40 = vpop.f32.mrf.mxu0  ;;  %v838_v62 = vadd.f32 %v818_v61, %v680_v47 }
 0x147   : > { %v4263_v36 = vpop.f32.mrf.mxu1 }
 0x148   : > { %v1182_v39 = vadd.f32 %v4263_v36, %v1046_v7  ;;  %v4278_v6 = vpop.f32.mrf.mxu0  ;;  %v1053_v14 = vadd.f32 %v1033_v55, %v838_v62 }
 0x149   : > { %v1134_v12 = vpop.f32.mrf.mxu1 }
 0x14a   : > { %v1180_v45 = vadd.f32 %v1134_v12, %v1044_v8  ;;  %v1340_v21 = vadd.f32 %v4277_v4, %v1182_v39  ;;  %v1295_v27 = vpop.f32.mrf.mxu0  ;;  %v834_v39 = vadd.f32 %v5566_v19, %v676_v52 }
 0x14b   : > { %v4264_v22 = vpop.f32.mrf.mxu1 }
 0x14c   : > { %v1183_v42 = vadd.f32 %v4264_v22, %v1047_v46  ;;  %v1338_v15 = vadd.f32 %v1292_v40, %v1180_v45  ;;  %v4281_v49 = vpop.f32.mrf.mxu0 }
 0x14d   : > { %v1137_v32 = vpop.f32.mrf.mxu1 }
 0x14e   : > { %v1341_v5 = vadd.f32 %v4278_v6, %v1183_v42  ;;  %v1308_v25 = vpop.f32.mrf.mxu0  ;;  %v1049_v42 = vadd.f32 %v5564_v11, %v834_v39 }
 0x14f   : > { %v4267_v33 = vpop.f32.mrf.mxu1 }
 0x150   : > { %v1186_v35 = vadd.f32 %v4267_v33, %v1050_v51  ;;  %v4282_v26 = vpop.f32.mrf.mxu0  ;;  %v672_v51 = vadd.f32 %v5550_v29, %v504_v3 }
 0x151   : > { %v1150_v18 = vpop.f32.mrf.mxu1 }
 0x152   : > { %v1184_v20 = vadd.f32 %v1150_v18, %v1048_v53  ;;  %v1344_v7 = vadd.f32 %v4281_v49, %v1186_v35  ;;  %v1311_v57 = vpop.f32.mrf.mxu0  ;;  %v830_v30 = vadd.f32 %v5562_v56, %v672_v51 }
 0x153   : > { %v4268_v48 = vpop.f32.mrf.mxu1 }
 0x154   : > { %v1187_v8 = vadd.f32 %v4268_v48, %v1051_v23  ;;  %v1342_v46 = vadd.f32 %v1308_v25, %v1184_v20  ;;  %v4285_v60 = vpop.f32.mrf.mxu0  ;;  %v1045_v16 = vadd.f32 %v5560_v13, %v830_v30 }
 0x155   : > { %v1153_v34 = vpop.f32.mrf.mxu1 }
 0x156   : > { %v1345_v2 = vadd.f32 %v4282_v26, %v1187_v8  ;;  %v1324_v54 = vpop.f32.mrf.mxu0  ;;  %v1181_v61 = vadd.f32 %v1137_v32, %v1045_v16 }
 0x157   : > { %v4271_v41 = vpop.f32.mrf.mxu1 }
 0x158   : > { %v1190_v59 = vadd.f32 %v4271_v41, %v1054_v31  ;;  %v4286_v23 = vpop.f32.mrf.mxu0  ;;  %v1339_v12 = vadd.f32 %v1295_v27, %v1181_v61 }
 0x159   : > { %v1166_v58 = vpop.f32.mrf.mxu1 }
 0x15a   : > { %v1188_v1 = vadd.f32 %v1166_v58, %v1052_v63  ;;  %v1348_v53 = vadd.f32 %v4285_v60, %v1190_v59  ;;  %v1327_v9 = vpop.f32.mrf.mxu0 }
 0x15b   : > { %v4272_v50 = vpop.f32.mrf.mxu1 }
 0x15c   : > { %v1346_v29 = vadd.f32 %v1324_v54, %v1188_v1  ;;  %v4305_v31 = vpop.f32.mrf.mxu0 }
 0x15d   : > { %v1169_v24 = vpop.f32.mrf.mxu1 }
 0x15e   : > { %v1189_v17 = vadd.f32 %v1169_v24, %v1053_v14  ;;  %v1601_v4 = vpop.f32.mrf.mxu0 }
 0x15f   : > { %v4291_v10 = vpop.f32.mrf.mxu1 }
 0x160   : > { %v1347_v56 = vadd.f32 %v1327_v9, %v1189_v17  ;;  %v1476_v63 = vadd.f32 %v4291_v10, %v1340_v21  ;;  %v4306_v44 = vpop.f32.mrf.mxu0  ;;  %v1185_v21 = vadd.f32 %v1153_v34, %v1049_v42 }
 0x161   : > { %v1428_v36 = vpop.f32.mrf.mxu1 }
 0x162   : > { %v1474_v40 = vadd.f32 %v1428_v36, %v1338_v15  ;;  %v1649_v28 = vadd.f32 %v4305_v31, %v1476_v63  ;;  %v1604_v13 = vpop.f32.mrf.mxu0  ;;  %v1343_v27 = vadd.f32 %v1311_v57, %v1185_v21 }
 0x163   : > { %v4292_v55 = vpop.f32.mrf.mxu1 }
 0x164   : > { %v1477_v45 = vadd.f32 %v4292_v55, %v1341_v5  ;;  %v1647_v6 = vadd.f32 %v1601_v4, %v1474_v40  ;;  %v4309_v32 = vpop.f32.mrf.mxu0 }
 0x165   : > { %v1431_v22 = vpop.f32.mrf.mxu1 }
 0x166   : > { %v1475_v49 = vadd.f32 %v1431_v22, %v1339_v12  ;;  %v1650_v43 = vadd.f32 %v4306_v44, %v1477_v45  ;;  %v1617_v18 = vpop.f32.mrf.mxu0 }
 0x167   : > { %v4295_v33 = vpop.f32.mrf.mxu1 }
 0x168   : > { %v1480_v35 = vadd.f32 %v4295_v33, %v1344_v7  ;;  %v1648_v25 = vadd.f32 %v1604_v13, %v1475_v49  ;;  %v4310_v20 = vpop.f32.mrf.mxu0 }
 0x169   : > { %v1444_v19 = vpop.f32.mrf.mxu1 }
 0x16a   : > { %v1478_v15 = vadd.f32 %v1444_v19, %v1342_v46  ;;  %v1653_v37 = vadd.f32 %v4309_v32, %v1480_v35  ;;  %v1620_v3 = vpop.f32.mrf.mxu0 }
 0x16b   : > { %v4296_v26 = vpop.f32.mrf.mxu1 }
 0x16c   : > { %v1481_v5 = vadd.f32 %v4296_v26, %v1345_v2  ;;  %v1651_v48 = vadd.f32 %v1617_v18, %v1478_v15  ;;  %v4313_v60 = vpop.f32.mrf.mxu0 }
 0x16d   : > { %v1447_v8 = vpop.f32.mrf.mxu1 }
 0x16e   : > { %v1479_v47 = vadd.f32 %v1447_v8, %v1343_v27  ;;  %v1654_v11 = vadd.f32 %v4310_v20, %v1481_v5  ;;  %v1633_v34 = vpop.f32.mrf.mxu0 }
 0x16f   : > { %v4299_v41 = vpop.f32.mrf.mxu1 }
 0x170   : > { %v1484_v7 = vadd.f32 %v4299_v41, %v1348_v53  ;;  %v1652_v46 = vadd.f32 %v1620_v3, %v1479_v47  ;;  %v4314_v62 = vpop.f32.mrf.mxu0 }
 0x171   : > { %v1460_v51 = vpop.f32.mrf.mxu1 }
 0x172   : > { %v1482_v57 = vadd.f32 %v1460_v51, %v1346_v29  ;;  %v5586_v2 = vadd.f32 %v4313_v60, %v1484_v7  ;;  %v1636_v58 = vpop.f32.mrf.mxu0 }
 0x173   : > { %v4300_v59 = vpop.f32.mrf.mxu1 }
 0x174   : > { %v1655_v54 = vadd.f32 %v1633_v34, %v1482_v57  ;;  %v4333_v23 = vpop.f32.mrf.mxu0 }
 0x175   : > { %v1463_v30 = vpop.f32.mrf.mxu1 }
 0x176   : > { %v1483_v1 = vadd.f32 %v1463_v30, %v1347_v56  ;;  %v1905_v9 = vpop.f32.mrf.mxu0 }
 0x177   : > { %v4319_v50 = vpop.f32.mrf.mxu1 }
 0x178   : > { %v5588_v38 = vadd.f32 %v1636_v58, %v1483_v1  ;;  %v1827_v14 = vadd.f32 %v4319_v50, %v1649_v28  ;;  %v4334_v17 = vpop.f32.mrf.mxu0 }
 0x179   : > { %v1779_v24 = vpop.f32.mrf.mxu1 }
 0x17a   : > { %v1825_v53 = vadd.f32 %v1779_v24, %v1647_v6  ;;  %v1953_v16 = vadd.f32 %v4333_v23, %v1827_v14  ;;  %v1908_v52 = vpop.f32.mrf.mxu0 }
 0x17b   : > { %v4320_v31 = vpop.f32.mrf.mxu1 }
 0x17c   : > { %v1828_v29 = vadd.f32 %v4320_v31, %v1650_v43  ;;  %v1951_v10 = vadd.f32 %v1905_v9, %v1825_v53  ;;  %v4337_v36 = vpop.f32.mrf.mxu0 }
 0x17d   : > { %v1782_v61 = vpop.f32.mrf.mxu1 }
 0x17e   : > { %v1826_v63 = vadd.f32 %v1782_v61, %v1648_v25  ;;  %v1954_v4 = vadd.f32 %v4334_v17, %v1828_v29  ;;  %v1921_v44 = vpop.f32.mrf.mxu0 }
 0x17f   : > { %v4323_v39 = vpop.f32.mrf.mxu1 }
 0x180   : > { %v1831_v56 = vadd.f32 %v4323_v39, %v1653_v37  ;;  %v1952_v40 = vadd.f32 %v1908_v52, %v1826_v63  ;;  %v4338_v45 = vpop.f32.mrf.mxu0 }
 0x181   : > { %v1795_v55 = vpop.f32.mrf.mxu1 }
 0x182   : > { %v1829_v12 = vadd.f32 %v1795_v55, %v1651_v48  ;;  %v5590_v28 = vadd.f32 %v4337_v36, %v1831_v56  ;;  %v1924_v42 = vpop.f32.mrf.mxu0 }
 0x183   : > { %v4324_v6 = vpop.f32.mrf.mxu1 }
 0x184   : > { %v1832_v13 = vadd.f32 %v4324_v6, %v1654_v11  ;;  %v5592_v22 = vadd.f32 %v1921_v44, %v1829_v12  ;;  %v5596_v33 = vpop.f32.mrf.mxu0 }
 0x185   : > { %v1798_v49 = vpop.f32.mrf.mxu1 }
 0x186   : > { %v1830_v43 = vadd.f32 %v1798_v49, %v1652_v46  ;;  %v5594_v32 = vadd.f32 %v4338_v45, %v1832_v13  ;;  %v1937_v25 = vpop.f32.mrf.mxu0 }
 0x187   : > { %v5598_v21 = vpop.f32.mrf.mxu1 }
 0x188   : > { %v5600_v35 = vadd.f32 %v1924_v42, %v1830_v43  ;;  %v4342_v15 = vpop.f32.mrf.mxu0 }
 0x189   : > { %v1811_v18 = vpop.f32.mrf.mxu1 }
 0x18a   : > { %v1833_v19 = vadd.f32 %v1811_v18, %v1655_v54  ;;  %v5604_v26 = vpop.f32.mrf.mxu0 }
 0x18b   : > { %v4328_v37 = vpop.f32.mrf.mxu1 }
 0x18c   : > { %v5602_v20 = vadd.f32 %v1937_v25, %v1833_v19  ;;  %v4361_v5 = vpop.f32.mrf.mxu0 }
 0x18d   : > { %v5606_v27 = vpop.f32.mrf.mxu1 }
 0x18e   : > { %v2323_v8 = vpop.f32.mrf.mxu0 }
 0x18f   : > { %v4347_v48 = vpop.f32.mrf.mxu1 }
 0x190   : > { %v2162_v3 = vadd.f32 %v4347_v48, %v1953_v16  ;;  %v4362_v41 = vpop.f32.mrf.mxu0 }
 0x191   : > { %v2114_v47 = vpop.f32.mrf.mxu1 }
 0x192   : > { %v2160_v11 = vadd.f32 %v2114_v47, %v1951_v10  ;;  %v2371_v60 = vadd.f32 %v4361_v5, %v2162_v3  ;;  %v2326_v51 = vpop.f32.mrf.mxu0 }
 0x193   : > { %v4348_v7 = vpop.f32.mrf.mxu1 }
 0x194   : > { %v2163_v46 = vadd.f32 %v4348_v7, %v1954_v4  ;;  %v2369_v34 = vadd.f32 %v2323_v8, %v2160_v11  ;;  %v4365_v54 = vpop.f32.mrf.mxu0  ;;  %v1835_v11 = vadd.f32 %v5598_v21, %v5586_v2 }
 0x195   : > { %v2117_v57 = vpop.f32.mrf.mxu1 }
 0x196   : > { %v2161_v62 = vadd.f32 %v2117_v57, %v1952_v40  ;;  %v2372_v59 = vadd.f32 %v4362_v41, %v2163_v46  ;;  %v2339_v1 = vpop.f32.mrf.mxu0 }
 0x197   : > { %v4351_v58 = vpop.f32.mrf.mxu1 }
 0x198   : > { %v2370_v30 = vadd.f32 %v2326_v51, %v2161_v62  ;;  %v4366_v50 = vpop.f32.mrf.mxu0  ;;  %v2166_v8 = vadd.f32 %v4351_v58, %v5590_v28  ;;  %v5631_v58 = vld [vmem:[#allocation4] ss:$0 sm:$0xff] }
 0x199   : > { %v2130_v23 = vpop.f32.mrf.mxu1 }
 0x19a   : > { %v2342_v9 = vpop.f32.mrf.mxu0  ;;  %v2164_v41 = vadd.f32 %v2130_v23, %v5592_v22 }
 0x19b   : > { %v4352_v14 = vpop.f32.mrf.mxu1 }
 0x19c   : > { %v5608_v53 = vpop.f32.mrf.mxu0  ;;  %v2167_v57 = vadd.f32 %v4352_v14, %v5594_v32  ;;  %v2373_v28 = vadd.f32 %v2339_v1, %v2164_v41 }
 0x19d   : > { %v2133_v24 = vpop.f32.mrf.mxu1 }
 0x19e   : > { %v5610_v17 = vpop.f32.mrf.mxu0  ;;  %v2376_v32 = vadd.f32 %v4366_v50, %v2167_v57 }
 0x19f   : > { %v4355_v16 = vpop.f32.mrf.mxu1 }
 0x1a0   : > { %v4370_v29 = vpop.f32.mrf.mxu0 }
 0x1a1   : > { %v2146_v31 = vpop.f32.mrf.mxu1  ;;  %v2375_v29 = vadd.f32 %v4365_v54, %v2166_v8 }
 0x1a2   : > { %v5612_v52 = vpop.f32.mrf.mxu0 }
 0x1a3   : > { %v4356_v10 = vpop.f32.mrf.mxu1 }
 0x1a4   : > { %v4389_v63 = vpop.f32.mrf.mxu0 }
 0x1a5   : > { %v5614_v61 = vpop.f32.mrf.mxu1 }
 0x1a6   : > { %v2615_v36 = vpop.f32.mrf.mxu0 }
 0x1a7   : > { %v4375_v4 = vpop.f32.mrf.mxu1 }
 0x1a8   : > { %v4390_v56 = vpop.f32.mrf.mxu0  ;;  %v2506_v5 = vadd.f32 %v4375_v4, %v2371_v60 }
 0x1a9   : > { %v2458_v39 = vpop.f32.mrf.mxu1 }
 0x1aa   : > { %v2618_v44 = vpop.f32.mrf.mxu0  ;;  %v2504_v47 = vadd.f32 %v2458_v39, %v2369_v34  ;;  %v2663_v46 = vadd.f32 %v4389_v63, %v2506_v5  ;;  %v2165_v34 = vadd.f32 %v2133_v24, %v5600_v35  ;;  %v2168_v35 = vadd.f32 %v2146_v31, %v5602_v20 }
 0x1ab   : > { %v4376_v40 = vpop.f32.mrf.mxu1 }
 0x1ac   : > { %v4393_v12 = vpop.f32.mrf.mxu0  ;;  %v2507_v51 = vadd.f32 %v4376_v40, %v2372_v59  ;;  %v2661_v10 = vadd.f32 %v2615_v36, %v2504_v47  ;;  %v1834_v59 = vadd.f32 %v5606_v27, %v5588_v38  ;;  %v2374_v1 = vadd.f32 %v2342_v9, %v2165_v34 }
 0x1ad   : > { %v2461_v55 = vpop.f32.mrf.mxu1  ;;  %v2377_v31 = vadd.f32 %v5610_v17, %v2168_v35 }
 0x1ae   : > { %v2631_v6 = vpop.f32.mrf.mxu0  ;;  %v2505_v60 = vadd.f32 %v2461_v55, %v2370_v30  ;;  %v2664_v22 = vadd.f32 %v4390_v56, %v2507_v51  ;;  %v1960_v38 = vadd.f32 %v5604_v26, %v1834_v59 }
 0x1af   : > { %v4379_v45 = vpop.f32.mrf.mxu1 }
 0x1b0   : > { %v4394_v42 = vpop.f32.mrf.mxu0  ;;  %v2510_v21 = vadd.f32 %v4379_v45, %v2375_v29  ;;  %v2662_v30 = vadd.f32 %v2618_v44, %v2505_v60 }
 0x1b1   : > { %v2474_v13 = vpop.f32.mrf.mxu1 }
 0x1b2   : > { %v5616_v43 = vpop.f32.mrf.mxu0  ;;  %v2508_v54 = vadd.f32 %v2474_v13, %v2373_v28  ;;  %v2667_v40 = vadd.f32 %v4393_v12, %v2510_v21  ;;  %v2169_v12 = vadd.f32 %v5614_v61, %v1960_v38  ;;  %v4760_v38 = vld [vmem:[#allocation6 + $0x28] sm:$0xff]  }
 0x1b3   : > { %v4380_v49 = vpop.f32.mrf.mxu1 }
 0x1b4   : > { %v5618_v18 = vpop.f32.mrf.mxu0  ;;  %v2511_v24 = vadd.f32 %v4380_v49, %v2376_v32  ;;  %v2665_v50 = vadd.f32 %v2631_v6, %v2508_v54  ;;  %v2378_v17 = vadd.f32 %v5612_v52, %v2169_v12  ;;  %v4770_v12 = vld [vmem:[#allocation6 + $0x60] ss:$0 sps:$4 sm:$0x77]  }
 0x1b5   : > { %v2477_v25 = vpop.f32.mrf.mxu1 }
 0x1b6   : > { %v5620_v15 = vpop.f32.mrf.mxu0  ;;  %v2668_v49 = vadd.f32 %v4394_v42, %v2511_v24 }
 0x1b7   : > { %v4383_v19 = vpop.f32.mrf.mxu1 }
 0x1b8   : > { %v4398_v48 = vpop.f32.mrf.mxu0 }
 0x1b9   : > { %v2490_v37 = vpop.f32.mrf.mxu1  ;;  %v1961_v48 = vadd.f32 %v5596_v33, %v1835_v11 }
 0x1ba   : > { %v2512_v6 = vadd.f32 %v2490_v37, %v2377_v31  ;;  %v2650_v34 = vpop.f32.mrf.mxu0  ;;  %v4769_v31 = vld [vmem:[#allocation6 + $0x6c] sm:$0xff]  }
 0x1bb   : > { %v4384_v3 = vpop.f32.mrf.mxu1  ;;  %v2170_v14 = vadd.f32 %v4355_v16, %v1961_v48  ;;  %v2509_v16 = vadd.f32 %v2477_v25, %v2374_v1 }
 0x1bc   : > { %v2669_v37 = vadd.f32 %v5620_v15, %v2512_v6  ;;  %v4777_v6 = vld [vmem:[#allocation6 + $0x9c] ss:$0 sps:$4 sm:$0x77]  }
 0x1bd   : > { %v5626_v7 = vpop.f32.mrf.mxu1  ;;  %v2379_v27 = vadd.f32 %v5608_v53, %v2170_v14  ;;  %v2666_v41 = vadd.f32 %v5616_v43, %v2509_v16  ;;  %v4763_v16 = vld [vmem:[#allocation6 + $0x44] sm:$0xff]  }
 0x1bf   : > { %v4403_v62 = vpop.f32.mrf.mxu1  ;;  %v2514_v3 = vadd.f32 %v4383_v19, %v2379_v27  ;;  %v4761_v27 = vld [vmem:[#allocation6 + $0x3c] sm:$0xff]  }
 0x1c0   : > { %v2798_v4 = vadd.f32 %v4403_v62, %v2663_v46 }
 0x1c1   : > { %v2750_v2 = vpop.f32.mrf.mxu1  ;;  %v2671_v19 = vadd.f32 %v5618_v18, %v2514_v3  ;;  %v4772_v3 = vld [vmem:[#allocation6 + $0x78] sm:$0xff]  }
 0x1c2   : > { %v2796_v23 = vadd.f32 %v2750_v2, %v2661_v10  ;;  %v2816_v36 = vadd.f32 %v5631_v58, %v2798_v4  ;;  %v2513_v10 = vadd.f32 %v5626_v7, %v2378_v17 }
 0x1c3   : > { %v4404_v63 = vpop.f32.mrf.mxu1 }
 0x1c4   : > { %v2799_v33 = vadd.f32 %v4404_v63, %v2664_v22  ;;  %v2814_v56 = vadd.f32 %v5631_v58, %v2796_v23  ;;  %v2827_v13 = vmax.f32 %v2816_v36, 0.0  ;;  %v2670_v32 = vadd.f32 %v2650_v34, %v2513_v10 }
 0x1c5   : > { %v2753_v39 = vpop.f32.mrf.mxu1 }
 0x1c6   : > { %v2817_v55 = vadd.f32 %v5631_v58, %v2799_v33  ;;  %v2797_v45 = vadd.f32 %v2753_v39, %v2662_v30  ;;  %v2825_v47 = vmax.f32 %v2814_v56, 0.0  ;;  %v4755_v39 = vld [vmem:[#allocation6 + $0x14] sm:$0xff]   ;;  %v4757_v56 = vld [vmem:[#allocation6 + $0x1c] sm:$0xff]  }
 0x1c7   : > { %v4407_v44 = vpop.f32.mrf.mxu1 }
 0x1c8   : > { %v2828_v5 = vmax.f32 %v2817_v55, 0.0  ;;  %v2815_v9 = vadd.f32 %v5631_v58, %v2797_v45  ;;  %v2802_v20 = vadd.f32 %v4407_v44, %v2667_v40  ;;  %v4756_v40 = vld [vmem:[#allocation6 + $0x8] sm:$0xff]   ;;  %v4758_v55 = vld [vmem:[#allocation6 + $0x10] ss:$0 sps:$4 sm:$0x77]  }
 0x1c9   : > { %v2766_v8 = vpop.f32.mrf.mxu1  ;;  %v4759_v45 = vld [vmem:[#allocation6 + $0x24] ss:$0 sps:$4 sm:$0x77]   ;;  %v4764_v44 = vld [vmem:[#allocation6 + $0x38] ss:$0 sps:$4 sm:$0x77]  }
 0x1ca   : > { %v5644_v11 = vpack.c.bf16 %v2828_v5, %v2827_v13  ;;  %v2826_v26 = vmax.f32 %v2815_v9, 0.0  ;;  %v2800_v53 = vadd.f32 %v2766_v8, %v2665_v50  ;;  %v2820_v51 = vadd.f32 %v5631_v58, %v2802_v20  ;;  %v4762_v50 = vld [vmem:[#allocation6 + $0x30] sm:$0xff]   ;;  %v4765_v13 = vld [vmem:[#allocation6 + $0x4c] ss:$0 sps:$4 sm:$0x77]   ;;  %v4767_v9 = vld [vmem:[#allocation6 + $0x64] sm:$0xff]  }
 0x1cb   : > { %v4408_v25 = vpop.f32.mrf.mxu1  ;;  %v4766_v5 = vld [vmem:[#allocation6 + $0x50] sm:$0xff]   ;;  %v4768_v20 = vld [vmem:[#allocation6 + $0x58] sm:$0xff]  }
 0x1cc   : > { %v5647_v46 = vpack.c.bf16 %v2826_v26, %v2825_v47  ;;  %v2803_v57 = vadd.f32 %v4408_v25, %v2668_v49  ;;  %v2818_v61 = vadd.f32 %v5631_v58, %v2800_v53  ;;  %v2831_v60 = vmax.f32 %v2820_v51, 0.0  ;;  %v4771_v49 = vld [vmem:[#allocation6 + $0x74] ss:$0 sps:$4 sm:$0x77]   ;;  %v4773_v8 = vld [vmem:[#allocation6 + $0x8c] sm:$0xff]   ;;  %v4774_v47 = vld [vmem:[#allocation6 + $0x80] sm:$0xff]  }
 0x1cd   : > { %v2769_v42 = vpop.f32.mrf.mxu1  ;;  %v4775_v26 = vld [vmem:[#allocation6 + $0x94] sm:$0xff]   ;;  %v4776_v53 = vld [vmem:[#allocation6 + $0x88] ss:$0 sps:$4 sm:$0x77]   ;;  %v4778_v25 = vld [vmem:[#allocation6 + $0xa0] sm:$0xff]  }
 0x1ce   : > { %v2821_v62 = vadd.f32 %v5631_v58, %v2803_v57  ;;  %v2801_v29 = vadd.f32 %v2769_v42, %v2666_v41  ;;  %v2829_v52 = vmax.f32 %v2818_v61, 0.0  ;;  %v4779_v41 = vld [vmem:[#allocation6 + $0xa8] sm:$0xff]  }
 0x1cf   : > { %v4411_v43 = vpop.f32.mrf.mxu1 }
 0x1d0   : > { %v2832_v4 = vmax.f32 %v2821_v62, 0.0  ;;  %v2819_v48 = vadd.f32 %v5631_v58, %v2801_v29  ;;  %v2806_v28 = vadd.f32 %v4411_v43, %v2671_v19 }
 0x1d1   : > { %v2782_v2 = vpop.f32.mrf.mxu1 }
 0x1d2   : > { %v5657_v22 = vpack.c.bf16 %v2832_v4, %v2831_v60  ;;  %v2830_v21 = vmax.f32 %v2819_v48, 0.0  ;;  %v2824_v18 = vadd.f32 %v5631_v58, %v2806_v28  ;;  %v2804_v23 = vadd.f32 %v2782_v2, %v2669_v37 }
 0x1d3   : > { %v4412_v59 = vpop.f32.mrf.mxu1 }
 0x1d4   : > { %v5660_v15 = vpack.c.bf16 %v2830_v21, %v2829_v52  ;;  %v2835_v7 = vmax.f32 %v2824_v18, 0.0  ;;  %v2822_v63 = vadd.f32 %v5631_v58, %v2804_v23 }
 0x1d5   : > { %v2785_v14 = vpop.f32.mrf.mxu1 }
 0x1d6   : > { %v2841_v54 = vpack.c.bf16 %v2835_v7, %v2835_v7  ;;  %v2805_v30 = vadd.f32 %v2785_v14, %v2670_v32  ;;  %v2833_v1 = vmax.f32 %v2822_v63, 0.0 }
 0x1d8   : > { %v5663_v36 = vsel %vm2870_vm9, %v2841_v54, 0  ;;  %v2823_v33 = vadd.f32 %v5631_v58, %v2805_v30  ;;  %v4754_v58 = vld [vmem:[#allocation6] sm:$0xff]  }
 0x1d9   : > { %4414 = vmatpush3.bf16.msra.mxu0 %v5663_v36  ;;  %4438 = vmatpush3.bf16.msra.mxu1 %v5663_v36 }
 0x1da   : > { %v2834_v35 = vmax.f32 %v2823_v33, 0.0  ;;  %4415 = vmatprep.subr.bf16.mxu0 %v4880_v0  ;;  %4439 = vmatprep.subr.bf16.mxu1 %v4880_v0 }
 0x1dc   : > { %v5670_v24 = vpack.c.bf16 %v2834_v35, %v2833_v1 }
 0x1de   : > { %4416 = vmatpush3.bf16.msra.mxu0 %v5670_v24  ;;  %4440 = vmatpush3.bf16.msra.mxu1 %v5670_v24 }
 0x1df   : > { %4417 = vmatprep.subr.bf16.mxu0 %v4880_v0  ;;  %4441 = vmatprep.subr.bf16.mxu1 %v4880_v0 }
 0x1e2   : > { %4418 = vmatpush3.bf16.msra.mxu0 %v5657_v22  ;;  %4442 = vmatpush3.bf16.msra.mxu1 %v5657_v22 }
 0x1e3   : > { %4419 = vmatprep.subr.bf16.mxu0 %v4880_v0  ;;  %4443 = vmatprep.subr.bf16.mxu1 %v4880_v0 }
 0x1e6   : > { %4420 = vmatpush3.bf16.msra.mxu0 %v5660_v15  ;;  %4444 = vmatpush3.bf16.msra.mxu1 %v5660_v15 }
 0x1e7   : > { %4421 = vmatprep.subr.bf16.mxu0 %v4880_v0  ;;  %4445 = vmatprep.subr.bf16.mxu1 %v4880_v0 }
 0x1ea   : > { %4422 = vmatpush3.bf16.msra.mxu0 %v5644_v11  ;;  %4446 = vmatpush3.bf16.msra.mxu1 %v5644_v11 }
 0x1eb   : > { %4423 = vmatprep.subr.bf16.mxu0 %v4880_v0  ;;  %4447 = vmatprep.subr.bf16.mxu1 %v4880_v0 }
 0x1ee   : > { %4424 = vmatpush3.bf16.msra.mxu0 %v5647_v46  ;;  %4448 = vmatpush3.bf16.msra.mxu1 %v5647_v46 }
 0x1ef   : > { %4461 = vmatprep.subr.bf16.mxu0 %v4880_v0  ;;  %4485 = vmatprep.subr.bf16.mxu1 %v4880_v0 }
 0x1f1   : > { %4426 = vmatmul.mubr.msk.bf16.vlgmr.msra.gmra.mxu0 %vm2860_vm10, %v4754_v58  ;;  %4450 = vmatmul.mubr.msk.bf16.vlgmr.msra.gmra.mxu1 %vm2860_vm10, %v4755_v39 }
 0x1f2   : > { %4462 = vmatpush3.bf16.msra.mxu0 %v5663_v36  ;;  %4486 = vmatpush3.bf16.msra.mxu1 %v5663_v36 }
 0x1f3   : > { %4463 = vmatprep.subr.bf16.mxu0 %v4880_v0  ;;  %4487 = vmatprep.subr.bf16.mxu1 %v4880_v0 }
 0x1f4   : > { %4429 = vmatprep.mubr.msk.bf16.mxu0 %vm4881_vm8, %v4880_v0  ;;  %4453 = vmatprep.mubr.msk.bf16.mxu1 %vm4881_vm8, %v4880_v0 }
 0x1f6   : > { %4464 = vmatpush3.bf16.msra.mxu0 %v5670_v24  ;;  %4488 = vmatpush3.bf16.msra.mxu1 %v5670_v24 }
 0x1f7   : > { %4465 = vmatprep.subr.bf16.mxu0 %v4880_v0  ;;  %4489 = vmatprep.subr.bf16.mxu1 %v4880_v0 }
 0x1f9   : > { %4430 = vmatmul.mubr.msk.bf16.gmra.mxu0 %vm2860_vm10, %v4756_v40  ;;  %4454 = vmatmul.mubr.msk.bf16.gmra.mxu1 %vm2860_vm10, %v4757_v56 }
 0x1fa   : > { %4466 = vmatpush3.bf16.msra.mxu0 %v5657_v22  ;;  %4490 = vmatpush3.bf16.msra.mxu1 %v5657_v22 }
 0x1fb   : > { %4467 = vmatprep.subr.bf16.mxu0 %v4880_v0  ;;  %4491 = vmatprep.subr.bf16.mxu1 %v4880_v0 }
 0x1fc   : > { %4433 = vmatprep.mubr.msk.bf16.mxu0 %vm4881_vm8, %v4880_v0  ;;  %4457 = vmatprep.mubr.msk.bf16.mxu1 %vm4881_vm8, %v4880_v0 }
 0x1fe   : > { %4468 = vmatpush3.bf16.msra.mxu0 %v5660_v15  ;;  %4492 = vmatpush3.bf16.msra.mxu1 %v5660_v15 }
 0x1ff   : > { %4469 = vmatprep.subr.bf16.mxu0 %v4880_v0  ;;  %4493 = vmatprep.subr.bf16.mxu1 %v4880_v0 }
 0x201   : > { %4434 = vmatmul.mubr.msk.bf16.gmra.mxu0 %vm2860_vm10, %v4758_v55  ;;  %4458 = vmatmul.mubr.msk.bf16.gmra.mxu1 %vm2860_vm10, %v4759_v45 }
 0x202   : > { %4470 = vmatpush3.bf16.msra.mxu0 %v5644_v11  ;;  %4494 = vmatpush3.bf16.msra.mxu1 %v5644_v11 }
 0x203   : > { %4471 = vmatprep.subr.bf16.mxu0 %v4880_v0  ;;  %4495 = vmatprep.subr.bf16.mxu1 %v4880_v0 }
 0x204   : > { %4473 = vmatprep.mubr.msk.bf16.mxu0 %vm4881_vm8, %v4880_v0  ;;  %4497 = vmatprep.mubr.msk.bf16.mxu1 %vm4881_vm8, %v4880_v0 }
 0x206   : > { %4472 = vmatpush3.bf16.msra.mxu0 %v5647_v46  ;;  %4496 = vmatpush3.bf16.msra.mxu1 %v5647_v46 }
 0x207   : > { %4509 = vmatprep.subr.bf16.mxu0 %v4880_v0  ;;  %4533 = vmatprep.subr.bf16.mxu1 %v4880_v0 }
 0x209   : > { %4474 = vmatmul.mubr.msk.bf16.vlgmr.msra.gmra.mxu0 %vm2860_vm10, %v4760_v38  ;;  %4498 = vmatmul.mubr.msk.bf16.vlgmr.msra.gmra.mxu1 %vm2860_vm10, %v4761_v27 }
 0x20a   : > { %4510 = vmatpush3.bf16.msra.mxu0 %v5663_v36  ;;  %4534 = vmatpush3.bf16.msra.mxu1 %v5663_v36 }
 0x20b   : > { %4511 = vmatprep.subr.bf16.mxu0 %v4880_v0  ;;  %4535 = vmatprep.subr.bf16.mxu1 %v4880_v0 }
 0x20c   : > { %4477 = vmatprep.mubr.msk.bf16.mxu0 %vm4881_vm8, %v4880_v0  ;;  %4501 = vmatprep.mubr.msk.bf16.mxu1 %vm4881_vm8, %v4880_v0 }
 0x20e   : > { %4512 = vmatpush3.bf16.msra.mxu0 %v5670_v24  ;;  %4536 = vmatpush3.bf16.msra.mxu1 %v5670_v24 }
 0x20f   : > { %4513 = vmatprep.subr.bf16.mxu0 %v4880_v0  ;;  %4537 = vmatprep.subr.bf16.mxu1 %v4880_v0 }
 0x211   : > { %4478 = vmatmul.mubr.msk.bf16.gmra.mxu0 %vm2860_vm10, %v4762_v50  ;;  %4502 = vmatmul.mubr.msk.bf16.gmra.mxu1 %vm2860_vm10, %v4763_v16 }
 0x212   : > { %4514 = vmatpush3.bf16.msra.mxu0 %v5657_v22  ;;  %4538 = vmatpush3.bf16.msra.mxu1 %v5657_v22 }
 0x213   : > { %4515 = vmatprep.subr.bf16.mxu0 %v4880_v0  ;;  %4539 = vmatprep.subr.bf16.mxu1 %v4880_v0 }
 0x214   : > { %4481 = vmatprep.mubr.msk.bf16.mxu0 %vm4881_vm8, %v4880_v0  ;;  %4505 = vmatprep.mubr.msk.bf16.mxu1 %vm4881_vm8, %v4880_v0 }
 0x216   : > { %4516 = vmatpush3.bf16.msra.mxu0 %v5660_v15  ;;  %4540 = vmatpush3.bf16.msra.mxu1 %v5660_v15 }
 0x217   : > { %4517 = vmatprep.subr.bf16.mxu0 %v4880_v0  ;;  %4541 = vmatprep.subr.bf16.mxu1 %v4880_v0 }
 0x219   : > { %4482 = vmatmul.mubr.msk.bf16.gmra.mxu0 %vm2860_vm10, %v4764_v44  ;;  %4506 = vmatmul.mubr.msk.bf16.gmra.mxu1 %vm2860_vm10, %v4765_v13 }
 0x21a   : > { %4518 = vmatpush3.bf16.msra.mxu0 %v5644_v11  ;;  %4542 = vmatpush3.bf16.msra.mxu1 %v5644_v11 }
 0x21b   : > { %4519 = vmatprep.subr.bf16.mxu0 %v4880_v0  ;;  %4543 = vmatprep.subr.bf16.mxu1 %v4880_v0 }
 0x21c   : > { %4521 = vmatprep.mubr.msk.bf16.mxu0 %vm4881_vm8, %v4880_v0  ;;  %4545 = vmatprep.mubr.msk.bf16.mxu1 %vm4881_vm8, %v4880_v0 }
 0x21e   : > { %4520 = vmatpush3.bf16.msra.mxu0 %v5647_v46  ;;  %4544 = vmatpush3.bf16.msra.mxu1 %v5647_v46 }
 0x21f   : > { %4557 = vmatprep.subr.bf16.mxu0 %v4880_v0  ;;  %4581 = vmatprep.subr.bf16.mxu1 %v4880_v0 }
 0x221   : > { %4522 = vmatmul.mubr.msk.bf16.vlgmr.msra.gmra.mxu0 %vm2860_vm10, %v4766_v5  ;;  %4546 = vmatmul.mubr.msk.bf16.vlgmr.msra.gmra.mxu1 %vm2860_vm10, %v4767_v9 }
 0x222   : > { %4558 = vmatpush3.bf16.msra.mxu0 %v5663_v36  ;;  %4582 = vmatpush3.bf16.msra.mxu1 %v5663_v36 }
 0x223   : > { %4559 = vmatprep.subr.bf16.mxu0 %v4880_v0  ;;  %4583 = vmatprep.subr.bf16.mxu1 %v4880_v0 }
 0x224   : > { %4525 = vmatprep.mubr.msk.bf16.mxu0 %vm4881_vm8, %v4880_v0  ;;  %4549 = vmatprep.mubr.msk.bf16.mxu1 %vm4881_vm8, %v4880_v0 }
 0x226   : > { %4560 = vmatpush3.bf16.msra.mxu0 %v5670_v24  ;;  %4584 = vmatpush3.bf16.msra.mxu1 %v5670_v24 }
 0x227   : > { %4561 = vmatprep.subr.bf16.mxu0 %v4880_v0  ;;  %4585 = vmatprep.subr.bf16.mxu1 %v4880_v0 }
 0x229   : > { %4526 = vmatmul.mubr.msk.bf16.gmra.mxu0 %vm2860_vm10, %v4768_v20  ;;  %4550 = vmatmul.mubr.msk.bf16.gmra.mxu1 %vm2860_vm10, %v4769_v31 }
 0x22a   : > { %4562 = vmatpush3.bf16.msra.mxu0 %v5657_v22  ;;  %4586 = vmatpush3.bf16.msra.mxu1 %v5657_v22 }
 0x22b   : > { %4563 = vmatprep.subr.bf16.mxu0 %v4880_v0  ;;  %4587 = vmatprep.subr.bf16.mxu1 %v4880_v0 }
 0x22c   : > { %4529 = vmatprep.mubr.msk.bf16.mxu0 %vm4881_vm8, %v4880_v0  ;;  %4553 = vmatprep.mubr.msk.bf16.mxu1 %vm4881_vm8, %v4880_v0 }
 0x22e   : > { %4564 = vmatpush3.bf16.msra.mxu0 %v5660_v15  ;;  %4588 = vmatpush3.bf16.msra.mxu1 %v5660_v15 }
 0x22f   : > { %4565 = vmatprep.subr.bf16.mxu0 %v4880_v0  ;;  %4589 = vmatprep.subr.bf16.mxu1 %v4880_v0 }
 0x231   : > { %4530 = vmatmul.mubr.msk.bf16.gmra.mxu0 %vm2860_vm10, %v4770_v12  ;;  %4554 = vmatmul.mubr.msk.bf16.gmra.mxu1 %vm2860_vm10, %v4771_v49 }
 0x232   : > { %4566 = vmatpush3.bf16.msra.mxu0 %v5644_v11  ;;  %4590 = vmatpush3.bf16.msra.mxu1 %v5644_v11 }
 0x233   : > { %4567 = vmatprep.subr.bf16.mxu0 %v4880_v0  ;;  %4591 = vmatprep.subr.bf16.mxu1 %v4880_v0 }
 0x234   : > { %4569 = vmatprep.mubr.msk.bf16.mxu0 %vm4881_vm8, %v4880_v0  ;;  %4593 = vmatprep.mubr.msk.bf16.mxu1 %vm4881_vm8, %v4880_v0 }
 0x236   : > { %4568 = vmatpush3.bf16.msra.mxu0 %v5647_v46  ;;  %4592 = vmatpush3.bf16.msra.mxu1 %v5647_v46 }
 0x237   : > { %4605 = vmatprep.subr.bf16.mxu0 %v4880_v0 }
 0x239   : > { %4570 = vmatmul.mubr.msk.bf16.vlgmr.msra.gmra.mxu0 %vm2860_vm10, %v4772_v3  ;;  %4594 = vmatmul.mubr.msk.bf16.vlgmr.msra.gmra.mxu1 %vm2860_vm10, %v4773_v8 }
 0x23a   : > { %4606 = vmatpush3.bf16.msra.mxu0 %v5663_v36  ;;  %4573 = vmatprep.mubr.msk.bf16.mxu0 %vm4881_vm8, %v4880_v0 }
 0x23b   : > { %4607 = vmatprep.subr.bf16.mxu0 %v4880_v0  ;;  %4597 = vmatprep.mubr.msk.bf16.mxu1 %vm4881_vm8, %v4880_v0 }
 0x23e   : > { %4608 = vmatpush3.bf16.msra.mxu0 %v5670_v24 }
 0x23f   : > { %4609 = vmatprep.subr.bf16.mxu0 %v4880_v0 }
 0x241   : > { %4574 = vmatmul.mubr.msk.bf16.gmra.mxu0 %vm2860_vm10, %v4774_v47  ;;  %4598 = vmatmul.mubr.msk.bf16.gmra.mxu1 %vm2860_vm10, %v4775_v26 }
 0x242   : > { %4610 = vmatpush3.bf16.msra.mxu0 %v5657_v22  ;;  %4577 = vmatprep.mubr.msk.bf16.mxu0 %vm4881_vm8, %v4880_v0 }
 0x243   : > { %4611 = vmatprep.subr.bf16.mxu0 %v4880_v0  ;;  %4601 = vmatprep.mubr.msk.bf16.mxu1 %vm4881_vm8, %v4880_v0 }
 0x246   : > { %4612 = vmatpush3.bf16.msra.mxu0 %v5660_v15 }
 0x247   : > { %4613 = vmatprep.subr.bf16.mxu0 %v4880_v0 }
 0x249   : > { %4578 = vmatmul.mubr.msk.bf16.gmra.mxu0 %vm2860_vm10, %v4776_v53  ;;  %4602 = vmatmul.mubr.msk.bf16.gmra.mxu1 %vm2860_vm10, %v4777_v6 }
 0x24a   : > { %4614 = vmatpush3.bf16.msra.mxu0 %v5644_v11  ;;  %4617 = vmatprep.mubr.msk.bf16.mxu0 %vm4881_vm8, %v4880_v0  ;;  %v4780_v11 = vld [vmem:[#allocation6 + $0xb0] ss:$0 sps:$4 sm:$0x77]  }
 0x24b   : > { %4615 = vmatprep.subr.bf16.mxu0 %v4880_v0 }
 0x24e   : > { %4616 = vmatpush3.bf16.msra.mxu0 %v5647_v46 }
 0x251   : > { %4618 = vmatmul.mubr.msk.bf16.vlgmr.msra.gmra.mxu0 %vm2860_vm10, %v4778_v25 }
 0x252   : > { %4621 = vmatprep.mubr.msk.bf16.mxu0 %vm4881_vm8, %v4880_v0 }
 0x259   : > { %4622 = vmatmul.mubr.msk.bf16.gmra.mxu0 %vm2860_vm10, %v4779_v41 }
 0x25a   : > { %4625 = vmatprep.mubr.msk.bf16.mxu0 %vm4881_vm8, %v4880_v0 }
 0x261   : > { %4626 = vmatmul.mubr.msk.bf16.gmra.mxu0 %vm2860_vm10, %v4780_v11 }
 0x2b1   : > { %v5851_v51 = vpop.f32.mrf.mxu0  ;;  %v5853_v57 = vpop.f32.mrf.mxu1 }
 0x2b2   : > { %v3014_v46 = vmax.f32 %v5851_v51, %v5853_v57 }
 0x2b3   : > { %v4427_v17 = vpop.f32.mrf.mxu0  ;;  %v4451_v61 = vpop.f32.mrf.mxu1 }
 0x2b5   : > { %v5857_v42 = vpop.f32.mrf.mxu0  ;;  %v5859_v19 = vpop.f32.mrf.mxu1 }
 0x2b6   : > { %v3015_v62 = vmax.f32 %v5857_v42, %v5859_v19 }
 0x2b7   : > { %v4428_v0 = vpop.f32.mrf.mxu0  ;;  %v4452_v29 = vpop.f32.mrf.mxu1 }
 0x2b9   : > { %v5863_v37 = vpop.f32.mrf.mxu0  ;;  %v5865_v10 = vpop.f32.mrf.mxu1 }
 0x2ba   : > { %v3016_v43 = vmax.f32 %v5863_v37, %v5865_v10 }
 0x2bb   : > { %v4431_v60 = vpop.f32.mrf.mxu0  ;;  %v4455_v4 = vpop.f32.mrf.mxu1 }
 0x2bd   : > { %v5869_v48 = vpop.f32.mrf.mxu0  ;;  %v5871_v28 = vpop.f32.mrf.mxu1 }
 0x2be   : > { %v3017_v34 = vmax.f32 %v5869_v48, %v5871_v28 }
 0x2bf   : > { %v4432_v52 = vpop.f32.mrf.mxu0  ;;  %v4456_v2 = vpop.f32.mrf.mxu1 }
 0x2c1   : > { %v5875_v22 = vpop.f32.mrf.mxu0  ;;  %v5877_v21 = vpop.f32.mrf.mxu1 }
 0x2c2   : > { %v3018_v18 = vmax.f32 %v5875_v22, %v5877_v21 }
 0x2c3   : > { %v4435_v23 = vpop.f32.mrf.mxu0  ;;  %v4459_v59 = vpop.f32.mrf.mxu1 }
 0x2c5   : > { %v2927_v32 = vpop.f32.mrf.mxu0  ;;  %v3011_v15 = vpop.f32.mrf.mxu1 }
 0x2c7   : > { %v4436_v7 = vpop.f32.mrf.mxu0  ;;  %v4460_v14 = vpop.f32.mrf.mxu1 }
 0x2c9   : > { %v3081_v54 = vpop.f32.mrf.mxu0  ;;  %v5881_v63 = vpop.f32.mrf.mxu1 }
 0x2cb   : > { %v4475_v30 = vpop.f32.mrf.mxu0  ;;  %v4499_v36 = vpop.f32.mrf.mxu1 }
 0x2cd   : > { %v3084_v33 = vpop.f32.mrf.mxu0  ;;  %v5883_v1 = vpop.f32.mrf.mxu1 }
 0x2cf   : > { %v4476_v35 = vpop.f32.mrf.mxu0  ;;  %v4500_v24 = vpop.f32.mrf.mxu1 }
 0x2d1   : > { %v3089_v58 = vpop.f32.mrf.mxu0  ;;  %v5885_v39 = vpop.f32.mrf.mxu1 }
 0x2d2   : > { %v3105_v51 = vmax.f32 %v3016_v43, %v3089_v58 }
 0x2d3   : > { %v4479_v40 = vpop.f32.mrf.mxu0  ;;  %v4503_v56 = vpop.f32.mrf.mxu1 }
 0x2d4   : > { %v3194_v42 = vmax.f32 %v3105_v51, %v5885_v39 }
 0x2d5   : > { %v5887_v55 = vpop.f32.mrf.mxu0  ;;  %v5889_v45 = vpop.f32.mrf.mxu1 }
 0x2d6   : > { %v3106_v19 = vmax.f32 %v3017_v34, %v5887_v55 }
 0x2d7   : > { %v4480_v38 = vpop.f32.mrf.mxu0  ;;  %v4504_v27 = vpop.f32.mrf.mxu1 }
 0x2d8   : > { %v3103_v27 = vmax.f32 %v3014_v46, %v3081_v54  ;;  %v3195_v58 = vmax.f32 %v3106_v19, %v5889_v45 }
 0x2d9   : > { %v5891_v50 = vpop.f32.mrf.mxu0  ;;  %v5893_v16 = vpop.f32.mrf.mxu1 }
 0x2da   : > { %v3107_v39 = vmax.f32 %v3018_v18, %v5891_v50 }
 0x2db   : > { %v4483_v44 = vpop.f32.mrf.mxu0  ;;  %v4507_v13 = vpop.f32.mrf.mxu1 }
 0x2dc   : > { %v3196_v45 = vmax.f32 %v3107_v39, %v5893_v16 }
 0x2dd   : > { %v3100_v5 = vpop.f32.mrf.mxu0  ;;  %v3189_v9 = vpop.f32.mrf.mxu1 }
 0x2df   : > { %v4484_v20 = vpop.f32.mrf.mxu0  ;;  %v4508_v31 = vpop.f32.mrf.mxu1 }
 0x2e0   : > { %v3192_v20 = vmax.f32 %v3103_v27, %v5881_v63  ;;  %v3104_v31 = vmax.f32 %v3015_v62, %v3084_v33 }
 0x2e1   : > { %v3259_v12 = vpop.f32.mrf.mxu0  ;;  %v3348_v49 = vpop.f32.mrf.mxu1 }
 0x2e3   : > { %v4523_v3 = vpop.f32.mrf.mxu0  ;;  %v4547_v8 = vpop.f32.mrf.mxu1 }
 0x2e5   : > { %v3262_v47 = vpop.f32.mrf.mxu0  ;;  %v3351_v26 = vpop.f32.mrf.mxu1 }
 0x2e7   : > { %v4524_v53 = vpop.f32.mrf.mxu0  ;;  %v4548_v6 = vpop.f32.mrf.mxu1 }
 0x2e8   : > { %v3281_v53 = vmax.f32 %v3192_v20, %v3259_v12 }
 0x2e9   : > { %v3267_v25 = vpop.f32.mrf.mxu0  ;;  %v5895_v41 = vpop.f32.mrf.mxu1 }
 0x2ea   : > { %v3370_v54 = vmax.f32 %v3281_v53, %v3348_v49  ;;  %v3283_v37 = vmax.f32 %v3194_v42, %v3267_v25 }
 0x2eb   : > { %v4527_v11 = vpop.f32.mrf.mxu0  ;;  %v4551_v17 = vpop.f32.mrf.mxu1 }
 0x2ec   : > { %v3193_v17 = vmax.f32 %v3104_v31, %v5883_v1  ;;  %v3372_v48 = vmax.f32 %v3283_v37, %v5895_v41 }
 0x2ed   : > { %v3270_v61 = vpop.f32.mrf.mxu0  ;;  %v5897_v0 = vpop.f32.mrf.mxu1 }
 0x2ee   : > { %v3282_v63 = vmax.f32 %v3193_v17, %v3262_v47  ;;  %v3284_v28 = vmax.f32 %v3195_v58, %v3270_v61 }
 0x2ef   : > { %v4528_v29 = vpop.f32.mrf.mxu0  ;;  %v4552_v60 = vpop.f32.mrf.mxu1 }
 0x2f0   : > { %v3371_v12 = vmax.f32 %v3282_v63, %v3351_v26  ;;  %v3373_v26 = vmax.f32 %v3284_v28, %v5897_v0 }
 0x2f1   : > { %v5899_v4 = vpop.f32.mrf.mxu0  ;;  %v5901_v52 = vpop.f32.mrf.mxu1 }
 0x2f2   : > { %v3285_v25 = vmax.f32 %v3196_v45, %v5899_v4 }
 0x2f3   : > { %v4531_v2 = vpop.f32.mrf.mxu0  ;;  %v4555_v23 = vpop.f32.mrf.mxu1 }
 0x2f4   : > { %v3374_v16 = vmax.f32 %v3285_v25, %v5901_v52 }
 0x2f5   : > { %v3278_v59 = vpop.f32.mrf.mxu0  ;;  %v3367_v32 = vpop.f32.mrf.mxu1 }
 0x2f7   : > { %v4532_v15 = vpop.f32.mrf.mxu0  ;;  %v4556_v7 = vpop.f32.mrf.mxu1 }
 0x2f9   : > { %v3437_v14 = vpop.f32.mrf.mxu0  ;;  %v3526_v30 = vpop.f32.mrf.mxu1 }
 0x2fa   : > { %v3459_v62 = vmax.f32 %v3370_v54, %v3437_v14 }
 0x2fb   : > { %v4571_v36 = vpop.f32.mrf.mxu0  ;;  %v4595_v35 = vpop.f32.mrf.mxu1 }
 0x2fc   : > { %v3548_v49 = vmax.f32 %v3459_v62, %v3526_v30 }
 0x2fd   : > { %v3440_v24 = vpop.f32.mrf.mxu0  ;;  %v3529_v40 = vpop.f32.mrf.mxu1 }
 0x2fe   : > { %v3460_v47 = vmax.f32 %v3371_v12, %v3440_v24 }
 0x2ff   : > { %v4572_v56 = vpop.f32.mrf.mxu0  ;;  %v4596_v38 = vpop.f32.mrf.mxu1 }
 0x300   : > { %v3549_v22 = vmax.f32 %v3460_v47, %v3529_v40 }
 0x301   : > { %v3445_v44 = vpop.f32.mrf.mxu0  ;;  %v3534_v13 = vpop.f32.mrf.mxu1 }
 0x302   : > { %v3461_v21 = vmax.f32 %v3372_v48, %v3445_v44 }
 0x303   : > { %v4575_v5 = vpop.f32.mrf.mxu0  ;;  %v4599_v9 = vpop.f32.mrf.mxu1 }
 0x304   : > { %v3550_v23 = vmax.f32 %v3461_v21, %v3534_v13 }
 0x305   : > { %v3448_v3 = vpop.f32.mrf.mxu0  ;;  %v3537_v8 = vpop.f32.mrf.mxu1 }
 0x306   : > { %v3462_v59 = vmax.f32 %v3373_v26, %v3448_v3 }
 0x307   : > { %v4576_v6 = vpop.f32.mrf.mxu0  ;;  %v4600_v11 = vpop.f32.mrf.mxu1 }
 0x308   : > { %v3551_v30 = vmax.f32 %v3462_v59, %v3537_v8 }
 0x309   : > { %v3453_v57 = vpop.f32.mrf.mxu0  ;;  %v3542_v46 = vpop.f32.mrf.mxu1 }
 0x30a   : > { %v3463_v0 = vmax.f32 %v3374_v16, %v3453_v57 }
 0x30b   : > { %v4579_v29 = vpop.f32.mrf.mxu0  ;;  %v4603_v60 = vpop.f32.mrf.mxu1 }
 0x30c   : > { %v3552_v40 = vmax.f32 %v3463_v0, %v3542_v46 }
 0x30d   : > { %v3456_v33 = vpop.f32.mrf.mxu0  ;;  %v3545_v1 = vpop.f32.mrf.mxu1 }
 0x30f   : > { %v4580_v10 = vpop.f32.mrf.mxu0  ;;  %v4604_v43 = vpop.f32.mrf.mxu1 }
 0x311   : > { %v3615_v2 = vpop.f32.mrf.mxu0 }
 0x312   : > { %v3637_v34 = vmax.f32 %v3548_v49, %v3615_v2 }
 0x313   : > { %v4619_v55 = vpop.f32.mrf.mxu0 }
 0x314   : > { %v3991_v18 = vpack.c.bf16 %v3637_v34, %v3637_v34 }
 0x315   : > { %v3618_v50 = vpop.f32.mrf.mxu0 }
 0x316   : > { %3664 = vst.msk [vmem:[%s5929_s20] sm:$0xf] %vm3663_vm11, %v3991_v18  ;;  %v3638_v41 = vmax.f32 %v3549_v22, %v3618_v50 }
 0x317   : > { %v4620_v61 = vpop.f32.mrf.mxu0 }
 0x318   : > { %v3992_v32 = vpack.c.bf16 %v3638_v41, %v3638_v41 }
 0x319   : > { %v3623_v15 = vpop.f32.mrf.mxu0 }
 0x31a   : > { %3665 = vst.msk [vmem:[%s5929_s20 + $0x4] sm:$0xf] %vm3663_vm11, %v3992_v32  ;;  %v3639_v7 = vmax.f32 %v3550_v23, %v3623_v15 }
 0x31b   : > { %v4623_v14 = vpop.f32.mrf.mxu0 }
 0x31c   : > { %v3993_v4 = vpack.c.bf16 %v3639_v7, %v3639_v7 }
 0x31d   : > { %v3626_v36 = vpop.f32.mrf.mxu0 }
 0x31e   : > { %3666 = vst.msk [vmem:[%s5929_s20 + $0x8] sm:$0xf] %vm3663_vm11, %v3993_v4  ;;  %v3640_v35 = vmax.f32 %v3551_v30, %v3626_v36 }
 0x31f   : > { %v4624_v24 = vpop.f32.mrf.mxu0 }
 0x320   : > { %v3994_v56 = vpack.c.bf16 %v3640_v35, %v3640_v35 }
 0x321   : > { %v3631_v38 = vpop.f32.mrf.mxu0 }
 0x322   : > { %3667 = vst.msk [vmem:[%s5929_s20 + $0xc] sm:$0xf] %vm3663_vm11, %v3994_v56  ;;  %v3641_v27 = vmax.f32 %v3552_v40, %v3631_v38 }
 0x323   : > { %v4627_v52 = vpop.f32.mrf.mxu0 }
 0x324   : > { %v3995_v44 = vpack.c.bf16 %v3641_v27, %v3641_v27 }
 0x325   : > { %v3634_v13 = vpop.f32.mrf.mxu0 }
 0x326   : > { %3669 = vst.msk [vmem:[%s5929_s20 + $0x10] sm:$0x7] %vm3668_vm12, %v3995_v44 }
 0x327   : > { %v4628_v5 = vpop.f32.mrf.mxu0 }
 0x328 PF: > { %s16_s15 = sadd.s32 1, %s4873_s15  }
 0x329   : > { %p13_p5 = scmp.ge.s32.totalorder %s16_s15, 4  }
 0x32b   :  { %15 = sbr.rel (!%p13_p5) target bundleno = 2 (0x2), region = 102 }
 0x330   :  { %3691 = vsyncpa [#allocation3], 1 }
 0x331   :  { %3693 = vsyncpa [#allocation3 + $0x1], 1 }
 0x332   :  { %3694 = vsyncpa [#allocation5], 1 }

// kernel: custom_cnn_forward.7
= control target key start
LH: loop header
LB: loop body
LE: loop exit
PB: predicated region body
PF: predicated region fallthrough
CT: control target
= control target key end

     0   :  { %s8178_s0 = inlined_call_operand.vmem [shape: bf16[2,11,256], index: 0, kind: input, shape index: {}]   ;;  %s8179_s1 = inlined_call_operand.hbm [shape: bf16[9,256,512], index: 1, kind: input, shape index: {}]   ;;  %s8180_s2 = inlined_call_operand.hbm [shape: f32[1,512], index: 2, kind: input, shape index: {}]   ;;  %s8181_s3 = inlined_call_operand.hbm [shape: f32[3,1], index: 3, kind: input, shape index: {}]   ;;  %s8182_s4 = inlined_call_operand.vmem [shape: bf16[512,256], index: 4, kind: input, shape index: {}]   ;;  %s8183_s5 = inlined_call_operand.hbm [shape: f32[1,256], index: 5, kind: input, shape index: {}]   ;;  %s8184_s6 = inlined_call_operand.vmem [shape: bf16[256,10], index: 6, kind: input, shape index: {}]   ;;  %s8185_s7 = inlined_call_operand.hbm [shape: f32[1,10], index: 7, kind: input, shape index: {}]   ;;  %s8186_s8 = inlined_call_operand.hbm [shape: f32[2,1,10], index: 8, kind: output, shape index: {}]  }
   0x1   :  { %8190 = sst [smem:[#allocation16_spill]] %s8180_s2 }
   0x2   :  { %13 = vsyncpa [#allocation3], 0 }
   0x3   :  { %14 = vsyncpa [#allocation6], 0 }
   0x4   :  { %15 = vsyncpa [#allocation9], 0 }
   0x5   :  { %16 = vsyncpa [#allocation4], 0 }
   0x6   :  { %18 = vsyncpa [#allocation4 + $0x1], 0  ;;  %s7610_s27 = smov 0   ;;  %s7612_s28 = smov 0  }
   0x7   :  { %s7614_s29 = smov 0   ;;  %s7616_s30 = smov 0  }
   0x8 LB: > { %s7631_s9 = sadd.s32 4294967295, %s7554_s30   ;;  %s5563_s10 = sadd.s32 4294967294, %s7554_s30   ;;  %s7554_s30 = sphi %s7616_s30, %s8209_s30   ;;  %s7550_s29 = sphi %s7614_s29, %s8208_s29   ;;  %s7546_s28 = sphi %s7612_s28, %s8207_s28   ;;  %s7542_s27 = sphi %s7610_s27, %s8206_s27  }
   0x9   : > { %s7635_s11 = sadd.s32 1, %s7554_s30   ;;  %s204_s12 = sadd.s32 1, %s7550_s29 }
   0xa   : > { %s201_s13 = ssub.s32 %s7554_s30, %s7635_s11  ;;  %p214_p0 = scmp.ne.s32.totalorder %s7550_s29, %s7546_s28 }
   0xb   : > { %p202_p1 = scmp.eq.s32.totalorder %s201_s13, 0  ;;  %p215_p2 = scmp.eq.s32.totalorder %s7631_s9, 1 }
   0xc   : > { %p220_p3 = scmp.ne.s32.totalorder %s7546_s28, %s7542_s27  ;;  %p221_p4 = scmp.eq.s32.totalorder %s5563_s10, 1 }
   0xd   : > { %s7646_s14 = scalar_select %p202_p1, %s7550_s29, %s204_s12  }
   0xe   : > { %p7648_p5 = por %p215_p2, %p214_p0  ;;  %p7652_p6 = por %p221_p4, %p220_p3 }
   0xf   : > { %p5564_p7 = scmp.ge.s32.totalorder %s7554_s30, 1  ;;  %p228_p8 = scmp.lt.s32.totalorder %s7554_s30, 3 }
  0x10   : > { %s8191_s15 = scalar_select %p7648_p5, 1, 0 }
  0x11   : > { %s8192_s16 = scalar_select %p7652_p6, 1, 0 }
  0x12   : > { %p8187_p9 = scmp.eq.s32.totalorder %s7631_s9, 0  ;;  %p7659_p10 = pnand %p5564_p7, %p228_p8 }
  0x13   : > { %s7556_s18 = smov [#allocation5]   ;;  %s7557_s20 = smov [#allocation8]  }
  0x14   : > { %s8193_s17 = scalar_select %p7659_p10, 1, 0 }
  0x15   : > { %s254_s19 = sshll.u32 %s7556_s18, 4  ;;  %p6293_p11 = pneg %p7659_p10  ;;  %s255_s19 = int_to_ptr.vmem [resolvable:$true] %s254_s19 }
  0x16   : > { %s279_s21 = sshll.u32 %s7557_s20, 4  ;;  %s7558_s23 = smov [#allocation2]   ;;  %s280_s21 = int_to_ptr.vmem [resolvable:$true] %s279_s21 }
  0x17   : > { %p7667_p12 = pnand %p8187_p9, %p6293_p11  ;;  %s240_s24 = sshll.u32 %s7558_s23, 4  ;;  %s7671_s24 = int_to_ptr.vmem [resolvable:$true] %s240_s24 }
  0x18   : > { %s7363_s26 = scalar_lea.vmem %s255_s19, 64  ;;  %p7371_p3 = scmp.lt.s32.totalorder %s255_s19, %s255_s19 }
  0x19   : > { %p7675_p13 = pneg %p7667_p12  ;;  %p7364_p0 = scmp.ne.s32.totalorder %s255_s19, %s7363_s26 }
  0x1a   : > { %p7372_p4 = scmp.lt.s32.totalorder %s7363_s26, %s7363_s26 }
  0x1b   : > { %p7366_p1 = pnand %p7364_p0, %p7675_p13 }
  0x1c   : > { %p7373_p7 = por %p7372_p4, %p7371_p3 }
  0x1d   : > { %p7367_p2 = pneg %p7366_p1 }
  0x1f   : > { %p7374_p8 = pnand %p7373_p7, %p7367_p2 }
  0x21   : > { %7377 = shalt.err (!%p7374_p8)
}
  0x22   : > { %s8196_s2 = sld [smem:[#allocation16_spill]]  ;;  %s7389_s13 = scalar_lea.vmem %s280_s21, 32 }
  0x23   : > { %p7390_p11 = scmp.ne.s32.totalorder %s280_s21, %s7389_s13  ;;  %p7397_p5 = scmp.lt.s32.totalorder %s280_s21, %s280_s21 }
  0x24   : > { %p7398_p0 = scmp.lt.s32.totalorder %s7389_s13, %s7389_s13 }
  0x25   : > { %p7392_p9 = pnand %p7390_p11, %p7675_p13 }
  0x26   : > { %p7399_p1 = por %p7398_p0, %p7397_p5 }
  0x27   : > { %p7393_p6 = pneg %p7392_p9 }
  0x28   : > { %6299 = dma.hbm_to_vmem [thread:$0]  (!%p7667_p12), %s8196_s2, 64, %s255_s19, [#allocation6]  }
  0x29   : > { %p7400_p10 = pnand %p7399_p1, %p7393_p6 }
  0x2b   : > { %7403 = shalt.err (!%p7400_p10)
}
  0x2c   : > { %6305 = dma.hbm_to_vmem [thread:$0]  (!%p7667_p12), %s8183_s5, 32, %s280_s21, [#allocation9]  }
  0x2d   : > { %s7415_s19 = scalar_lea.vmem %s7671_s24, 73728  ;;  %p7423_p4 = scmp.lt.s32.totalorder %s7671_s24, %s7671_s24 }
  0x2e   : > { %p7416_p2 = scmp.ne.s32.totalorder %s7671_s24, %s7415_s19  ;;  %p7424_p5 = scmp.lt.s32.totalorder %s7415_s19, %s7415_s19 }
  0x30   : > { %p7418_p3 = pnand %p7416_p2, %p7675_p13  ;;  %p7425_p6 = por %p7424_p5, %p7423_p4 }
  0x32   : > { %p7419_p9 = pneg %p7418_p3 }
  0x34   : > { %p7426_p10 = pnand %p7425_p6, %p7419_p9 }
  0x36   : > { %7429 = shalt.err (!%p7426_p10)
}
  0x37   : > { %s7559_s23 = smov 256   ;;  %s7560_s26 = smov 16  }
  0x38   : > { %6296 = dma.hbm_to_vmem [thread:$0]  (!%p7667_p12), %s8179_s1, 73728, %s7671_s24, [#allocation3], %s7559_s23, %s7559_s23, %s7560_s26  }
  0x39   : > { %s7561_s21 = smov [#allocation7]   ;;  %s7562_s18 = smov [#allocation10]  }
  0x3a   : > { %s265_s13 = sshll.u32 %s7561_s21, 4  ;;  %s293_s20 = sshll.u32 %s7562_s18, 4  ;;  %s266_s13 = int_to_ptr.vmem [resolvable:$true] %s265_s13  ;;  %s294_s20 = int_to_ptr.vmem [resolvable:$true] %s293_s20 }
  0x3b   : > { %s7441_s2 = scalar_lea.vmem %s266_s13, 64  ;;  %p7449_p0 = scmp.lt.s32.totalorder %s266_s13, %s266_s13 }
  0x3c   : > { %p7442_p7 = scmp.ne.s32.totalorder %s266_s13, %s7441_s2  ;;  %p7450_p1 = scmp.lt.s32.totalorder %s7441_s2, %s7441_s2 }
  0x3e   : > { %p7444_p8 = pnand %p7442_p7, %p7675_p13  ;;  %p7451_p2 = por %p7450_p1, %p7449_p0 }
  0x40   : > { %p7445_p11 = pneg %p7444_p8 }
  0x42   : > { %p7452_p3 = pnand %p7451_p2, %p7445_p11 }
  0x44   : > { %7455 = shalt.err (!%p7452_p3)
}
  0x45   : > { %6302 = dma.hbm_to_vmem [thread:$0]  (!%p7667_p12), %s8181_s3, 64, %s266_s13, [#allocation6]  }
  0x46   : > { %s7467_s24 = scalar_lea.vmem %s294_s20, 16  ;;  %s7474_s23 = scalar_lea.vmem %s294_s20, 32 }
  0x47   : > { %p7468_p9 = scmp.ne.s32.totalorder %s294_s20, %s7467_s24  ;;  %p7475_p6 = scmp.lt.s32.totalorder %s294_s20, %s294_s20 }
  0x48   : > { %p7476_p10 = scmp.lt.s32.totalorder %s7474_s23, %s7467_s24 }
  0x49   : > { %p7470_p4 = pnand %p7468_p9, %p7675_p13 }
  0x4a   : > { %p7477_p7 = por %p7476_p10, %p7475_p6 }
  0x4b   : > { %p7471_p5 = pneg %p7470_p4 }
  0x4d   : > { %p7478_p8 = pnand %p7477_p7, %p7471_p5 }
  0x4f   : > { %7481 = shalt.err (!%p7478_p8)
}
  0x50   : > { %6308 = dma.hbm_to_vmem [thread:$0]  (!%p7667_p12), %s8185_s7, 16, %s294_s20, [#allocation9]  }
  0x51   : > { %p8197_p11 = scmp.ne.s32.totalorder %s8193_s17, 0 }
  0x52   : > { %p8198_p0 = scmp.eq.s32.totalorder (!%p8197_p11), %s7631_s9, 0 }
  0x53   : > { %314 = sbr.rel (%p8197_p11) target bundleno = 1307 (0x51b), region = 52 }
  0x58   : > { %7525 = dma.done.wait (%p8198_p0), [#allocation3], 73728   ;;  %p8199_p13 = pmov %p8198_p0 }
  0x59   : > { %p8200_p1 = pmov %p8198_p0 }
  0x5a   : > { %7527 = vsyncadd (%p8199_p13), [#allocation3], 4294893568 }
  0x5b   : > { %7529 = dma.done.wait (%p8200_p1), [#allocation6], 128   ;;  %p8201_p2 = pmov %p8198_p0 }
  0x5c   : > { %p8202_p3 = pmov %p8198_p0 }
  0x5d   : > { %7531 = vsyncadd (%p8201_p2), [#allocation6], 4294967168 }
  0x5e   : > { %7533 = dma.done.wait (%p8202_p3), [#allocation9], 48   ;;  %p8203_p12 = pmov %p8198_p0 }
  0x5f   : > { %v6365_v0 = vld [vmem:[#allocation2 + $0x2e4] ss:$16 sps:$4 sm:$0xff]   ;;  %v6367_v1 = vld [vmem:[#allocation2 + $0x2ec] ss:$16 sps:$4 sm:$0xff]   ;;  %v6369_v2 = vld [vmem:[#allocation2 + $0x2e0] ss:$16 sps:$4 sm:$0xff]  }
  0x60   : > { %7535 = vsyncadd (%p8203_p12), [#allocation9], 4294967248  ;;  %840 = vmatprep.subr.bf16.mxu0 %v6365_v0  ;;  %v6370_v3 = vld [vmem:[#allocation2 + $0x2e8] ss:$16 sps:$4 sm:$0xff]   ;;  %881 = vmatprep.subr.bf16.mxu1 %v6367_v1  ;;  %v6371_v4 = vld [vmem:[#allocation2 + $0x2c4] ss:$16 sps:$4 sm:$0xff]  }
  0x61   : > { %841 = vmatpush1.bf16.msra.mxu0 %v6369_v2  ;;  %882 = vmatpush1.bf16.msra.mxu1 %v6370_v3  ;;  %v6373_v5 = vld [vmem:[#allocation2 + $0x2cc] ss:$16 sps:$4 sm:$0xff]   ;;  %v6375_v6 = vld [vmem:[#allocation2 + $0x2c0] ss:$16 sps:$4 sm:$0xff]   ;;  %v6376_v7 = vld [vmem:[#allocation2 + $0x2c8] ss:$16 sps:$4 sm:$0xff]  }
  0x62   : > { %842 = vmatprep.subr.bf16.mxu0 %v6371_v4  ;;  %883 = vmatprep.subr.bf16.mxu1 %v6373_v5  ;;  %v6377_v8 = vld [vmem:[#allocation2 + $0x2a4] ss:$16 sps:$4 sm:$0xff]   ;;  %v6379_v9 = vld [vmem:[#allocation2 + $0x2ac] ss:$16 sps:$4 sm:$0xff]   ;;  %v6381_v10 = vld [vmem:[#allocation2 + $0x2a0] ss:$16 sps:$4 sm:$0xff]  }
  0x63   : > { %v6382_v11 = vld [vmem:[#allocation2 + $0x2a8] ss:$16 sps:$4 sm:$0xff]   ;;  %v6383_v12 = vld [vmem:[#allocation2 + $0x284] ss:$16 sps:$4 sm:$0xff]   ;;  %v6385_v13 = vld [vmem:[#allocation2 + $0x28c] ss:$16 sps:$4 sm:$0xff]  }
  0x64   : > { %v6387_v14 = vld [vmem:[#allocation2 + $0x280] ss:$16 sps:$4 sm:$0xff]   ;;  %v6388_v15 = vld [vmem:[#allocation2 + $0x288] ss:$16 sps:$4 sm:$0xff]   ;;  %v6389_v16 = vld [vmem:[#allocation2 + $0x264] ss:$16 sps:$4 sm:$0xff]  }
  0x65   : > { %843 = vmatpush1.bf16.msra.mxu0 %v6375_v6  ;;  %884 = vmatpush1.bf16.msra.mxu1 %v6376_v7  ;;  %v6391_v17 = vld [vmem:[#allocation2 + $0x26c] ss:$16 sps:$4 sm:$0xff]   ;;  %v6393_v18 = vld [vmem:[#allocation2 + $0x260] ss:$16 sps:$4 sm:$0xff]   ;;  %v6394_v19 = vld [vmem:[#allocation2 + $0x268] ss:$16 sps:$4 sm:$0xff]  }
  0x66   : > { %844 = vmatprep.subr.bf16.mxu0 %v6377_v8  ;;  %885 = vmatprep.subr.bf16.mxu1 %v6379_v9  ;;  %v6395_v20 = vld [vmem:[#allocation2 + $0x244] ss:$16 sps:$4 sm:$0xff]   ;;  %v6397_v21 = vld [vmem:[#allocation2 + $0x24c] ss:$16 sps:$4 sm:$0xff]   ;;  %v6399_v22 = vld [vmem:[#allocation2 + $0x240] ss:$16 sps:$4 sm:$0xff]  }
  0x67   : > { %v6400_v23 = vld [vmem:[#allocation2 + $0x248] ss:$16 sps:$4 sm:$0xff]   ;;  %v6401_v24 = vld [vmem:[#allocation2 + $0x224] ss:$16 sps:$4 sm:$0xff]   ;;  %v6403_v25 = vld [vmem:[#allocation2 + $0x22c] ss:$16 sps:$4 sm:$0xff]  }
  0x68   : > { %v6405_v26 = vld [vmem:[#allocation2 + $0x220] ss:$16 sps:$4 sm:$0xff]   ;;  %v6406_v27 = vld [vmem:[#allocation2 + $0x228] ss:$16 sps:$4 sm:$0xff]   ;;  %v6407_v28 = vld [vmem:[#allocation2 + $0x204] ss:$16 sps:$4 sm:$0xff]  }
  0x69   : > { %845 = vmatpush1.bf16.msra.mxu0 %v6381_v10  ;;  %886 = vmatpush1.bf16.msra.mxu1 %v6382_v11  ;;  %v6409_v29 = vld [vmem:[#allocation2 + $0x20c] ss:$16 sps:$4 sm:$0xff]   ;;  %v6411_v30 = vld [vmem:[#allocation2 + $0x200] ss:$16 sps:$4 sm:$0xff]   ;;  %v6412_v31 = vld [vmem:[#allocation2 + $0x208] ss:$16 sps:$4 sm:$0xff]  }
  0x6a   : > { %846 = vmatprep.subr.bf16.mxu0 %v6383_v12  ;;  %887 = vmatprep.subr.bf16.mxu1 %v6385_v13  ;;  %v6413_v32 = vld [vmem:[#allocation2 + $0x3e4] ss:$16 sps:$4 sm:$0xff]   ;;  %p363_p9 = scmp.lt.s32.totalorder %s7631_s9, 1  ;;  %v6415_v33 = vld [vmem:[#allocation2 + $0x3ec] ss:$16 sps:$4 sm:$0xff]   ;;  %vm4759_vm0 = vcmask 1042432  }
  0x6b   : > { %v6417_v34 = vld [vmem:[#allocation2 + $0x3e0] ss:$16 sps:$4 sm:$0xff]   ;;  %v6418_v35 = vld [vmem:[#allocation2 + $0x3e8] ss:$16 sps:$4 sm:$0xff]   ;;  %v6419_v36 = vld [vmem:[#allocation2 + $0x3c4] ss:$16 sps:$4 sm:$0xff]  }
  0x6c   : > { %s364_s17 = scalar_select %p363_p9, %s7631_s9, 1  ;;  %v6421_v37 = vld [vmem:[#allocation2 + $0x3cc] ss:$16 sps:$4 sm:$0xff]   ;;  %v6423_v38 = vld [vmem:[#allocation2 + $0x3c0] ss:$16 sps:$4 sm:$0xff]   ;;  %vm5443_vm1 = vcmask 73728  }
  0x6d   : > { %847 = vmatpush1.bf16.msra.mxu0 %v6387_v14  ;;  %888 = vmatpush1.bf16.msra.mxu1 %v6388_v15  ;;  %v6424_v39 = vld [vmem:[#allocation2 + $0x3c8] ss:$16 sps:$4 sm:$0xff]   ;;  %v6425_v40 = vld [vmem:[#allocation2 + $0x3a4] ss:$16 sps:$4 sm:$0xff]   ;;  %v6427_v41 = vld [vmem:[#allocation2 + $0x3ac] ss:$16 sps:$4 sm:$0xff]  }
  0x6e   : > { %848 = vmatprep.subr.bf16.mxu0 %v6389_v16  ;;  %889 = vmatprep.subr.bf16.mxu1 %v6391_v17  ;;  %s6248_s22 = sshll.u32 %s364_s17, 4  ;;  %v6429_v42 = vld [vmem:[#allocation2 + $0x3a0] ss:$16 sps:$4 sm:$0xff]   ;;  %v6430_v43 = vld [vmem:[#allocation2 + $0x3a8] ss:$16 sps:$4 sm:$0xff]   ;;  %s361_s23 = sand.u32 1, %s7546_s28  }
  0x6f   : > { %s7738_s21 = scalar_lea.vmem %s8178_s0, %s6248_s22  ;;  %v6431_v44 = vld [vmem:[#allocation2 + $0x384] ss:$16 sps:$4 sm:$0xff]   ;;  %v6433_v45 = vld [vmem:[#allocation2 + $0x38c] ss:$16 sps:$4 sm:$0xff]   ;;  %v6435_v47 = vld [vmem:[#allocation2 + $0x380] ss:$16 sps:$4 sm:$0xff]  }
  0x70   : > { %v369_v46 = vld [vmem:[%s7738_s21] sm:$0x33]  ;;  %v6436_v49 = vld [vmem:[#allocation2 + $0x388] ss:$16 sps:$4 sm:$0xff]   ;;  %v6439_v51 = vld [vmem:[#allocation2 + $0x36c] ss:$16 sps:$4 sm:$0xff]  }
  0x71   : > { %849 = vmatpush1.bf16.msra.mxu0 %v6393_v18  ;;  %890 = vmatpush1.bf16.msra.mxu1 %v6394_v19  ;;  %v7741_v48 = vcombine.high %v369_v46, %v369_v46  ;;  %v6437_v50 = vld [vmem:[#allocation2 + $0x364] ss:$16 sps:$4 sm:$0xff]   ;;  %v6441_v54 = vld [vmem:[#allocation2 + $0x360] ss:$16 sps:$4 sm:$0xff]   ;;  %v6442_v55 = vld [vmem:[#allocation2 + $0x368] ss:$16 sps:$4 sm:$0xff]   ;;  %v7745_v62 = vcombine.low %v369_v46, %v369_v46 }
  0x72   : > { %850 = vmatprep.subr.bf16.mxu0 %v6395_v20  ;;  %891 = vmatprep.subr.bf16.mxu1 %v6397_v21  ;;  %v6443_v57 = vld [vmem:[#allocation2 + $0x344] ss:$16 sps:$4 sm:$0xff]   ;;  %v6445_v58 = vld [vmem:[#allocation2 + $0x34c] ss:$16 sps:$4 sm:$0xff]   ;;  %v6447_v60 = vld [vmem:[#allocation2 + $0x340] ss:$16 sps:$4 sm:$0xff]  }
  0x73   : > { %v512_v52 = vshrl.u32 %v7741_v48, 16  ;;  %v514_v53 = vshll.u32 %v7741_v48, 16  ;;  %v6448_v61 = vld [vmem:[#allocation2 + $0x348] ss:$16 sps:$4 sm:$0xff]   ;;  %v6449_v63 = vld [vmem:[#allocation2 + $0x324] ss:$16 sps:$4 sm:$0xff]  }
  0x74   : > { %v6451_v0 = vld [vmem:[#allocation2 + $0x32c] ss:$16 sps:$4 sm:$0xff]   ;;  %v6453_v1 = vld [vmem:[#allocation2 + $0x320] ss:$16 sps:$4 sm:$0xff]   ;;  %v6454_v2 = vld [vmem:[#allocation2 + $0x328] ss:$16 sps:$4 sm:$0xff]  }
  0x75   : > { %851 = vmatpush1.bf16.msra.mxu0 %v6399_v22  ;;  %892 = vmatpush1.bf16.msra.mxu1 %v6400_v23  ;;  %v516_v56 = vrot.slane %v514_v53, 1  ;;  %v507_v3 = vshll.u32 %v7745_v62, 16  ;;  %v6455_v4 = vld [vmem:[#allocation2 + $0x304] ss:$16 sps:$4 sm:$0xff]   ;;  %v6457_v5 = vld [vmem:[#allocation2 + $0x30c] ss:$16 sps:$4 sm:$0xff]  }
  0x76   : > { %852 = vmatprep.subr.bf16.mxu0 %v6401_v24  ;;  %893 = vmatprep.subr.bf16.mxu1 %v6403_v25  ;;  %v6459_v6 = vld [vmem:[#allocation2 + $0x300] ss:$16 sps:$4 sm:$0xff]   ;;  %v6460_v7 = vld [vmem:[#allocation2 + $0x308] ss:$16 sps:$4 sm:$0xff]   ;;  %v505_v8 = vshrl.u32 %v7745_v62, 16  ;;  %s6245_s2 = sshll.u32 %s7631_s9, 4 }
  0x77   : > { %v517_v59 = vor.u32 %v516_v56, %v512_v52  ;;  %v509_v9 = vrot.slane %v507_v3, 1  ;;  %v6465_v10 = vld [vmem:[#allocation2 + $0xe4] ss:$16 sps:$4 sm:$0xff]   ;;  %v6468_v11 = vld [vmem:[#allocation2 + $0xec] ss:$16 sps:$4 sm:$0xff]   ;;  %s362_s26 = scalar_lea.vmem [#allocation11], %s361_s23  ;;  %s8143_s12 = scalar_lea.hbm %s8186_s8, %s6245_s2 }
  0x78   : > { %v6463_v13 = vld [vmem:[#allocation2 + $0xe0] ss:$16 sps:$4 sm:$0xff]   ;;  %v6466_v14 = vld [vmem:[#allocation2 + $0xe8] ss:$16 sps:$4 sm:$0xff]   ;;  %v6471_v15 = vld [vmem:[#allocation2 + $0xc4] ss:$16 sps:$4 sm:$0xff]  }
  0x79   : > { %853 = vmatpush1.bf16.msra.mxu0 %v6405_v26  ;;  %894 = vmatpush1.bf16.msra.mxu1 %v6406_v27  ;;  %v510_v12 = vor.u32 %v509_v9, %v505_v8  ;;  %v6474_v16 = vld [vmem:[#allocation2 + $0xcc] ss:$16 sps:$4 sm:$0xff]   ;;  %v6469_v17 = vld [vmem:[#allocation2 + $0xc0] ss:$16 sps:$4 sm:$0xff]   ;;  %v6472_v18 = vld [vmem:[#allocation2 + $0xc8] ss:$16 sps:$4 sm:$0xff]  }
  0x7a   : > { %854 = vmatprep.subr.bf16.mxu0 %v6407_v28  ;;  %895 = vmatprep.subr.bf16.mxu1 %v6409_v29  ;;  %v6477_v19 = vld [vmem:[#allocation2 + $0xa4] ss:$16 sps:$4 sm:$0xff]   ;;  %v6480_v20 = vld [vmem:[#allocation2 + $0xac] ss:$16 sps:$4 sm:$0xff]   ;;  %v6475_v21 = vld [vmem:[#allocation2 + $0xa0] ss:$16 sps:$4 sm:$0xff]  }
  0x7b   : > { %872 = vmatprep.mubr.bf16.mxu0 %v517_v59  ;;  %913 = vmatprep.mubr.bf16.mxu1 %v517_v59  ;;  %v6478_v22 = vld [vmem:[#allocation2 + $0xa8] ss:$16 sps:$4 sm:$0xff]   ;;  %v6483_v23 = vld [vmem:[#allocation2 + $0x84] ss:$16 sps:$4 sm:$0xff]   ;;  %v6486_v24 = vld [vmem:[#allocation2 + $0x8c] ss:$16 sps:$4 sm:$0xff]  }
  0x7c   : > { %v6481_v25 = vld [vmem:[#allocation2 + $0x80] ss:$16 sps:$4 sm:$0xff]   ;;  %v6484_v26 = vld [vmem:[#allocation2 + $0x88] ss:$16 sps:$4 sm:$0xff]   ;;  %v6489_v27 = vld [vmem:[#allocation2 + $0x64] ss:$16 sps:$4 sm:$0xff]  }
  0x7d   : > { %855 = vmatpush1.bf16.msra.mxu0 %v6411_v30  ;;  %896 = vmatpush1.bf16.msra.mxu1 %v6412_v31  ;;  %v6492_v28 = vld [vmem:[#allocation2 + $0x6c] ss:$16 sps:$4 sm:$0xff]   ;;  %v6487_v29 = vld [vmem:[#allocation2 + $0x60] ss:$16 sps:$4 sm:$0xff]   ;;  %v6490_v30 = vld [vmem:[#allocation2 + $0x68] ss:$16 sps:$4 sm:$0xff]  }
  0x7e   : > { %856 = vmatprep.subr.bf16.mxu0 %v6413_v32  ;;  %897 = vmatprep.subr.bf16.mxu1 %v6415_v33  ;;  %v6495_v31 = vld [vmem:[#allocation2 + $0x44] ss:$16 sps:$4 sm:$0xff]   ;;  %v6498_v32 = vld [vmem:[#allocation2 + $0x4c] ss:$16 sps:$4 sm:$0xff]   ;;  %v6493_v33 = vld [vmem:[#allocation2 + $0x40] ss:$16 sps:$4 sm:$0xff]  }
  0x7f   : > { %v6514_v46 = vld [vmem:[#allocation2 + $0x1e8] ss:$16 sps:$4 sm:$0xff]   ;;  %v6528_v52 = vld [vmem:[#allocation2 + $0x1ac] ss:$16 sps:$4 sm:$0xff]   ;;  %v6523_v53 = vld [vmem:[#allocation2 + $0x1a0] ss:$16 sps:$4 sm:$0xff]  }
  0x80   : > { %v6534_v56 = vld [vmem:[#allocation2 + $0x18c] ss:$16 sps:$4 sm:$0xff]   ;;  %v6537_v59 = vld [vmem:[#allocation2 + $0x164] ss:$16 sps:$4 sm:$0xff]   ;;  %v6544_v3 = vld [vmem:[#allocation2 + $0x148] ss:$16 sps:$4 sm:$0xff]  }
  0x81   : > { %857 = vmatpush2.bf16.msra.mxu0 %v6417_v34  ;;  %898 = vmatpush2.bf16.msra.mxu1 %v6418_v35  ;;  %v6496_v34 = vld [vmem:[#allocation2 + $0x48] ss:$16 sps:$4 sm:$0xff]   ;;  %v6501_v35 = vld [vmem:[#allocation2 + $0x24] ss:$16 sps:$4 sm:$0xff]   ;;  %v6558_v9 = vld [vmem:[#allocation2 + $0x10c] ss:$16 sps:$4 sm:$0xff]  }
  0x82   : > { %858 = vmatprep.subr.bf16.mxu0 %v6419_v36  ;;  %899 = vmatprep.subr.bf16.mxu1 %v6421_v37  ;;  %v6504_v36 = vld [vmem:[#allocation2 + $0x2c] ss:$16 sps:$4 sm:$0xff]   ;;  %v6499_v37 = vld [vmem:[#allocation2 + $0x20] ss:$16 sps:$4 sm:$0xff]   ;;  %v6555_v8 = vld [vmem:[#allocation2 + $0x104] ss:$16 sps:$4 sm:$0xff]  }
  0x83   : > { %s5458_s17 = sshll.u32 %s362_s26, 4  ;;  %p8204_p5 = scmp.ne.s32.totalorder %s8191_s15, 0  ;;  %s5459_s17 = int_to_ptr.vmem [resolvable:$true] %s5458_s17 }
  0x84   : > { %s7482_s13 = scalar_lea.vmem %s5459_s17, 16  ;;  %s7564_s9 = smov [#allocation11]  }
  0x85   : > { %859 = vmatpush2.bf16.msra.mxu0 %v6423_v38  ;;  %900 = vmatpush2.bf16.msra.mxu1 %v6424_v39  ;;  %v6502_v38 = vld [vmem:[#allocation2 + $0x28] ss:$16 sps:$4 sm:$0xff]   ;;  %v6507_v39 = vld [vmem:[#allocation2 + $0x4] ss:$16 sps:$4 sm:$0xff]   ;;  %p7483_p4 = scmp.ne.s32.totalorder %s5459_s17, %s7482_s13  ;;  %s7486_s18 = sshll.u32 %s7564_s9, 4  ;;  %s7487_s18 = int_to_ptr.vmem [resolvable:$false] %s7486_s18 }
  0x86   : > { %860 = vmatprep.subr.bf16.mxu0 %v6425_v40  ;;  %901 = vmatprep.subr.bf16.mxu1 %v6427_v41  ;;  %v6510_v40 = vld [vmem:[#allocation2 + $0xc] ss:$16 sps:$4 sm:$0xff]   ;;  %v6505_v41 = vld [vmem:[#allocation2] ss:$16 sps:$4 sm:$0xff]   ;;  %s7488_s20 = scalar_lea.vmem %s7487_s18, 32  ;;  %p7489_p7 = scmp.lt.s32.totalorder %s5459_s17, %s7487_s18 }
  0x87   : > { %p7484_p6 = pnand %p7483_p4, %p8204_p5  ;;  %p7490_p8 = scmp.lt.s32.totalorder %s7488_s20, %s7482_s13 }
  0x89   : > { %861 = vmatpush2.bf16.msra.mxu0 %v6429_v42  ;;  %902 = vmatpush2.bf16.msra.mxu1 %v6430_v43  ;;  %v6508_v42 = vld [vmem:[#allocation2 + $0x8] ss:$16 sps:$4 sm:$0xff]   ;;  %v6513_v43 = vld [vmem:[#allocation2 + $0x1e4] ss:$16 sps:$4 sm:$0xff]   ;;  %p7485_p10 = pneg %p7484_p6  ;;  %p7491_p11 = por %p7490_p8, %p7489_p7 }
  0x8a   : > { %862 = vmatprep.subr.bf16.mxu0 %v6431_v44  ;;  %903 = vmatprep.subr.bf16.mxu1 %v6433_v45  ;;  %v6516_v44 = vld [vmem:[#allocation2 + $0x1ec] ss:$16 sps:$4 sm:$0xff]   ;;  %v6511_v45 = vld [vmem:[#allocation2 + $0x1e0] ss:$16 sps:$4 sm:$0xff]  }
  0x8b   : > { %p7492_p0 = pnand %p7491_p11, %p7485_p10 }
  0x8d   : > { %863 = vmatpush2.bf16.msra.mxu0 %v6435_v47  ;;  %904 = vmatpush2.bf16.msra.mxu1 %v6436_v49  ;;  %v6519_v47 = vld [vmem:[#allocation2 + $0x1c4] ss:$16 sps:$4 sm:$0xff]   ;;  %v6517_v49 = vld [vmem:[#allocation2 + $0x1c0] ss:$16 sps:$4 sm:$0xff]  }
  0x8e   : > { %864 = vmatprep.subr.bf16.mxu0 %v6437_v50  ;;  %905 = vmatprep.subr.bf16.mxu1 %v6439_v51  ;;  %v6520_v50 = vld [vmem:[#allocation2 + $0x1c8] ss:$16 sps:$4 sm:$0xff]   ;;  %v6525_v51 = vld [vmem:[#allocation2 + $0x1a4] ss:$16 sps:$4 sm:$0xff]  }
  0x91   : > { %865 = vmatpush2.bf16.msra.mxu0 %v6441_v54  ;;  %906 = vmatpush2.bf16.msra.mxu1 %v6442_v55  ;;  %v6526_v54 = vld [vmem:[#allocation2 + $0x1a8] ss:$16 sps:$4 sm:$0xff]   ;;  %v6531_v55 = vld [vmem:[#allocation2 + $0x184] ss:$16 sps:$4 sm:$0xff]  }
  0x92   : > { %866 = vmatprep.subr.bf16.mxu0 %v6443_v57  ;;  %907 = vmatprep.subr.bf16.mxu1 %v6445_v58  ;;  %v6529_v57 = vld [vmem:[#allocation2 + $0x180] ss:$16 sps:$4 sm:$0xff]   ;;  %v6532_v58 = vld [vmem:[#allocation2 + $0x188] ss:$16 sps:$4 sm:$0xff]  }
  0x95   : > { %867 = vmatpush2.bf16.msra.mxu0 %v6447_v60  ;;  %908 = vmatpush2.bf16.msra.mxu1 %v6448_v61  ;;  %v6540_v60 = vld [vmem:[#allocation2 + $0x16c] ss:$16 sps:$4 sm:$0xff]   ;;  %v6535_v61 = vld [vmem:[#allocation2 + $0x160] ss:$16 sps:$4 sm:$0xff]  }
  0x96   : > { %868 = vmatprep.subr.bf16.mxu0 %v6449_v63  ;;  %909 = vmatprep.subr.bf16.mxu1 %v6451_v0  ;;  %v6538_v63 = vld [vmem:[#allocation2 + $0x168] ss:$16 sps:$4 sm:$0xff]   ;;  %v6543_v0 = vld [vmem:[#allocation2 + $0x144] ss:$16 sps:$4 sm:$0xff]  }
  0x99   : > { %869 = vmatpush2.bf16.msra.mxu0 %v6453_v1  ;;  %910 = vmatpush2.bf16.msra.mxu1 %v6454_v2  ;;  %v6546_v1 = vld [vmem:[#allocation2 + $0x14c] ss:$16 sps:$4 sm:$0xff]   ;;  %v6541_v2 = vld [vmem:[#allocation2 + $0x140] ss:$16 sps:$4 sm:$0xff]  }
  0x9a   : > { %870 = vmatprep.subr.bf16.mxu0 %v6455_v4  ;;  %911 = vmatprep.subr.bf16.mxu1 %v6457_v5  ;;  %v6549_v4 = vld [vmem:[#allocation2 + $0x124] ss:$16 sps:$4 sm:$0xff]   ;;  %v6552_v5 = vld [vmem:[#allocation2 + $0x12c] ss:$16 sps:$4 sm:$0xff]  }
  0x9d   : > { %871 = vmatpush2.bf16.msra.mxu0 %v6459_v6  ;;  %912 = vmatpush2.bf16.msra.mxu1 %v6460_v7  ;;  %v6547_v6 = vld [vmem:[#allocation2 + $0x120] ss:$16 sps:$4 sm:$0xff]   ;;  %v6550_v7 = vld [vmem:[#allocation2 + $0x128] ss:$16 sps:$4 sm:$0xff]  }
  0x9e   : > { %1244 = vmatprep.subr.bf16.mxu0 %v6465_v10  ;;  %1285 = vmatprep.subr.bf16.mxu1 %v6468_v11  ;;  %v6553_v10 = vld [vmem:[#allocation2 + $0x100] ss:$16 sps:$4 sm:$0xff]   ;;  %v6556_v11 = vld [vmem:[#allocation2 + $0x108] ss:$16 sps:$4 sm:$0xff]  }
  0xa0   : > { %873 = vmatmul.mubr.bf16.vlgmr.msra.gmra.mxu0 %v510_v12  ;;  %914 = vmatmul.mubr.bf16.vlgmr.msra.gmra.mxu1 %v510_v12  ;;  %v6561_v12 = vld [vmem:[#allocation2 + $0x4e4] ss:$16 sps:$4 sm:$0xff]  }
  0xa1   : > { %1245 = vmatpush1.bf16.msra.mxu0 %v6463_v13  ;;  %1286 = vmatpush1.bf16.msra.mxu1 %v6466_v14  ;;  %v6564_v13 = vld [vmem:[#allocation2 + $0x4ec] ss:$16 sps:$4 sm:$0xff]   ;;  %v6559_v14 = vld [vmem:[#allocation2 + $0x4e0] ss:$16 sps:$4 sm:$0xff]  }
  0xa2   : > { %1246 = vmatprep.subr.bf16.mxu0 %v6471_v15  ;;  %1287 = vmatprep.subr.bf16.mxu1 %v6474_v16  ;;  %v6562_v15 = vld [vmem:[#allocation2 + $0x4e8] ss:$16 sps:$4 sm:$0xff]   ;;  %v6567_v16 = vld [vmem:[#allocation2 + $0x4c4] ss:$16 sps:$4 sm:$0xff]  }
  0xa3   : > { %1276 = vmatprep.mubr.bf16.mxu0 %v7741_v48  ;;  %1317 = vmatprep.mubr.bf16.mxu1 %v7741_v48  ;;  %v6522_v48 = vld [vmem:[#allocation2 + $0x1cc] ss:$16 sps:$4 sm:$0xff]  }
  0xa5   : > { %1247 = vmatpush1.bf16.msra.mxu0 %v6469_v17  ;;  %1288 = vmatpush1.bf16.msra.mxu1 %v6472_v18  ;;  %v6570_v17 = vld [vmem:[#allocation2 + $0x4cc] ss:$16 sps:$4 sm:$0xff]   ;;  %v7752_v18 = vld [vmem:[%s7738_s21] sm:$0x66] }
  0xa6   : > { %1248 = vmatprep.subr.bf16.mxu0 %v6477_v19  ;;  %1289 = vmatprep.subr.bf16.mxu1 %v6480_v20  ;;  %v7756_v19 = vcombine.high %v7752_v18, %v7752_v18  ;;  %v6565_v20 = vld [vmem:[#allocation2 + $0x4c0] ss:$16 sps:$4 sm:$0xff]  }
  0xa9   : > { %1249 = vmatpush1.bf16.msra.mxu0 %v6475_v21  ;;  %1290 = vmatpush1.bf16.msra.mxu1 %v6478_v22  ;;  %v6568_v21 = vld [vmem:[#allocation2 + $0x4c8] ss:$16 sps:$4 sm:$0xff]   ;;  %v1398_v22 = vrot.slane %v7756_v19, 1 }
  0xaa   : > { %1250 = vmatprep.subr.bf16.mxu0 %v6483_v23  ;;  %1291 = vmatprep.subr.bf16.mxu1 %v6486_v24  ;;  %v6573_v23 = vld [vmem:[#allocation2 + $0x4a4] ss:$16 sps:$4 sm:$0xff]   ;;  %v6576_v24 = vld [vmem:[#allocation2 + $0x4ac] ss:$16 sps:$4 sm:$0xff]  }
  0xad   : > { %1251 = vmatpush1.bf16.msra.mxu0 %v6481_v25  ;;  %1292 = vmatpush1.bf16.msra.mxu1 %v6484_v26  ;;  %v6571_v25 = vld [vmem:[#allocation2 + $0x4a0] ss:$16 sps:$4 sm:$0xff]   ;;  %v6574_v26 = vld [vmem:[#allocation2 + $0x4a8] ss:$16 sps:$4 sm:$0xff]  }
  0xae   : > { %1252 = vmatprep.subr.bf16.mxu0 %v6489_v27  ;;  %1293 = vmatprep.subr.bf16.mxu1 %v6492_v28  ;;  %v6579_v27 = vld [vmem:[#allocation2 + $0x484] ss:$16 sps:$4 sm:$0xff]   ;;  %v6577_v28 = vld [vmem:[#allocation2 + $0x480] ss:$16 sps:$4 sm:$0xff]  }
  0xb1   : > { %1253 = vmatpush1.bf16.msra.mxu0 %v6487_v29  ;;  %1294 = vmatpush1.bf16.msra.mxu1 %v6490_v30  ;;  %v6580_v29 = vld [vmem:[#allocation2 + $0x488] ss:$16 sps:$4 sm:$0xff]   ;;  %v6585_v30 = vld [vmem:[#allocation2 + $0x464] ss:$16 sps:$4 sm:$0xff]  }
  0xb2   : > { %1254 = vmatprep.subr.bf16.mxu0 %v6495_v31  ;;  %1295 = vmatprep.subr.bf16.mxu1 %v6498_v32  ;;  %v6588_v31 = vld [vmem:[#allocation2 + $0x46c] ss:$16 sps:$4 sm:$0xff]   ;;  %v6583_v32 = vld [vmem:[#allocation2 + $0x460] ss:$16 sps:$4 sm:$0xff]  }
  0xb5   : > { %1255 = vmatpush1.bf16.msra.mxu0 %v6493_v33  ;;  %1296 = vmatpush1.bf16.msra.mxu1 %v6496_v34  ;;  %v6586_v33 = vld [vmem:[#allocation2 + $0x468] ss:$16 sps:$4 sm:$0xff]   ;;  %v6591_v34 = vld [vmem:[#allocation2 + $0x444] ss:$16 sps:$4 sm:$0xff]  }
  0xb6   : > { %1256 = vmatprep.subr.bf16.mxu0 %v6501_v35  ;;  %1297 = vmatprep.subr.bf16.mxu1 %v6504_v36  ;;  %v6594_v35 = vld [vmem:[#allocation2 + $0x44c] ss:$16 sps:$4 sm:$0xff]   ;;  %v6589_v36 = vld [vmem:[#allocation2 + $0x440] ss:$16 sps:$4 sm:$0xff]  }
  0xb9   : > { %1257 = vmatpush1.bf16.msra.mxu0 %v6499_v37  ;;  %1298 = vmatpush1.bf16.msra.mxu1 %v6502_v38  ;;  %v6592_v37 = vld [vmem:[#allocation2 + $0x448] ss:$16 sps:$4 sm:$0xff]   ;;  %v6597_v38 = vld [vmem:[#allocation2 + $0x424] ss:$16 sps:$4 sm:$0xff]  }
  0xba   : > { %1258 = vmatprep.subr.bf16.mxu0 %v6507_v39  ;;  %1299 = vmatprep.subr.bf16.mxu1 %v6510_v40  ;;  %v6600_v39 = vld [vmem:[#allocation2 + $0x42c] ss:$16 sps:$4 sm:$0xff]   ;;  %v6595_v40 = vld [vmem:[#allocation2 + $0x420] ss:$16 sps:$4 sm:$0xff]  }
  0xbd   : > { %1259 = vmatpush1.bf16.msra.mxu0 %v6505_v41  ;;  %1300 = vmatpush1.bf16.msra.mxu1 %v6508_v42  ;;  %v6598_v41 = vld [vmem:[#allocation2 + $0x428] ss:$16 sps:$4 sm:$0xff]   ;;  %v6603_v42 = vld [vmem:[#allocation2 + $0x404] ss:$16 sps:$4 sm:$0xff]  }
  0xbe   : > { %1260 = vmatprep.subr.bf16.mxu0 %v6513_v43  ;;  %1301 = vmatprep.subr.bf16.mxu1 %v6516_v44  ;;  %v6606_v43 = vld [vmem:[#allocation2 + $0x40c] ss:$16 sps:$4 sm:$0xff]   ;;  %v6601_v44 = vld [vmem:[#allocation2 + $0x400] ss:$16 sps:$4 sm:$0xff]  }
  0xc1   : > { %1261 = vmatpush2.bf16.msra.mxu0 %v6511_v45  ;;  %1302 = vmatpush2.bf16.msra.mxu1 %v6514_v46  ;;  %v6604_v45 = vld [vmem:[#allocation2 + $0x408] ss:$16 sps:$4 sm:$0xff]   ;;  %v6609_v46 = vld [vmem:[#allocation2 + $0x5e4] ss:$16 sps:$4 sm:$0xff]  }
  0xc2   : > { %1262 = vmatprep.subr.bf16.mxu0 %v6519_v47  ;;  %1303 = vmatprep.subr.bf16.mxu1 %v6522_v48  ;;  %v6612_v47 = vld [vmem:[#allocation2 + $0x5ec] ss:$16 sps:$4 sm:$0xff]   ;;  %v6607_v48 = vld [vmem:[#allocation2 + $0x5e0] ss:$16 sps:$4 sm:$0xff]  }
  0xc5   : > { %1263 = vmatpush2.bf16.msra.mxu0 %v6517_v49  ;;  %1304 = vmatpush2.bf16.msra.mxu1 %v6520_v50  ;;  %v6610_v49 = vld [vmem:[#allocation2 + $0x5e8] ss:$16 sps:$4 sm:$0xff]   ;;  %v6615_v50 = vld [vmem:[#allocation2 + $0x5c4] ss:$16 sps:$4 sm:$0xff]  }
  0xc6   : > { %1264 = vmatprep.subr.bf16.mxu0 %v6525_v51  ;;  %1305 = vmatprep.subr.bf16.mxu1 %v6528_v52  ;;  %v6618_v51 = vld [vmem:[#allocation2 + $0x5cc] ss:$16 sps:$4 sm:$0xff]   ;;  %v6613_v52 = vld [vmem:[#allocation2 + $0x5c0] ss:$16 sps:$4 sm:$0xff]  }
  0xc9   : > { %1265 = vmatpush2.bf16.msra.mxu0 %v6523_v53  ;;  %1306 = vmatpush2.bf16.msra.mxu1 %v6526_v54  ;;  %v6616_v53 = vld [vmem:[#allocation2 + $0x5c8] ss:$16 sps:$4 sm:$0xff]   ;;  %v6621_v54 = vld [vmem:[#allocation2 + $0x5a4] ss:$16 sps:$4 sm:$0xff]  }
  0xca   : > { %1266 = vmatprep.subr.bf16.mxu0 %v6531_v55  ;;  %1307 = vmatprep.subr.bf16.mxu1 %v6534_v56  ;;  %v6624_v55 = vld [vmem:[#allocation2 + $0x5ac] ss:$16 sps:$4 sm:$0xff]   ;;  %v6619_v56 = vld [vmem:[#allocation2 + $0x5a0] ss:$16 sps:$4 sm:$0xff]  }
  0xcd   : > { %1267 = vmatpush2.bf16.msra.mxu0 %v6529_v57  ;;  %1308 = vmatpush2.bf16.msra.mxu1 %v6532_v58  ;;  %v6622_v57 = vld [vmem:[#allocation2 + $0x5a8] ss:$16 sps:$4 sm:$0xff]   ;;  %v6627_v58 = vld [vmem:[#allocation2 + $0x584] ss:$16 sps:$4 sm:$0xff]  }
  0xce   : > { %1268 = vmatprep.subr.bf16.mxu0 %v6537_v59  ;;  %1309 = vmatprep.subr.bf16.mxu1 %v6540_v60  ;;  %v6630_v59 = vld [vmem:[#allocation2 + $0x58c] ss:$16 sps:$4 sm:$0xff]   ;;  %v6625_v60 = vld [vmem:[#allocation2 + $0x580] ss:$16 sps:$4 sm:$0xff]  }
  0xd1   : > { %1269 = vmatpush2.bf16.msra.mxu0 %v6535_v61  ;;  %1310 = vmatpush2.bf16.msra.mxu1 %v6538_v63  ;;  %v6628_v61 = vld [vmem:[#allocation2 + $0x588] ss:$16 sps:$4 sm:$0xff]   ;;  %v6633_v63 = vld [vmem:[#allocation2 + $0x564] ss:$16 sps:$4 sm:$0xff]  }
  0xd2   : > { %1270 = vmatprep.subr.bf16.mxu0 %v6543_v0  ;;  %1311 = vmatprep.subr.bf16.mxu1 %v6546_v1  ;;  %v6636_v0 = vld [vmem:[#allocation2 + $0x56c] ss:$16 sps:$4 sm:$0xff]   ;;  %v6631_v1 = vld [vmem:[#allocation2 + $0x560] ss:$16 sps:$4 sm:$0xff]  }
  0xd5   : > { %1271 = vmatpush2.bf16.msra.mxu0 %v6541_v2  ;;  %1312 = vmatpush2.bf16.msra.mxu1 %v6544_v3  ;;  %v6634_v2 = vld [vmem:[#allocation2 + $0x568] ss:$16 sps:$4 sm:$0xff]   ;;  %v6639_v3 = vld [vmem:[#allocation2 + $0x544] ss:$16 sps:$4 sm:$0xff]  }
  0xd6   : > { %1272 = vmatprep.subr.bf16.mxu0 %v6549_v4  ;;  %1313 = vmatprep.subr.bf16.mxu1 %v6552_v5  ;;  %v6642_v4 = vld [vmem:[#allocation2 + $0x54c] ss:$16 sps:$4 sm:$0xff]   ;;  %v6637_v5 = vld [vmem:[#allocation2 + $0x540] ss:$16 sps:$4 sm:$0xff]  }
  0xd9   : > { %1273 = vmatpush2.bf16.msra.mxu0 %v6547_v6  ;;  %1314 = vmatpush2.bf16.msra.mxu1 %v6550_v7  ;;  %v6640_v6 = vld [vmem:[#allocation2 + $0x548] ss:$16 sps:$4 sm:$0xff]   ;;  %v6645_v7 = vld [vmem:[#allocation2 + $0x524] ss:$16 sps:$4 sm:$0xff]  }
  0xda   : > { %1274 = vmatprep.subr.bf16.mxu0 %v6555_v8  ;;  %1315 = vmatprep.subr.bf16.mxu1 %v6558_v9  ;;  %v6648_v8 = vld [vmem:[#allocation2 + $0x52c] ss:$16 sps:$4 sm:$0xff]   ;;  %v6643_v9 = vld [vmem:[#allocation2 + $0x520] ss:$16 sps:$4 sm:$0xff]  }
  0xdd   : > { %1275 = vmatpush2.bf16.msra.mxu0 %v6553_v10  ;;  %1316 = vmatpush2.bf16.msra.mxu1 %v6556_v11  ;;  %v6646_v10 = vld [vmem:[#allocation2 + $0x528] ss:$16 sps:$4 sm:$0xff]   ;;  %v6651_v11 = vld [vmem:[#allocation2 + $0x504] ss:$16 sps:$4 sm:$0xff]  }
  0xde   : > { %1721 = vmatprep.subr.bf16.mxu0 %v6561_v12  ;;  %1762 = vmatprep.subr.bf16.mxu1 %v6564_v13  ;;  %v6654_v12 = vld [vmem:[#allocation2 + $0x50c] ss:$16 sps:$4 sm:$0xff]   ;;  %v1881_v13 = vshrl.u32 %v7756_v19, 16 }
  0xe0   : > { %1277 = vmatmul.mubr.bf16.vlgmr.msra.gmra.mxu0 %v7745_v62  ;;  %1318 = vmatmul.mubr.bf16.vlgmr.msra.gmra.mxu1 %v7745_v62  ;;  %v6582_v62 = vld [vmem:[#allocation2 + $0x48c] ss:$16 sps:$4 sm:$0xff]  }
  0xe1   : > { %1722 = vmatpush1.bf16.msra.mxu0 %v6559_v14  ;;  %1763 = vmatpush1.bf16.msra.mxu1 %v6562_v15  ;;  %v1884_v14 = vshll.u32 %v7756_v19, 16  ;;  %v6649_v15 = vld [vmem:[#allocation2 + $0x500] ss:$16 sps:$4 sm:$0xff]   ;;  %v6660_v19 = vld [vmem:[#allocation2 + $0x6e8] ss:$16 sps:$4 sm:$0xff]  }
  0xe2   : > { %1723 = vmatprep.subr.bf16.mxu0 %v6567_v16  ;;  %1764 = vmatprep.subr.bf16.mxu1 %v6570_v17  ;;  %v7765_v16 = vcombine.low %v7752_v18, %v7752_v18  ;;  %v6652_v17 = vld [vmem:[#allocation2 + $0x508] ss:$16 sps:$4 sm:$0xff]   ;;  %v6668_v18 = vld [vmem:[#allocation2 + $0x6cc] ss:$16 sps:$4 sm:$0xff]  }
  0xe3   : > { %1753 = vmatprep.mubr.bf16.mxu0 %v1398_v22  ;;  %1794 = vmatprep.mubr.bf16.mxu1 %v1398_v22  ;;  %v1883_v22 = vrot.slane %v1881_v13, 1  ;;  %v6738_v13 = vld [vmem:[#allocation2 + $0x748] ss:$16 sps:$4 sm:$0xff]  }
  0xe5   : > { %1724 = vmatpush1.bf16.msra.mxu0 %v6565_v20  ;;  %1765 = vmatpush1.bf16.msra.mxu1 %v6568_v21  ;;  %v6659_v20 = vld [vmem:[#allocation2 + $0x6e4] ss:$16 sps:$4 sm:$0xff]   ;;  %v6662_v21 = vld [vmem:[#allocation2 + $0x6ec] ss:$16 sps:$4 sm:$0xff]  }
  0xe6   : > { %1725 = vmatprep.subr.bf16.mxu0 %v6573_v23  ;;  %1766 = vmatprep.subr.bf16.mxu1 %v6576_v24  ;;  %v1886_v23 = vrot.slane %v1884_v14, 2  ;;  %v1397_v24 = vrot.slane %v7765_v16, 1  ;;  %v6743_v14 = vld [vmem:[#allocation2 + $0x724] ss:$16 sps:$4 sm:$0xff]  }
  0xe9   : > { %1726 = vmatpush1.bf16.msra.mxu0 %v6571_v25  ;;  %1767 = vmatpush1.bf16.msra.mxu1 %v6574_v26  ;;  %v6657_v25 = vld [vmem:[#allocation2 + $0x6e0] ss:$16 sps:$4 sm:$0xff]   ;;  %v6665_v26 = vld [vmem:[#allocation2 + $0x6c4] ss:$16 sps:$4 sm:$0xff]  }
  0xea   : > { %1727 = vmatprep.subr.bf16.mxu0 %v6579_v27  ;;  %1768 = vmatprep.subr.bf16.mxu1 %v6582_v62  ;;  %v1887_v27 = vor.u32 %v1886_v23, %v1883_v22  ;;  %v6663_v62 = vld [vmem:[#allocation2 + $0x6c0] ss:$16 sps:$4 sm:$0xff]   ;;  %v6744_v22 = vld [vmem:[#allocation2 + $0x728] ss:$16 sps:$4 sm:$0xff]   ;;  %v6749_v23 = vld [vmem:[#allocation2 + $0x704] ss:$16 sps:$4 sm:$0xff]  }
  0xed   : > { %1728 = vmatpush1.bf16.msra.mxu0 %v6577_v28  ;;  %1769 = vmatpush1.bf16.msra.mxu1 %v6580_v29  ;;  %v6666_v28 = vld [vmem:[#allocation2 + $0x6c8] ss:$16 sps:$4 sm:$0xff]   ;;  %v6671_v29 = vld [vmem:[#allocation2 + $0x6a4] ss:$16 sps:$4 sm:$0xff]  }
  0xee   : > { %1729 = vmatprep.subr.bf16.mxu0 %v6585_v30  ;;  %1770 = vmatprep.subr.bf16.mxu1 %v6588_v31  ;;  %v6674_v30 = vld [vmem:[#allocation2 + $0x6ac] ss:$16 sps:$4 sm:$0xff]   ;;  %v6669_v31 = vld [vmem:[#allocation2 + $0x6a0] ss:$16 sps:$4 sm:$0xff]  }
  0xf1   : > { %1730 = vmatpush1.bf16.msra.mxu0 %v6583_v32  ;;  %1771 = vmatpush1.bf16.msra.mxu1 %v6586_v33  ;;  %v6672_v32 = vld [vmem:[#allocation2 + $0x6a8] ss:$16 sps:$4 sm:$0xff]   ;;  %v6677_v33 = vld [vmem:[#allocation2 + $0x684] ss:$16 sps:$4 sm:$0xff]  }
  0xf2   : > { %1731 = vmatprep.subr.bf16.mxu0 %v6591_v34  ;;  %1772 = vmatprep.subr.bf16.mxu1 %v6594_v35  ;;  %v6680_v34 = vld [vmem:[#allocation2 + $0x68c] ss:$16 sps:$4 sm:$0xff]   ;;  %v6675_v35 = vld [vmem:[#allocation2 + $0x680] ss:$16 sps:$4 sm:$0xff]  }
  0xf5   : > { %1732 = vmatpush1.bf16.msra.mxu0 %v6589_v36  ;;  %1773 = vmatpush1.bf16.msra.mxu1 %v6592_v37  ;;  %v6678_v36 = vld [vmem:[#allocation2 + $0x688] ss:$16 sps:$4 sm:$0xff]   ;;  %v6683_v37 = vld [vmem:[#allocation2 + $0x664] ss:$16 sps:$4 sm:$0xff]  }
  0xf6   : > { %1733 = vmatprep.subr.bf16.mxu0 %v6597_v38  ;;  %1774 = vmatprep.subr.bf16.mxu1 %v6600_v39  ;;  %v6686_v38 = vld [vmem:[#allocation2 + $0x66c] ss:$16 sps:$4 sm:$0xff]   ;;  %v6681_v39 = vld [vmem:[#allocation2 + $0x660] ss:$16 sps:$4 sm:$0xff]  }
  0xf9   : > { %1734 = vmatpush1.bf16.msra.mxu0 %v6595_v40  ;;  %1775 = vmatpush1.bf16.msra.mxu1 %v6598_v41  ;;  %v6684_v40 = vld [vmem:[#allocation2 + $0x668] ss:$16 sps:$4 sm:$0xff]   ;;  %v6689_v41 = vld [vmem:[#allocation2 + $0x644] ss:$16 sps:$4 sm:$0xff]  }
  0xfa   : > { %1735 = vmatprep.subr.bf16.mxu0 %v6603_v42  ;;  %1776 = vmatprep.subr.bf16.mxu1 %v6606_v43  ;;  %v6692_v42 = vld [vmem:[#allocation2 + $0x64c] ss:$16 sps:$4 sm:$0xff]   ;;  %v6687_v43 = vld [vmem:[#allocation2 + $0x640] ss:$16 sps:$4 sm:$0xff]  }
  0xfd   : > { %1736 = vmatpush1.bf16.msra.mxu0 %v6601_v44  ;;  %1777 = vmatpush1.bf16.msra.mxu1 %v6604_v45  ;;  %v6690_v44 = vld [vmem:[#allocation2 + $0x648] ss:$16 sps:$4 sm:$0xff]   ;;  %v6695_v45 = vld [vmem:[#allocation2 + $0x624] ss:$16 sps:$4 sm:$0xff]  }
  0xfe   : > { %1737 = vmatprep.subr.bf16.mxu0 %v6609_v46  ;;  %1778 = vmatprep.subr.bf16.mxu1 %v6612_v47  ;;  %v6698_v46 = vld [vmem:[#allocation2 + $0x62c] ss:$16 sps:$4 sm:$0xff]   ;;  %v6693_v47 = vld [vmem:[#allocation2 + $0x620] ss:$16 sps:$4 sm:$0xff]  }
 0x101   : > { %1738 = vmatpush2.bf16.msra.mxu0 %v6607_v48  ;;  %1779 = vmatpush2.bf16.msra.mxu1 %v6610_v49  ;;  %v6696_v48 = vld [vmem:[#allocation2 + $0x628] ss:$16 sps:$4 sm:$0xff]   ;;  %v6701_v49 = vld [vmem:[#allocation2 + $0x604] ss:$16 sps:$4 sm:$0xff]  }
 0x102   : > { %1739 = vmatprep.subr.bf16.mxu0 %v6615_v50  ;;  %1780 = vmatprep.subr.bf16.mxu1 %v6618_v51  ;;  %v6704_v50 = vld [vmem:[#allocation2 + $0x60c] ss:$16 sps:$4 sm:$0xff]   ;;  %v6699_v51 = vld [vmem:[#allocation2 + $0x600] ss:$16 sps:$4 sm:$0xff]  }
 0x105   : > { %1740 = vmatpush2.bf16.msra.mxu0 %v6613_v52  ;;  %1781 = vmatpush2.bf16.msra.mxu1 %v6616_v53  ;;  %v6702_v52 = vld [vmem:[#allocation2 + $0x608] ss:$16 sps:$4 sm:$0xff]   ;;  %v6707_v53 = vld [vmem:[#allocation2 + $0x7e4] ss:$16 sps:$4 sm:$0xff]  }
 0x106   : > { %1741 = vmatprep.subr.bf16.mxu0 %v6621_v54  ;;  %1782 = vmatprep.subr.bf16.mxu1 %v6624_v55  ;;  %v6710_v54 = vld [vmem:[#allocation2 + $0x7ec] ss:$16 sps:$4 sm:$0xff]   ;;  %v6705_v55 = vld [vmem:[#allocation2 + $0x7e0] ss:$16 sps:$4 sm:$0xff]  }
 0x109   : > { %1742 = vmatpush2.bf16.msra.mxu0 %v6619_v56  ;;  %1783 = vmatpush2.bf16.msra.mxu1 %v6622_v57  ;;  %v6708_v56 = vld [vmem:[#allocation2 + $0x7e8] ss:$16 sps:$4 sm:$0xff]   ;;  %v6713_v57 = vld [vmem:[#allocation2 + $0x7c4] ss:$16 sps:$4 sm:$0xff]  }
 0x10a   : > { %1743 = vmatprep.subr.bf16.mxu0 %v6627_v58  ;;  %1784 = vmatprep.subr.bf16.mxu1 %v6630_v59  ;;  %v6716_v58 = vld [vmem:[#allocation2 + $0x7cc] ss:$16 sps:$4 sm:$0xff]   ;;  %v6711_v59 = vld [vmem:[#allocation2 + $0x7c0] ss:$16 sps:$4 sm:$0xff]  }
 0x10d   : > { %1744 = vmatpush2.bf16.msra.mxu0 %v6625_v60  ;;  %1785 = vmatpush2.bf16.msra.mxu1 %v6628_v61  ;;  %v6714_v60 = vld [vmem:[#allocation2 + $0x7c8] ss:$16 sps:$4 sm:$0xff]   ;;  %v6719_v61 = vld [vmem:[#allocation2 + $0x7a4] ss:$16 sps:$4 sm:$0xff]  }
 0x10e   : > { %1745 = vmatprep.subr.bf16.mxu0 %v6633_v63  ;;  %1786 = vmatprep.subr.bf16.mxu1 %v6636_v0  ;;  %v6722_v63 = vld [vmem:[#allocation2 + $0x7ac] ss:$16 sps:$4 sm:$0xff]   ;;  %v6717_v0 = vld [vmem:[#allocation2 + $0x7a0] ss:$16 sps:$4 sm:$0xff]  }
 0x111   : > { %1746 = vmatpush2.bf16.msra.mxu0 %v6631_v1  ;;  %1787 = vmatpush2.bf16.msra.mxu1 %v6634_v2  ;;  %v6720_v1 = vld [vmem:[#allocation2 + $0x7a8] ss:$16 sps:$4 sm:$0xff]   ;;  %v6725_v2 = vld [vmem:[#allocation2 + $0x784] ss:$16 sps:$4 sm:$0xff]  }
 0x112   : > { %1747 = vmatprep.subr.bf16.mxu0 %v6639_v3  ;;  %1788 = vmatprep.subr.bf16.mxu1 %v6642_v4  ;;  %v6728_v3 = vld [vmem:[#allocation2 + $0x78c] ss:$16 sps:$4 sm:$0xff]   ;;  %v6723_v4 = vld [vmem:[#allocation2 + $0x780] ss:$16 sps:$4 sm:$0xff]  }
 0x115   : > { %1748 = vmatpush2.bf16.msra.mxu0 %v6637_v5  ;;  %1789 = vmatpush2.bf16.msra.mxu1 %v6640_v6  ;;  %v6726_v5 = vld [vmem:[#allocation2 + $0x788] ss:$16 sps:$4 sm:$0xff]   ;;  %v6731_v6 = vld [vmem:[#allocation2 + $0x764] ss:$16 sps:$4 sm:$0xff]  }
 0x116   : > { %1749 = vmatprep.subr.bf16.mxu0 %v6645_v7  ;;  %1790 = vmatprep.subr.bf16.mxu1 %v6648_v8  ;;  %v6734_v7 = vld [vmem:[#allocation2 + $0x76c] ss:$16 sps:$4 sm:$0xff]   ;;  %v6729_v8 = vld [vmem:[#allocation2 + $0x760] ss:$16 sps:$4 sm:$0xff]  }
 0x119   : > { %1750 = vmatpush2.bf16.msra.mxu0 %v6643_v9  ;;  %1791 = vmatpush2.bf16.msra.mxu1 %v6646_v10  ;;  %v6732_v9 = vld [vmem:[#allocation2 + $0x768] ss:$16 sps:$4 sm:$0xff]   ;;  %v6737_v10 = vld [vmem:[#allocation2 + $0x744] ss:$16 sps:$4 sm:$0xff]  }
 0x11a   : > { %1751 = vmatprep.subr.bf16.mxu0 %v6651_v11  ;;  %1792 = vmatprep.subr.bf16.mxu1 %v6654_v12  ;;  %v6740_v11 = vld [vmem:[#allocation2 + $0x74c] ss:$16 sps:$4 sm:$0xff]   ;;  %v6735_v12 = vld [vmem:[#allocation2 + $0x740] ss:$16 sps:$4 sm:$0xff]  }
 0x11d   : > { %1752 = vmatpush2.bf16.msra.mxu0 %v6649_v15  ;;  %1793 = vmatpush2.bf16.msra.mxu1 %v6652_v17  ;;  %v6746_v15 = vld [vmem:[#allocation2 + $0x72c] ss:$16 sps:$4 sm:$0xff]   ;;  %v1873_v17 = vshrl.u32 %v7765_v16, 16 }
 0x11e   : > { %2210 = vmatprep.subr.bf16.mxu0 %v6659_v20  ;;  %2251 = vmatprep.subr.bf16.mxu1 %v6662_v21  ;;  %v1876_v20 = vshll.u32 %v7765_v16, 16  ;;  %v6741_v21 = vld [vmem:[#allocation2 + $0x720] ss:$16 sps:$4 sm:$0xff]   ;;  %v6758_v16 = vld [vmem:[#allocation2 + $0x8ec] ss:$16 sps:$4 sm:$0xff]  }
 0x120   : > { %1754 = vmatmul.mubr.bf16.vlgmr.msra.gmra.mxu0 %v1397_v24  ;;  %1795 = vmatmul.mubr.bf16.vlgmr.msra.gmra.mxu1 %v1397_v24  ;;  %v6752_v24 = vld [vmem:[#allocation2 + $0x70c] ss:$16 sps:$4 sm:$0xff]  }
 0x121   : > { %2211 = vmatpush1.bf16.msra.mxu0 %v6657_v25  ;;  %2252 = vmatpush1.bf16.msra.mxu1 %v6660_v19  ;;  %v1875_v25 = vrot.slane %v1873_v17, 1  ;;  %v1878_v19 = vrot.slane %v1876_v20, 2  ;;  %v6813_v17 = vld [vmem:[#allocation2 + $0x9a0] ss:$16 sps:$4 sm:$0xff]   ;;  %v6816_v20 = vld [vmem:[#allocation2 + $0x9a8] ss:$16 sps:$4 sm:$0xff]  }
 0x122   : > { %2212 = vmatprep.subr.bf16.mxu0 %v6665_v26  ;;  %2253 = vmatprep.subr.bf16.mxu1 %v6668_v18  ;;  %v7771_v26 = vld [vmem:[%s7738_s21] sm:$0xcc] }
 0x123   : > { %2242 = vmatprep.mubr.bf16.mxu0 %v1887_v27  ;;  %2283 = vmatprep.mubr.bf16.mxu1 %v1887_v27  ;;  %v6747_v18 = vld [vmem:[#allocation2 + $0x700] ss:$16 sps:$4 sm:$0xff]   ;;  %v6750_v27 = vld [vmem:[#allocation2 + $0x708] ss:$16 sps:$4 sm:$0xff]  }
 0x125   : > { %2213 = vmatpush1.bf16.msra.mxu0 %v6663_v62  ;;  %2254 = vmatpush1.bf16.msra.mxu1 %v6666_v28  ;;  %v6755_v62 = vld [vmem:[#allocation2 + $0x8e4] ss:$16 sps:$4 sm:$0xff]   ;;  %v7775_v28 = vcombine.high %v7771_v26, %v7771_v26 }
 0x126   : > { %2214 = vmatprep.subr.bf16.mxu0 %v6671_v29  ;;  %2255 = vmatprep.subr.bf16.mxu1 %v6674_v30  ;;  %v1879_v29 = vor.u32 %v1878_v19, %v1875_v25  ;;  %v6753_v30 = vld [vmem:[#allocation2 + $0x8e0] ss:$16 sps:$4 sm:$0xff]   ;;  %v6827_v25 = vld [vmem:[#allocation2 + $0x964] ss:$16 sps:$4 sm:$0xff]   ;;  %v6830_v19 = vld [vmem:[#allocation2 + $0x96c] ss:$16 sps:$4 sm:$0xff]  }
 0x129   : > { %2215 = vmatpush1.bf16.msra.mxu0 %v6669_v31  ;;  %2256 = vmatpush1.bf16.msra.mxu1 %v6672_v32  ;;  %v6756_v31 = vld [vmem:[#allocation2 + $0x8e8] ss:$16 sps:$4 sm:$0xff]   ;;  %v6761_v32 = vld [vmem:[#allocation2 + $0x8c4] ss:$16 sps:$4 sm:$0xff]  }
 0x12a   : > { %2216 = vmatprep.subr.bf16.mxu0 %v6677_v33  ;;  %2257 = vmatprep.subr.bf16.mxu1 %v6680_v34  ;;  %v6764_v33 = vld [vmem:[#allocation2 + $0x8cc] ss:$16 sps:$4 sm:$0xff]   ;;  %v2368_v34 = vrot.slane %v7775_v28, 2 }
 0x12d   : > { %2217 = vmatpush1.bf16.msra.mxu0 %v6675_v35  ;;  %2258 = vmatpush1.bf16.msra.mxu1 %v6678_v36 }
 0x12e   : > { %2218 = vmatprep.subr.bf16.mxu0 %v6683_v37  ;;  %2259 = vmatprep.subr.bf16.mxu1 %v6686_v38  ;;  %v6759_v37 = vld [vmem:[#allocation2 + $0x8c0] ss:$16 sps:$4 sm:$0xff]   ;;  %v6762_v38 = vld [vmem:[#allocation2 + $0x8c8] ss:$16 sps:$4 sm:$0xff]  }
 0x131   : > { %2219 = vmatpush1.bf16.msra.mxu0 %v6681_v39  ;;  %2260 = vmatpush1.bf16.msra.mxu1 %v6684_v40  ;;  %v6767_v39 = vld [vmem:[#allocation2 + $0x8a4] ss:$16 sps:$4 sm:$0xff]  }
 0x132   : > { %2220 = vmatprep.subr.bf16.mxu0 %v6689_v41  ;;  %2261 = vmatprep.subr.bf16.mxu1 %v6692_v42  ;;  %v6770_v42 = vld [vmem:[#allocation2 + $0x8ac] ss:$16 sps:$4 sm:$0xff]  }
 0x135   : > { %2221 = vmatpush1.bf16.msra.mxu0 %v6687_v43  ;;  %2262 = vmatpush1.bf16.msra.mxu1 %v6690_v44  ;;  %v6765_v43 = vld [vmem:[#allocation2 + $0x8a0] ss:$16 sps:$4 sm:$0xff]  }
 0x136   : > { %2222 = vmatprep.subr.bf16.mxu0 %v6695_v45  ;;  %2263 = vmatprep.subr.bf16.mxu1 %v6698_v46  ;;  %v6768_v46 = vld [vmem:[#allocation2 + $0x8a8] ss:$16 sps:$4 sm:$0xff]  }
 0x139   : > { %2223 = vmatpush1.bf16.msra.mxu0 %v6693_v47  ;;  %2264 = vmatpush1.bf16.msra.mxu1 %v6696_v48 }
 0x13a   : > { %2224 = vmatprep.subr.bf16.mxu0 %v6701_v49  ;;  %2265 = vmatprep.subr.bf16.mxu1 %v6704_v50  ;;  %v6773_v49 = vld [vmem:[#allocation2 + $0x884] ss:$16 sps:$4 sm:$0xff]   ;;  %v6776_v50 = vld [vmem:[#allocation2 + $0x88c] ss:$16 sps:$4 sm:$0xff]  }
 0x13d   : > { %2225 = vmatpush1.bf16.msra.mxu0 %v6699_v51  ;;  %2266 = vmatpush1.bf16.msra.mxu1 %v6702_v52  ;;  %v6771_v51 = vld [vmem:[#allocation2 + $0x880] ss:$16 sps:$4 sm:$0xff]   ;;  %v6774_v52 = vld [vmem:[#allocation2 + $0x888] ss:$16 sps:$4 sm:$0xff]  }
 0x13e   : > { %2226 = vmatprep.subr.bf16.mxu0 %v6707_v53  ;;  %2267 = vmatprep.subr.bf16.mxu1 %v6710_v54  ;;  %v6779_v53 = vld [vmem:[#allocation2 + $0x864] ss:$16 sps:$4 sm:$0xff]   ;;  %v6782_v54 = vld [vmem:[#allocation2 + $0x86c] ss:$16 sps:$4 sm:$0xff]  }
 0x141   : > { %2227 = vmatpush2.bf16.msra.mxu0 %v6705_v55  ;;  %2268 = vmatpush2.bf16.msra.mxu1 %v6708_v56  ;;  %v6777_v55 = vld [vmem:[#allocation2 + $0x860] ss:$16 sps:$4 sm:$0xff]   ;;  %v6780_v56 = vld [vmem:[#allocation2 + $0x868] ss:$16 sps:$4 sm:$0xff]  }
 0x142   : > { %2228 = vmatprep.subr.bf16.mxu0 %v6713_v57  ;;  %2269 = vmatprep.subr.bf16.mxu1 %v6716_v58  ;;  %v6785_v57 = vld [vmem:[#allocation2 + $0x844] ss:$16 sps:$4 sm:$0xff]   ;;  %v6788_v58 = vld [vmem:[#allocation2 + $0x84c] ss:$16 sps:$4 sm:$0xff]  }
 0x145   : > { %2229 = vmatpush2.bf16.msra.mxu0 %v6711_v59  ;;  %2270 = vmatpush2.bf16.msra.mxu1 %v6714_v60  ;;  %v6783_v59 = vld [vmem:[#allocation2 + $0x840] ss:$16 sps:$4 sm:$0xff]   ;;  %v6786_v60 = vld [vmem:[#allocation2 + $0x848] ss:$16 sps:$4 sm:$0xff]  }
 0x146   : > { %2230 = vmatprep.subr.bf16.mxu0 %v6719_v61  ;;  %2271 = vmatprep.subr.bf16.mxu1 %v6722_v63  ;;  %v6791_v61 = vld [vmem:[#allocation2 + $0x824] ss:$16 sps:$4 sm:$0xff]   ;;  %v6794_v63 = vld [vmem:[#allocation2 + $0x82c] ss:$16 sps:$4 sm:$0xff]  }
 0x149   : > { %2231 = vmatpush2.bf16.msra.mxu0 %v6717_v0  ;;  %2272 = vmatpush2.bf16.msra.mxu1 %v6720_v1  ;;  %v6789_v0 = vld [vmem:[#allocation2 + $0x820] ss:$16 sps:$4 sm:$0xff]   ;;  %v6792_v1 = vld [vmem:[#allocation2 + $0x828] ss:$16 sps:$4 sm:$0xff]  }
 0x14a   : > { %2232 = vmatprep.subr.bf16.mxu0 %v6725_v2  ;;  %2273 = vmatprep.subr.bf16.mxu1 %v6728_v3  ;;  %v6797_v2 = vld [vmem:[#allocation2 + $0x804] ss:$16 sps:$4 sm:$0xff]   ;;  %v6800_v3 = vld [vmem:[#allocation2 + $0x80c] ss:$16 sps:$4 sm:$0xff]  }
 0x14d   : > { %2233 = vmatpush2.bf16.msra.mxu0 %v6723_v4  ;;  %2274 = vmatpush2.bf16.msra.mxu1 %v6726_v5  ;;  %v6795_v4 = vld [vmem:[#allocation2 + $0x800] ss:$16 sps:$4 sm:$0xff]   ;;  %v6798_v5 = vld [vmem:[#allocation2 + $0x808] ss:$16 sps:$4 sm:$0xff]  }
 0x14e   : > { %2234 = vmatprep.subr.bf16.mxu0 %v6731_v6  ;;  %2275 = vmatprep.subr.bf16.mxu1 %v6734_v7  ;;  %v6803_v6 = vld [vmem:[#allocation2 + $0x9e4] ss:$16 sps:$4 sm:$0xff]   ;;  %v6806_v7 = vld [vmem:[#allocation2 + $0x9ec] ss:$16 sps:$4 sm:$0xff]  }
 0x151   : > { %2235 = vmatpush2.bf16.msra.mxu0 %v6729_v8  ;;  %2276 = vmatpush2.bf16.msra.mxu1 %v6732_v9  ;;  %v6801_v8 = vld [vmem:[#allocation2 + $0x9e0] ss:$16 sps:$4 sm:$0xff]   ;;  %v6804_v9 = vld [vmem:[#allocation2 + $0x9e8] ss:$16 sps:$4 sm:$0xff]  }
 0x152   : > { %2236 = vmatprep.subr.bf16.mxu0 %v6737_v10  ;;  %2277 = vmatprep.subr.bf16.mxu1 %v6740_v11  ;;  %v6809_v10 = vld [vmem:[#allocation2 + $0x9c4] ss:$16 sps:$4 sm:$0xff]   ;;  %v6812_v11 = vld [vmem:[#allocation2 + $0x9cc] ss:$16 sps:$4 sm:$0xff]  }
 0x155   : > { %2237 = vmatpush2.bf16.msra.mxu0 %v6735_v12  ;;  %2278 = vmatpush2.bf16.msra.mxu1 %v6738_v13  ;;  %v6807_v12 = vld [vmem:[#allocation2 + $0x9c0] ss:$16 sps:$4 sm:$0xff]   ;;  %v6810_v13 = vld [vmem:[#allocation2 + $0x9c8] ss:$16 sps:$4 sm:$0xff]  }
 0x156   : > { %2238 = vmatprep.subr.bf16.mxu0 %v6743_v14  ;;  %2279 = vmatprep.subr.bf16.mxu1 %v6746_v15  ;;  %v6815_v14 = vld [vmem:[#allocation2 + $0x9a4] ss:$16 sps:$4 sm:$0xff]   ;;  %v6818_v15 = vld [vmem:[#allocation2 + $0x9ac] ss:$16 sps:$4 sm:$0xff]  }
 0x159   : > { %2239 = vmatpush2.bf16.msra.mxu0 %v6741_v21  ;;  %2280 = vmatpush2.bf16.msra.mxu1 %v6744_v22  ;;  %v6821_v21 = vld [vmem:[#allocation2 + $0x984] ss:$16 sps:$4 sm:$0xff]   ;;  %v6824_v22 = vld [vmem:[#allocation2 + $0x98c] ss:$16 sps:$4 sm:$0xff]  }
 0x15a   : > { %2240 = vmatprep.subr.bf16.mxu0 %v6749_v23  ;;  %2281 = vmatprep.subr.bf16.mxu1 %v6752_v24  ;;  %v6819_v23 = vld [vmem:[#allocation2 + $0x980] ss:$16 sps:$4 sm:$0xff]   ;;  %v6822_v24 = vld [vmem:[#allocation2 + $0x988] ss:$16 sps:$4 sm:$0xff]  }
 0x15d   : > { %2241 = vmatpush2.bf16.msra.mxu0 %v6747_v18  ;;  %2282 = vmatpush2.bf16.msra.mxu1 %v6750_v27  ;;  %v6825_v18 = vld [vmem:[#allocation2 + $0x960] ss:$16 sps:$4 sm:$0xff]   ;;  %v6828_v27 = vld [vmem:[#allocation2 + $0x968] ss:$16 sps:$4 sm:$0xff]  }
 0x15e   : > { %2691 = vmatprep.subr.bf16.mxu0 %v6755_v62  ;;  %2732 = vmatprep.subr.bf16.mxu1 %v6758_v16  ;;  %v6833_v62 = vld [vmem:[#allocation2 + $0x944] ss:$16 sps:$4 sm:$0xff]   ;;  %v6836_v16 = vld [vmem:[#allocation2 + $0x94c] ss:$16 sps:$4 sm:$0xff]  }
 0x160   : > { %v7778_v35 = vpop.f32.mrf.mxu0  ;;  %v7780_v36 = vpop.f32.mrf.mxu1  ;;  %2243 = vmatmul.mubr.bf16.vlgmr.msra.gmra.mxu0 %v1879_v29  ;;  %2284 = vmatmul.mubr.bf16.vlgmr.msra.gmra.mxu1 %v1879_v29  ;;  %v6831_v29 = vld [vmem:[#allocation2 + $0x940] ss:$16 sps:$4 sm:$0xff]  }
 0x161   : > { %2692 = vmatpush1.bf16.msra.mxu0 %v6753_v30  ;;  %2733 = vmatpush1.bf16.msra.mxu1 %v6756_v31  ;;  %v6834_v30 = vld [vmem:[#allocation2 + $0x948] ss:$16 sps:$4 sm:$0xff]   ;;  %v6839_v31 = vld [vmem:[#allocation2 + $0x924] ss:$16 sps:$4 sm:$0xff]  }
 0x162   : > { %v7782_v40 = vpop.f32.mrf.mxu0  ;;  %v7784_v41 = vpop.f32.mrf.mxu1  ;;  %2693 = vmatprep.subr.bf16.mxu0 %v6761_v32  ;;  %2734 = vmatprep.subr.bf16.mxu1 %v6764_v33  ;;  %v6842_v32 = vld [vmem:[#allocation2 + $0x92c] ss:$16 sps:$4 sm:$0xff]   ;;  %v6837_v33 = vld [vmem:[#allocation2 + $0x920] ss:$16 sps:$4 sm:$0xff]  }
 0x163   : > { %2723 = vmatprep.mubr.bf16.mxu0 %v2368_v34  ;;  %2764 = vmatprep.mubr.bf16.mxu1 %v2368_v34  ;;  %v6840_v34 = vld [vmem:[#allocation2 + $0x928] ss:$16 sps:$4 sm:$0xff]  }
 0x164   : > { %v878_v44 = vpop.f32.mrf.mxu0  ;;  %v919_v45 = vpop.f32.mrf.mxu1 }
 0x165   : > { %2694 = vmatpush1.bf16.msra.mxu0 %v6759_v37  ;;  %2735 = vmatpush1.bf16.msra.mxu1 %v6762_v38  ;;  %v6845_v37 = vld [vmem:[#allocation2 + $0x904] ss:$16 sps:$4 sm:$0xff]   ;;  %v6848_v38 = vld [vmem:[#allocation2 + $0x90c] ss:$16 sps:$4 sm:$0xff]   ;;  %v6843_v44 = vld [vmem:[#allocation2 + $0x900] ss:$16 sps:$4 sm:$0xff]  }
 0x166   : > { %v879_v47 = vpop.f32.mrf.mxu0  ;;  %v920_v48 = vpop.f32.mrf.mxu1  ;;  %2695 = vmatprep.subr.bf16.mxu0 %v6767_v39  ;;  %2736 = vmatprep.subr.bf16.mxu1 %v6770_v42  ;;  %v2851_v39 = vshrl.u32 %v7775_v28, 16  ;;  %v2854_v42 = vshll.u32 %v7775_v28, 16  ;;  %v6846_v45 = vld [vmem:[#allocation2 + $0x908] ss:$16 sps:$4 sm:$0xff]   ;;  %v6862_v28 = vld [vmem:[#allocation2 + $0xacc] ss:$16 sps:$4 sm:$0xff]  }
 0x167   : > { %v6856_v47 = vld [vmem:[#allocation2 + $0xaec] ss:$16 sps:$4 sm:$0xff]   ;;  %v6851_v48 = vld [vmem:[#allocation2 + $0xae0] ss:$16 sps:$4 sm:$0xff]  }
 0x169   : > { %2696 = vmatpush1.bf16.msra.mxu0 %v6765_v43  ;;  %2737 = vmatpush1.bf16.msra.mxu1 %v6768_v46  ;;  %v7790_v43 = vcombine.low %v7771_v26, %v7771_v26  ;;  %v6853_v46 = vld [vmem:[#allocation2 + $0xae4] ss:$16 sps:$4 sm:$0xff]  }
 0x16a   : > { %2697 = vmatprep.subr.bf16.mxu0 %v6773_v49  ;;  %2738 = vmatprep.subr.bf16.mxu1 %v6776_v50  ;;  %v2853_v49 = vrot.slane %v2851_v39, 2  ;;  %v2856_v50 = vrot.slane %v2854_v42, 3  ;;  %v6859_v26 = vld [vmem:[#allocation2 + $0xac4] ss:$16 sps:$4 sm:$0xff]   ;;  %v6914_v39 = vld [vmem:[#allocation2 + $0xba8] ss:$16 sps:$4 sm:$0xff]  }
 0x16b   : > { %v6919_v42 = vld [vmem:[#allocation2 + $0xb84] ss:$16 sps:$4 sm:$0xff]  }
 0x16d   : > { %2698 = vmatpush1.bf16.msra.mxu0 %v6771_v51  ;;  %2739 = vmatpush1.bf16.msra.mxu1 %v6774_v52  ;;  %v2367_v51 = vrot.slane %v7790_v43, 2  ;;  %v6854_v52 = vld [vmem:[#allocation2 + $0xae8] ss:$16 sps:$4 sm:$0xff]  }
 0x16e   : > { %2699 = vmatprep.subr.bf16.mxu0 %v6779_v53  ;;  %2740 = vmatprep.subr.bf16.mxu1 %v6782_v54  ;;  %v6857_v53 = vld [vmem:[#allocation2 + $0xac0] ss:$16 sps:$4 sm:$0xff]   ;;  %v6860_v54 = vld [vmem:[#allocation2 + $0xac8] ss:$16 sps:$4 sm:$0xff]  }
 0x171   : > { %2700 = vmatpush1.bf16.msra.mxu0 %v6777_v55  ;;  %2741 = vmatpush1.bf16.msra.mxu1 %v6780_v56  ;;  %v2857_v55 = vor.u32 %v2856_v50, %v2853_v49  ;;  %v6923_v49 = vld [vmem:[#allocation2 + $0xb60] ss:$16 sps:$4 sm:$0xff]   ;;  %v6926_v50 = vld [vmem:[#allocation2 + $0xb68] ss:$16 sps:$4 sm:$0xff]  }
 0x172   : > { %2701 = vmatprep.subr.bf16.mxu0 %v6785_v57  ;;  %2742 = vmatprep.subr.bf16.mxu1 %v6788_v58 }
 0x175   : > { %2702 = vmatpush1.bf16.msra.mxu0 %v6783_v59  ;;  %2743 = vmatpush1.bf16.msra.mxu1 %v6786_v60 }
 0x176   : > { %2703 = vmatprep.subr.bf16.mxu0 %v6791_v61  ;;  %2744 = vmatprep.subr.bf16.mxu1 %v6794_v63  ;;  %v6865_v63 = vld [vmem:[#allocation2 + $0xaa4] ss:$16 sps:$4 sm:$0xff]  }
 0x179   : > { %2704 = vmatpush1.bf16.msra.mxu0 %v6789_v0  ;;  %2745 = vmatpush1.bf16.msra.mxu1 %v6792_v1  ;;  %v6868_v0 = vld [vmem:[#allocation2 + $0xaac] ss:$16 sps:$4 sm:$0xff]  }
 0x17a   : > { %2705 = vmatprep.subr.bf16.mxu0 %v6797_v2  ;;  %2746 = vmatprep.subr.bf16.mxu1 %v6800_v3  ;;  %v6863_v3 = vld [vmem:[#allocation2 + $0xaa0] ss:$16 sps:$4 sm:$0xff]  }
 0x17d   : > { %2706 = vmatpush1.bf16.msra.mxu0 %v6795_v4  ;;  %2747 = vmatpush1.bf16.msra.mxu1 %v6798_v5 }
 0x17e   : > { %2707 = vmatprep.subr.bf16.mxu0 %v6803_v6  ;;  %2748 = vmatprep.subr.bf16.mxu1 %v6806_v7  ;;  %v6871_v7 = vld [vmem:[#allocation2 + $0xa84] ss:$16 sps:$4 sm:$0xff]  }
 0x181   : > { %2708 = vmatpush2.bf16.msra.mxu0 %v6801_v8  ;;  %2749 = vmatpush2.bf16.msra.mxu1 %v6804_v9  ;;  %v6874_v8 = vld [vmem:[#allocation2 + $0xa8c] ss:$16 sps:$4 sm:$0xff]   ;;  %v6872_v9 = vld [vmem:[#allocation2 + $0xa88] ss:$16 sps:$4 sm:$0xff]  }
 0x182   : > { %2709 = vmatprep.subr.bf16.mxu0 %v6809_v10  ;;  %2750 = vmatprep.subr.bf16.mxu1 %v6812_v11  ;;  %v6880_v10 = vld [vmem:[#allocation2 + $0xa6c] ss:$16 sps:$4 sm:$0xff]   ;;  %v6875_v11 = vld [vmem:[#allocation2 + $0xa60] ss:$16 sps:$4 sm:$0xff]  }
 0x185   : > { %2710 = vmatpush2.bf16.msra.mxu0 %v6807_v12  ;;  %2751 = vmatpush2.bf16.msra.mxu1 %v6810_v13  ;;  %v6878_v12 = vld [vmem:[#allocation2 + $0xa68] ss:$16 sps:$4 sm:$0xff]   ;;  %v6883_v13 = vld [vmem:[#allocation2 + $0xa44] ss:$16 sps:$4 sm:$0xff]  }
 0x186   : > { %2711 = vmatprep.subr.bf16.mxu0 %v6815_v14  ;;  %2752 = vmatprep.subr.bf16.mxu1 %v6818_v15  ;;  %v6886_v14 = vld [vmem:[#allocation2 + $0xa4c] ss:$16 sps:$4 sm:$0xff]   ;;  %v6881_v15 = vld [vmem:[#allocation2 + $0xa40] ss:$16 sps:$4 sm:$0xff]  }
 0x189   : > { %2712 = vmatpush2.bf16.msra.mxu0 %v6813_v17  ;;  %2753 = vmatpush2.bf16.msra.mxu1 %v6816_v20  ;;  %v6884_v17 = vld [vmem:[#allocation2 + $0xa48] ss:$16 sps:$4 sm:$0xff]   ;;  %v6889_v20 = vld [vmem:[#allocation2 + $0xa24] ss:$16 sps:$4 sm:$0xff]  }
 0x18a   : > { %2713 = vmatprep.subr.bf16.mxu0 %v6821_v21  ;;  %2754 = vmatprep.subr.bf16.mxu1 %v6824_v22  ;;  %v6892_v21 = vld [vmem:[#allocation2 + $0xa2c] ss:$16 sps:$4 sm:$0xff]   ;;  %v6887_v22 = vld [vmem:[#allocation2 + $0xa20] ss:$16 sps:$4 sm:$0xff]  }
 0x18d   : > { %2714 = vmatpush2.bf16.msra.mxu0 %v6819_v23  ;;  %2755 = vmatpush2.bf16.msra.mxu1 %v6822_v24  ;;  %v6890_v23 = vld [vmem:[#allocation2 + $0xa28] ss:$16 sps:$4 sm:$0xff]   ;;  %v6895_v24 = vld [vmem:[#allocation2 + $0xa04] ss:$16 sps:$4 sm:$0xff]  }
 0x18e   : > { %2715 = vmatprep.subr.bf16.mxu0 %v6827_v25  ;;  %2756 = vmatprep.subr.bf16.mxu1 %v6830_v19  ;;  %v6898_v25 = vld [vmem:[#allocation2 + $0xa0c] ss:$16 sps:$4 sm:$0xff]   ;;  %v6893_v19 = vld [vmem:[#allocation2 + $0xa00] ss:$16 sps:$4 sm:$0xff]  }
 0x191   : > { %2716 = vmatpush2.bf16.msra.mxu0 %v6825_v18  ;;  %2757 = vmatpush2.bf16.msra.mxu1 %v6828_v27  ;;  %v6896_v18 = vld [vmem:[#allocation2 + $0xa08] ss:$16 sps:$4 sm:$0xff]   ;;  %v6901_v27 = vld [vmem:[#allocation2 + $0xbe4] ss:$16 sps:$4 sm:$0xff]  }
 0x192   : > { %2717 = vmatprep.subr.bf16.mxu0 %v6833_v62  ;;  %2758 = vmatprep.subr.bf16.mxu1 %v6836_v16  ;;  %v6904_v62 = vld [vmem:[#allocation2 + $0xbec] ss:$16 sps:$4 sm:$0xff]   ;;  %v6899_v16 = vld [vmem:[#allocation2 + $0xbe0] ss:$16 sps:$4 sm:$0xff]  }
 0x195   : > { %2718 = vmatpush2.bf16.msra.mxu0 %v6831_v29  ;;  %2759 = vmatpush2.bf16.msra.mxu1 %v6834_v30  ;;  %v6902_v29 = vld [vmem:[#allocation2 + $0xbe8] ss:$16 sps:$4 sm:$0xff]   ;;  %v6907_v30 = vld [vmem:[#allocation2 + $0xbc4] ss:$16 sps:$4 sm:$0xff]  }
 0x196   : > { %2719 = vmatprep.subr.bf16.mxu0 %v6839_v31  ;;  %2760 = vmatprep.subr.bf16.mxu1 %v6842_v32  ;;  %v6910_v31 = vld [vmem:[#allocation2 + $0xbcc] ss:$16 sps:$4 sm:$0xff]   ;;  %v6905_v32 = vld [vmem:[#allocation2 + $0xbc0] ss:$16 sps:$4 sm:$0xff]  }
 0x199   : > { %2720 = vmatpush2.bf16.msra.mxu0 %v6837_v33  ;;  %2761 = vmatpush2.bf16.msra.mxu1 %v6840_v34  ;;  %v6908_v33 = vld [vmem:[#allocation2 + $0xbc8] ss:$16 sps:$4 sm:$0xff]   ;;  %v6913_v34 = vld [vmem:[#allocation2 + $0xba4] ss:$16 sps:$4 sm:$0xff]  }
 0x19a   : > { %2721 = vmatprep.subr.bf16.mxu0 %v6845_v37  ;;  %2762 = vmatprep.subr.bf16.mxu1 %v6848_v38  ;;  %v6916_v37 = vld [vmem:[#allocation2 + $0xbac] ss:$16 sps:$4 sm:$0xff]   ;;  %v6911_v38 = vld [vmem:[#allocation2 + $0xba0] ss:$16 sps:$4 sm:$0xff]  }
 0x19d   : > { %2722 = vmatpush2.bf16.msra.mxu0 %v6843_v44  ;;  %2763 = vmatpush2.bf16.msra.mxu1 %v6846_v45  ;;  %v6922_v44 = vld [vmem:[#allocation2 + $0xb8c] ss:$16 sps:$4 sm:$0xff]   ;;  %v6917_v45 = vld [vmem:[#allocation2 + $0xb80] ss:$16 sps:$4 sm:$0xff]  }
 0x19e   : > { %3180 = vmatprep.subr.bf16.mxu0 %v6853_v46  ;;  %3221 = vmatprep.subr.bf16.mxu1 %v6856_v47  ;;  %v6920_v46 = vld [vmem:[#allocation2 + $0xb88] ss:$16 sps:$4 sm:$0xff]   ;;  %v6925_v47 = vld [vmem:[#allocation2 + $0xb64] ss:$16 sps:$4 sm:$0xff]  }
 0x1a0   : > { %v1278_v56 = vpop.f32.mrf.mxu0  ;;  %v1319_v57 = vpop.f32.mrf.mxu1  ;;  %2724 = vmatmul.mubr.bf16.vlgmr.msra.gmra.mxu0 %v2367_v51  ;;  %2765 = vmatmul.mubr.bf16.vlgmr.msra.gmra.mxu1 %v2367_v51  ;;  %v6931_v51 = vld [vmem:[#allocation2 + $0xb44] ss:$16 sps:$4 sm:$0xff]  }
 0x1a1   : > { %v7794_v58 = vadd.f32 %v1278_v56, %v7778_v35  ;;  %v7797_v59 = vadd.f32 %v1319_v57, %v7780_v36  ;;  %3181 = vmatpush1.bf16.msra.mxu0 %v6851_v48  ;;  %3222 = vmatpush1.bf16.msra.mxu1 %v6854_v52  ;;  %v6866_v35 = vld [vmem:[#allocation2 + $0xaa8] ss:$16 sps:$4 sm:$0xff]   ;;  %v6928_v48 = vld [vmem:[#allocation2 + $0xb6c] ss:$16 sps:$4 sm:$0xff]   ;;  %v2846_v56 = vshll.u32 %v7790_v43, 16 }
 0x1a2   : > { %v1280_v60 = vpop.f32.mrf.mxu0  ;;  %v1321_v61 = vpop.f32.mrf.mxu1  ;;  %3182 = vmatprep.subr.bf16.mxu0 %v6859_v26  ;;  %3223 = vmatprep.subr.bf16.mxu1 %v6862_v28  ;;  %v6934_v52 = vld [vmem:[#allocation2 + $0xb4c] ss:$16 sps:$4 sm:$0xff]   ;;  %v6929_v26 = vld [vmem:[#allocation2 + $0xb40] ss:$16 sps:$4 sm:$0xff]   ;;  %v6932_v28 = vld [vmem:[#allocation2 + $0xb48] ss:$16 sps:$4 sm:$0xff]  }
 0x1a3   : > { %v7800_v1 = vadd.f32 %v1280_v60, %v7782_v40  ;;  %v7803_v2 = vadd.f32 %v1321_v61, %v7784_v41  ;;  %3212 = vmatprep.mubr.bf16.mxu0 %v2857_v55  ;;  %3253 = vmatprep.mubr.bf16.mxu1 %v2857_v55  ;;  %v6869_v40 = vld [vmem:[#allocation2 + $0xa80] ss:$16 sps:$4 sm:$0xff]   ;;  %v6877_v41 = vld [vmem:[#allocation2 + $0xa64] ss:$16 sps:$4 sm:$0xff]   ;;  %v2843_v55 = vshrl.u32 %v7790_v43, 16 }
 0x1a4   : > { %v1282_v36 = vpop.f32.mrf.mxu0  ;;  %v1323_v4 = vpop.f32.mrf.mxu1  ;;  %v6935_v57 = vld [vmem:[#allocation2 + $0xb20] ss:$16 sps:$4 sm:$0xff]   ;;  %v6938_v60 = vld [vmem:[#allocation2 + $0xb28] ss:$16 sps:$4 sm:$0xff]   ;;  %v6943_v61 = vld [vmem:[#allocation2 + $0xb04] ss:$16 sps:$4 sm:$0xff]  }
 0x1a5   : > { %3183 = vmatpush1.bf16.msra.mxu0 %v6857_v53  ;;  %3224 = vmatpush1.bf16.msra.mxu1 %v6860_v54  ;;  %v6937_v53 = vld [vmem:[#allocation2 + $0xb24] ss:$16 sps:$4 sm:$0xff]   ;;  %v6940_v54 = vld [vmem:[#allocation2 + $0xb2c] ss:$16 sps:$4 sm:$0xff]   ;;  %v6944_v36 = vld [vmem:[#allocation2 + $0xb08] ss:$16 sps:$4 sm:$0xff]  }
 0x1a6   : > { %v1283_v5 = vpop.f32.mrf.mxu0  ;;  %v1324_v6 = vpop.f32.mrf.mxu1  ;;  %3184 = vmatprep.subr.bf16.mxu0 %v6865_v63  ;;  %3225 = vmatprep.subr.bf16.mxu1 %v6868_v0  ;;  %v6946_v63 = vld [vmem:[#allocation2 + $0xb0c] ss:$16 sps:$4 sm:$0xff]   ;;  %v2845_v0 = vrot.slane %v2843_v55, 2  ;;  %v6949_v4 = vld [vmem:[#allocation2 + $0xce4] ss:$16 sps:$4 sm:$0xff]  }
 0x1a7   : > { %v6952_v5 = vld [vmem:[#allocation2 + $0xcec] ss:$16 sps:$4 sm:$0xff]   ;;  %v6947_v6 = vld [vmem:[#allocation2 + $0xce0] ss:$16 sps:$4 sm:$0xff]   ;;  %v7004_v55 = vld [vmem:[#allocation2 + $0xdc8] ss:$16 sps:$4 sm:$0xff]  }
 0x1a8   : > { %v7808_v43 = vld [vmem:[%s7738_s21 + $0x4] ss:$8 sps:$4 sm:$0x18]  }
 0x1a9   : > { %3185 = vmatpush1.bf16.msra.mxu0 %v6863_v3  ;;  %3226 = vmatpush1.bf16.msra.mxu1 %v6866_v35  ;;  %v2848_v3 = vrot.slane %v2846_v56, 3  ;;  %v6941_v35 = vld [vmem:[#allocation2 + $0xb00] ss:$16 sps:$4 sm:$0xff]   ;;  %v7009_v56 = vld [vmem:[#allocation2 + $0xda4] ss:$16 sps:$4 sm:$0xff]  }
 0x1aa   : > { %3186 = vmatprep.subr.bf16.mxu0 %v6871_v7  ;;  %3227 = vmatprep.subr.bf16.mxu1 %v6874_v8  ;;  %v6950_v7 = vld [vmem:[#allocation2 + $0xce8] ss:$16 sps:$4 sm:$0xff]  }
 0x1ab   : > { %v2849_v8 = vor.u32 %v2848_v3, %v2845_v0  ;;  %v7018_v0 = vld [vmem:[#allocation2 + $0xd8c] ss:$16 sps:$4 sm:$0xff]   ;;  %v7013_v3 = vld [vmem:[#allocation2 + $0xd80] ss:$16 sps:$4 sm:$0xff]  }
 0x1ad   : > { %3187 = vmatpush1.bf16.msra.mxu0 %v6869_v40  ;;  %3228 = vmatpush1.bf16.msra.mxu1 %v6872_v9  ;;  %v6955_v40 = vld [vmem:[#allocation2 + $0xcc4] ss:$16 sps:$4 sm:$0xff]   ;;  %v6958_v9 = vld [vmem:[#allocation2 + $0xccc] ss:$16 sps:$4 sm:$0xff]  }
 0x1ae   : > { %3188 = vmatprep.subr.bf16.mxu0 %v6877_v41  ;;  %3229 = vmatprep.subr.bf16.mxu1 %v6880_v10  ;;  %v6953_v41 = vld [vmem:[#allocation2 + $0xcc0] ss:$16 sps:$4 sm:$0xff]   ;;  %v6956_v10 = vld [vmem:[#allocation2 + $0xcc8] ss:$16 sps:$4 sm:$0xff]  }
 0x1b1   : > { %3189 = vmatpush1.bf16.msra.mxu0 %v6875_v11  ;;  %3230 = vmatpush1.bf16.msra.mxu1 %v6878_v12  ;;  %v3342_v11 = vrot.slane %v7808_v43, 3 }
 0x1b2   : > { %3190 = vmatprep.subr.bf16.mxu0 %v6883_v13  ;;  %3231 = vmatprep.subr.bf16.mxu1 %v6886_v14 }
 0x1b5   : > { %3191 = vmatpush1.bf16.msra.mxu0 %v6881_v15  ;;  %3232 = vmatpush1.bf16.msra.mxu1 %v6884_v17 }
 0x1b6   : > { %3192 = vmatprep.subr.bf16.mxu0 %v6889_v20  ;;  %3233 = vmatprep.subr.bf16.mxu1 %v6892_v21  ;;  %v6961_v21 = vld [vmem:[#allocation2 + $0xca4] ss:$16 sps:$4 sm:$0xff]  }
 0x1b9   : > { %3193 = vmatpush1.bf16.msra.mxu0 %v6887_v22  ;;  %3234 = vmatpush1.bf16.msra.mxu1 %v6890_v23  ;;  %v6964_v22 = vld [vmem:[#allocation2 + $0xcac] ss:$16 sps:$4 sm:$0xff]  }
 0x1ba   : > { %3194 = vmatprep.subr.bf16.mxu0 %v6895_v24  ;;  %3235 = vmatprep.subr.bf16.mxu1 %v6898_v25  ;;  %v6959_v25 = vld [vmem:[#allocation2 + $0xca0] ss:$16 sps:$4 sm:$0xff]  }
 0x1bd   : > { %3195 = vmatpush1.bf16.msra.mxu0 %v6893_v19  ;;  %3236 = vmatpush1.bf16.msra.mxu1 %v6896_v18 }
 0x1be   : > { %3196 = vmatprep.subr.bf16.mxu0 %v6901_v27  ;;  %3237 = vmatprep.subr.bf16.mxu1 %v6904_v62  ;;  %v6967_v62 = vld [vmem:[#allocation2 + $0xc84] ss:$16 sps:$4 sm:$0xff]  }
 0x1c1   : > { %3197 = vmatpush2.bf16.msra.mxu0 %v6899_v16  ;;  %3238 = vmatpush2.bf16.msra.mxu1 %v6902_v29  ;;  %v6970_v16 = vld [vmem:[#allocation2 + $0xc8c] ss:$16 sps:$4 sm:$0xff]   ;;  %v6968_v29 = vld [vmem:[#allocation2 + $0xc88] ss:$16 sps:$4 sm:$0xff]  }
 0x1c2   : > { %3198 = vmatprep.subr.bf16.mxu0 %v6907_v30  ;;  %3239 = vmatprep.subr.bf16.mxu1 %v6910_v31  ;;  %v6976_v30 = vld [vmem:[#allocation2 + $0xc6c] ss:$16 sps:$4 sm:$0xff]   ;;  %v6971_v31 = vld [vmem:[#allocation2 + $0xc60] ss:$16 sps:$4 sm:$0xff]  }
 0x1c5   : > { %3199 = vmatpush2.bf16.msra.mxu0 %v6905_v32  ;;  %3240 = vmatpush2.bf16.msra.mxu1 %v6908_v33  ;;  %v6974_v32 = vld [vmem:[#allocation2 + $0xc68] ss:$16 sps:$4 sm:$0xff]   ;;  %v6979_v33 = vld [vmem:[#allocation2 + $0xc44] ss:$16 sps:$4 sm:$0xff]  }
 0x1c6   : > { %3200 = vmatprep.subr.bf16.mxu0 %v6913_v34  ;;  %3241 = vmatprep.subr.bf16.mxu1 %v6916_v37  ;;  %v6982_v34 = vld [vmem:[#allocation2 + $0xc4c] ss:$16 sps:$4 sm:$0xff]   ;;  %v6977_v37 = vld [vmem:[#allocation2 + $0xc40] ss:$16 sps:$4 sm:$0xff]  }
 0x1c9   : > { %3201 = vmatpush2.bf16.msra.mxu0 %v6911_v38  ;;  %3242 = vmatpush2.bf16.msra.mxu1 %v6914_v39  ;;  %v6980_v38 = vld [vmem:[#allocation2 + $0xc48] ss:$16 sps:$4 sm:$0xff]   ;;  %v6985_v39 = vld [vmem:[#allocation2 + $0xc24] ss:$16 sps:$4 sm:$0xff]  }
 0x1ca   : > { %3202 = vmatprep.subr.bf16.mxu0 %v6919_v42  ;;  %3243 = vmatprep.subr.bf16.mxu1 %v6922_v44  ;;  %v6988_v42 = vld [vmem:[#allocation2 + $0xc2c] ss:$16 sps:$4 sm:$0xff]   ;;  %v6983_v44 = vld [vmem:[#allocation2 + $0xc20] ss:$16 sps:$4 sm:$0xff]  }
 0x1cd   : > { %3203 = vmatpush2.bf16.msra.mxu0 %v6917_v45  ;;  %3244 = vmatpush2.bf16.msra.mxu1 %v6920_v46  ;;  %v6986_v45 = vld [vmem:[#allocation2 + $0xc28] ss:$16 sps:$4 sm:$0xff]   ;;  %v6991_v46 = vld [vmem:[#allocation2 + $0xc04] ss:$16 sps:$4 sm:$0xff]  }
 0x1ce   : > { %3204 = vmatprep.subr.bf16.mxu0 %v6925_v47  ;;  %3245 = vmatprep.subr.bf16.mxu1 %v6928_v48  ;;  %v6994_v47 = vld [vmem:[#allocation2 + $0xc0c] ss:$16 sps:$4 sm:$0xff]   ;;  %v6989_v48 = vld [vmem:[#allocation2 + $0xc00] ss:$16 sps:$4 sm:$0xff]  }
 0x1d1   : > { %3205 = vmatpush2.bf16.msra.mxu0 %v6923_v49  ;;  %3246 = vmatpush2.bf16.msra.mxu1 %v6926_v50  ;;  %v6992_v49 = vld [vmem:[#allocation2 + $0xc08] ss:$16 sps:$4 sm:$0xff]   ;;  %v6997_v50 = vld [vmem:[#allocation2 + $0xde4] ss:$16 sps:$4 sm:$0xff]  }
 0x1d2   : > { %3206 = vmatprep.subr.bf16.mxu0 %v6931_v51  ;;  %3247 = vmatprep.subr.bf16.mxu1 %v6934_v52  ;;  %v7000_v51 = vld [vmem:[#allocation2 + $0xdec] ss:$16 sps:$4 sm:$0xff]   ;;  %v6995_v52 = vld [vmem:[#allocation2 + $0xde0] ss:$16 sps:$4 sm:$0xff]  }
 0x1d5   : > { %3207 = vmatpush2.bf16.msra.mxu0 %v6929_v26  ;;  %3248 = vmatpush2.bf16.msra.mxu1 %v6932_v28  ;;  %v6998_v26 = vld [vmem:[#allocation2 + $0xde8] ss:$16 sps:$4 sm:$0xff]   ;;  %v7003_v28 = vld [vmem:[#allocation2 + $0xdc4] ss:$16 sps:$4 sm:$0xff]  }
 0x1d6   : > { %3208 = vmatprep.subr.bf16.mxu0 %v6937_v53  ;;  %3249 = vmatprep.subr.bf16.mxu1 %v6940_v54  ;;  %v7006_v53 = vld [vmem:[#allocation2 + $0xdcc] ss:$16 sps:$4 sm:$0xff]   ;;  %v7001_v54 = vld [vmem:[#allocation2 + $0xdc0] ss:$16 sps:$4 sm:$0xff]  }
 0x1d9   : > { %3209 = vmatpush2.bf16.msra.mxu0 %v6935_v57  ;;  %3250 = vmatpush2.bf16.msra.mxu1 %v6938_v60  ;;  %v7012_v57 = vld [vmem:[#allocation2 + $0xdac] ss:$16 sps:$4 sm:$0xff]   ;;  %v7007_v60 = vld [vmem:[#allocation2 + $0xda0] ss:$16 sps:$4 sm:$0xff]  }
 0x1da   : > { %3210 = vmatprep.subr.bf16.mxu0 %v6943_v61  ;;  %3251 = vmatprep.subr.bf16.mxu1 %v6946_v63  ;;  %v7010_v61 = vld [vmem:[#allocation2 + $0xda8] ss:$16 sps:$4 sm:$0xff]   ;;  %v7015_v63 = vld [vmem:[#allocation2 + $0xd84] ss:$16 sps:$4 sm:$0xff]  }
 0x1dd   : > { %3211 = vmatpush2.bf16.msra.mxu0 %v6941_v35  ;;  %3252 = vmatpush2.bf16.msra.mxu1 %v6944_v36  ;;  %v7016_v35 = vld [vmem:[#allocation2 + $0xd88] ss:$16 sps:$4 sm:$0xff]   ;;  %v7021_v36 = vld [vmem:[#allocation2 + $0xd64] ss:$16 sps:$4 sm:$0xff]  }
 0x1de   : > { %3665 = vmatprep.subr.bf16.mxu0 %v6949_v4  ;;  %3706 = vmatprep.subr.bf16.mxu1 %v6952_v5  ;;  %v7024_v4 = vld [vmem:[#allocation2 + $0xd6c] ss:$16 sps:$4 sm:$0xff]   ;;  %v7019_v5 = vld [vmem:[#allocation2 + $0xd60] ss:$16 sps:$4 sm:$0xff]  }
 0x1e0   : > { %v1755_v12 = vpop.f32.mrf.mxu0  ;;  %v1796_v13 = vpop.f32.mrf.mxu1  ;;  %3213 = vmatmul.mubr.bf16.vlgmr.msra.gmra.mxu0 %v2849_v8  ;;  %3254 = vmatmul.mubr.bf16.vlgmr.msra.gmra.mxu1 %v2849_v8  ;;  %v7030_v8 = vld [vmem:[#allocation2 + $0xd4c] ss:$16 sps:$4 sm:$0xff]  }
 0x1e1   : > { %v7812_v14 = vadd.f32 %v1755_v12, %v7794_v58  ;;  %v7815_v15 = vadd.f32 %v1796_v13, %v7797_v59  ;;  %3666 = vmatpush1.bf16.msra.mxu0 %v6947_v6  ;;  %3707 = vmatpush1.bf16.msra.mxu1 %v6950_v7  ;;  %v6962_v58 = vld [vmem:[#allocation2 + $0xca8] ss:$16 sps:$4 sm:$0xff]   ;;  %v7027_v7 = vld [vmem:[#allocation2 + $0xd44] ss:$16 sps:$4 sm:$0xff]  }
 0x1e2   : > { %v1757_v17 = vpop.f32.mrf.mxu0  ;;  %v1798_v20 = vpop.f32.mrf.mxu1  ;;  %3667 = vmatprep.subr.bf16.mxu0 %v6955_v40  ;;  %3708 = vmatprep.subr.bf16.mxu1 %v6958_v9  ;;  %v7022_v6 = vld [vmem:[#allocation2 + $0xd68] ss:$16 sps:$4 sm:$0xff]   ;;  %v7025_v40 = vld [vmem:[#allocation2 + $0xd40] ss:$16 sps:$4 sm:$0xff]   ;;  %v7039_v13 = vld [vmem:[#allocation2 + $0xd04] ss:$16 sps:$4 sm:$0xff]  }
 0x1e3   : > { %v7818_v23 = vadd.f32 %v1757_v17, %v7800_v1  ;;  %v7821_v24 = vadd.f32 %v1798_v20, %v7803_v2  ;;  %3697 = vmatprep.mubr.bf16.mxu0 %v3342_v11  ;;  %3738 = vmatprep.mubr.bf16.mxu1 %v3342_v11  ;;  %v6965_v1 = vld [vmem:[#allocation2 + $0xc80] ss:$16 sps:$4 sm:$0xff]   ;;  %v6973_v2 = vld [vmem:[#allocation2 + $0xc64] ss:$16 sps:$4 sm:$0xff]   ;;  %v7028_v9 = vld [vmem:[#allocation2 + $0xd48] ss:$16 sps:$4 sm:$0xff]  }
 0x1e4   : > { %v1759_v59 = vpop.f32.mrf.mxu0  ;;  %v1800_v19 = vpop.f32.mrf.mxu1  ;;  %v7031_v11 = vld [vmem:[#allocation2 + $0xd20] ss:$16 sps:$4 sm:$0xff]   ;;  %v7034_v12 = vld [vmem:[#allocation2 + $0xd28] ss:$16 sps:$4 sm:$0xff]   ;;  %v7042_v17 = vld [vmem:[#allocation2 + $0xd0c] ss:$16 sps:$4 sm:$0xff]  }
 0x1e5   : > { %3668 = vmatpush1.bf16.msra.mxu0 %v6953_v41  ;;  %3709 = vmatpush1.bf16.msra.mxu1 %v6956_v10  ;;  %v7033_v41 = vld [vmem:[#allocation2 + $0xd24] ss:$16 sps:$4 sm:$0xff]   ;;  %v7036_v10 = vld [vmem:[#allocation2 + $0xd2c] ss:$16 sps:$4 sm:$0xff]   ;;  %v3825_v20 = vshrl.u32 %v7808_v43, 16 }
 0x1e6   : > { %v1760_v18 = vpop.f32.mrf.mxu0  ;;  %v1801_v27 = vpop.f32.mrf.mxu1  ;;  %3669 = vmatprep.subr.bf16.mxu0 %v6961_v21  ;;  %3710 = vmatprep.subr.bf16.mxu1 %v6964_v22  ;;  %v3828_v21 = vshll.u32 %v7808_v43, 16  ;;  %v7826_v22 = vld [vmem:[%s7738_s21] ss:$8 sps:$4 sm:$0x18]   ;;  %v7048_v59 = vld [vmem:[#allocation2 + $0xee4] ss:$16 sps:$4 sm:$0xff]  }
 0x1e7   : > { %v7051_v19 = vld [vmem:[#allocation2 + $0xeec] ss:$16 sps:$4 sm:$0xff]   ;;  %v3827_v18 = vrot.slane %v3825_v20, 3  ;;  %v7054_v43 = vld [vmem:[#allocation2 + $0xec4] ss:$16 sps:$4 sm:$0xff]  }
 0x1e8   : > { %v3830_v27 = vrot.slane %v3828_v21, 4  ;;  %v7109_v20 = vld [vmem:[#allocation2 + $0xfa8] ss:$16 sps:$4 sm:$0xff]   ;;  %v7114_v21 = vld [vmem:[#allocation2 + $0xf84] ss:$16 sps:$4 sm:$0xff]  }
 0x1e9   : > { %3670 = vmatpush1.bf16.msra.mxu0 %v6959_v25  ;;  %3711 = vmatpush1.bf16.msra.mxu1 %v6962_v58  ;;  %v7037_v25 = vld [vmem:[#allocation2 + $0xd00] ss:$16 sps:$4 sm:$0xff]   ;;  %v7040_v58 = vld [vmem:[#allocation2 + $0xd08] ss:$16 sps:$4 sm:$0xff]  }
 0x1ea   : > { %3671 = vmatprep.subr.bf16.mxu0 %v6967_v62  ;;  %3712 = vmatprep.subr.bf16.mxu1 %v6970_v16  ;;  %v3341_v62 = vrot.slane %v7826_v22, 3  ;;  %v7046_v16 = vld [vmem:[#allocation2 + $0xee0] ss:$16 sps:$4 sm:$0xff]  }
 0x1ed   : > { %3672 = vmatpush1.bf16.msra.mxu0 %v6965_v1  ;;  %3713 = vmatpush1.bf16.msra.mxu1 %v6968_v29  ;;  %v7049_v1 = vld [vmem:[#allocation2 + $0xee8] ss:$16 sps:$4 sm:$0xff]   ;;  %v7057_v29 = vld [vmem:[#allocation2 + $0xecc] ss:$16 sps:$4 sm:$0xff]  }
 0x1ee   : > { %3673 = vmatprep.subr.bf16.mxu0 %v6973_v2  ;;  %3714 = vmatprep.subr.bf16.mxu1 %v6976_v30  ;;  %v3831_v2 = vor.u32 %v3830_v27, %v3827_v18  ;;  %v7123_v18 = vld [vmem:[#allocation2 + $0xf6c] ss:$16 sps:$4 sm:$0xff]   ;;  %v7118_v27 = vld [vmem:[#allocation2 + $0xf60] ss:$16 sps:$4 sm:$0xff]  }
 0x1f1   : > { %3674 = vmatpush1.bf16.msra.mxu0 %v6971_v31  ;;  %3715 = vmatpush1.bf16.msra.mxu1 %v6974_v32 }
 0x1f2   : > { %3675 = vmatprep.subr.bf16.mxu0 %v6979_v33  ;;  %3716 = vmatprep.subr.bf16.mxu1 %v6982_v34  ;;  %v7052_v34 = vld [vmem:[#allocation2 + $0xec0] ss:$16 sps:$4 sm:$0xff]  }
 0x1f5   : > { %3676 = vmatpush1.bf16.msra.mxu0 %v6977_v37  ;;  %3717 = vmatpush1.bf16.msra.mxu1 %v6980_v38  ;;  %v7055_v37 = vld [vmem:[#allocation2 + $0xec8] ss:$16 sps:$4 sm:$0xff]  }
 0x1f6   : > { %3677 = vmatprep.subr.bf16.mxu0 %v6985_v39  ;;  %3718 = vmatprep.subr.bf16.mxu1 %v6988_v42  ;;  %v7060_v42 = vld [vmem:[#allocation2 + $0xea4] ss:$16 sps:$4 sm:$0xff]  }
 0x1f9   : > { %3678 = vmatpush1.bf16.msra.mxu0 %v6983_v44  ;;  %3719 = vmatpush1.bf16.msra.mxu1 %v6986_v45  ;;  %v7063_v44 = vld [vmem:[#allocation2 + $0xeac] ss:$16 sps:$4 sm:$0xff]  }
 0x1fa   : > { %3679 = vmatprep.subr.bf16.mxu0 %v6991_v46  ;;  %3720 = vmatprep.subr.bf16.mxu1 %v6994_v47  ;;  %v7058_v47 = vld [vmem:[#allocation2 + $0xea0] ss:$16 sps:$4 sm:$0xff]  }
 0x1fd   : > { %3680 = vmatpush1.bf16.msra.mxu0 %v6989_v48  ;;  %3721 = vmatpush1.bf16.msra.mxu1 %v6992_v49  ;;  %v7061_v48 = vld [vmem:[#allocation2 + $0xea8] ss:$16 sps:$4 sm:$0xff]  }
 0x1fe   : > { %3681 = vmatprep.subr.bf16.mxu0 %v6997_v50  ;;  %3722 = vmatprep.subr.bf16.mxu1 %v7000_v51  ;;  %v7066_v51 = vld [vmem:[#allocation2 + $0xe84] ss:$16 sps:$4 sm:$0xff]  }
 0x201   : > { %3682 = vmatpush2.bf16.msra.mxu0 %v6995_v52  ;;  %3723 = vmatpush2.bf16.msra.mxu1 %v6998_v26  ;;  %v7069_v52 = vld [vmem:[#allocation2 + $0xe8c] ss:$16 sps:$4 sm:$0xff]   ;;  %v7067_v26 = vld [vmem:[#allocation2 + $0xe88] ss:$16 sps:$4 sm:$0xff]  }
 0x202   : > { %3683 = vmatprep.subr.bf16.mxu0 %v7003_v28  ;;  %3724 = vmatprep.subr.bf16.mxu1 %v7006_v53  ;;  %v7075_v28 = vld [vmem:[#allocation2 + $0xe6c] ss:$16 sps:$4 sm:$0xff]   ;;  %v7070_v53 = vld [vmem:[#allocation2 + $0xe60] ss:$16 sps:$4 sm:$0xff]  }
 0x205   : > { %3684 = vmatpush2.bf16.msra.mxu0 %v7001_v54  ;;  %3725 = vmatpush2.bf16.msra.mxu1 %v7004_v55  ;;  %v7073_v54 = vld [vmem:[#allocation2 + $0xe68] ss:$16 sps:$4 sm:$0xff]   ;;  %v7078_v55 = vld [vmem:[#allocation2 + $0xe44] ss:$16 sps:$4 sm:$0xff]  }
 0x206   : > { %3685 = vmatprep.subr.bf16.mxu0 %v7009_v56  ;;  %3726 = vmatprep.subr.bf16.mxu1 %v7012_v57  ;;  %v7081_v56 = vld [vmem:[#allocation2 + $0xe4c] ss:$16 sps:$4 sm:$0xff]   ;;  %v7076_v57 = vld [vmem:[#allocation2 + $0xe40] ss:$16 sps:$4 sm:$0xff]  }
 0x209   : > { %3686 = vmatpush2.bf16.msra.mxu0 %v7007_v60  ;;  %3727 = vmatpush2.bf16.msra.mxu1 %v7010_v61  ;;  %v7079_v60 = vld [vmem:[#allocation2 + $0xe48] ss:$16 sps:$4 sm:$0xff]   ;;  %v7084_v61 = vld [vmem:[#allocation2 + $0xe24] ss:$16 sps:$4 sm:$0xff]  }
 0x20a   : > { %3687 = vmatprep.subr.bf16.mxu0 %v7015_v63  ;;  %3728 = vmatprep.subr.bf16.mxu1 %v7018_v0  ;;  %v7087_v63 = vld [vmem:[#allocation2 + $0xe2c] ss:$16 sps:$4 sm:$0xff]   ;;  %v7082_v0 = vld [vmem:[#allocation2 + $0xe20] ss:$16 sps:$4 sm:$0xff]  }
 0x20d   : > { %3688 = vmatpush2.bf16.msra.mxu0 %v7013_v3  ;;  %3729 = vmatpush2.bf16.msra.mxu1 %v7016_v35  ;;  %v7085_v3 = vld [vmem:[#allocation2 + $0xe28] ss:$16 sps:$4 sm:$0xff]   ;;  %v7090_v35 = vld [vmem:[#allocation2 + $0xe04] ss:$16 sps:$4 sm:$0xff]  }
 0x20e   : > { %3689 = vmatprep.subr.bf16.mxu0 %v7021_v36  ;;  %3730 = vmatprep.subr.bf16.mxu1 %v7024_v4  ;;  %v7093_v36 = vld [vmem:[#allocation2 + $0xe0c] ss:$16 sps:$4 sm:$0xff]   ;;  %v7088_v4 = vld [vmem:[#allocation2 + $0xe00] ss:$16 sps:$4 sm:$0xff]  }
 0x211   : > { %3690 = vmatpush2.bf16.msra.mxu0 %v7019_v5  ;;  %3731 = vmatpush2.bf16.msra.mxu1 %v7022_v6  ;;  %v7091_v5 = vld [vmem:[#allocation2 + $0xe08] ss:$16 sps:$4 sm:$0xff]   ;;  %v7096_v6 = vld [vmem:[#allocation2 + $0xfe4] ss:$16 sps:$4 sm:$0xff]  }
 0x212   : > { %3691 = vmatprep.subr.bf16.mxu0 %v7027_v7  ;;  %3732 = vmatprep.subr.bf16.mxu1 %v7030_v8  ;;  %v7099_v7 = vld [vmem:[#allocation2 + $0xfec] ss:$16 sps:$4 sm:$0xff]   ;;  %v7094_v8 = vld [vmem:[#allocation2 + $0xfe0] ss:$16 sps:$4 sm:$0xff]  }
 0x215   : > { %3692 = vmatpush2.bf16.msra.mxu0 %v7025_v40  ;;  %3733 = vmatpush2.bf16.msra.mxu1 %v7028_v9  ;;  %v7097_v40 = vld [vmem:[#allocation2 + $0xfe8] ss:$16 sps:$4 sm:$0xff]   ;;  %v7102_v9 = vld [vmem:[#allocation2 + $0xfc4] ss:$16 sps:$4 sm:$0xff]  }
 0x216   : > { %3693 = vmatprep.subr.bf16.mxu0 %v7033_v41  ;;  %3734 = vmatprep.subr.bf16.mxu1 %v7036_v10  ;;  %v7105_v41 = vld [vmem:[#allocation2 + $0xfcc] ss:$16 sps:$4 sm:$0xff]   ;;  %v7100_v10 = vld [vmem:[#allocation2 + $0xfc0] ss:$16 sps:$4 sm:$0xff]  }
 0x219   : > { %3694 = vmatpush2.bf16.msra.mxu0 %v7031_v11  ;;  %3735 = vmatpush2.bf16.msra.mxu1 %v7034_v12  ;;  %v7103_v11 = vld [vmem:[#allocation2 + $0xfc8] ss:$16 sps:$4 sm:$0xff]   ;;  %v7108_v12 = vld [vmem:[#allocation2 + $0xfa4] ss:$16 sps:$4 sm:$0xff]  }
 0x21a   : > { %3695 = vmatprep.subr.bf16.mxu0 %v7039_v13  ;;  %3736 = vmatprep.subr.bf16.mxu1 %v7042_v17  ;;  %v7111_v13 = vld [vmem:[#allocation2 + $0xfac] ss:$16 sps:$4 sm:$0xff]   ;;  %v7106_v17 = vld [vmem:[#allocation2 + $0xfa0] ss:$16 sps:$4 sm:$0xff]  }
 0x21d   : > { %3696 = vmatpush2.bf16.msra.mxu0 %v7037_v25  ;;  %3737 = vmatpush2.bf16.msra.mxu1 %v7040_v58  ;;  %v7117_v25 = vld [vmem:[#allocation2 + $0xf8c] ss:$16 sps:$4 sm:$0xff]   ;;  %v7112_v58 = vld [vmem:[#allocation2 + $0xf80] ss:$16 sps:$4 sm:$0xff]  }
 0x21e   : > { %4154 = vmatprep.subr.bf16.mxu0 %v7048_v59  ;;  %4195 = vmatprep.subr.bf16.mxu1 %v7051_v19  ;;  %v7115_v59 = vld [vmem:[#allocation2 + $0xf88] ss:$16 sps:$4 sm:$0xff]   ;;  %v7120_v19 = vld [vmem:[#allocation2 + $0xf64] ss:$16 sps:$4 sm:$0xff]  }
 0x220   : > { %v2244_v30 = vpop.f32.mrf.mxu0  ;;  %v2285_v31 = vpop.f32.mrf.mxu1  ;;  %3698 = vmatmul.mubr.bf16.vlgmr.msra.gmra.mxu0 %v3341_v62  ;;  %3739 = vmatmul.mubr.bf16.vlgmr.msra.gmra.mxu1 %v3341_v62  ;;  %v7121_v62 = vld [vmem:[#allocation2 + $0xf68] ss:$16 sps:$4 sm:$0xff]  }
 0x221   : > { %v7830_v32 = vadd.f32 %v2244_v30, %v7812_v14  ;;  %v7833_v33 = vadd.f32 %v2285_v31, %v7815_v15  ;;  %4155 = vmatpush1.bf16.msra.mxu0 %v7046_v16  ;;  %4196 = vmatpush1.bf16.msra.mxu1 %v7049_v1  ;;  %v7126_v16 = vld [vmem:[#allocation2 + $0xf44] ss:$16 sps:$4 sm:$0xff]   ;;  %v7129_v1 = vld [vmem:[#allocation2 + $0xf4c] ss:$16 sps:$4 sm:$0xff]   ;;  %v3817_v31 = vshrl.u32 %v7826_v22, 16 }
 0x222   : > { %v2246_v38 = vpop.f32.mrf.mxu0  ;;  %v2287_v39 = vpop.f32.mrf.mxu1  ;;  %4156 = vmatprep.subr.bf16.mxu0 %v7054_v43  ;;  %4197 = vmatprep.subr.bf16.mxu1 %v7057_v29  ;;  %v7124_v43 = vld [vmem:[#allocation2 + $0xf40] ss:$16 sps:$4 sm:$0xff]   ;;  %v7127_v29 = vld [vmem:[#allocation2 + $0xf48] ss:$16 sps:$4 sm:$0xff]   ;;  %v7135_v30 = vld [vmem:[#allocation2 + $0xf2c] ss:$16 sps:$4 sm:$0xff]  }
 0x223   : > { %v7836_v45 = vadd.f32 %v2246_v38, %v7818_v23  ;;  %v7839_v46 = vadd.f32 %v2287_v39, %v7821_v24  ;;  %4186 = vmatprep.mubr.bf16.mxu0 %v3831_v2  ;;  %4227 = vmatprep.mubr.bf16.mxu1 %v3831_v2  ;;  %v7064_v23 = vld [vmem:[#allocation2 + $0xe80] ss:$16 sps:$4 sm:$0xff]   ;;  %v7072_v24 = vld [vmem:[#allocation2 + $0xe64] ss:$16 sps:$4 sm:$0xff]   ;;  %v7133_v38 = vld [vmem:[#allocation2 + $0xf28] ss:$16 sps:$4 sm:$0xff]  }
 0x224   : > { %v2248_v14 = vpop.f32.mrf.mxu0  ;;  %v2289_v15 = vpop.f32.mrf.mxu1  ;;  %v7132_v2 = vld [vmem:[#allocation2 + $0xf24] ss:$16 sps:$4 sm:$0xff]  }
 0x225   : > { %4157 = vmatpush1.bf16.msra.mxu0 %v7052_v34  ;;  %4198 = vmatpush1.bf16.msra.mxu1 %v7055_v37  ;;  %v3820_v34 = vshll.u32 %v7826_v22, 16  ;;  %v7130_v37 = vld [vmem:[#allocation2 + $0xf20] ss:$16 sps:$4 sm:$0xff]   ;;  %v7138_v39 = vld [vmem:[#allocation2 + $0xf04] ss:$16 sps:$4 sm:$0xff]  }
 0x226   : > { %v2249_v49 = vpop.f32.mrf.mxu0  ;;  %v2290_v50 = vpop.f32.mrf.mxu1  ;;  %4158 = vmatprep.subr.bf16.mxu0 %v7060_v42  ;;  %4199 = vmatprep.subr.bf16.mxu1 %v7063_v44  ;;  %v7141_v42 = vld [vmem:[#allocation2 + $0xf0c] ss:$16 sps:$4 sm:$0xff]   ;;  %v3819_v44 = vrot.slane %v3817_v31, 3  ;;  %v7136_v15 = vld [vmem:[#allocation2 + $0xf00] ss:$16 sps:$4 sm:$0xff]  }
 0x227   : > { %v3822_v14 = vrot.slane %v3820_v34, 4  ;;  %v7147_v49 = vld [vmem:[#allocation2 + $0x10ec] ss:$16 sps:$4 sm:$0xff]   ;;  %v7196_v34 = vld [vmem:[#allocation2 + $0x11c0] ss:$16 sps:$4 sm:$0xff]  }
 0x228   : > { %v7844_v50 = vld [vmem:[%s7738_s21 + $0x8] sm:$0x33]  ;;  %s5446_s21 = scalar_lea.sflag [#allocation4], %s361_s23 }
 0x229   : > { %4159 = vmatpush1.bf16.msra.mxu0 %v7058_v47  ;;  %4200 = vmatpush1.bf16.msra.mxu1 %v7061_v48  ;;  %v7139_v47 = vld [vmem:[#allocation2 + $0xf08] ss:$16 sps:$4 sm:$0xff]   ;;  %v7144_v48 = vld [vmem:[#allocation2 + $0x10e4] ss:$16 sps:$4 sm:$0xff]   ;;  %v3823_v22 = vor.u32 %v3822_v14, %v3819_v44  ;;  %v7201_v31 = vld [vmem:[#allocation2 + $0x11cc] ss:$16 sps:$4 sm:$0xff]  }
 0x22a   : > { %4160 = vmatprep.subr.bf16.mxu0 %v7066_v51  ;;  %4201 = vmatprep.subr.bf16.mxu1 %v7069_v52  ;;  %v7142_v51 = vld [vmem:[#allocation2 + $0x10e0] ss:$16 sps:$4 sm:$0xff]   ;;  %v7145_v52 = vld [vmem:[#allocation2 + $0x10e8] ss:$16 sps:$4 sm:$0xff]   ;;  %v7210_v14 = vld [vmem:[#allocation2 + $0x1184] ss:$16 sps:$4 sm:$0xff]  }
 0x22b   : > { %v7205_v44 = vld [vmem:[#allocation2 + $0x11a8] ss:$16 sps:$4 sm:$0xff]  }
 0x22d   : > { %4161 = vmatpush1.bf16.msra.mxu0 %v7064_v23  ;;  %4202 = vmatpush1.bf16.msra.mxu1 %v7067_v26  ;;  %v7150_v23 = vld [vmem:[#allocation2 + $0x10c4] ss:$16 sps:$4 sm:$0xff]   ;;  %v7153_v26 = vld [vmem:[#allocation2 + $0x10cc] ss:$16 sps:$4 sm:$0xff]  }
 0x22e   : > { %4162 = vmatprep.subr.bf16.mxu0 %v7072_v24  ;;  %4203 = vmatprep.subr.bf16.mxu1 %v7075_v28  ;;  %v6100_v24 = vcombine.high %v7844_v50, %v7844_v50 }
 0x231   : > { %4163 = vmatpush1.bf16.msra.mxu0 %v7070_v53  ;;  %4204 = vmatpush1.bf16.msra.mxu1 %v7073_v54 }
 0x232   : > { %4164 = vmatprep.subr.bf16.mxu0 %v7078_v55  ;;  %4205 = vmatprep.subr.bf16.mxu1 %v7081_v56  ;;  %v7148_v56 = vld [vmem:[#allocation2 + $0x10c0] ss:$16 sps:$4 sm:$0xff]  }
 0x235   : > { %4165 = vmatpush1.bf16.msra.mxu0 %v7076_v57  ;;  %4206 = vmatpush1.bf16.msra.mxu1 %v7079_v60  ;;  %v7151_v57 = vld [vmem:[#allocation2 + $0x10c8] ss:$16 sps:$4 sm:$0xff]  }
 0x236   : > { %4166 = vmatprep.subr.bf16.mxu0 %v7084_v61  ;;  %4207 = vmatprep.subr.bf16.mxu1 %v7087_v63  ;;  %v7156_v63 = vld [vmem:[#allocation2 + $0x10a4] ss:$16 sps:$4 sm:$0xff]  }
 0x239   : > { %4167 = vmatpush1.bf16.msra.mxu0 %v7082_v0  ;;  %4208 = vmatpush1.bf16.msra.mxu1 %v7085_v3  ;;  %v7159_v0 = vld [vmem:[#allocation2 + $0x10ac] ss:$16 sps:$4 sm:$0xff]  }
 0x23a   : > { %4168 = vmatprep.subr.bf16.mxu0 %v7090_v35  ;;  %4209 = vmatprep.subr.bf16.mxu1 %v7093_v36  ;;  %v7154_v36 = vld [vmem:[#allocation2 + $0x10a0] ss:$16 sps:$4 sm:$0xff]  }
 0x23d   : > { %4169 = vmatpush1.bf16.msra.mxu0 %v7088_v4  ;;  %4210 = vmatpush1.bf16.msra.mxu1 %v7091_v5  ;;  %v7157_v4 = vld [vmem:[#allocation2 + $0x10a8] ss:$16 sps:$4 sm:$0xff]   ;;  %v7162_v5 = vld [vmem:[#allocation2 + $0x1084] ss:$16 sps:$4 sm:$0xff]  }
 0x23e   : > { %4170 = vmatprep.subr.bf16.mxu0 %v7096_v6  ;;  %4211 = vmatprep.subr.bf16.mxu1 %v7099_v7 }
 0x241   : > { %4171 = vmatpush2.bf16.msra.mxu0 %v7094_v8  ;;  %4212 = vmatpush2.bf16.msra.mxu1 %v7097_v40  ;;  %v7165_v8 = vld [vmem:[#allocation2 + $0x108c] ss:$16 sps:$4 sm:$0xff]   ;;  %v4749_v40 = vld [vmem:[#allocation7] sm:$0x7] }
 0x242   : > { %4172 = vmatprep.subr.bf16.mxu0 %v7102_v9  ;;  %4213 = vmatprep.subr.bf16.mxu1 %v7105_v41  ;;  %v7163_v9 = vld [vmem:[#allocation2 + $0x1088] ss:$16 sps:$4 sm:$0xff]   ;;  %v7168_v41 = vld [vmem:[#allocation2 + $0x1064] ss:$16 sps:$4 sm:$0xff]  }
 0x245   : > { %4173 = vmatpush2.bf16.msra.mxu0 %v7100_v10  ;;  %4214 = vmatpush2.bf16.msra.mxu1 %v7103_v11  ;;  %v7171_v10 = vld [vmem:[#allocation2 + $0x106c] ss:$16 sps:$4 sm:$0xff]   ;;  %v7166_v11 = vld [vmem:[#allocation2 + $0x1060] ss:$16 sps:$4 sm:$0xff]  }
 0x246   : > { %4174 = vmatprep.subr.bf16.mxu0 %v7108_v12  ;;  %4215 = vmatprep.subr.bf16.mxu1 %v7111_v13  ;;  %v7169_v12 = vld [vmem:[#allocation2 + $0x1068] ss:$16 sps:$4 sm:$0xff]   ;;  %v7174_v13 = vld [vmem:[#allocation2 + $0x1044] ss:$16 sps:$4 sm:$0xff]  }
 0x249   : > { %4175 = vmatpush2.bf16.msra.mxu0 %v7106_v17  ;;  %4216 = vmatpush2.bf16.msra.mxu1 %v7109_v20  ;;  %v7177_v17 = vld [vmem:[#allocation2 + $0x104c] ss:$16 sps:$4 sm:$0xff]   ;;  %v7172_v20 = vld [vmem:[#allocation2 + $0x1040] ss:$16 sps:$4 sm:$0xff]  }
 0x24a   : > { %4176 = vmatprep.subr.bf16.mxu0 %v7114_v21  ;;  %4217 = vmatprep.subr.bf16.mxu1 %v7117_v25  ;;  %v7175_v21 = vld [vmem:[#allocation2 + $0x1048] ss:$16 sps:$4 sm:$0xff]   ;;  %v7180_v25 = vld [vmem:[#allocation2 + $0x1024] ss:$16 sps:$4 sm:$0xff]  }
 0x24d   : > { %4177 = vmatpush2.bf16.msra.mxu0 %v7112_v58  ;;  %4218 = vmatpush2.bf16.msra.mxu1 %v7115_v59  ;;  %v7183_v58 = vld [vmem:[#allocation2 + $0x102c] ss:$16 sps:$4 sm:$0xff]   ;;  %v7178_v59 = vld [vmem:[#allocation2 + $0x1020] ss:$16 sps:$4 sm:$0xff]  }
 0x24e   : > { %4178 = vmatprep.subr.bf16.mxu0 %v7120_v19  ;;  %4219 = vmatprep.subr.bf16.mxu1 %v7123_v18  ;;  %v7181_v19 = vld [vmem:[#allocation2 + $0x1028] ss:$16 sps:$4 sm:$0xff]   ;;  %v7186_v18 = vld [vmem:[#allocation2 + $0x1004] ss:$16 sps:$4 sm:$0xff]  }
 0x251   : > { %4179 = vmatpush2.bf16.msra.mxu0 %v7118_v27  ;;  %4220 = vmatpush2.bf16.msra.mxu1 %v7121_v62  ;;  %v7189_v27 = vld [vmem:[#allocation2 + $0x100c] ss:$16 sps:$4 sm:$0xff]   ;;  %v7184_v62 = vld [vmem:[#allocation2 + $0x1000] ss:$16 sps:$4 sm:$0xff]  }
 0x252   : > { %4180 = vmatprep.subr.bf16.mxu0 %v7126_v16  ;;  %4221 = vmatprep.subr.bf16.mxu1 %v7129_v1  ;;  %v7187_v16 = vld [vmem:[#allocation2 + $0x1008] ss:$16 sps:$4 sm:$0xff]   ;;  %v7192_v1 = vld [vmem:[#allocation2 + $0x11e4] ss:$16 sps:$4 sm:$0xff]  }
 0x255   : > { %4181 = vmatpush2.bf16.msra.mxu0 %v7124_v43  ;;  %4222 = vmatpush2.bf16.msra.mxu1 %v7127_v29  ;;  %v7195_v43 = vld [vmem:[#allocation2 + $0x11ec] ss:$16 sps:$4 sm:$0xff]   ;;  %v7190_v29 = vld [vmem:[#allocation2 + $0x11e0] ss:$16 sps:$4 sm:$0xff]  }
 0x256   : > { %4182 = vmatprep.subr.bf16.mxu0 %v7132_v2  ;;  %4223 = vmatprep.subr.bf16.mxu1 %v7135_v30  ;;  %v7193_v2 = vld [vmem:[#allocation2 + $0x11e8] ss:$16 sps:$4 sm:$0xff]   ;;  %v7198_v30 = vld [vmem:[#allocation2 + $0x11c4] ss:$16 sps:$4 sm:$0xff]  }
 0x259   : > { %4183 = vmatpush2.bf16.msra.mxu0 %v7130_v37  ;;  %4224 = vmatpush2.bf16.msra.mxu1 %v7133_v38  ;;  %v7199_v37 = vld [vmem:[#allocation2 + $0x11c8] ss:$16 sps:$4 sm:$0xff]   ;;  %v7204_v38 = vld [vmem:[#allocation2 + $0x11a4] ss:$16 sps:$4 sm:$0xff]  }
 0x25a   : > { %4184 = vmatprep.subr.bf16.mxu0 %v7138_v39  ;;  %4225 = vmatprep.subr.bf16.mxu1 %v7141_v42  ;;  %v7207_v39 = vld [vmem:[#allocation2 + $0x11ac] ss:$16 sps:$4 sm:$0xff]   ;;  %v7202_v42 = vld [vmem:[#allocation2 + $0x11a0] ss:$16 sps:$4 sm:$0xff]  }
 0x25d   : > { %4185 = vmatpush2.bf16.msra.mxu0 %v7136_v15  ;;  %4226 = vmatpush2.bf16.msra.mxu1 %v7139_v47  ;;  %v7213_v15 = vld [vmem:[#allocation2 + $0x118c] ss:$16 sps:$4 sm:$0xff]   ;;  %v7208_v47 = vld [vmem:[#allocation2 + $0x1180] ss:$16 sps:$4 sm:$0xff]  }
 0x25e   : > { %4633 = vmatprep.subr.bf16.mxu0 %v7144_v48  ;;  %4674 = vmatprep.subr.bf16.mxu1 %v7147_v49  ;;  %v7211_v48 = vld [vmem:[#allocation2 + $0x1188] ss:$16 sps:$4 sm:$0xff]   ;;  %v7216_v49 = vld [vmem:[#allocation2 + $0x1164] ss:$16 sps:$4 sm:$0xff]  }
 0x260   : > { %v2725_v28 = vpop.f32.mrf.mxu0  ;;  %v2766_v53 = vpop.f32.mrf.mxu1  ;;  %4187 = vmatmul.mubr.bf16.vlgmr.msra.gmra.mxu0 %v3823_v22  ;;  %4228 = vmatmul.mubr.bf16.vlgmr.msra.gmra.mxu1 %v3823_v22  ;;  %v7219_v22 = vld [vmem:[#allocation2 + $0x116c] ss:$16 sps:$4 sm:$0xff]  }
 0x261   : > { %v7849_v54 = vadd.f32 %v2725_v28, %v7830_v32  ;;  %v7852_v55 = vadd.f32 %v2766_v53, %v7833_v33  ;;  %4634 = vmatpush1.bf16.msra.mxu0 %v7142_v51  ;;  %4675 = vmatpush1.bf16.msra.mxu1 %v7145_v52  ;;  %v7214_v51 = vld [vmem:[#allocation2 + $0x1160] ss:$16 sps:$4 sm:$0xff]   ;;  %v7217_v52 = vld [vmem:[#allocation2 + $0x1168] ss:$16 sps:$4 sm:$0xff]   ;;  %v7228_v53 = vld [vmem:[#allocation2 + $0x1124] ss:$16 sps:$4 sm:$0xff]  }
 0x262   : > { %v2727_v60 = vpop.f32.mrf.mxu0  ;;  %v2768_v61 = vpop.f32.mrf.mxu1  ;;  %4635 = vmatprep.subr.bf16.mxu0 %v7150_v23  ;;  %4676 = vmatprep.subr.bf16.mxu1 %v7153_v26  ;;  %v7222_v23 = vld [vmem:[#allocation2 + $0x1144] ss:$16 sps:$4 sm:$0xff]   ;;  %v7225_v26 = vld [vmem:[#allocation2 + $0x114c] ss:$16 sps:$4 sm:$0xff]   ;;  %v7223_v28 = vld [vmem:[#allocation2 + $0x1148] ss:$16 sps:$4 sm:$0xff]  }
 0x263   : > { %v7855_v3 = vadd.f32 %v2727_v60, %v7836_v45  ;;  %v7858_v35 = vadd.f32 %v2768_v61, %v7839_v46  ;;  %4665 = vmatprep.mubr.bf16.mxu0 %v6100_v24  ;;  %4706 = vmatprep.mubr.bf16.mxu1 %v6100_v24  ;;  %v7563_v45 = vmov 0   ;;  %v7160_v46 = vld [vmem:[#allocation2 + $0x1080] ss:$16 sps:$4 sm:$0xff]   ;;  %v7229_v60 = vld [vmem:[#allocation2 + $0x1128] ss:$16 sps:$4 sm:$0xff]  }
 0x264   : > { %v2729_v32 = vpop.f32.mrf.mxu0  ;;  %v2770_v33 = vpop.f32.mrf.mxu1  ;;  %6364 = vset.pattern.permute.xlu0 %v7563_v45  ;;  %v7220_v24 = vld [vmem:[#allocation2 + $0x1140] ss:$16 sps:$4 sm:$0xff]   ;;  %v7234_v61 = vld [vmem:[#allocation2 + $0x1104] ss:$16 sps:$4 sm:$0xff]  }
 0x265   : > { %4636 = vmatpush1.bf16.msra.mxu0 %v7148_v56  ;;  %4677 = vmatpush1.bf16.msra.mxu1 %v7151_v57  ;;  %v7231_v56 = vld [vmem:[#allocation2 + $0x112c] ss:$16 sps:$4 sm:$0xff]   ;;  %v7226_v57 = vld [vmem:[#allocation2 + $0x1120] ss:$16 sps:$4 sm:$0xff]   ;;  %v7235_v32 = vld [vmem:[#allocation2 + $0x1108] ss:$16 sps:$4 sm:$0xff]   ;;  %v6099_v33 = vcombine.low %v7844_v50, %v7844_v50 }
 0x266   : > { %v2730_v6 = vpop.f32.mrf.mxu0  ;;  %v2771_v7 = vpop.f32.mrf.mxu1  ;;  %4637 = vmatprep.subr.bf16.mxu0 %v7156_v63  ;;  %4678 = vmatprep.subr.bf16.mxu1 %v7159_v0  ;;  %v7237_v63 = vld [vmem:[#allocation2 + $0x110c] ss:$16 sps:$4 sm:$0xff]   ;;  %v7232_v0 = vld [vmem:[#allocation2 + $0x1100] ss:$16 sps:$4 sm:$0xff]  }
 0x267   : > { %4752 = vperm.xlu0 %6364, %v4749_v40  }
 0x269   : > { %4638 = vmatpush1.bf16.msra.mxu0 %v7154_v36  ;;  %4679 = vmatpush1.bf16.msra.mxu1 %v7157_v4 }
 0x26a   : > { %4639 = vmatprep.subr.bf16.mxu0 %v7162_v5  ;;  %4680 = vmatprep.subr.bf16.mxu1 %v7165_v8 }
 0x26d   : > { %4640 = vmatpush1.bf16.msra.mxu0 %v7160_v46  ;;  %4681 = vmatpush1.bf16.msra.mxu1 %v7163_v9 }
 0x26e   : > { %4641 = vmatprep.subr.bf16.mxu0 %v7168_v41  ;;  %4682 = vmatprep.subr.bf16.mxu1 %v7171_v10  ;;  %v7248_v10 = vld [vmem:[%s8182_s4 + $0x64] ss:$8 sps:$4 sm:$0xff]  }
 0x271   : > { %4642 = vmatpush1.bf16.msra.mxu0 %v7166_v11  ;;  %4683 = vmatpush1.bf16.msra.mxu1 %v7169_v12  ;;  %v7251_v11 = vld [vmem:[%s8182_s4 + $0x164] ss:$8 sps:$4 sm:$0xff]   ;;  %v7246_v12 = vld [vmem:[%s8182_s4 + $0x60] ss:$8 sps:$4 sm:$0xff]  }
 0x272   : > { %4643 = vmatprep.subr.bf16.mxu0 %v7174_v13  ;;  %4684 = vmatprep.subr.bf16.mxu1 %v7177_v17  ;;  %v7249_v13 = vld [vmem:[%s8182_s4 + $0x160] ss:$8 sps:$4 sm:$0xff]   ;;  %v7254_v17 = vld [vmem:[%s8182_s4 + $0x54] ss:$8 sps:$4 sm:$0xff]  }
 0x275   : > { %4644 = vmatpush1.bf16.msra.mxu0 %v7172_v20  ;;  %4685 = vmatpush1.bf16.msra.mxu1 %v7175_v21  ;;  %v7257_v20 = vld [vmem:[%s8182_s4 + $0x154] ss:$8 sps:$4 sm:$0xff]   ;;  %v7252_v21 = vld [vmem:[%s8182_s4 + $0x50] ss:$8 sps:$4 sm:$0xff]  }
 0x276   : > { %4645 = vmatprep.subr.bf16.mxu0 %v7180_v25  ;;  %4686 = vmatprep.subr.bf16.mxu1 %v7183_v58  ;;  %v7255_v25 = vld [vmem:[%s8182_s4 + $0x150] ss:$8 sps:$4 sm:$0xff]   ;;  %v7260_v58 = vld [vmem:[%s8182_s4 + $0x44] ss:$8 sps:$4 sm:$0xff]  }
 0x279   : > { %4646 = vmatpush1.bf16.msra.mxu0 %v7178_v59  ;;  %4687 = vmatpush1.bf16.msra.mxu1 %v7181_v19  ;;  %v7263_v59 = vld [vmem:[%s8182_s4 + $0x144] ss:$8 sps:$4 sm:$0xff]   ;;  %v7258_v19 = vld [vmem:[%s8182_s4 + $0x40] ss:$8 sps:$4 sm:$0xff]  }
 0x27a   : > { %4647 = vmatprep.subr.bf16.mxu0 %v7186_v18  ;;  %4688 = vmatprep.subr.bf16.mxu1 %v7189_v27  ;;  %v7261_v18 = vld [vmem:[%s8182_s4 + $0x140] ss:$8 sps:$4 sm:$0xff]   ;;  %v7266_v27 = vld [vmem:[%s8182_s4 + $0x34] ss:$8 sps:$4 sm:$0xff]  }
 0x27d   : > { %4648 = vmatpush1.bf16.msra.mxu0 %v7184_v62  ;;  %4689 = vmatpush1.bf16.msra.mxu1 %v7187_v16  ;;  %v7269_v62 = vld [vmem:[%s8182_s4 + $0x134] ss:$8 sps:$4 sm:$0xff]   ;;  %v7264_v16 = vld [vmem:[%s8182_s4 + $0x30] ss:$8 sps:$4 sm:$0xff]  }
 0x27e   : > { %4649 = vmatprep.subr.bf16.mxu0 %v7192_v1  ;;  %4690 = vmatprep.subr.bf16.mxu1 %v7195_v43  ;;  %v7267_v1 = vld [vmem:[%s8182_s4 + $0x130] ss:$8 sps:$4 sm:$0xff]   ;;  %v7272_v43 = vld [vmem:[%s8182_s4 + $0x24] ss:$8 sps:$4 sm:$0xff]  }
 0x281   : > { %4650 = vmatpush2.bf16.msra.mxu0 %v7190_v29  ;;  %4691 = vmatpush2.bf16.msra.mxu1 %v7193_v2  ;;  %v7275_v29 = vld [vmem:[%s8182_s4 + $0x124] ss:$8 sps:$4 sm:$0xff]   ;;  %v7270_v2 = vld [vmem:[%s8182_s4 + $0x20] ss:$8 sps:$4 sm:$0xff]  }
 0x282   : > { %4651 = vmatprep.subr.bf16.mxu0 %v7198_v30  ;;  %4692 = vmatprep.subr.bf16.mxu1 %v7201_v31  ;;  %v7273_v30 = vld [vmem:[%s8182_s4 + $0x120] ss:$8 sps:$4 sm:$0xff]   ;;  %v7278_v31 = vld [vmem:[%s8182_s4 + $0x14] ss:$8 sps:$4 sm:$0xff]  }
 0x285   : > { %4652 = vmatpush2.bf16.msra.mxu0 %v7196_v34  ;;  %4693 = vmatpush2.bf16.msra.mxu1 %v7199_v37  ;;  %v7281_v34 = vld [vmem:[%s8182_s4 + $0x114] ss:$8 sps:$4 sm:$0xff]   ;;  %v7276_v37 = vld [vmem:[%s8182_s4 + $0x10] ss:$8 sps:$4 sm:$0xff]  }
 0x286   : > { %4653 = vmatprep.subr.bf16.mxu0 %v7204_v38  ;;  %4694 = vmatprep.subr.bf16.mxu1 %v7207_v39  ;;  %v7279_v38 = vld [vmem:[%s8182_s4 + $0x110] ss:$8 sps:$4 sm:$0xff]   ;;  %v7284_v39 = vld [vmem:[%s8182_s4 + $0x4] ss:$8 sps:$4 sm:$0xff]  }
 0x289   : > { %4654 = vmatpush2.bf16.msra.mxu0 %v7202_v42  ;;  %4695 = vmatpush2.bf16.msra.mxu1 %v7205_v44  ;;  %v7287_v42 = vld [vmem:[%s8182_s4 + $0x104] ss:$8 sps:$4 sm:$0xff]   ;;  %v7282_v44 = vld [vmem:[%s8182_s4] ss:$8 sps:$4 sm:$0xff]  }
 0x28a   : > { %4655 = vmatprep.subr.bf16.mxu0 %v7210_v14  ;;  %4696 = vmatprep.subr.bf16.mxu1 %v7213_v15  ;;  %v7285_v14 = vld [vmem:[%s8182_s4 + $0x100] ss:$8 sps:$4 sm:$0xff]   ;;  %v7290_v15 = vld [vmem:[%s8182_s4 + $0xf4] ss:$8 sps:$4 sm:$0xff]  }
 0x28d   : > { %4656 = vmatpush2.bf16.msra.mxu0 %v7208_v47  ;;  %4697 = vmatpush2.bf16.msra.mxu1 %v7211_v48  ;;  %v7293_v47 = vld [vmem:[%s8182_s4 + $0x1f4] ss:$8 sps:$4 sm:$0xff]   ;;  %v7288_v48 = vld [vmem:[%s8182_s4 + $0xf0] ss:$8 sps:$4 sm:$0xff]  }
 0x28e   : > { %4657 = vmatprep.subr.bf16.mxu0 %v7216_v49  ;;  %4698 = vmatprep.subr.bf16.mxu1 %v7219_v22  ;;  %v7291_v49 = vld [vmem:[%s8182_s4 + $0x1f0] ss:$8 sps:$4 sm:$0xff]   ;;  %v7296_v22 = vld [vmem:[%s8182_s4 + $0xe4] ss:$8 sps:$4 sm:$0xff]  }
 0x291   : > { %4658 = vmatpush2.bf16.msra.mxu0 %v7214_v51  ;;  %4699 = vmatpush2.bf16.msra.mxu1 %v7217_v52  ;;  %v7299_v51 = vld [vmem:[%s8182_s4 + $0x1e4] ss:$8 sps:$4 sm:$0xff]   ;;  %v7294_v52 = vld [vmem:[%s8182_s4 + $0xe0] ss:$8 sps:$4 sm:$0xff]  }
 0x292   : > { %4659 = vmatprep.subr.bf16.mxu0 %v7222_v23  ;;  %4700 = vmatprep.subr.bf16.mxu1 %v7225_v26  ;;  %v7297_v23 = vld [vmem:[%s8182_s4 + $0x1e0] ss:$8 sps:$4 sm:$0xff]  }
 0x295   : > { %4660 = vmatpush2.bf16.msra.mxu0 %v7220_v24  ;;  %4701 = vmatpush2.bf16.msra.mxu1 %v7223_v28 }
 0x296   : > { %4661 = vmatprep.subr.bf16.mxu0 %v7228_v53  ;;  %4702 = vmatprep.subr.bf16.mxu1 %v7231_v56  ;;  %v7302_v56 = vld [vmem:[%s8182_s4 + $0xd4] ss:$8 sps:$4 sm:$0xff]  }
 0x299   : > { %4662 = vmatpush2.bf16.msra.mxu0 %v7226_v57  ;;  %4703 = vmatpush2.bf16.msra.mxu1 %v7229_v60  ;;  %v7305_v57 = vld [vmem:[%s8182_s4 + $0x1d4] ss:$8 sps:$4 sm:$0xff]  }
 0x29a   : > { %4663 = vmatprep.subr.bf16.mxu0 %v7234_v61  ;;  %4704 = vmatprep.subr.bf16.mxu1 %v7237_v63  ;;  %v7300_v63 = vld [vmem:[%s8182_s4 + $0xd0] ss:$8 sps:$4 sm:$0xff]  }
 0x29d   : > { %4664 = vmatpush2.bf16.msra.mxu0 %v7232_v0  ;;  %4705 = vmatpush2.bf16.msra.mxu1 %v7235_v32  ;;  %v7303_v0 = vld [vmem:[%s8182_s4 + $0x1d0] ss:$8 sps:$4 sm:$0xff]  }
 0x2a0   : > { %v3214_v36 = vpop.f32.mrf.mxu0  ;;  %v3255_v4 = vpop.f32.mrf.mxu1  ;;  %4666 = vmatmul.mubr.bf16.vlgmr.msra.gmra.mxu0 %v6099_v33  ;;  %4707 = vmatmul.mubr.bf16.vlgmr.msra.gmra.mxu1 %v6099_v33 }
 0x2a1   : > { %v7863_v5 = vadd.f32 %v3214_v36, %v7849_v54  ;;  %v7866_v6 = vadd.f32 %v3255_v4, %v7852_v55  ;;  %v7240_v54 = vld [vmem:[%s8182_s4 + $0x70] ss:$8 sps:$4 sm:$0xff]   ;;  %v7242_v55 = vld [vmem:[%s8182_s4 + $0x74] ss:$8 sps:$4 sm:$0xff]  }
 0x2a2   : > { %v3216_v7 = vpop.f32.mrf.mxu0  ;;  %v3257_v8 = vpop.f32.mrf.mxu1  ;;  %5188 = vmatprep.subr.bf16.mxu0 %v7242_v55  ;;  %v7323_v55 = vld [vmem:[%s8182_s4 + $0x1a4] ss:$8 sps:$4 sm:$0xff]  }
 0x2a3   : > { %v7869_v40 = vadd.f32 %v3216_v7, %v7855_v3  ;;  %v7872_v45 = vadd.f32 %v3257_v8, %v7858_v35  ;;  %v7243_v3 = vld [vmem:[%s8182_s4 + $0x170] ss:$8 sps:$4 sm:$0xff]   ;;  %v7245_v35 = vld [vmem:[%s8182_s4 + $0x174] ss:$8 sps:$4 sm:$0xff]   ;;  %5189 = vmatpush1.bf16.msra.mxu0 %v7240_v54  ;;  %v7320_v54 = vld [vmem:[%s8182_s4 + $0xa4] ss:$8 sps:$4 sm:$0xff]  }
 0x2a4   : > { %v3218_v50 = vpop.f32.mrf.mxu0  ;;  %v3259_v46 = vpop.f32.mrf.mxu1  ;;  %5229 = vmatprep.subr.bf16.mxu1 %v7245_v35  ;;  %5190 = vmatprep.subr.bf16.mxu0 %v7248_v10  ;;  %v7321_v35 = vld [vmem:[%s8182_s4 + $0x1a0] ss:$8 sps:$4 sm:$0xff]   ;;  %v7324_v10 = vld [vmem:[%s8182_s4 + $0x90] ss:$8 sps:$4 sm:$0xff]  }
 0x2a5   : > { %5230 = vmatpush1.bf16.msra.mxu1 %v7243_v3  ;;  %v7314_v50 = vld [vmem:[%s8182_s4 + $0xb4] ss:$8 sps:$4 sm:$0xff]   ;;  %v7318_v3 = vld [vmem:[%s8182_s4 + $0xa0] ss:$8 sps:$4 sm:$0xff]  }
 0x2a6   : > { %v3219_v9 = vpop.f32.mrf.mxu0  ;;  %v3260_v41 = vpop.f32.mrf.mxu1  ;;  %5231 = vmatprep.subr.bf16.mxu1 %v7251_v11  ;;  %v7317_v46 = vld [vmem:[%s8182_s4 + $0x1b4] ss:$8 sps:$4 sm:$0xff]  }
 0x2a7   : > { %5191 = vmatpush1.bf16.msra.mxu0 %v7246_v12  ;;  %v7312_v9 = vld [vmem:[%s8182_s4 + $0xb0] ss:$8 sps:$4 sm:$0xff]   ;;  %v7326_v11 = vld [vmem:[%s8182_s4 + $0x94] ss:$8 sps:$4 sm:$0xff]  }
 0x2a8   : > { %5192 = vmatprep.subr.bf16.mxu0 %v7254_v17  ;;  %v7315_v41 = vld [vmem:[%s8182_s4 + $0x1b0] ss:$8 sps:$4 sm:$0xff]   ;;  %v7332_v17 = vld [vmem:[%s8182_s4 + $0x84] ss:$8 sps:$4 sm:$0xff]  }
 0x2a9   : > { %5232 = vmatpush1.bf16.msra.mxu1 %v7249_v13  ;;  %v7327_v12 = vld [vmem:[%s8182_s4 + $0x190] ss:$8 sps:$4 sm:$0xff]   ;;  %v7329_v13 = vld [vmem:[%s8182_s4 + $0x194] ss:$8 sps:$4 sm:$0xff]  }
 0x2aa   : > { %5233 = vmatprep.subr.bf16.mxu1 %v7257_v20  ;;  %v7335_v20 = vld [vmem:[%s8182_s4 + $0x184] ss:$8 sps:$4 sm:$0xff]  }
 0x2ab   : > { %5193 = vmatpush1.bf16.msra.mxu0 %v7252_v21  ;;  %v7330_v21 = vld [vmem:[%s8182_s4 + $0x80] ss:$8 sps:$4 sm:$0xff]  }
 0x2ac   : > { %5194 = vmatprep.subr.bf16.mxu0 %v7260_v58  ;;  %v7336_v58 = vld [vmem:[%s8184_s6 + $0x78] sm:$0xff]  }
 0x2ad   : > { %5234 = vmatpush1.bf16.msra.mxu1 %v7255_v25  ;;  %v7333_v25 = vld [vmem:[%s8182_s4 + $0x180] ss:$8 sps:$4 sm:$0xff]  }
 0x2ae   : > { %5235 = vmatprep.subr.bf16.mxu1 %v7263_v59 }
 0x2af   : > { %5195 = vmatpush1.bf16.msra.mxu0 %v7258_v19 }
 0x2b0   : > { %5196 = vmatprep.subr.bf16.mxu0 %v7266_v27 }
 0x2b1   : > { %5236 = vmatpush1.bf16.msra.mxu1 %v7261_v18 }
 0x2b2   : > { %5237 = vmatprep.subr.bf16.mxu1 %v7269_v62 }
 0x2b3   : > { %5197 = vmatpush1.bf16.msra.mxu0 %v7264_v16 }
 0x2b4   : > { %5198 = vmatprep.subr.bf16.mxu0 %v7272_v43 }
 0x2b5   : > { %5238 = vmatpush1.bf16.msra.mxu1 %v7267_v1 }
 0x2b6   : > { %5239 = vmatprep.subr.bf16.mxu1 %v7275_v29 }
 0x2b7   : > { %5199 = vmatpush1.bf16.msra.mxu0 %v7270_v2 }
 0x2b8   : > { %5200 = vmatprep.subr.bf16.mxu0 %v7278_v31 }
 0x2b9   : > { %5240 = vmatpush1.bf16.msra.mxu1 %v7273_v30  ;;  %v4721_v30 = vlaneseq }
 0x2ba   : > { %5241 = vmatprep.subr.bf16.mxu1 %v7281_v34 }
 0x2bb   : > { %5201 = vmatpush1.bf16.msra.mxu0 %v7276_v37  ;;  %v8077_v31 = vshrl.u32 %v4721_v30, 7 }
 0x2bc   : > { %5202 = vmatprep.subr.bf16.mxu0 %v7284_v39 }
 0x2bd   : > { %5242 = vmatpush1.bf16.msra.mxu1 %v7279_v38  ;;  %v4723_v34 = vsub.s32 0, %v8077_v31  ;;  %v4731_v37 = vsub.s32 2, %v8077_v31  ;;  %v4719_v38 = vld [vmem:[#allocation5] sm:$0xf]  ;;  %v4727_v39 = vsub.s32 1, %v8077_v31 }
 0x2be   : > { %5243 = vmatprep.subr.bf16.mxu1 %v7287_v42  ;;  %v4735_v42 = vsub.s32 3, %v8077_v31 }
 0x2bf   : > { %5203 = vmatpush1.bf16.msra.mxu0 %v7282_v44  ;;  %v4724_v44 = vrot.slane %v4719_v38, %v4723_v34 }
 0x2c0   : > { %5204 = vmatprep.subr.bf16.mxu0 %v7290_v15 }
 0x2c1   : > { %5244 = vmatpush1.bf16.msra.mxu1 %v7285_v14  ;;  %v4732_v14 = vrot.slane %v4719_v38, %v4731_v37 }
 0x2c2   : > { %5245 = vmatprep.subr.bf16.mxu1 %v7293_v47 }
 0x2c3   : > { %5205 = vmatpush2.bf16.msra.mxu0 %v7288_v48  ;;  %v4728_v48 = vrot.slane %v4719_v38, %v4727_v39 }
 0x2c4   : > { %5206 = vmatprep.subr.bf16.mxu0 %v7296_v22 }
 0x2c5   : > { %5246 = vmatpush2.bf16.msra.mxu1 %v7291_v49  ;;  %v4736_v49 = vrot.slane %v4719_v38, %v4735_v42 }
 0x2c6   : > { %5247 = vmatprep.subr.bf16.mxu1 %v7299_v51 }
 0x2c7   : > { %5207 = vmatpush2.bf16.msra.mxu0 %v7294_v52 }
 0x2c8   : > { %5208 = vmatprep.subr.bf16.mxu0 %v7302_v56 }
 0x2c9   : > { %5248 = vmatpush2.bf16.msra.mxu1 %v7297_v23 }
 0x2ca   : > { %5249 = vmatprep.subr.bf16.mxu1 %v7305_v57 }
 0x2cb   : > { %5209 = vmatpush2.bf16.msra.mxu0 %v7300_v63 }
 0x2cd   : > { %5250 = vmatpush2.bf16.msra.mxu1 %v7303_v0 }
 0x2e0   : > { %v3699_v26 = vpop.f32.mrf.mxu0  ;;  %v3740_v24 = vpop.f32.mrf.mxu1 }
 0x2e1   : > { %v3747_v28 = vadd.f32 %v3699_v26, %v7863_v5  ;;  %v3749_v53 = vadd.f32 %v3740_v24, %v7866_v6  ;;  %v7308_v5 = vld [vmem:[%s8182_s4 + $0xc4] ss:$8 sps:$4 sm:$0xff]  }
 0x2e2   : > { %v3701_v60 = vpop.f32.mrf.mxu0  ;;  %v3742_v61 = vpop.f32.mrf.mxu1  ;;  %v7311_v6 = vld [vmem:[%s8182_s4 + $0x1c4] ss:$8 sps:$4 sm:$0xff]   ;;  %5210 = vmatprep.subr.bf16.mxu0 %v7308_v5 }
 0x2e3   : > { %v8009_v32 = vadd.f32 %v3701_v60, %v7869_v40  ;;  %v8012_v33 = vadd.f32 %v3742_v61, %v7872_v45  ;;  %v7306_v40 = vld [vmem:[%s8182_s4 + $0xc0] ss:$8 sps:$4 sm:$0xff]   ;;  %5251 = vmatprep.subr.bf16.mxu1 %v7311_v6  ;;  %v4753_v60 = vpop.permute.xlu0 %4752 }
 0x2e4   : > { %v3703_v36 = vpop.f32.mrf.mxu0  ;;  %v3744_v4 = vpop.f32.mrf.mxu1  ;;  %v7309_v45 = vld [vmem:[%s8182_s4 + $0x1c0] ss:$8 sps:$4 sm:$0xff]   ;;  %5211 = vmatpush2.bf16.msra.mxu0 %v7306_v40 }
 0x2e5   : > { %5252 = vmatpush2.bf16.msra.mxu1 %v7309_v45  ;;  %5212 = vmatprep.subr.bf16.mxu0 %v7314_v50 }
 0x2e6   : > { %v3704_v7 = vpop.f32.mrf.mxu0  ;;  %v3745_v8 = vpop.f32.mrf.mxu1  ;;  %5253 = vmatprep.subr.bf16.mxu1 %v7317_v46 }
 0x2e8   : > { %5213 = vmatpush2.bf16.msra.mxu0 %v7312_v9 }
 0x2e9   : > { %5254 = vmatpush2.bf16.msra.mxu1 %v7315_v41  ;;  %5214 = vmatprep.subr.bf16.mxu0 %v7320_v54 }
 0x2ea   : > { %5255 = vmatprep.subr.bf16.mxu1 %v7323_v55 }
 0x2ec   : > { %5215 = vmatpush2.bf16.msra.mxu0 %v7318_v3 }
 0x2ed   : > { %5256 = vmatpush2.bf16.msra.mxu1 %v7321_v35  ;;  %5216 = vmatprep.subr.bf16.mxu0 %v7326_v11 }
 0x2ee   : > { %5257 = vmatprep.subr.bf16.mxu1 %v7329_v13 }
 0x2f0   : > { %5217 = vmatpush2.bf16.msra.mxu0 %v7324_v10 }
 0x2f1   : > { %5258 = vmatpush2.bf16.msra.mxu1 %v7327_v12  ;;  %5218 = vmatprep.subr.bf16.mxu0 %v7332_v17 }
 0x2f2   : > { %5259 = vmatprep.subr.bf16.mxu1 %v7335_v20 }
 0x2f4   : > { %5219 = vmatpush2.bf16.msra.mxu0 %v7330_v21 }
 0x2f5   : > { %5260 = vmatpush2.bf16.msra.mxu1 %v7333_v25  ;;  %6249 = vmatprep.subr.bf16.mxu0 %v7336_v58 }
 0x320   : > { %v4188_v59 = vpop.f32.mrf.mxu0  ;;  %v4229_v19 = vpop.f32.mrf.mxu1 }
 0x321   : > { %v4236_v18 = vadd.f32 %v4188_v59, %v3747_v28  ;;  %v4238_v27 = vadd.f32 %v4229_v19, %v3749_v53 }
 0x322   : > { %v4190_v62 = vpop.f32.mrf.mxu0  ;;  %v4231_v16 = vpop.f32.mrf.mxu1 }
 0x323   : > { %v4237_v22 = vadd.f32 %v4190_v62, %v8009_v32  ;;  %v4239_v51 = vadd.f32 %v4231_v16, %v8012_v33 }
 0x324   : > { %v4192_v1 = vpop.f32.mrf.mxu0  ;;  %v4233_v43 = vpop.f32.mrf.mxu1 }
 0x326   : > { %v4193_v29 = vpop.f32.mrf.mxu0  ;;  %v4234_v2 = vpop.f32.mrf.mxu1 }
 0x360   : > { %v4667_v15 = vpop.f32.mrf.mxu0  ;;  %v4708_v47 = vpop.f32.mrf.mxu1 }
 0x361   : > { %v4715_v52 = vadd.f32 %v4667_v15, %v4236_v18  ;;  %v4717_v23 = vadd.f32 %v4708_v47, %v4238_v27  ;;  %v7338_v47 = vld [vmem:[%s8184_s6 + $0x70] sm:$0xff]  }
 0x362   : > { %v4669_v26 = vpop.f32.mrf.mxu0  ;;  %v4710_v24 = vpop.f32.mrf.mxu1 }
 0x363   : > { %v4741_v28 = vadd.f32 %v4724_v44, %v4715_v52  ;;  %v4743_v53 = vadd.f32 %v4732_v14, %v4717_v23  ;;  %v4716_v56 = vadd.f32 %v4669_v26, %v4237_v22  ;;  %v4718_v57 = vadd.f32 %v4710_v24, %v4239_v51  ;;  %v7337_v44 = vld [vmem:[%s8184_s6 + $0x38] sm:$0xff]   ;;  %v7341_v22 = vld [vmem:[%s8184_s6 + $0x28] sm:$0xff]   ;;  %v7342_v51 = vld [vmem:[%s8184_s6 + $0x60] sm:$0xff]  }
 0x364   : > { %v4671_v61 = vpop.f32.mrf.mxu0  ;;  %v4712_v63 = vpop.f32.mrf.mxu1  ;;  %v7343_v52 = vld [vmem:[%s8184_s6 + $0x20] sm:$0xff]   ;;  %v7344_v23 = vld [vmem:[%s8184_s6 + $0x58] sm:$0xff]   ;;  %v7346_v24 = vld [vmem:[%s8184_s6 + $0x50] sm:$0xff]  }
 0x365   : > { %v4745_v0 = vmax.f32 %v4741_v28, 0.0  ;;  %v4747_v36 = vmax.f32 %v4743_v53, 0.0  ;;  %v4742_v4 = vadd.f32 %v4728_v48, %v4716_v56  ;;  %v4744_v5 = vadd.f32 %v4736_v49, %v4718_v57  ;;  %v7339_v48 = vld [vmem:[%s8184_s6 + $0x30] sm:$0xff]   ;;  %v7340_v49 = vld [vmem:[%s8184_s6 + $0x68] sm:$0xff]   ;;  %v7345_v26 = vld [vmem:[%s8184_s6 + $0x18] sm:$0xff]  }
 0x366   : > { %v4672_v6 = vpop.f32.mrf.mxu0  ;;  %v4713_v32 = vpop.f32.mrf.mxu1  ;;  %v7347_v28 = vld [vmem:[%s8184_s6 + $0x10] sm:$0xff]   ;;  %v7348_v53 = vld [vmem:[%s8184_s6 + $0x48] sm:$0xff]   ;;  %v7350_v57 = vld [vmem:[%s8184_s6 + $0x40] sm:$0xff]  }
 0x367   : > { %v4746_v7 = vmax.f32 %v4742_v4, 0.0  ;;  %v4748_v33 = vmax.f32 %v4744_v5, 0.0  ;;  %v4755_v8 = vmul.f32 %v4753_v60, %v4745_v0  ;;  %v4757_v40 = vmul.f32 %v4753_v60, %v4747_v36  ;;  %v7349_v56 = vld [vmem:[%s8184_s6 + $0x8] sm:$0xff]  }
 0x368   : > { %v4856_v61 = vld [vmem:[#allocation8] sm:$0x3] }
 0x369   : > { %v4756_v45 = vmul.f32 %v4753_v60, %v4746_v7  ;;  %v4758_v50 = vmul.f32 %v4753_v60, %v4748_v33  ;;  %v4760_v46 = vsel %vm4759_vm0, %v4755_v8, 0.0  ;;  %v4774_v9 = vsel %vm4759_vm0, %v4757_v40, 0.0  ;;  %v7351_v60 = vld [vmem:[%s8184_s6] sm:$0xff]  }
 0x36a   : > { %v4761_v41 = vrot.slane %v4760_v46, 4  ;;  %v4775_v54 = vrot.slane %v4774_v9, 4  ;;  %v5181_v63 = vrot.slane %v4856_v61, %v4723_v34  ;;  %v5185_v0 = vrot.slane %v4856_v61, %v4727_v39  ;;  %v5306_v39 = vld [vmem:[#allocation10] sm:$0x1] }
 0x36b   : > { %v4767_v55 = vsel %vm4759_vm0, %v4756_v45, 0.0  ;;  %v4781_v3 = vsel %vm4759_vm0, %v4758_v50, 0.0 }
 0x36c   : > { %v4762_v35 = vadd.f32 %v4761_v41, %v4760_v46  ;;  %v4768_v10 = vrot.slane %v4767_v55, 4  ;;  %v4776_v11 = vadd.f32 %v4775_v54, %v4774_v9  ;;  %v4782_v12 = vrot.slane %v4781_v3, 4 }
 0x36e   : > { %v4763_v13 = vrot.slane %v4762_v35, 2  ;;  %v4769_v17 = vadd.f32 %v4768_v10, %v4767_v55  ;;  %v4777_v20 = vrot.slane %v4776_v11, 2  ;;  %v4783_v21 = vadd.f32 %v4782_v12, %v4781_v3 }
 0x370   : > { %v4764_v25 = vadd.f32 %v4763_v13, %v4762_v35  ;;  %v4778_v58 = vadd.f32 %v4777_v20, %v4776_v11  ;;  %v4770_v59 = vrot.slane %v4769_v17, 2  ;;  %v4784_v19 = vrot.slane %v4783_v21, 2 }
 0x372   : > { %v4771_v18 = vadd.f32 %v4770_v59, %v4769_v17  ;;  %v4785_v27 = vadd.f32 %v4784_v19, %v4783_v21  ;;  %v4765_v62 = vrot.slane %v4764_v25, 1  ;;  %v4779_v16 = vrot.slane %v4778_v58, 1 }
 0x374   : > { %v4772_v1 = vrot.slane %v4771_v18, 1  ;;  %v4786_v43 = vrot.slane %v4785_v27, 1  ;;  %v4766_v29 = vadd.f32 %v4765_v62, %v4764_v25  ;;  %v4780_v2 = vadd.f32 %v4779_v16, %v4778_v58 }
 0x376   : > { %v4773_v30 = vadd.f32 %v4772_v1, %v4771_v18  ;;  %v4787_v37 = vadd.f32 %v4786_v43, %v4785_v27  ;;  %v4788_v14 = vpack.c.bf16 %v4766_v29, %v4766_v29  ;;  %v4790_v15 = vpack.c.bf16 %v4780_v2, %v4780_v2 }
 0x378   : > { %v4789_v38 = vpack.c.bf16 %v4773_v30, %v4773_v30  ;;  %v4791_v42 = vpack.c.bf16 %v4787_v37, %v4787_v37 }
 0x37a   : > { %5220 = vmatprep.mubr.bf16.mxu0 %v4789_v38  ;;  %5261 = vmatprep.mubr.bf16.mxu1 %v4791_v42 }
 0x37b   : > { %5221 = vmatmul.mubr.bf16.vlgmr.msra.gmra.mxu0 %v4788_v14  ;;  %5262 = vmatmul.mubr.bf16.vlgmr.msra.gmra.mxu1 %v4790_v15 }
 0x37c   : > { %6250 = vmatpush3.bf16.msra.mxu0 %v7337_v44 }
 0x37d   : > { %6251 = vmatprep.subr.bf16.mxu0 %v7338_v47 }
 0x380   : > { %6252 = vmatpush3.bf16.msra.mxu0 %v7339_v48 }
 0x381   : > { %6253 = vmatprep.subr.bf16.mxu0 %v7340_v49 }
 0x384   : > { %6254 = vmatpush3.bf16.msra.mxu0 %v7341_v22 }
 0x385   : > { %6255 = vmatprep.subr.bf16.mxu0 %v7342_v51 }
 0x388   : > { %6256 = vmatpush3.bf16.msra.mxu0 %v7343_v52 }
 0x389   : > { %6257 = vmatprep.subr.bf16.mxu0 %v7344_v23 }
 0x38c   : > { %6258 = vmatpush3.bf16.msra.mxu0 %v7345_v26 }
 0x38d   : > { %6259 = vmatprep.subr.bf16.mxu0 %v7346_v24 }
 0x390   : > { %6260 = vmatpush3.bf16.msra.mxu0 %v7347_v28 }
 0x391   : > { %6261 = vmatprep.subr.bf16.mxu0 %v7348_v53 }
 0x394   : > { %6262 = vmatpush3.bf16.msra.mxu0 %v7349_v56 }
 0x395   : > { %6263 = vmatprep.subr.bf16.mxu0 %v7350_v57 }
 0x398   : > { %6264 = vmatpush3.bf16.msra.mxu0 %v7351_v60 }
 0x43b   : > { %v5222_v36 = vpop.f32.mrf.mxu0  ;;  %v5263_v4 = vpop.f32.mrf.mxu1 }
 0x43c   : > { %v5223_v5 = vadd.f32 %v5222_v36, %v5181_v63 }
 0x43d   : > { %v5224_v6 = vpop.f32.mrf.mxu0  ;;  %v5265_v32 = vpop.f32.mrf.mxu1 }
 0x43e   : > { %v5264_v7 = vadd.f32 %v5263_v4, %v5223_v5  ;;  %v5225_v33 = vadd.f32 %v5224_v6, %v5185_v0 }
 0x43f   : > { %v5226_v8 = vpop.f32.mrf.mxu0  ;;  %v5267_v40 = vpop.f32.mrf.mxu1 }
 0x440   : > { %v5266_v45 = vadd.f32 %v5265_v32, %v5225_v33  ;;  %v5270_v50 = vmax.f32 %v5264_v7, 0.0 }
 0x441   : > { %v5227_v46 = vpop.f32.mrf.mxu0  ;;  %v5268_v9 = vpop.f32.mrf.mxu1 }
 0x442   : > { %v5271_v41 = vmax.f32 %v5266_v45, 0.0  ;;  %v5272_v54 = vpack.c.bf16 %v5270_v50, %v5270_v50 }
 0x444   : > { %v5273_v34 = vpack.c.bf16 %v5271_v41, %v5271_v41 }
 0x446   : > { %5435 = vmatprep.mubr.bf16.mxu0 %v5273_v34 }
 0x447   : > { %5436 = vmatmul.mubr.bf16.vlgmr.msra.gmra.mxu0 %v5272_v54 }
 0x507   : > { %v6265_v31 = vpop.f32.mrf.mxu0 }
 0x509   : > { %v6266_v55 = vpop.f32.mrf.mxu0 }
 0x50a   : > { %v6267_v3 = vadd.f32 %v6266_v55, %v6265_v31 }
 0x50b   : > { %v6268_v35 = vpop.f32.mrf.mxu0 }
 0x50c   : > { %v5438_v10 = vadd.f32 %v6267_v3, %v5306_v39 }
 0x50d   : > { %v6269_v11 = vpop.f32.mrf.mxu0 }
 0x50e   : > { %5444 = vst.msk [vmem:[%s362_s26] sm:$0x1] %vm5443_vm1, %v5438_v10 }
 0x50f   : > { %7495 = shalt.err (!%p7492_p0)
}
 0x510   : > { %s7496_s19 = scalar_lea.hbm %s8143_s12, 16  ;;  %s7500_s23 = scalar_lea.hbm %s8186_s8, 32 }
 0x511   : > { %p7497_p13 = scmp.ne.s32.totalorder %s8143_s12, %s7496_s19  ;;  %p7501_p3 = scmp.lt.s32.totalorder %s8143_s12, %s8186_s8 }
 0x512   : > { %p7502_p12 = scmp.lt.s32.totalorder %s7500_s23, %s7496_s19 }
 0x513   : > { %p7498_p1 = pnand %p7497_p13, %p8204_p5 }
 0x514   : > { %p7503_p9 = por %p7502_p12, %p7501_p3 }
 0x515   : > { %p7499_p2 = pneg %p7498_p1 }
 0x517   : > { %p7504_p4 = pnand %p7503_p9, %p7499_p2 }
 0x519   : > { %7507 = shalt.err (!%p7504_p4)
}
 0x51a   : > { %6291 = dma.vmem_to_hbm [thread:$0]  (%p8204_p5), %s5459_s17, 16, %s8143_s12, %s5446_s21  }
 0x51b PF: > { %p6323_p6 = scmp.ge.s32.totalorder %s7554_s30, 2  ;;  %s5470_s22 = sand.u32 1, %s7542_s27  }
 0x51c   : > { %p8205_p10 = scmp.ne.s32.totalorder %s8192_s16, 0  ;;  %s5471_s25 = scalar_lea.sflag [#allocation4], %s5470_s22 }
 0x51e   : > { %p6310_p7 = pnand %p6323_p6, %p8205_p10 }
 0x520   : > { %p6311_p8 = pneg %p6310_p7 }
 0x522   : > { %7537 = dma.done.wait (%p6311_p8), %s5471_s25, 16  }
 0x523   : > { %7539 = vsyncadd (%p6311_p8), %s5471_s25, 4294967280  ;;  %p21_p11 = scmp.ge.s32.totalorder %s7635_s11, 4   ;;  %s8206_s27 = smov %s7546_s28 }
 0x524   : > { %s8207_s28 = smov %s7550_s29  ;;  %s8208_s29 = smov %s7646_s14 }
 0x525   : > { %s8209_s30 = smov %s7635_s11  ;;  %23 = sbr.rel (!%p21_p11) target bundleno = 8 (0x8), region = 116 }
 0x52a   :  { %5475 = vsyncpa [#allocation3], 1 }
 0x52b   :  { %5477 = vsyncpa [#allocation3 + $0x1], 1 }
 0x52c   :  { %5478 = vsyncpa [#allocation6], 1 }
 0x52d   :  { %5479 = vsyncpa [#allocation9], 1 }
 0x52e   :  { %5480 = vsyncpa [#allocation4], 1 }
 0x52f   :  { %5482 = vsyncpa [#allocation4 + $0x1], 1 }

</bundles_post_ra>
